<compile_context>
chip_gen: v5e
topology: v5e:2x2
jax: 0.10.0
libtpu: 0.0.40
codegen_flags: <defaults>
</compile_context>

<pallas_src>
import jax
import jax.numpy as jnp
from jax.experimental import pallas as pl
from jax.experimental.pallas import tpu as pltpu

# Small but forward-consistent dims (reference defaults: 38 / 200 / 3 / 20 / 100).
INPUT_DIM = 8      # input_dim
H_DIM = 32         # h_dim
Z_DIM = 4          # z_dim
PLANAR_LEN = 4     # planar_length
SEQ_LEN = 8        # forward() steps processed per kernel launch
LANES = 128        # lane-dense slab width

# ---- input slab lane layout (SEQ, 128) ----
IN_X = 0                              # [0 : 8)    x_t
IN_EPS_Z = INPUT_DIM                  # [8 : 12)   eps for z reparametrize
IN_EPS_X = INPUT_DIM + Z_DIM          # [12: 20)   eps for x reparametrize
IN_NOISE = IN_EPS_X + INPUT_DIM       # [20: 22)   (transition, observation) scalars

# ---- output slab lane layout (SEQ, 128) ----
OUT_XT = 0                            # [0 : 8)    x_t
OUT_Z = INPUT_DIM                     # [8 : 12)   z
OUT_MU = INPUT_DIM + Z_DIM            # [12: 16)   mu_z
OUT_LV = INPUT_DIM + 2 * Z_DIM        # [16: 20)   log_var_z
OUT_WIDTH = INPUT_DIM + 3 * Z_DIM


# ----------------------------------------------------------------------------
# Parameter slab layout: every tensor at a static, sublane-aligned row offset,
# occupying lanes [0:cols] of a 128-lane fp32 slab (remaining lanes are zero).
# ----------------------------------------------------------------------------
def _build_layout():
    entries = [
        # encoder GRU (fused gates, column order r|z|n along 3H)
        ("q_wx", (INPUT_DIM, 3 * H_DIM)),
        ("q_wh", (H_DIM, 3 * H_DIM)),
        ("q_bih", (1, 3 * H_DIM)),
        ("q_bhh", (1, 3 * H_DIM)),
        # decoder GRU (fused gates)
        ("p_wx", (Z_DIM, 3 * H_DIM)),
        ("p_wh", (H_DIM, 3 * H_DIM)),
        ("p_bih", (1, 3 * H_DIM)),
        ("p_bhh", (1, 3 * H_DIM)),
        # q_dense (concat folded into split matmuls)
        ("qd_w1h", (H_DIM, H_DIM)),
        ("qd_w1x", (INPUT_DIM, H_DIM)),
        ("qd_b1", (1, H_DIM)),
        ("qd_w2", (H_DIM, H_DIM)),
        ("qd_b2", (1, H_DIM)),
        # fused q_mu | q_sigma head
        ("q_head_w", (H_DIM, 2 * Z_DIM)),
        ("q_head_b", (1, 2 * Z_DIM)),
        # planar flow
        ("pf_u", (PLANAR_LEN, Z_DIM)),
        ("pf_w", (PLANAR_LEN, Z_DIM)),
        ("pf_b", (1, PLANAR_LEN)),
        # transition / observation linears (no bias)
        ("t_w", (Z_DIM, Z_DIM)),
        ("o_w", (Z_DIM, Z_DIM)),
        # p_dense
        ("pd_w1", (H_DIM, H_DIM)),
        ("pd_b1", (1, H_DIM)),
        ("pd_w2", (H_DIM, H_DIM)),
        ("pd_b2", (1, H_DIM)),
        # fused p_mu | p_sigma head
        ("p_head_w", (H_DIM, 2 * INPUT_DIM)),
        ("p_head_b", (1, 2 * INPUT_DIM)),
        # persistent state initializers
        ("h_q0", (1, H_DIM)),
        ("h_p0", (1, H_DIM)),
        ("ztm1", (1, INPUT_DIM)),
    ]
    layout = {}
    row = 0
    for name, (r, c) in entries:
        layout[name] = (row, r, c)
        row += -(-r // 8) * 8   # align every slot start to a sublane multiple
    return layout, row


PARAM_LAYOUT, PARAM_ROWS = _build_layout()


def _sigmoid(v):
    # divide on the EUP slot instead of a VPU divide sequence
    return pl.reciprocal(1.0 + jnp.exp(-v), approx=True)


def _softplus_torch(v):
    # nn.Softplus(beta=1, threshold=1): x if x > 1 else log(1 + exp(x))
    return jnp.where(v > 1.0, v, jnp.log(1.0 + jnp.exp(jnp.minimum(v, 1.0))))


def vae_kernel(p_ref, in_ref, out_ref):
    f32 = jnp.float32
    seq = in_ref.shape[0]

    def p(name):
        row, r, c = PARAM_LAYOUT[name]
        return p_ref[row:row + r, 0:c]

    # --- hoisted weight loads: once per launch, not once per step -----------
    q_wx, q_wh, q_bih, q_bhh = p("q_wx"), p("q_wh"), p("q_bih"), p("q_bhh")
    p_wx, p_wh, p_bih, p_bhh = p("p_wx"), p("p_wh"), p("p_bih"), p("p_bhh")
    qd_w1h, qd_w1x, qd_b1 = p("qd_w1h"), p("qd_w1x"), p("qd_b1")
    qd_w2, qd_b2 = p("qd_w2"), p("qd_b2")
    q_head_w, q_head_b = p("q_head_w"), p("q_head_b")
    pf_u, pf_w, pf_b = p("pf_u"), p("pf_w"), p("pf_b")
    t_w, o_w = p("t_w"), p("o_w")
    pd_w1, pd_b1, pd_w2, pd_b2 = p("pd_w1"), p("pd_b1"), p("pd_w2"), p("pd_b2")
    p_head_w, p_head_b = p("p_head_w"), p("p_head_b")

    # --- carried state lives in values (vregs), not VMEM scratch ------------
    h_q = p("h_q0")          # (1, H)
    h_p = p("h_p0")          # (1, H)
    ztm1 = p("ztm1")         # (1, IN), fixed after init (as in the reference)

    # Whole packed input sequence: (SEQ, 128) fp32 == exactly one vreg at SEQ=8.
    inp = in_ref[...]

    # --- hoisted time-invariant compute --------------------------------------
    # (a) encoder GRU input-gates for every step in one batched matmul
    x_all = inp[:, IN_X:IN_X + INPUT_DIM]                                  # (SEQ, IN)
    gx_all = jnp.dot(x_all, q_wx, preferred_element_type=f32) + q_bih     # (SEQ, 3H)
    # (b) ztm1 contribution of q_dense layer 1 (constant across steps)
    c_ztm1 = jnp.dot(ztm1, qd_w1x, preferred_element_type=f32) + qd_b1    # (1, H)

    out_ref[...] = jnp.zeros_like(out_ref)   # keep unused lanes defined

    def gru_from_gx(gx, h, wh, bhh):
        """PyTorch GRUCell with the x-side gates precomputed; cols are [r|z|n]."""
        gh = jnp.dot(h, wh, preferred_element_type=f32) + bhh             # (1, 3H)
        H = H_DIM
        r = _sigmoid(gx[:, 0:H] + gh[:, 0:H])
        zg = _sigmoid(gx[:, H:2 * H] + gh[:, H:2 * H])
        n = jnp.tanh(gx[:, 2 * H:3 * H] + r * gh[:, 2 * H:3 * H])
        return (1.0 - zg) * n + zg * h

    # Fully-unrolled recurrence (static trip count == lax.fori_loop(unroll=True)
    # with all slice indices static).
    for t in range(seq):
        # ---------------- encode ----------------
        h_q = gru_from_gx(gx_all[t:t + 1, :], h_q, q_wh, q_bhh)
        zp = jnp.maximum(
            jnp.dot(h_q, qd_w1h, preferred_element_type=f32) + c_ztm1, 0.0)
        zp = jnp.maximum(
            jnp.dot(zp, qd_w2, preferred_element_type=f32) + qd_b2, 0.0)
        q_head = jnp.dot(zp, q_head_w, preferred_element_type=f32) + q_head_b
        mu_z = q_head[:, 0:Z_DIM]
        logvar_z = _softplus_torch(q_head[:, Z_DIM:2 * Z_DIM])

        # ---------------- reparametrize (z) ----------------
        eps_z = inp[t:t + 1, IN_EPS_Z:IN_EPS_Z + Z_DIM]
        z = mu_z + eps_z * jnp.exp(0.5 * logvar_z)

        # ---------------- planar normalizing flow ----------------
        # TODO(synk): PlanarFlow class is not provided in the reference; the
        # standard planar flow z <- z + u * tanh(w.z + b) is used (forward()
        # discards the log-det anyway).
        for i in range(PLANAR_LEN):
            a = (jnp.sum(pf_w[i:i + 1, :] * z, axis=-1, keepdims=True)
                 + pf_b[0:1, i:i + 1])
            z = z + pf_u[i:i + 1, :] * jnp.tanh(a)

        # ---------------- decode ----------------
        zt = (jnp.dot(z, t_w, preferred_element_type=f32)
              + inp[t:t + 1, IN_NOISE:IN_NOISE + 1])       # + transition noise
        zt = (jnp.dot(zt, o_w, preferred_element_type=f32)
              + inp[t:t + 1, IN_NOISE + 1:IN_NOISE + 2])   # + observation noise

        gx_p = jnp.dot(zt, p_wx, preferred_element_type=f32) + p_bih
        h_p = gru_from_gx(gx_p, h_p, p_wh, p_bhh)

        xp = jnp.maximum(
            jnp.dot(h_p, pd_w1, preferred_element_type=f32) + pd_b1, 0.0)
        xp = jnp.maximum(
            jnp.dot(xp, pd_w2, preferred_element_type=f32) + pd_b2, 0.0)
        p_head = jnp.dot(xp, p_head_w, preferred_element_type=f32) + p_head_b
        mu_x = p_head[:, 0:INPUT_DIM]
        logvar_x = _softplus_torch(p_head[:, INPUT_DIM:2 * INPUT_DIM])

        # ---------------- reparametrize (x_t) ----------------
        eps_x = inp[t:t + 1, IN_EPS_X:IN_EPS_X + INPUT_DIM]
        x_t = mu_x + eps_x * jnp.exp(0.5 * logvar_x)

        # Direct writes at static lane offsets (no concatenate / pad relayout).
        out_ref[t:t + 1, OUT_XT:OUT_XT + INPUT_DIM] = x_t
        out_ref[t:t + 1, OUT_Z:OUT_Z + Z_DIM] = z
        out_ref[t:t + 1, OUT_MU:OUT_MU + Z_DIM] = mu_z
        out_ref[t:t + 1, OUT_LV:OUT_LV + Z_DIM] = logvar_z


# ----------------------------------------------------------------------------
# Host-side: parameter init, slab packing, input packing, wrapper.
# ----------------------------------------------------------------------------
def init_params(key):
    names = list(PARAM_LAYOUT.keys())
    ks = jax.random.split(key, len(names))
    params = {}
    for k, name in zip(ks, names):
        _, r, c = PARAM_LAYOUT[name]
        scale = 1.0 if name in ("h_q0", "h_p0", "ztm1") else 0.1
        params[name] = (scale * jax.random.normal(k, (r, c))).astype(jnp.float32)
    return params


def pack_params(params):
    slab = jnp.zeros((PARAM_ROWS, LANES), jnp.float32)
    for name, (row, r, c) in PARAM_LAYOUT.items():
        slab = slab.at[row:row + r, 0:c].set(params[name].astype(jnp.float32))
    return slab


def pack_inputs(x_seq, eps_z_seq, eps_x_seq, noise_seq):
    """Lane-dense (SEQ, 128) input slab: [x | eps_z | eps_x | noise | 0...]."""
    seq = x_seq.shape[0]
    inp = jnp.zeros((seq, LANES), jnp.float32)
    inp = inp.at[:, IN_X:IN_X + INPUT_DIM].set(x_seq.astype(jnp.float32))
    inp = inp.at[:, IN_EPS_Z:IN_EPS_Z + Z_DIM].set(eps_z_seq.astype(jnp.float32))
    inp = inp.at[:, IN_EPS_X:IN_EPS_X + INPUT_DIM].set(eps_x_seq.astype(jnp.float32))
    inp = inp.at[:, IN_NOISE:IN_NOISE + 2].set(noise_seq.astype(jnp.float32))
    return inp


def vae_forward_seq(slab, inputs):
    """Runs inputs.shape[0] forward() steps of the stateful module in ONE
    kernel launch.  Returns (x_t, z, mu_z, log_var_z) stacked over time."""
    seq = inputs.shape[0]
    out = pl.pallas_call(
        vae_kernel,
        out_shape=jax.ShapeDtypeStruct((seq, LANES), jnp.float32),
        # no grid: whole arrays resident in VMEM, single DMA in / single out
        in_specs=[
            pl.BlockSpec(memory_space=pltpu.MemorySpace.VMEM),  # param slab (~217 KB)
            pl.BlockSpec(memory_space=pltpu.MemorySpace.VMEM),  # packed inputs
        ],
        out_specs=pl.BlockSpec(memory_space=pltpu.MemorySpace.VMEM),
    )(slab, inputs)

    x_t = out[:, OUT_XT:OUT_XT + INPUT_DIM]
    z = out[:, OUT_Z:OUT_Z + Z_DIM]
    mu_z = out[:, OUT_MU:OUT_MU + Z_DIM]
    log_var_z = out[:, OUT_LV:OUT_LV + Z_DIM]
    return x_t, z, mu_z, log_var_z


if __name__ == "__main__":
    key = jax.random.PRNGKey(0)
    pkey, xkey, nkey = jax.random.split(key, 3)
    params = init_params(pkey)
    slab = pack_params(params)

    x_seq = jax.random.normal(xkey, (SEQ_LEN, INPUT_DIM), jnp.float32)
    nk = jax.random.split(nkey, 3)
    eps_z = jax.random.normal(nk[0], (SEQ_LEN, Z_DIM), jnp.float32)      # z reparam eps
    eps_x = jax.random.normal(nk[1], (SEQ_LEN, INPUT_DIM), jnp.float32)  # x reparam eps
    noise = jax.random.normal(nk[2], (SEQ_LEN, 2), jnp.float32)          # trans/obs noise

    inputs = pack_inputs(x_seq, eps_z, eps_x, noise)
    x_t, z, mu_z, log_var_z = vae_forward_seq(slab, inputs)
    jax.block_until_ready((x_t, z, mu_z, log_var_z))

    assert x_t.shape == (SEQ_LEN, INPUT_DIM)
    assert z.shape == (SEQ_LEN, Z_DIM)
    assert mu_z.shape == (SEQ_LEN, Z_DIM)
    assert log_var_z.shape == (SEQ_LEN, Z_DIM)
    assert bool(jnp.all(jnp.isfinite(x_t)))
    assert bool(jnp.all(jnp.isfinite(z)))
    print("KERNEL_OK")
</pallas_src>

<mosaic_0001>
module attributes {stable_mosaic.version = 11 : i64} {
  func.func @vae_kernel(%arg0: memref<424x128xf32, #tpu.memory_space<vmem>>, %arg1: memref<8x128xf32, #tpu.memory_space<vmem>>, %arg2: memref<8x128xf32, #tpu.memory_space<vmem>>) attributes {dimension_semantics = [], scalar_prefetch = 0 : i64, scratch_operands = 0 : i64, tpu.core_type = #tpu.core_type<tc>} {
    %c0 = arith.constant 0 : index
    %c0_0 = arith.constant 0 : index
    %0 = vector.load %arg0[%c0, %c0_0] : memref<424x128xf32, #tpu.memory_space<vmem>>, vector<8x96xf32>
    %c8 = arith.constant 8 : index
    %c0_1 = arith.constant 0 : index
    %1 = vector.load %arg0[%c8, %c0_1] : memref<424x128xf32, #tpu.memory_space<vmem>>, vector<32x96xf32>
    %c40 = arith.constant 40 : index
    %c0_2 = arith.constant 0 : index
    %2 = vector.load %arg0[%c40, %c0_2] : memref<424x128xf32, #tpu.memory_space<vmem>>, vector<1x96xf32>
    %c48 = arith.constant 48 : index
    %c0_3 = arith.constant 0 : index
    %3 = vector.load %arg0[%c48, %c0_3] : memref<424x128xf32, #tpu.memory_space<vmem>>, vector<1x96xf32>
    %c56 = arith.constant 56 : index
    %c0_4 = arith.constant 0 : index
    %4 = vector.load %arg0[%c56, %c0_4] : memref<424x128xf32, #tpu.memory_space<vmem>>, vector<4x96xf32>
    %c64 = arith.constant 64 : index
    %c0_5 = arith.constant 0 : index
    %5 = vector.load %arg0[%c64, %c0_5] : memref<424x128xf32, #tpu.memory_space<vmem>>, vector<32x96xf32>
    %c96 = arith.constant 96 : index
    %c0_6 = arith.constant 0 : index
    %6 = vector.load %arg0[%c96, %c0_6] : memref<424x128xf32, #tpu.memory_space<vmem>>, vector<1x96xf32>
    %c104 = arith.constant 104 : index
    %c0_7 = arith.constant 0 : index
    %7 = vector.load %arg0[%c104, %c0_7] : memref<424x128xf32, #tpu.memory_space<vmem>>, vector<1x96xf32>
    %c112 = arith.constant 112 : index
    %c0_8 = arith.constant 0 : index
    %8 = vector.load %arg0[%c112, %c0_8] : memref<424x128xf32, #tpu.memory_space<vmem>>, vector<32x32xf32>
    %c144 = arith.constant 144 : index
    %c0_9 = arith.constant 0 : index
    %9 = vector.load %arg0[%c144, %c0_9] : memref<424x128xf32, #tpu.memory_space<vmem>>, vector<8x32xf32>
    %c152 = arith.constant 152 : index
    %c0_10 = arith.constant 0 : index
    %10 = vector.load %arg0[%c152, %c0_10] : memref<424x128xf32, #tpu.memory_space<vmem>>, vector<1x32xf32>
    %c160 = arith.constant 160 : index
    %c0_11 = arith.constant 0 : index
    %11 = vector.load %arg0[%c160, %c0_11] : memref<424x128xf32, #tpu.memory_space<vmem>>, vector<32x32xf32>
    %c192 = arith.constant 192 : index
    %c0_12 = arith.constant 0 : index
    %12 = vector.load %arg0[%c192, %c0_12] : memref<424x128xf32, #tpu.memory_space<vmem>>, vector<1x32xf32>
    %c200 = arith.constant 200 : index
    %c0_13 = arith.constant 0 : index
    %13 = vector.load %arg0[%c200, %c0_13] : memref<424x128xf32, #tpu.memory_space<vmem>>, vector<32x8xf32>
    %c232 = arith.constant 232 : index
    %c0_14 = arith.constant 0 : index
    %14 = vector.load %arg0[%c232, %c0_14] : memref<424x128xf32, #tpu.memory_space<vmem>>, vector<1x8xf32>
    %c240 = arith.constant 240 : index
    %c0_15 = arith.constant 0 : index
    %15 = vector.load %arg0[%c240, %c0_15] : memref<424x128xf32, #tpu.memory_space<vmem>>, vector<4x4xf32>
    %c248 = arith.constant 248 : index
    %c0_16 = arith.constant 0 : index
    %16 = vector.load %arg0[%c248, %c0_16] : memref<424x128xf32, #tpu.memory_space<vmem>>, vector<4x4xf32>
    %c256 = arith.constant 256 : index
    %c0_17 = arith.constant 0 : index
    %17 = vector.load %arg0[%c256, %c0_17] : memref<424x128xf32, #tpu.memory_space<vmem>>, vector<1x4xf32>
    %c264 = arith.constant 264 : index
    %c0_18 = arith.constant 0 : index
    %18 = vector.load %arg0[%c264, %c0_18] : memref<424x128xf32, #tpu.memory_space<vmem>>, vector<4x4xf32>
    %c272 = arith.constant 272 : index
    %c0_19 = arith.constant 0 : index
    %19 = vector.load %arg0[%c272, %c0_19] : memref<424x128xf32, #tpu.memory_space<vmem>>, vector<4x4xf32>
    %c280 = arith.constant 280 : index
    %c0_20 = arith.constant 0 : index
    %20 = vector.load %arg0[%c280, %c0_20] : memref<424x128xf32, #tpu.memory_space<vmem>>, vector<32x32xf32>
    %c312 = arith.constant 312 : index
    %c0_21 = arith.constant 0 : index
    %21 = vector.load %arg0[%c312, %c0_21] : memref<424x128xf32, #tpu.memory_space<vmem>>, vector<1x32xf32>
    %c320 = arith.constant 320 : index
    %c0_22 = arith.constant 0 : index
    %22 = vector.load %arg0[%c320, %c0_22] : memref<424x128xf32, #tpu.memory_space<vmem>>, vector<32x32xf32>
    %c352 = arith.constant 352 : index
    %c0_23 = arith.constant 0 : index
    %23 = vector.load %arg0[%c352, %c0_23] : memref<424x128xf32, #tpu.memory_space<vmem>>, vector<1x32xf32>
    %c360 = arith.constant 360 : index
    %c0_24 = arith.constant 0 : index
    %24 = vector.load %arg0[%c360, %c0_24] : memref<424x128xf32, #tpu.memory_space<vmem>>, vector<32x16xf32>
    %c392 = arith.constant 392 : index
    %c0_25 = arith.constant 0 : index
    %25 = vector.load %arg0[%c392, %c0_25] : memref<424x128xf32, #tpu.memory_space<vmem>>, vector<1x16xf32>
    %c400 = arith.constant 400 : index
    %c0_26 = arith.constant 0 : index
    %26 = vector.load %arg0[%c400, %c0_26] : memref<424x128xf32, #tpu.memory_space<vmem>>, vector<1x32xf32>
    %c408 = arith.constant 408 : index
    %c0_27 = arith.constant 0 : index
    %27 = vector.load %arg0[%c408, %c0_27] : memref<424x128xf32, #tpu.memory_space<vmem>>, vector<1x32xf32>
    %c416 = arith.constant 416 : index
    %c0_28 = arith.constant 0 : index
    %28 = vector.load %arg0[%c416, %c0_28] : memref<424x128xf32, #tpu.memory_space<vmem>>, vector<1x8xf32>
    %c0_29 = arith.constant 0 : index
    %c0_30 = arith.constant 0 : index
    %29 = vector.load %arg1[%c0_29, %c0_30] : memref<8x128xf32, #tpu.memory_space<vmem>>, vector<8x128xf32>
    %30 = vector.extract_strided_slice %29 {offsets = [0, 0], sizes = [8, 8], strides = [1, 1]} : vector<8x128xf32> to vector<8x8xf32>
    %cst = arith.constant dense<0.000000e+00> : vector<8x96xf32>
    %31 = tpu.matmul %30, %0, %cst {dimension_numbers = #tpu.dot_dimension_numbers<[1], [0], [0], [1], [0, 0, 1, 1], [], []>} : vector<8x8xf32>, vector<8x96xf32>, vector<8x96xf32> -> vector<8x96xf32>
    %32 = vector.broadcast %2 : vector<1x96xf32> to vector<8x96xf32>
    %33 = arith.addf %31, %32 : vector<8x96xf32>
    %cst_31 = arith.constant dense<0.000000e+00> : vector<1x32xf32>
    %34 = tpu.matmul %28, %9, %cst_31 {dimension_numbers = #tpu.dot_dimension_numbers<[1], [0], [0], [1], [0, 0, 1, 1], [], []>} : vector<1x8xf32>, vector<8x32xf32>, vector<1x32xf32> -> vector<1x32xf32>
    %35 = arith.addf %34, %10 : vector<1x32xf32>
    %cst_32 = arith.constant 0.000000e+00 : f32
    %36 = vector.broadcast %cst_32 : f32 to vector<8x128xf32>
    %c0_33 = arith.constant 0 : index
    %c0_34 = arith.constant 0 : index
    %37 = vector.load %arg2[%c0_33, %c0_34] : memref<8x128xf32, #tpu.memory_space<vmem>>, vector<8x128xf32>
    tpu.vector_store %arg2[%c0_33, %c0_34], %36 {strides = array<i32>} : memref<8x128xf32, #tpu.memory_space<vmem>>, vector<8x128xf32>,
    %38 = vector.extract_strided_slice %33 {offsets = [0, 0], sizes = [1, 96], strides = [1, 1]} : vector<8x96xf32> to vector<1x96xf32>
    %cst_35 = arith.constant dense<0.000000e+00> : vector<1x96xf32>
    %39 = tpu.matmul %26, %1, %cst_35 {dimension_numbers = #tpu.dot_dimension_numbers<[1], [0], [0], [1], [0, 0, 1, 1], [], []>} : vector<1x32xf32>, vector<32x96xf32>, vector<1x96xf32> -> vector<1x96xf32>
    %40 = arith.addf %39, %3 : vector<1x96xf32>
    %41 = vector.extract_strided_slice %38 {offsets = [0, 0], sizes = [1, 32], strides = [1, 1]} : vector<1x96xf32> to vector<1x32xf32>
    %42 = vector.extract_strided_slice %40 {offsets = [0, 0], sizes = [1, 32], strides = [1, 1]} : vector<1x96xf32> to vector<1x32xf32>
    %43 = arith.addf %41, %42 : vector<1x32xf32>
    %cst_36 = arith.constant 0.000000e+00 : f32
    %44 = vector.broadcast %cst_36 : f32 to vector<1x32xf32>
    %45 = arith.subf %44, %43 : vector<1x32xf32>
    %46 = math.exp %45 : vector<1x32xf32>
    %cst_37 = arith.constant 1.000000e+00 : f32
    %47 = vector.broadcast %cst_37 : f32 to vector<1x32xf32>
    %48 = arith.addf %47, %46 : vector<1x32xf32>
    %49 = tpu.reciprocal %48 {approx = true} : vector<1x32xf32> -> vector<1x32xf32>
    %50 = vector.extract_strided_slice %38 {offsets = [0, 32], sizes = [1, 32], strides = [1, 1]} : vector<1x96xf32> to vector<1x32xf32>
    %51 = vector.extract_strided_slice %40 {offsets = [0, 32], sizes = [1, 32], strides = [1, 1]} : vector<1x96xf32> to vector<1x32xf32>
    %52 = arith.addf %50, %51 : vector<1x32xf32>
    %cst_38 = arith.constant 0.000000e+00 : f32
    %53 = vector.broadcast %cst_38 : f32 to vector<1x32xf32>
    %54 = arith.subf %53, %52 : vector<1x32xf32>
    %55 = math.exp %54 : vector<1x32xf32>
    %cst_39 = arith.constant 1.000000e+00 : f32
    %56 = vector.broadcast %cst_39 : f32 to vector<1x32xf32>
    %57 = arith.addf %56, %55 : vector<1x32xf32>
    %58 = tpu.reciprocal %57 {approx = true} : vector<1x32xf32> -> vector<1x32xf32>
    %59 = vector.extract_strided_slice %38 {offsets = [0, 64], sizes = [1, 32], strides = [1, 1]} : vector<1x96xf32> to vector<1x32xf32>
    %60 = vector.extract_strided_slice %40 {offsets = [0, 64], sizes = [1, 32], strides = [1, 1]} : vector<1x96xf32> to vector<1x32xf32>
    %61 = arith.mulf %49, %60 : vector<1x32xf32>
    %62 = arith.addf %59, %61 : vector<1x32xf32>
    %63 = math.tanh %62 : vector<1x32xf32>
    %cst_40 = arith.constant 1.000000e+00 : f32
    %64 = vector.broadcast %cst_40 : f32 to vector<1x32xf32>
    %65 = arith.subf %64, %58 : vector<1x32xf32>
    %66 = arith.mulf %65, %63 : vector<1x32xf32>
    %67 = arith.mulf %58, %26 : vector<1x32xf32>
    %68 = arith.addf %66, %67 : vector<1x32xf32>
    %cst_41 = arith.constant dense<0.000000e+00> : vector<1x32xf32>
    %69 = tpu.matmul %68, %8, %cst_41 {dimension_numbers = #tpu.dot_dimension_numbers<[1], [0], [0], [1], [0, 0, 1, 1], [], []>} : vector<1x32xf32>, vector<32x32xf32>, vector<1x32xf32> -> vector<1x32xf32>
    %70 = arith.addf %69, %35 : vector<1x32xf32>
    %cst_42 = arith.constant 0.000000e+00 : f32
    %71 = vector.broadcast %cst_42 : f32 to vector<1x32xf32>
    %72 = arith.maximumf %70, %71 : vector<1x32xf32>
    %cst_43 = arith.constant dense<0.000000e+00> : vector<1x32xf32>
    %73 = tpu.matmul %72, %11, %cst_43 {dimension_numbers = #tpu.dot_dimension_numbers<[1], [0], [0], [1], [0, 0, 1, 1], [], []>} : vector<1x32xf32>, vector<32x32xf32>, vector<1x32xf32> -> vector<1x32xf32>
    %74 = arith.addf %73, %12 : vector<1x32xf32>
    %cst_44 = arith.constant 0.000000e+00 : f32
    %75 = vector.broadcast %cst_44 : f32 to vector<1x32xf32>
    %76 = arith.maximumf %74, %75 : vector<1x32xf32>
    %cst_45 = arith.constant dense<0.000000e+00> : vector<1x8xf32>
    %77 = tpu.matmul %76, %13, %cst_45 {dimension_numbers = #tpu.dot_dimension_numbers<[1], [0], [0], [1], [0, 0, 1, 1], [], []>} : vector<1x32xf32>, vector<32x8xf32>, vector<1x8xf32> -> vector<1x8xf32>
    %78 = arith.addf %77, %14 : vector<1x8xf32>
    %79 = vector.extract_strided_slice %78 {offsets = [0, 0], sizes = [1, 4], strides = [1, 1]} : vector<1x8xf32> to vector<1x4xf32>
    %80 = vector.extract_strided_slice %78 {offsets = [0, 4], sizes = [1, 4], strides = [1, 1]} : vector<1x8xf32> to vector<1x4xf32>
    %cst_46 = arith.constant 1.000000e+00 : f32
    %81 = vector.broadcast %cst_46 : f32 to vector<1x4xf32>
    %82 = arith.cmpf ogt, %80, %81 : vector<1x4xf32>
    %cst_47 = arith.constant 1.000000e+00 : f32
    %83 = vector.broadcast %cst_47 : f32 to vector<1x4xf32>
    %84 = arith.minimumf %80, %83 : vector<1x4xf32>
    %85 = math.exp %84 : vector<1x4xf32>
    %cst_48 = arith.constant 1.000000e+00 : f32
    %86 = vector.broadcast %cst_48 : f32 to vector<1x4xf32>
    %87 = arith.addf %86, %85 : vector<1x4xf32>
    %88 = math.log %87 : vector<1x4xf32>
    %89 = arith.select %82, %80, %88 : vector<1x4xi1>, vector<1x4xf32>
    %90 = vector.extract_strided_slice %29 {offsets = [0, 8], sizes = [1, 4], strides = [1, 1]} : vector<8x128xf32> to vector<1x4xf32>
    %cst_49 = arith.constant 5.000000e-01 : f32
    %91 = vector.broadcast %cst_49 : f32 to vector<1x4xf32>
    %92 = arith.mulf %91, %89 : vector<1x4xf32>
    %93 = math.exp %92 : vector<1x4xf32>
    %94 = arith.mulf %90, %93 : vector<1x4xf32>
    %95 = arith.addf %79, %94 : vector<1x4xf32>
    %96 = vector.extract_strided_slice %16 {offsets = [0, 0], sizes = [1, 4], strides = [1, 1]} : vector<4x4xf32> to vector<1x4xf32>
    %97 = arith.mulf %96, %95 : vector<1x4xf32>
    %cst_50 = arith.constant dense<0.000000e+00> : vector<1xf32>
    %98 = vector.multi_reduction <add>, %97, %cst_50 [1] : vector<1x4xf32> to vector<1xf32>
    %99 = vector.shape_cast %98 : vector<1xf32> to vector<1x1xf32>
    %100 = vector.extract_strided_slice %17 {offsets = [0, 0], sizes = [1, 1], strides = [1, 1]} : vector<1x4xf32> to vector<1x1xf32>
    %101 = arith.addf %99, %100 : vector<1x1xf32>
    %102 = vector.extract_strided_slice %15 {offsets = [0, 0], sizes = [1, 4], strides = [1, 1]} : vector<4x4xf32> to vector<1x4xf32>
    %103 = math.tanh %101 : vector<1x1xf32>
    %104 = vector.broadcast %103 : vector<1x1xf32> to vector<1x4xf32>
    %105 = arith.mulf %102, %104 : vector<1x4xf32>
    %106 = arith.addf %95, %105 : vector<1x4xf32>
    %107 = vector.extract_strided_slice %16 {offsets = [1, 0], sizes = [1, 4], strides = [1, 1]} : vector<4x4xf32> to vector<1x4xf32>
    %108 = arith.mulf %107, %106 : vector<1x4xf32>
    %cst_51 = arith.constant dense<0.000000e+00> : vector<1xf32>
    %109 = vector.multi_reduction <add>, %108, %cst_51 [1] : vector<1x4xf32> to vector<1xf32>
    %110 = vector.shape_cast %109 : vector<1xf32> to vector<1x1xf32>
    %111 = vector.extract_strided_slice %17 {offsets = [0, 1], sizes = [1, 1], strides = [1, 1]} : vector<1x4xf32> to vector<1x1xf32>
    %112 = arith.addf %110, %111 : vector<1x1xf32>
    %113 = vector.extract_strided_slice %15 {offsets = [1, 0], sizes = [1, 4], strides = [1, 1]} : vector<4x4xf32> to vector<1x4xf32>
    %114 = math.tanh %112 : vector<1x1xf32>
    %115 = vector.broadcast %114 : vector<1x1xf32> to vector<1x4xf32>
    %116 = arith.mulf %113, %115 : vector<1x4xf32>
    %117 = arith.addf %106, %116 : vector<1x4xf32>
    %118 = vector.extract_strided_slice %16 {offsets = [2, 0], sizes = [1, 4], strides = [1, 1]} : vector<4x4xf32> to vector<1x4xf32>
    %119 = arith.mulf %118, %117 : vector<1x4xf32>
    %cst_52 = arith.constant dense<0.000000e+00> : vector<1xf32>
    %120 = vector.multi_reduction <add>, %119, %cst_52 [1] : vector<1x4xf32> to vector<1xf32>
    %121 = vector.shape_cast %120 : vector<1xf32> to vector<1x1xf32>
    %122 = vector.extract_strided_slice %17 {offsets = [0, 2], sizes = [1, 1], strides = [1, 1]} : vector<1x4xf32> to vector<1x1xf32>
    %123 = arith.addf %121, %122 : vector<1x1xf32>
    %124 = vector.extract_strided_slice %15 {offsets = [2, 0], sizes = [1, 4], strides = [1, 1]} : vector<4x4xf32> to vector<1x4xf32>
    %125 = math.tanh %123 : vector<1x1xf32>
    %126 = vector.broadcast %125 : vector<1x1xf32> to vector<1x4xf32>
    %127 = arith.mulf %124, %126 : vector<1x4xf32>
    %128 = arith.addf %117, %127 : vector<1x4xf32>
    %129 = vector.extract_strided_slice %16 {offsets = [3, 0], sizes = [1, 4], strides = [1, 1]} : vector<4x4xf32> to vector<1x4xf32>
    %130 = arith.mulf %129, %128 : vector<1x4xf32>
    %cst_53 = arith.constant dense<0.000000e+00> : vector<1xf32>
    %131 = vector.multi_reduction <add>, %130, %cst_53 [1] : vector<1x4xf32> to vector<1xf32>
    %132 = vector.shape_cast %131 : vector<1xf32> to vector<1x1xf32>
    %133 = vector.extract_strided_slice %17 {offsets = [0, 3], sizes = [1, 1], strides = [1, 1]} : vector<1x4xf32> to vector<1x1xf32>
    %134 = arith.addf %132, %133 : vector<1x1xf32>
    %135 = vector.extract_strided_slice %15 {offsets = [3, 0], sizes = [1, 4], strides = [1, 1]} : vector<4x4xf32> to vector<1x4xf32>
    %136 = math.tanh %134 : vector<1x1xf32>
    %137 = vector.broadcast %136 : vector<1x1xf32> to vector<1x4xf32>
    %138 = arith.mulf %135, %137 : vector<1x4xf32>
    %139 = arith.addf %128, %138 : vector<1x4xf32>
    %cst_54 = arith.constant dense<0.000000e+00> : vector<1x4xf32>
    %140 = tpu.matmul %139, %18, %cst_54 {dimension_numbers = #tpu.dot_dimension_numbers<[1], [0], [0], [1], [0, 0, 1, 1], [], []>} : vector<1x4xf32>, vector<4x4xf32>, vector<1x4xf32> -> vector<1x4xf32>
    %141 = vector.extract_strided_slice %29 {offsets = [0, 20], sizes = [1, 1], strides = [1, 1]} : vector<8x128xf32> to vector<1x1xf32>
    %142 = vector.broadcast %141 : vector<1x1xf32> to vector<1x4xf32>
    %143 = arith.addf %140, %142 : vector<1x4xf32>
    %cst_55 = arith.constant dense<0.000000e+00> : vector<1x4xf32>
    %144 = tpu.matmul %143, %19, %cst_55 {dimension_numbers = #tpu.dot_dimension_numbers<[1], [0], [0], [1], [0, 0, 1, 1], [], []>} : vector<1x4xf32>, vector<4x4xf32>, vector<1x4xf32> -> vector<1x4xf32>
    %145 = vector.extract_strided_slice %29 {offsets = [0, 21], sizes = [1, 1], strides = [1, 1]} : vector<8x128xf32> to vector<1x1xf32>
    %146 = vector.broadcast %145 : vector<1x1xf32> to vector<1x4xf32>
    %147 = arith.addf %144, %146 : vector<1x4xf32>
    %cst_56 = arith.constant dense<0.000000e+00> : vector<1x96xf32>
    %148 = tpu.matmul %147, %4, %cst_56 {dimension_numbers = #tpu.dot_dimension_numbers<[1], [0], [0], [1], [0, 0, 1, 1], [], []>} : vector<1x4xf32>, vector<4x96xf32>, vector<1x96xf32> -> vector<1x96xf32>
    %149 = arith.addf %148, %6 : vector<1x96xf32>
    %cst_57 = arith.constant dense<0.000000e+00> : vector<1x96xf32>
    %150 = tpu.matmul %27, %5, %cst_57 {dimension_numbers = #tpu.dot_dimension_numbers<[1], [0], [0], [1], [0, 0, 1, 1], [], []>} : vector<1x32xf32>, vector<32x96xf32>, vector<1x96xf32> -> vector<1x96xf32>
    %151 = arith.addf %150, %7 : vector<1x96xf32>
    %152 = vector.extract_strided_slice %149 {offsets = [0, 0], sizes = [1, 32], strides = [1, 1]} : vector<1x96xf32> to vector<1x32xf32>
    %153 = vector.extract_strided_slice %151 {offsets = [0, 0], sizes = [1, 32], strides = [1, 1]} : vector<1x96xf32> to vector<1x32xf32>
    %154 = arith.addf %152, %153 : vector<1x32xf32>
    %cst_58 = arith.constant 0.000000e+00 : f32
    %155 = vector.broadcast %cst_58 : f32 to vector<1x32xf32>
    %156 = arith.subf %155, %154 : vector<1x32xf32>
    %157 = math.exp %156 : vector<1x32xf32>
    %cst_59 = arith.constant 1.000000e+00 : f32
    %158 = vector.broadcast %cst_59 : f32 to vector<1x32xf32>
    %159 = arith.addf %158, %157 : vector<1x32xf32>
    %160 = tpu.reciprocal %159 {approx = true} : vector<1x32xf32> -> vector<1x32xf32>
    %161 = vector.extract_strided_slice %149 {offsets = [0, 32], sizes = [1, 32], strides = [1, 1]} : vector<1x96xf32> to vector<1x32xf32>
    %162 = vector.extract_strided_slice %151 {offsets = [0, 32], sizes = [1, 32], strides = [1, 1]} : vector<1x96xf32> to vector<1x32xf32>
    %163 = arith.addf %161, %162 : vector<1x32xf32>
    %cst_60 = arith.constant 0.000000e+00 : f32
    %164 = vector.broadcast %cst_60 : f32 to vector<1x32xf32>
    %165 = arith.subf %164, %163 : vector<1x32xf32>
    %166 = math.exp %165 : vector<1x32xf32>
    %cst_61 = arith.constant 1.000000e+00 : f32
    %167 = vector.broadcast %cst_61 : f32 to vector<1x32xf32>
    %168 = arith.addf %167, %166 : vector<1x32xf32>
    %169 = tpu.reciprocal %168 {approx = true} : vector<1x32xf32> -> vector<1x32xf32>
    %170 = vector.extract_strided_slice %149 {offsets = [0, 64], sizes = [1, 32], strides = [1, 1]} : vector<1x96xf32> to vector<1x32xf32>
    %171 = vector.extract_strided_slice %151 {offsets = [0, 64], sizes = [1, 32], strides = [1, 1]} : vector<1x96xf32> to vector<1x32xf32>
    %172 = arith.mulf %160, %171 : vector<1x32xf32>
    %173 = arith.addf %170, %172 : vector<1x32xf32>
    %174 = math.tanh %173 : vector<1x32xf32>
    %cst_62 = arith.constant 1.000000e+00 : f32
    %175 = vector.broadcast %cst_62 : f32 to vector<1x32xf32>
    %176 = arith.subf %175, %169 : vector<1x32xf32>
    %177 = arith.mulf %176, %174 : vector<1x32xf32>
    %178 = arith.mulf %169, %27 : vector<1x32xf32>
    %179 = arith.addf %177, %178 : vector<1x32xf32>
    %cst_63 = arith.constant dense<0.000000e+00> : vector<1x32xf32>
    %180 = tpu.matmul %179, %20, %cst_63 {dimension_numbers = #tpu.dot_dimension_numbers<[1], [0], [0], [1], [0, 0, 1, 1], [], []>} : vector<1x32xf32>, vector<32x32xf32>, vector<1x32xf32> -> vector<1x32xf32>
    %181 = arith.addf %180, %21 : vector<1x32xf32>
    %cst_64 = arith.constant 0.000000e+00 : f32
    %182 = vector.broadcast %cst_64 : f32 to vector<1x32xf32>
    %183 = arith.maximumf %181, %182 : vector<1x32xf32>
    %cst_65 = arith.constant dense<0.000000e+00> : vector<1x32xf32>
    %184 = tpu.matmul %183, %22, %cst_65 {dimension_numbers = #tpu.dot_dimension_numbers<[1], [0], [0], [1], [0, 0, 1, 1], [], []>} : vector<1x32xf32>, vector<32x32xf32>, vector<1x32xf32> -> vector<1x32xf32>
    %185 = arith.addf %184, %23 : vector<1x32xf32>
    %cst_66 = arith.constant 0.000000e+00 : f32
    %186 = vector.broadcast %cst_66 : f32 to vector<1x32xf32>
    %187 = arith.maximumf %185, %186 : vector<1x32xf32>
    %cst_67 = arith.constant dense<0.000000e+00> : vector<1x16xf32>
    %188 = tpu.matmul %187, %24, %cst_67 {dimension_numbers = #tpu.dot_dimension_numbers<[1], [0], [0], [1], [0, 0, 1, 1], [], []>} : vector<1x32xf32>, vector<32x16xf32>, vector<1x16xf32> -> vector<1x16xf32>
    %189 = arith.addf %188, %25 : vector<1x16xf32>
    %190 = vector.extract_strided_slice %189 {offsets = [0, 0], sizes = [1, 8], strides = [1, 1]} : vector<1x16xf32> to vector<1x8xf32>
    %191 = vector.extract_strided_slice %189 {offsets = [0, 8], sizes = [1, 8], strides = [1, 1]} : vector<1x16xf32> to vector<1x8xf32>
    %cst_68 = arith.constant 1.000000e+00 : f32
    %192 = vector.broadcast %cst_68 : f32 to vector<1x8xf32>
    %193 = arith.cmpf ogt, %191, %192 : vector<1x8xf32>
    %cst_69 = arith.constant 1.000000e+00 : f32
    %194 = vector.broadcast %cst_69 : f32 to vector<1x8xf32>
    %195 = arith.minimumf %191, %194 : vector<1x8xf32>
    %196 = math.exp %195 : vector<1x8xf32>
    %cst_70 = arith.constant 1.000000e+00 : f32
    %197 = vector.broadcast %cst_70 : f32 to vector<1x8xf32>
    %198 = arith.addf %197, %196 : vector<1x8xf32>
    %199 = math.log %198 : vector<1x8xf32>
    %200 = arith.select %193, %191, %199 : vector<1x8xi1>, vector<1x8xf32>
    %201 = vector.extract_strided_slice %29 {offsets = [0, 12], sizes = [1, 8], strides = [1, 1]} : vector<8x128xf32> to vector<1x8xf32>
    %cst_71 = arith.constant 5.000000e-01 : f32
    %202 = vector.broadcast %cst_71 : f32 to vector<1x8xf32>
    %203 = arith.mulf %202, %200 : vector<1x8xf32>
    %204 = math.exp %203 : vector<1x8xf32>
    %205 = arith.mulf %201, %204 : vector<1x8xf32>
    %206 = arith.addf %190, %205 : vector<1x8xf32>
    %c0_72 = arith.constant 0 : index
    %c0_73 = arith.constant 0 : index
    %207 = vector.load %arg2[%c0_72, %c0_73] : memref<8x128xf32, #tpu.memory_space<vmem>>, vector<1x8xf32>
    tpu.vector_store %arg2[%c0_72, %c0_73], %206 {strides = array<i32>} : memref<8x128xf32, #tpu.memory_space<vmem>>, vector<1x8xf32>,
    %c0_74 = arith.constant 0 : index
    %c8_75 = arith.constant 8 : index
    %208 = vector.load %arg2[%c0_74, %c8_75] : memref<8x128xf32, #tpu.memory_space<vmem>>, vector<1x4xf32>
    tpu.vector_store %arg2[%c0_74, %c8_75], %139 {strides = array<i32>} : memref<8x128xf32, #tpu.memory_space<vmem>>, vector<1x4xf32>,
    %c0_76 = arith.constant 0 : index
    %c12 = arith.constant 12 : index
    %209 = vector.load %arg2[%c0_76, %c12] : memref<8x128xf32, #tpu.memory_space<vmem>>, vector<1x4xf32>
    tpu.vector_store %arg2[%c0_76, %c12], %79 {strides = array<i32>} : memref<8x128xf32, #tpu.memory_space<vmem>>, vector<1x4xf32>,
    %c0_77 = arith.constant 0 : index
    %c16 = arith.constant 16 : index
    %210 = vector.load %arg2[%c0_77, %c16] : memref<8x128xf32, #tpu.memory_space<vmem>>, vector<1x4xf32>
    tpu.vector_store %arg2[%c0_77, %c16], %89 {strides = array<i32>} : memref<8x128xf32, #tpu.memory_space<vmem>>, vector<1x4xf32>,
    %211 = vector.extract_strided_slice %33 {offsets = [1, 0], sizes = [1, 96], strides = [1, 1]} : vector<8x96xf32> to vector<1x96xf32>
    %cst_78 = arith.constant dense<0.000000e+00> : vector<1x96xf32>
    %212 = tpu.matmul %68, %1, %cst_78 {dimension_numbers = #tpu.dot_dimension_numbers<[1], [0], [0], [1], [0, 0, 1, 1], [], []>} : vector<1x32xf32>, vector<32x96xf32>, vector<1x96xf32> -> vector<1x96xf32>
    %213 = arith.addf %212, %3 : vector<1x96xf32>
    %214 = vector.extract_strided_slice %211 {offsets = [0, 0], sizes = [1, 32], strides = [1, 1]} : vector<1x96xf32> to vector<1x32xf32>
    %215 = vector.extract_strided_slice %213 {offsets = [0, 0], sizes = [1, 32], strides = [1, 1]} : vector<1x96xf32> to vector<1x32xf32>
    %216 = arith.addf %214, %215 : vector<1x32xf32>
    %cst_79 = arith.constant 0.000000e+00 : f32
    %217 = vector.broadcast %cst_79 : f32 to vector<1x32xf32>
    %218 = arith.subf %217, %216 : vector<1x32xf32>
    %219 = math.exp %218 : vector<1x32xf32>
    %cst_80 = arith.constant 1.000000e+00 : f32
    %220 = vector.broadcast %cst_80 : f32 to vector<1x32xf32>
    %221 = arith.addf %220, %219 : vector<1x32xf32>
    %222 = tpu.reciprocal %221 {approx = true} : vector<1x32xf32> -> vector<1x32xf32>
    %223 = vector.extract_strided_slice %211 {offsets = [0, 32], sizes = [1, 32], strides = [1, 1]} : vector<1x96xf32> to vector<1x32xf32>
    %224 = vector.extract_strided_slice %213 {offsets = [0, 32], sizes = [1, 32], strides = [1, 1]} : vector<1x96xf32> to vector<1x32xf32>
    %225 = arith.addf %223, %224 : vector<1x32xf32>
    %cst_81 = arith.constant 0.000000e+00 : f32
    %226 = vector.broadcast %cst_81 : f32 to vector<1x32xf32>
    %227 = arith.subf %226, %225 : vector<1x32xf32>
    %228 = math.exp %227 : vector<1x32xf32>
    %cst_82 = arith.constant 1.000000e+00 : f32
    %229 = vector.broadcast %cst_82 : f32 to vector<1x32xf32>
    %230 = arith.addf %229, %228 : vector<1x32xf32>
    %231 = tpu.reciprocal %230 {approx = true} : vector<1x32xf32> -> vector<1x32xf32>
    %232 = vector.extract_strided_slice %211 {offsets = [0, 64], sizes = [1, 32], strides = [1, 1]} : vector<1x96xf32> to vector<1x32xf32>
    %233 = vector.extract_strided_slice %213 {offsets = [0, 64], sizes = [1, 32], strides = [1, 1]} : vector<1x96xf32> to vector<1x32xf32>
    %234 = arith.mulf %222, %233 : vector<1x32xf32>
    %235 = arith.addf %232, %234 : vector<1x32xf32>
    %236 = math.tanh %235 : vector<1x32xf32>
    %cst_83 = arith.constant 1.000000e+00 : f32
    %237 = vector.broadcast %cst_83 : f32 to vector<1x32xf32>
    %238 = arith.subf %237, %231 : vector<1x32xf32>
    %239 = arith.mulf %238, %236 : vector<1x32xf32>
    %240 = arith.mulf %231, %68 : vector<1x32xf32>
    %241 = arith.addf %239, %240 : vector<1x32xf32>
    %cst_84 = arith.constant dense<0.000000e+00> : vector<1x32xf32>
    %242 = tpu.matmul %241, %8, %cst_84 {dimension_numbers = #tpu.dot_dimension_numbers<[1], [0], [0], [1], [0, 0, 1, 1], [], []>} : vector<1x32xf32>, vector<32x32xf32>, vector<1x32xf32> -> vector<1x32xf32>
    %243 = arith.addf %242, %35 : vector<1x32xf32>
    %cst_85 = arith.constant 0.000000e+00 : f32
    %244 = vector.broadcast %cst_85 : f32 to vector<1x32xf32>
    %245 = arith.maximumf %243, %244 : vector<1x32xf32>
    %cst_86 = arith.constant dense<0.000000e+00> : vector<1x32xf32>
    %246 = tpu.matmul %245, %11, %cst_86 {dimension_numbers = #tpu.dot_dimension_numbers<[1], [0], [0], [1], [0, 0, 1, 1], [], []>} : vector<1x32xf32>, vector<32x32xf32>, vector<1x32xf32> -> vector<1x32xf32>
    %247 = arith.addf %246, %12 : vector<1x32xf32>
    %cst_87 = arith.constant 0.000000e+00 : f32
    %248 = vector.broadcast %cst_87 : f32 to vector<1x32xf32>
    %249 = arith.maximumf %247, %248 : vector<1x32xf32>
    %cst_88 = arith.constant dense<0.000000e+00> : vector<1x8xf32>
    %250 = tpu.matmul %249, %13, %cst_88 {dimension_numbers = #tpu.dot_dimension_numbers<[1], [0], [0], [1], [0, 0, 1, 1], [], []>} : vector<1x32xf32>, vector<32x8xf32>, vector<1x8xf32> -> vector<1x8xf32>
    %251 = arith.addf %250, %14 : vector<1x8xf32>
    %252 = vector.extract_strided_slice %251 {offsets = [0, 0], sizes = [1, 4], strides = [1, 1]} : vector<1x8xf32> to vector<1x4xf32>
    %253 = vector.extract_strided_slice %251 {offsets = [0, 4], sizes = [1, 4], strides = [1, 1]} : vector<1x8xf32> to vector<1x4xf32>
    %cst_89 = arith.constant 1.000000e+00 : f32
    %254 = vector.broadcast %cst_89 : f32 to vector<1x4xf32>
    %255 = arith.cmpf ogt, %253, %254 : vector<1x4xf32>
    %cst_90 = arith.constant 1.000000e+00 : f32
    %256 = vector.broadcast %cst_90 : f32 to vector<1x4xf32>
    %257 = arith.minimumf %253, %256 : vector<1x4xf32>
    %258 = math.exp %257 : vector<1x4xf32>
    %cst_91 = arith.constant 1.000000e+00 : f32
    %259 = vector.broadcast %cst_91 : f32 to vector<1x4xf32>
    %260 = arith.addf %259, %258 : vector<1x4xf32>
    %261 = math.log %260 : vector<1x4xf32>
    %262 = arith.select %255, %253, %261 : vector<1x4xi1>, vector<1x4xf32>
    %263 = vector.extract_strided_slice %29 {offsets = [1, 8], sizes = [1, 4], strides = [1, 1]} : vector<8x128xf32> to vector<1x4xf32>
    %cst_92 = arith.constant 5.000000e-01 : f32
    %264 = vector.broadcast %cst_92 : f32 to vector<1x4xf32>
    %265 = arith.mulf %264, %262 : vector<1x4xf32>
    %266 = math.exp %265 : vector<1x4xf32>
    %267 = arith.mulf %263, %266 : vector<1x4xf32>
    %268 = arith.addf %252, %267 : vector<1x4xf32>
    %269 = vector.extract_strided_slice %16 {offsets = [0, 0], sizes = [1, 4], strides = [1, 1]} : vector<4x4xf32> to vector<1x4xf32>
    %270 = arith.mulf %269, %268 : vector<1x4xf32>
    %cst_93 = arith.constant dense<0.000000e+00> : vector<1xf32>
    %271 = vector.multi_reduction <add>, %270, %cst_93 [1] : vector<1x4xf32> to vector<1xf32>
    %272 = vector.shape_cast %271 : vector<1xf32> to vector<1x1xf32>
    %273 = vector.extract_strided_slice %17 {offsets = [0, 0], sizes = [1, 1], strides = [1, 1]} : vector<1x4xf32> to vector<1x1xf32>
    %274 = arith.addf %272, %273 : vector<1x1xf32>
    %275 = vector.extract_strided_slice %15 {offsets = [0, 0], sizes = [1, 4], strides = [1, 1]} : vector<4x4xf32> to vector<1x4xf32>
    %276 = math.tanh %274 : vector<1x1xf32>
    %277 = vector.broadcast %276 : vector<1x1xf32> to vector<1x4xf32>
    %278 = arith.mulf %275, %277 : vector<1x4xf32>
    %279 = arith.addf %268, %278 : vector<1x4xf32>
    %280 = vector.extract_strided_slice %16 {offsets = [1, 0], sizes = [1, 4], strides = [1, 1]} : vector<4x4xf32> to vector<1x4xf32>
    %281 = arith.mulf %280, %279 : vector<1x4xf32>
    %cst_94 = arith.constant dense<0.000000e+00> : vector<1xf32>
    %282 = vector.multi_reduction <add>, %281, %cst_94 [1] : vector<1x4xf32> to vector<1xf32>
    %283 = vector.shape_cast %282 : vector<1xf32> to vector<1x1xf32>
    %284 = vector.extract_strided_slice %17 {offsets = [0, 1], sizes = [1, 1], strides = [1, 1]} : vector<1x4xf32> to vector<1x1xf32>
    %285 = arith.addf %283, %284 : vector<1x1xf32>
    %286 = vector.extract_strided_slice %15 {offsets = [1, 0], sizes = [1, 4], strides = [1, 1]} : vector<4x4xf32> to vector<1x4xf32>
    %287 = math.tanh %285 : vector<1x1xf32>
    %288 = vector.broadcast %287 : vector<1x1xf32> to vector<1x4xf32>
    %289 = arith.mulf %286, %288 : vector<1x4xf32>
    %290 = arith.addf %279, %289 : vector<1x4xf32>
    %291 = vector.extract_strided_slice %16 {offsets = [2, 0], sizes = [1, 4], strides = [1, 1]} : vector<4x4xf32> to vector<1x4xf32>
    %292 = arith.mulf %291, %290 : vector<1x4xf32>
    %cst_95 = arith.constant dense<0.000000e+00> : vector<1xf32>
    %293 = vector.multi_reduction <add>, %292, %cst_95 [1] : vector<1x4xf32> to vector<1xf32>
    %294 = vector.shape_cast %293 : vector<1xf32> to vector<1x1xf32>
    %295 = vector.extract_strided_slice %17 {offsets = [0, 2], sizes = [1, 1], strides = [1, 1]} : vector<1x4xf32> to vector<1x1xf32>
    %296 = arith.addf %294, %295 : vector<1x1xf32>
    %297 = vector.extract_strided_slice %15 {offsets = [2, 0], sizes = [1, 4], strides = [1, 1]} : vector<4x4xf32> to vector<1x4xf32>
    %298 = math.tanh %296 : vector<1x1xf32>
    %299 = vector.broadcast %298 : vector<1x1xf32> to vector<1x4xf32>
    %300 = arith.mulf %297, %299 : vector<1x4xf32>
    %301 = arith.addf %290, %300 : vector<1x4xf32>
    %302 = vector.extract_strided_slice %16 {offsets = [3, 0], sizes = [1, 4], strides = [1, 1]} : vector<4x4xf32> to vector<1x4xf32>
    %303 = arith.mulf %302, %301 : vector<1x4xf32>
    %cst_96 = arith.constant dense<0.000000e+00> : vector<1xf32>
    %304 = vector.multi_reduction <add>, %303, %cst_96 [1] : vector<1x4xf32> to vector<1xf32>
    %305 = vector.shape_cast %304 : vector<1xf32> to vector<1x1xf32>
    %306 = vector.extract_strided_slice %17 {offsets = [0, 3], sizes = [1, 1], strides = [1, 1]} : vector<1x4xf32> to vector<1x1xf32>
    %307 = arith.addf %305, %306 : vector<1x1xf32>
    %308 = vector.extract_strided_slice %15 {offsets = [3, 0], sizes = [1, 4], strides = [1, 1]} : vector<4x4xf32> to vector<1x4xf32>
    %309 = math.tanh %307 : vector<1x1xf32>
    %310 = vector.broadcast %309 : vector<1x1xf32> to vector<1x4xf32>
    %311 = arith.mulf %308, %310 : vector<1x4xf32>
    %312 = arith.addf %301, %311 : vector<1x4xf32>
    %cst_97 = arith.constant dense<0.000000e+00> : vector<1x4xf32>
    %313 = tpu.matmul %312, %18, %cst_97 {dimension_numbers = #tpu.dot_dimension_numbers<[1], [0], [0], [1], [0, 0, 1, 1], [], []>} : vector<1x4xf32>, vector<4x4xf32>, vector<1x4xf32> -> vector<1x4xf32>
    %314 = vector.extract_strided_slice %29 {offsets = [1, 20], sizes = [1, 1], strides = [1, 1]} : vector<8x128xf32> to vector<1x1xf32>
    %315 = vector.broadcast %314 : vector<1x1xf32> to vector<1x4xf32>
    %316 = arith.addf %313, %315 : vector<1x4xf32>
    %cst_98 = arith.constant dense<0.000000e+00> : vector<1x4xf32>
    %317 = tpu.matmul %316, %19, %cst_98 {dimension_numbers = #tpu.dot_dimension_numbers<[1], [0], [0], [1], [0, 0, 1, 1], [], []>} : vector<1x4xf32>, vector<4x4xf32>, vector<1x4xf32> -> vector<1x4xf32>
    %318 = vector.extract_strided_slice %29 {offsets = [1, 21], sizes = [1, 1], strides = [1, 1]} : vector<8x128xf32> to vector<1x1xf32>
    %319 = vector.broadcast %318 : vector<1x1xf32> to vector<1x4xf32>
    %320 = arith.addf %317, %319 : vector<1x4xf32>
    %cst_99 = arith.constant dense<0.000000e+00> : vector<1x96xf32>
    %321 = tpu.matmul %320, %4, %cst_99 {dimension_numbers = #tpu.dot_dimension_numbers<[1], [0], [0], [1], [0, 0, 1, 1], [], []>} : vector<1x4xf32>, vector<4x96xf32>, vector<1x96xf32> -> vector<1x96xf32>
    %322 = arith.addf %321, %6 : vector<1x96xf32>
    %cst_100 = arith.constant dense<0.000000e+00> : vector<1x96xf32>
    %323 = tpu.matmul %179, %5, %cst_100 {dimension_numbers = #tpu.dot_dimension_numbers<[1], [0], [0], [1], [0, 0, 1, 1], [], []>} : vector<1x32xf32>, vector<32x96xf32>, vector<1x96xf32> -> vector<1x96xf32>
    %324 = arith.addf %323, %7 : vector<1x96xf32>
    %325 = vector.extract_strided_slice %322 {offsets = [0, 0], sizes = [1, 32], strides = [1, 1]} : vector<1x96xf32> to vector<1x32xf32>
    %326 = vector.extract_strided_slice %324 {offsets = [0, 0], sizes = [1, 32], strides = [1, 1]} : vector<1x96xf32> to vector<1x32xf32>
    %327 = arith.addf %325, %326 : vector<1x32xf32>
    %cst_101 = arith.constant 0.000000e+00 : f32
    %328 = vector.broadcast %cst_101 : f32 to vector<1x32xf32>
    %329 = arith.subf %328, %327 : vector<1x32xf32>
    %330 = math.exp %329 : vector<1x32xf32>
    %cst_102 = arith.constant 1.000000e+00 : f32
    %331 = vector.broadcast %cst_102 : f32 to vector<1x32xf32>
    %332 = arith.addf %331, %330 : vector<1x32xf32>
    %333 = tpu.reciprocal %332 {approx = true} : vector<1x32xf32> -> vector<1x32xf32>
    %334 = vector.extract_strided_slice %322 {offsets = [0, 32], sizes = [1, 32], strides = [1, 1]} : vector<1x96xf32> to vector<1x32xf32>
    %335 = vector.extract_strided_slice %324 {offsets = [0, 32], sizes = [1, 32], strides = [1, 1]} : vector<1x96xf32> to vector<1x32xf32>
    %336 = arith.addf %334, %335 : vector<1x32xf32>
    %cst_103 = arith.constant 0.000000e+00 : f32
    %337 = vector.broadcast %cst_103 : f32 to vector<1x32xf32>
    %338 = arith.subf %337, %336 : vector<1x32xf32>
    %339 = math.exp %338 : vector<1x32xf32>
    %cst_104 = arith.constant 1.000000e+00 : f32
    %340 = vector.broadcast %cst_104 : f32 to vector<1x32xf32>
    %341 = arith.addf %340, %339 : vector<1x32xf32>
    %342 = tpu.reciprocal %341 {approx = true} : vector<1x32xf32> -> vector<1x32xf32>
    %343 = vector.extract_strided_slice %322 {offsets = [0, 64], sizes = [1, 32], strides = [1, 1]} : vector<1x96xf32> to vector<1x32xf32>
    %344 = vector.extract_strided_slice %324 {offsets = [0, 64], sizes = [1, 32], strides = [1, 1]} : vector<1x96xf32> to vector<1x32xf32>
    %345 = arith.mulf %333, %344 : vector<1x32xf32>
    %346 = arith.addf %343, %345 : vector<1x32xf32>
    %347 = math.tanh %346 : vector<1x32xf32>
    %cst_105 = arith.constant 1.000000e+00 : f32
    %348 = vector.broadcast %cst_105 : f32 to vector<1x32xf32>
    %349 = arith.subf %348, %342 : vector<1x32xf32>
    %350 = arith.mulf %349, %347 : vector<1x32xf32>
    %351 = arith.mulf %342, %179 : vector<1x32xf32>
    %352 = arith.addf %350, %351 : vector<1x32xf32>
    %cst_106 = arith.constant dense<0.000000e+00> : vector<1x32xf32>
    %353 = tpu.matmul %352, %20, %cst_106 {dimension_numbers = #tpu.dot_dimension_numbers<[1], [0], [0], [1], [0, 0, 1, 1], [], []>} : vector<1x32xf32>, vector<32x32xf32>, vector<1x32xf32> -> vector<1x32xf32>
    %354 = arith.addf %353, %21 : vector<1x32xf32>
    %cst_107 = arith.constant 0.000000e+00 : f32
    %355 = vector.broadcast %cst_107 : f32 to vector<1x32xf32>
    %356 = arith.maximumf %354, %355 : vector<1x32xf32>
    %cst_108 = arith.constant dense<0.000000e+00> : vector<1x32xf32>
    %357 = tpu.matmul %356, %22, %cst_108 {dimension_numbers = #tpu.dot_dimension_numbers<[1], [0], [0], [1], [0, 0, 1, 1], [], []>} : vector<1x32xf32>, vector<32x32xf32>, vector<1x32xf32> -> vector<1x32xf32>
    %358 = arith.addf %357, %23 : vector<1x32xf32>
    %cst_109 = arith.constant 0.000000e+00 : f32
    %359 = vector.broadcast %cst_109 : f32 to vector<1x32xf32>
    %360 = arith.maximumf %358, %359 : vector<1x32xf32>
    %cst_110 = arith.constant dense<0.000000e+00> : vector<1x16xf32>
    %361 = tpu.matmul %360, %24, %cst_110 {dimension_numbers = #tpu.dot_dimension_numbers<[1], [0], [0], [1], [0, 0, 1, 1], [], []>} : vector<1x32xf32>, vector<32x16xf32>, vector<1x16xf32> -> vector<1x16xf32>
    %362 = arith.addf %361, %25 : vector<1x16xf32>
    %363 = vector.extract_strided_slice %362 {offsets = [0, 0], sizes = [1, 8], strides = [1, 1]} : vector<1x16xf32> to vector<1x8xf32>
    %364 = vector.extract_strided_slice %362 {offsets = [0, 8], sizes = [1, 8], strides = [1, 1]} : vector<1x16xf32> to vector<1x8xf32>
    %cst_111 = arith.constant 1.000000e+00 : f32
    %365 = vector.broadcast %cst_111 : f32 to vector<1x8xf32>
    %366 = arith.cmpf ogt, %364, %365 : vector<1x8xf32>
    %cst_112 = arith.constant 1.000000e+00 : f32
    %367 = vector.broadcast %cst_112 : f32 to vector<1x8xf32>
    %368 = arith.minimumf %364, %367 : vector<1x8xf32>
    %369 = math.exp %368 : vector<1x8xf32>
    %cst_113 = arith.constant 1.000000e+00 : f32
    %370 = vector.broadcast %cst_113 : f32 to vector<1x8xf32>
    %371 = arith.addf %370, %369 : vector<1x8xf32>
    %372 = math.log %371 : vector<1x8xf32>
    %373 = arith.select %366, %364, %372 : vector<1x8xi1>, vector<1x8xf32>
    %374 = vector.extract_strided_slice %29 {offsets = [1, 12], sizes = [1, 8], strides = [1, 1]} : vector<8x128xf32> to vector<1x8xf32>
    %cst_114 = arith.constant 5.000000e-01 : f32
    %375 = vector.broadcast %cst_114 : f32 to vector<1x8xf32>
    %376 = arith.mulf %375, %373 : vector<1x8xf32>
    %377 = math.exp %376 : vector<1x8xf32>
    %378 = arith.mulf %374, %377 : vector<1x8xf32>
    %379 = arith.addf %363, %378 : vector<1x8xf32>
    %c1 = arith.constant 1 : index
    %c0_115 = arith.constant 0 : index
    %380 = vector.load %arg2[%c1, %c0_115] : memref<8x128xf32, #tpu.memory_space<vmem>>, vector<1x8xf32>
    tpu.vector_store %arg2[%c1, %c0_115], %379 {strides = array<i32>} : memref<8x128xf32, #tpu.memory_space<vmem>>, vector<1x8xf32>,
    %c1_116 = arith.constant 1 : index
    %c8_117 = arith.constant 8 : index
    %381 = vector.load %arg2[%c1_116, %c8_117] : memref<8x128xf32, #tpu.memory_space<vmem>>, vector<1x4xf32>
    tpu.vector_store %arg2[%c1_116, %c8_117], %312 {strides = array<i32>} : memref<8x128xf32, #tpu.memory_space<vmem>>, vector<1x4xf32>,
    %c1_118 = arith.constant 1 : index
    %c12_119 = arith.constant 12 : index
    %382 = vector.load %arg2[%c1_118, %c12_119] : memref<8x128xf32, #tpu.memory_space<vmem>>, vector<1x4xf32>
    tpu.vector_store %arg2[%c1_118, %c12_119], %252 {strides = array<i32>} : memref<8x128xf32, #tpu.memory_space<vmem>>, vector<1x4xf32>,
    %c1_120 = arith.constant 1 : index
    %c16_121 = arith.constant 16 : index
    %383 = vector.load %arg2[%c1_120, %c16_121] : memref<8x128xf32, #tpu.memory_space<vmem>>, vector<1x4xf32>
    tpu.vector_store %arg2[%c1_120, %c16_121], %262 {strides = array<i32>} : memref<8x128xf32, #tpu.memory_space<vmem>>, vector<1x4xf32>,
    %384 = vector.extract_strided_slice %33 {offsets = [2, 0], sizes = [1, 96], strides = [1, 1]} : vector<8x96xf32> to vector<1x96xf32>
    %cst_122 = arith.constant dense<0.000000e+00> : vector<1x96xf32>
    %385 = tpu.matmul %241, %1, %cst_122 {dimension_numbers = #tpu.dot_dimension_numbers<[1], [0], [0], [1], [0, 0, 1, 1], [], []>} : vector<1x32xf32>, vector<32x96xf32>, vector<1x96xf32> -> vector<1x96xf32>
    %386 = arith.addf %385, %3 : vector<1x96xf32>
    %387 = vector.extract_strided_slice %384 {offsets = [0, 0], sizes = [1, 32], strides = [1, 1]} : vector<1x96xf32> to vector<1x32xf32>
    %388 = vector.extract_strided_slice %386 {offsets = [0, 0], sizes = [1, 32], strides = [1, 1]} : vector<1x96xf32> to vector<1x32xf32>
    %389 = arith.addf %387, %388 : vector<1x32xf32>
    %cst_123 = arith.constant 0.000000e+00 : f32
    %390 = vector.broadcast %cst_123 : f32 to vector<1x32xf32>
    %391 = arith.subf %390, %389 : vector<1x32xf32>
    %392 = math.exp %391 : vector<1x32xf32>
    %cst_124 = arith.constant 1.000000e+00 : f32
    %393 = vector.broadcast %cst_124 : f32 to vector<1x32xf32>
    %394 = arith.addf %393, %392 : vector<1x32xf32>
    %395 = tpu.reciprocal %394 {approx = true} : vector<1x32xf32> -> vector<1x32xf32>
    %396 = vector.extract_strided_slice %384 {offsets = [0, 32], sizes = [1, 32], strides = [1, 1]} : vector<1x96xf32> to vector<1x32xf32>
    %397 = vector.extract_strided_slice %386 {offsets = [0, 32], sizes = [1, 32], strides = [1, 1]} : vector<1x96xf32> to vector<1x32xf32>
    %398 = arith.addf %396, %397 : vector<1x32xf32>
    %cst_125 = arith.constant 0.000000e+00 : f32
    %399 = vector.broadcast %cst_125 : f32 to vector<1x32xf32>
    %400 = arith.subf %399, %398 : vector<1x32xf32>
    %401 = math.exp %400 : vector<1x32xf32>
    %cst_126 = arith.constant 1.000000e+00 : f32
    %402 = vector.broadcast %cst_126 : f32 to vector<1x32xf32>
    %403 = arith.addf %402, %401 : vector<1x32xf32>
    %404 = tpu.reciprocal %403 {approx = true} : vector<1x32xf32> -> vector<1x32xf32>
    %405 = vector.extract_strided_slice %384 {offsets = [0, 64], sizes = [1, 32], strides = [1, 1]} : vector<1x96xf32> to vector<1x32xf32>
    %406 = vector.extract_strided_slice %386 {offsets = [0, 64], sizes = [1, 32], strides = [1, 1]} : vector<1x96xf32> to vector<1x32xf32>
    %407 = arith.mulf %395, %406 : vector<1x32xf32>
    %408 = arith.addf %405, %407 : vector<1x32xf32>
    %409 = math.tanh %408 : vector<1x32xf32>
    %cst_127 = arith.constant 1.000000e+00 : f32
    %410 = vector.broadcast %cst_127 : f32 to vector<1x32xf32>
    %411 = arith.subf %410, %404 : vector<1x32xf32>
    %412 = arith.mulf %411, %409 : vector<1x32xf32>
    %413 = arith.mulf %404, %241 : vector<1x32xf32>
    %414 = arith.addf %412, %413 : vector<1x32xf32>
    %cst_128 = arith.constant dense<0.000000e+00> : vector<1x32xf32>
    %415 = tpu.matmul %414, %8, %cst_128 {dimension_numbers = #tpu.dot_dimension_numbers<[1], [0], [0], [1], [0, 0, 1, 1], [], []>} : vector<1x32xf32>, vector<32x32xf32>, vector<1x32xf32> -> vector<1x32xf32>
    %416 = arith.addf %415, %35 : vector<1x32xf32>
    %cst_129 = arith.constant 0.000000e+00 : f32
    %417 = vector.broadcast %cst_129 : f32 to vector<1x32xf32>
    %418 = arith.maximumf %416, %417 : vector<1x32xf32>
    %cst_130 = arith.constant dense<0.000000e+00> : vector<1x32xf32>
    %419 = tpu.matmul %418, %11, %cst_130 {dimension_numbers = #tpu.dot_dimension_numbers<[1], [0], [0], [1], [0, 0, 1, 1], [], []>} : vector<1x32xf32>, vector<32x32xf32>, vector<1x32xf32> -> vector<1x32xf32>
    %420 = arith.addf %419, %12 : vector<1x32xf32>
    %cst_131 = arith.constant 0.000000e+00 : f32
    %421 = vector.broadcast %cst_131 : f32 to vector<1x32xf32>
    %422 = arith.maximumf %420, %421 : vector<1x32xf32>
    %cst_132 = arith.constant dense<0.000000e+00> : vector<1x8xf32>
    %423 = tpu.matmul %422, %13, %cst_132 {dimension_numbers = #tpu.dot_dimension_numbers<[1], [0], [0], [1], [0, 0, 1, 1], [], []>} : vector<1x32xf32>, vector<32x8xf32>, vector<1x8xf32> -> vector<1x8xf32>
    %424 = arith.addf %423, %14 : vector<1x8xf32>
    %425 = vector.extract_strided_slice %424 {offsets = [0, 0], sizes = [1, 4], strides = [1, 1]} : vector<1x8xf32> to vector<1x4xf32>
    %426 = vector.extract_strided_slice %424 {offsets = [0, 4], sizes = [1, 4], strides = [1, 1]} : vector<1x8xf32> to vector<1x4xf32>
    %cst_133 = arith.constant 1.000000e+00 : f32
    %427 = vector.broadcast %cst_133 : f32 to vector<1x4xf32>
    %428 = arith.cmpf ogt, %426, %427 : vector<1x4xf32>
    %cst_134 = arith.constant 1.000000e+00 : f32
    %429 = vector.broadcast %cst_134 : f32 to vector<1x4xf32>
    %430 = arith.minimumf %426, %429 : vector<1x4xf32>
    %431 = math.exp %430 : vector<1x4xf32>
    %cst_135 = arith.constant 1.000000e+00 : f32
    %432 = vector.broadcast %cst_135 : f32 to vector<1x4xf32>
    %433 = arith.addf %432, %431 : vector<1x4xf32>
    %434 = math.log %433 : vector<1x4xf32>
    %435 = arith.select %428, %426, %434 : vector<1x4xi1>, vector<1x4xf32>
    %436 = vector.extract_strided_slice %29 {offsets = [2, 8], sizes = [1, 4], strides = [1, 1]} : vector<8x128xf32> to vector<1x4xf32>
    %cst_136 = arith.constant 5.000000e-01 : f32
    %437 = vector.broadcast %cst_136 : f32 to vector<1x4xf32>
    %438 = arith.mulf %437, %435 : vector<1x4xf32>
    %439 = math.exp %438 : vector<1x4xf32>
    %440 = arith.mulf %436, %439 : vector<1x4xf32>
    %441 = arith.addf %425, %440 : vector<1x4xf32>
    %442 = vector.extract_strided_slice %16 {offsets = [0, 0], sizes = [1, 4], strides = [1, 1]} : vector<4x4xf32> to vector<1x4xf32>
    %443 = arith.mulf %442, %441 : vector<1x4xf32>
    %cst_137 = arith.constant dense<0.000000e+00> : vector<1xf32>
    %444 = vector.multi_reduction <add>, %443, %cst_137 [1] : vector<1x4xf32> to vector<1xf32>
    %445 = vector.shape_cast %444 : vector<1xf32> to vector<1x1xf32>
    %446 = vector.extract_strided_slice %17 {offsets = [0, 0], sizes = [1, 1], strides = [1, 1]} : vector<1x4xf32> to vector<1x1xf32>
    %447 = arith.addf %445, %446 : vector<1x1xf32>
    %448 = vector.extract_strided_slice %15 {offsets = [0, 0], sizes = [1, 4], strides = [1, 1]} : vector<4x4xf32> to vector<1x4xf32>
    %449 = math.tanh %447 : vector<1x1xf32>
    %450 = vector.broadcast %449 : vector<1x1xf32> to vector<1x4xf32>
    %451 = arith.mulf %448, %450 : vector<1x4xf32>
    %452 = arith.addf %441, %451 : vector<1x4xf32>
    %453 = vector.extract_strided_slice %16 {offsets = [1, 0], sizes = [1, 4], strides = [1, 1]} : vector<4x4xf32> to vector<1x4xf32>
    %454 = arith.mulf %453, %452 : vector<1x4xf32>
    %cst_138 = arith.constant dense<0.000000e+00> : vector<1xf32>
    %455 = vector.multi_reduction <add>, %454, %cst_138 [1] : vector<1x4xf32> to vector<1xf32>
    %456 = vector.shape_cast %455 : vector<1xf32> to vector<1x1xf32>
    %457 = vector.extract_strided_slice %17 {offsets = [0, 1], sizes = [1, 1], strides = [1, 1]} : vector<1x4xf32> to vector<1x1xf32>
    %458 = arith.addf %456, %457 : vector<1x1xf32>
    %459 = vector.extract_strided_slice %15 {offsets = [1, 0], sizes = [1, 4], strides = [1, 1]} : vector<4x4xf32> to vector<1x4xf32>
    %460 = math.tanh %458 : vector<1x1xf32>
    %461 = vector.broadcast %460 : vector<1x1xf32> to vector<1x4xf32>
    %462 = arith.mulf %459, %461 : vector<1x4xf32>
    %463 = arith.addf %452, %462 : vector<1x4xf32>
    %464 = vector.extract_strided_slice %16 {offsets = [2, 0], sizes = [1, 4], strides = [1, 1]} : vector<4x4xf32> to vector<1x4xf32>
    %465 = arith.mulf %464, %463 : vector<1x4xf32>
    %cst_139 = arith.constant dense<0.000000e+00> : vector<1xf32>
    %466 = vector.multi_reduction <add>, %465, %cst_139 [1] : vector<1x4xf32> to vector<1xf32>
    %467 = vector.shape_cast %466 : vector<1xf32> to vector<1x1xf32>
    %468 = vector.extract_strided_slice %17 {offsets = [0, 2], sizes = [1, 1], strides = [1, 1]} : vector<1x4xf32> to vector<1x1xf32>
    %469 = arith.addf %467, %468 : vector<1x1xf32>
    %470 = vector.extract_strided_slice %15 {offsets = [2, 0], sizes = [1, 4], strides = [1, 1]} : vector<4x4xf32> to vector<1x4xf32>
    %471 = math.tanh %469 : vector<1x1xf32>
    %472 = vector.broadcast %471 : vector<1x1xf32> to vector<1x4xf32>
    %473 = arith.mulf %470, %472 : vector<1x4xf32>
    %474 = arith.addf %463, %473 : vector<1x4xf32>
    %475 = vector.extract_strided_slice %16 {offsets = [3, 0], sizes = [1, 4], strides = [1, 1]} : vector<4x4xf32> to vector<1x4xf32>
    %476 = arith.mulf %475, %474 : vector<1x4xf32>
    %cst_140 = arith.constant dense<0.000000e+00> : vector<1xf32>
    %477 = vector.multi_reduction <add>, %476, %cst_140 [1] : vector<1x4xf32> to vector<1xf32>
    %478 = vector.shape_cast %477 : vector<1xf32> to vector<1x1xf32>
    %479 = vector.extract_strided_slice %17 {offsets = [0, 3], sizes = [1, 1], strides = [1, 1]} : vector<1x4xf32> to vector<1x1xf32>
    %480 = arith.addf %478, %479 : vector<1x1xf32>
    %481 = vector.extract_strided_slice %15 {offsets = [3, 0], sizes = [1, 4], strides = [1, 1]} : vector<4x4xf32> to vector<1x4xf32>
    %482 = math.tanh %480 : vector<1x1xf32>
    %483 = vector.broadcast %482 : vector<1x1xf32> to vector<1x4xf32>
    %484 = arith.mulf %481, %483 : vector<1x4xf32>
    %485 = arith.addf %474, %484 : vector<1x4xf32>
    %cst_141 = arith.constant dense<0.000000e+00> : vector<1x4xf32>
    %486 = tpu.matmul %485, %18, %cst_141 {dimension_numbers = #tpu.dot_dimension_numbers<[1], [0], [0], [1], [0, 0, 1, 1], [], []>} : vector<1x4xf32>, vector<4x4xf32>, vector<1x4xf32> -> vector<1x4xf32>
    %487 = vector.extract_strided_slice %29 {offsets = [2, 20], sizes = [1, 1], strides = [1, 1]} : vector<8x128xf32> to vector<1x1xf32>
    %488 = vector.broadcast %487 : vector<1x1xf32> to vector<1x4xf32>
    %489 = arith.addf %486, %488 : vector<1x4xf32>
    %cst_142 = arith.constant dense<0.000000e+00> : vector<1x4xf32>
    %490 = tpu.matmul %489, %19, %cst_142 {dimension_numbers = #tpu.dot_dimension_numbers<[1], [0], [0], [1], [0, 0, 1, 1], [], []>} : vector<1x4xf32>, vector<4x4xf32>, vector<1x4xf32> -> vector<1x4xf32>
    %491 = vector.extract_strided_slice %29 {offsets = [2, 21], sizes = [1, 1], strides = [1, 1]} : vector<8x128xf32> to vector<1x1xf32>
    %492 = vector.broadcast %491 : vector<1x1xf32> to vector<1x4xf32>
    %493 = arith.addf %490, %492 : vector<1x4xf32>
    %cst_143 = arith.constant dense<0.000000e+00> : vector<1x96xf32>
    %494 = tpu.matmul %493, %4, %cst_143 {dimension_numbers = #tpu.dot_dimension_numbers<[1], [0], [0], [1], [0, 0, 1, 1], [], []>} : vector<1x4xf32>, vector<4x96xf32>, vector<1x96xf32> -> vector<1x96xf32>
    %495 = arith.addf %494, %6 : vector<1x96xf32>
    %cst_144 = arith.constant dense<0.000000e+00> : vector<1x96xf32>
    %496 = tpu.matmul %352, %5, %cst_144 {dimension_numbers = #tpu.dot_dimension_numbers<[1], [0], [0], [1], [0, 0, 1, 1], [], []>} : vector<1x32xf32>, vector<32x96xf32>, vector<1x96xf32> -> vector<1x96xf32>
    %497 = arith.addf %496, %7 : vector<1x96xf32>
    %498 = vector.extract_strided_slice %495 {offsets = [0, 0], sizes = [1, 32], strides = [1, 1]} : vector<1x96xf32> to vector<1x32xf32>
    %499 = vector.extract_strided_slice %497 {offsets = [0, 0], sizes = [1, 32], strides = [1, 1]} : vector<1x96xf32> to vector<1x32xf32>
    %500 = arith.addf %498, %499 : vector<1x32xf32>
    %cst_145 = arith.constant 0.000000e+00 : f32
    %501 = vector.broadcast %cst_145 : f32 to vector<1x32xf32>
    %502 = arith.subf %501, %500 : vector<1x32xf32>
    %503 = math.exp %502 : vector<1x32xf32>
    %cst_146 = arith.constant 1.000000e+00 : f32
    %504 = vector.broadcast %cst_146 : f32 to vector<1x32xf32>
    %505 = arith.addf %504, %503 : vector<1x32xf32>
    %506 = tpu.reciprocal %505 {approx = true} : vector<1x32xf32> -> vector<1x32xf32>
    %507 = vector.extract_strided_slice %495 {offsets = [0, 32], sizes = [1, 32], strides = [1, 1]} : vector<1x96xf32> to vector<1x32xf32>
    %508 = vector.extract_strided_slice %497 {offsets = [0, 32], sizes = [1, 32], strides = [1, 1]} : vector<1x96xf32> to vector<1x32xf32>
    %509 = arith.addf %507, %508 : vector<1x32xf32>
    %cst_147 = arith.constant 0.000000e+00 : f32
    %510 = vector.broadcast %cst_147 : f32 to vector<1x32xf32>
    %511 = arith.subf %510, %509 : vector<1x32xf32>
    %512 = math.exp %511 : vector<1x32xf32>
    %cst_148 = arith.constant 1.000000e+00 : f32
    %513 = vector.broadcast %cst_148 : f32 to vector<1x32xf32>
    %514 = arith.addf %513, %512 : vector<1x32xf32>
    %515 = tpu.reciprocal %514 {approx = true} : vector<1x32xf32> -> vector<1x32xf32>
    %516 = vector.extract_strided_slice %495 {offsets = [0, 64], sizes = [1, 32], strides = [1, 1]} : vector<1x96xf32> to vector<1x32xf32>
    %517 = vector.extract_strided_slice %497 {offsets = [0, 64], sizes = [1, 32], strides = [1, 1]} : vector<1x96xf32> to vector<1x32xf32>
    %518 = arith.mulf %506, %517 : vector<1x32xf32>
    %519 = arith.addf %516, %518 : vector<1x32xf32>
    %520 = math.tanh %519 : vector<1x32xf32>
    %cst_149 = arith.constant 1.000000e+00 : f32
    %521 = vector.broadcast %cst_149 : f32 to vector<1x32xf32>
    %522 = arith.subf %521, %515 : vector<1x32xf32>
    %523 = arith.mulf %522, %520 : vector<1x32xf32>
    %524 = arith.mulf %515, %352 : vector<1x32xf32>
    %525 = arith.addf %523, %524 : vector<1x32xf32>
    %cst_150 = arith.constant dense<0.000000e+00> : vector<1x32xf32>
    %526 = tpu.matmul %525, %20, %cst_150 {dimension_numbers = #tpu.dot_dimension_numbers<[1], [0], [0], [1], [0, 0, 1, 1], [], []>} : vector<1x32xf32>, vector<32x32xf32>, vector<1x32xf32> -> vector<1x32xf32>
    %527 = arith.addf %526, %21 : vector<1x32xf32>
    %cst_151 = arith.constant 0.000000e+00 : f32
    %528 = vector.broadcast %cst_151 : f32 to vector<1x32xf32>
    %529 = arith.maximumf %527, %528 : vector<1x32xf32>
    %cst_152 = arith.constant dense<0.000000e+00> : vector<1x32xf32>
    %530 = tpu.matmul %529, %22, %cst_152 {dimension_numbers = #tpu.dot_dimension_numbers<[1], [0], [0], [1], [0, 0, 1, 1], [], []>} : vector<1x32xf32>, vector<32x32xf32>, vector<1x32xf32> -> vector<1x32xf32>
    %531 = arith.addf %530, %23 : vector<1x32xf32>
    %cst_153 = arith.constant 0.000000e+00 : f32
    %532 = vector.broadcast %cst_153 : f32 to vector<1x32xf32>
    %533 = arith.maximumf %531, %532 : vector<1x32xf32>
    %cst_154 = arith.constant dense<0.000000e+00> : vector<1x16xf32>
    %534 = tpu.matmul %533, %24, %cst_154 {dimension_numbers = #tpu.dot_dimension_numbers<[1], [0], [0], [1], [0, 0, 1, 1], [], []>} : vector<1x32xf32>, vector<32x16xf32>, vector<1x16xf32> -> vector<1x16xf32>
    %535 = arith.addf %534, %25 : vector<1x16xf32>
    %536 = vector.extract_strided_slice %535 {offsets = [0, 0], sizes = [1, 8], strides = [1, 1]} : vector<1x16xf32> to vector<1x8xf32>
    %537 = vector.extract_strided_slice %535 {offsets = [0, 8], sizes = [1, 8], strides = [1, 1]} : vector<1x16xf32> to vector<1x8xf32>
    %cst_155 = arith.constant 1.000000e+00 : f32
    %538 = vector.broadcast %cst_155 : f32 to vector<1x8xf32>
    %539 = arith.cmpf ogt, %537, %538 : vector<1x8xf32>
    %cst_156 = arith.constant 1.000000e+00 : f32
    %540 = vector.broadcast %cst_156 : f32 to vector<1x8xf32>
    %541 = arith.minimumf %537, %540 : vector<1x8xf32>
    %542 = math.exp %541 : vector<1x8xf32>
    %cst_157 = arith.constant 1.000000e+00 : f32
    %543 = vector.broadcast %cst_157 : f32 to vector<1x8xf32>
    %544 = arith.addf %543, %542 : vector<1x8xf32>
    %545 = math.log %544 : vector<1x8xf32>
    %546 = arith.select %539, %537, %545 : vector<1x8xi1>, vector<1x8xf32>
    %547 = vector.extract_strided_slice %29 {offsets = [2, 12], sizes = [1, 8], strides = [1, 1]} : vector<8x128xf32> to vector<1x8xf32>
    %cst_158 = arith.constant 5.000000e-01 : f32
    %548 = vector.broadcast %cst_158 : f32 to vector<1x8xf32>
    %549 = arith.mulf %548, %546 : vector<1x8xf32>
    %550 = math.exp %549 : vector<1x8xf32>
    %551 = arith.mulf %547, %550 : vector<1x8xf32>
    %552 = arith.addf %536, %551 : vector<1x8xf32>
    %c2 = arith.constant 2 : index
    %c0_159 = arith.constant 0 : index
    %553 = vector.load %arg2[%c2, %c0_159] : memref<8x128xf32, #tpu.memory_space<vmem>>, vector<1x8xf32>
    tpu.vector_store %arg2[%c2, %c0_159], %552 {strides = array<i32>} : memref<8x128xf32, #tpu.memory_space<vmem>>, vector<1x8xf32>,
    %c2_160 = arith.constant 2 : index
    %c8_161 = arith.constant 8 : index
    %554 = vector.load %arg2[%c2_160, %c8_161] : memref<8x128xf32, #tpu.memory_space<vmem>>, vector<1x4xf32>
    tpu.vector_store %arg2[%c2_160, %c8_161], %485 {strides = array<i32>} : memref<8x128xf32, #tpu.memory_space<vmem>>, vector<1x4xf32>,
    %c2_162 = arith.constant 2 : index
    %c12_163 = arith.constant 12 : index
    %555 = vector.load %arg2[%c2_162, %c12_163] : memref<8x128xf32, #tpu.memory_space<vmem>>, vector<1x4xf32>
    tpu.vector_store %arg2[%c2_162, %c12_163], %425 {strides = array<i32>} : memref<8x128xf32, #tpu.memory_space<vmem>>, vector<1x4xf32>,
    %c2_164 = arith.constant 2 : index
    %c16_165 = arith.constant 16 : index
    %556 = vector.load %arg2[%c2_164, %c16_165] : memref<8x128xf32, #tpu.memory_space<vmem>>, vector<1x4xf32>
    tpu.vector_store %arg2[%c2_164, %c16_165], %435 {strides = array<i32>} : memref<8x128xf32, #tpu.memory_space<vmem>>, vector<1x4xf32>,
    %557 = vector.extract_strided_slice %33 {offsets = [3, 0], sizes = [1, 96], strides = [1, 1]} : vector<8x96xf32> to vector<1x96xf32>
    %cst_166 = arith.constant dense<0.000000e+00> : vector<1x96xf32>
    %558 = tpu.matmul %414, %1, %cst_166 {dimension_numbers = #tpu.dot_dimension_numbers<[1], [0], [0], [1], [0, 0, 1, 1], [], []>} : vector<1x32xf32>, vector<32x96xf32>, vector<1x96xf32> -> vector<1x96xf32>
    %559 = arith.addf %558, %3 : vector<1x96xf32>
    %560 = vector.extract_strided_slice %557 {offsets = [0, 0], sizes = [1, 32], strides = [1, 1]} : vector<1x96xf32> to vector<1x32xf32>
    %561 = vector.extract_strided_slice %559 {offsets = [0, 0], sizes = [1, 32], strides = [1, 1]} : vector<1x96xf32> to vector<1x32xf32>
    %562 = arith.addf %560, %561 : vector<1x32xf32>
    %cst_167 = arith.constant 0.000000e+00 : f32
    %563 = vector.broadcast %cst_167 : f32 to vector<1x32xf32>
    %564 = arith.subf %563, %562 : vector<1x32xf32>
    %565 = math.exp %564 : vector<1x32xf32>
    %cst_168 = arith.constant 1.000000e+00 : f32
    %566 = vector.broadcast %cst_168 : f32 to vector<1x32xf32>
    %567 = arith.addf %566, %565 : vector<1x32xf32>
    %568 = tpu.reciprocal %567 {approx = true} : vector<1x32xf32> -> vector<1x32xf32>
    %569 = vector.extract_strided_slice %557 {offsets = [0, 32], sizes = [1, 32], strides = [1, 1]} : vector<1x96xf32> to vector<1x32xf32>
    %570 = vector.extract_strided_slice %559 {offsets = [0, 32], sizes = [1, 32], strides = [1, 1]} : vector<1x96xf32> to vector<1x32xf32>
    %571 = arith.addf %569, %570 : vector<1x32xf32>
    %cst_169 = arith.constant 0.000000e+00 : f32
    %572 = vector.broadcast %cst_169 : f32 to vector<1x32xf32>
    %573 = arith.subf %572, %571 : vector<1x32xf32>
    %574 = math.exp %573 : vector<1x32xf32>
    %cst_170 = arith.constant 1.000000e+00 : f32
    %575 = vector.broadcast %cst_170 : f32 to vector<1x32xf32>
    %576 = arith.addf %575, %574 : vector<1x32xf32>
    %577 = tpu.reciprocal %576 {approx = true} : vector<1x32xf32> -> vector<1x32xf32>
    %578 = vector.extract_strided_slice %557 {offsets = [0, 64], sizes = [1, 32], strides = [1, 1]} : vector<1x96xf32> to vector<1x32xf32>
    %579 = vector.extract_strided_slice %559 {offsets = [0, 64], sizes = [1, 32], strides = [1, 1]} : vector<1x96xf32> to vector<1x32xf32>
    %580 = arith.mulf %568, %579 : vector<1x32xf32>
    %581 = arith.addf %578, %580 : vector<1x32xf32>
    %582 = math.tanh %581 : vector<1x32xf32>
    %cst_171 = arith.constant 1.000000e+00 : f32
    %583 = vector.broadcast %cst_171 : f32 to vector<1x32xf32>
    %584 = arith.subf %583, %577 : vector<1x32xf32>
    %585 = arith.mulf %584, %582 : vector<1x32xf32>
    %586 = arith.mulf %577, %414 : vector<1x32xf32>
    %587 = arith.addf %585, %586 : vector<1x32xf32>
    %cst_172 = arith.constant dense<0.000000e+00> : vector<1x32xf32>
    %588 = tpu.matmul %587, %8, %cst_172 {dimension_numbers = #tpu.dot_dimension_numbers<[1], [0], [0], [1], [0, 0, 1, 1], [], []>} : vector<1x32xf32>, vector<32x32xf32>, vector<1x32xf32> -> vector<1x32xf32>
    %589 = arith.addf %588, %35 : vector<1x32xf32>
    %cst_173 = arith.constant 0.000000e+00 : f32
    %590 = vector.broadcast %cst_173 : f32 to vector<1x32xf32>
    %591 = arith.maximumf %589, %590 : vector<1x32xf32>
    %cst_174 = arith.constant dense<0.000000e+00> : vector<1x32xf32>
    %592 = tpu.matmul %591, %11, %cst_174 {dimension_numbers = #tpu.dot_dimension_numbers<[1], [0], [0], [1], [0, 0, 1, 1], [], []>} : vector<1x32xf32>, vector<32x32xf32>, vector<1x32xf32> -> vector<1x32xf32>
    %593 = arith.addf %592, %12 : vector<1x32xf32>
    %cst_175 = arith.constant 0.000000e+00 : f32
    %594 = vector.broadcast %cst_175 : f32 to vector<1x32xf32>
    %595 = arith.maximumf %593, %594 : vector<1x32xf32>
    %cst_176 = arith.constant dense<0.000000e+00> : vector<1x8xf32>
    %596 = tpu.matmul %595, %13, %cst_176 {dimension_numbers = #tpu.dot_dimension_numbers<[1], [0], [0], [1], [0, 0, 1, 1], [], []>} : vector<1x32xf32>, vector<32x8xf32>, vector<1x8xf32> -> vector<1x8xf32>
    %597 = arith.addf %596, %14 : vector<1x8xf32>
    %598 = vector.extract_strided_slice %597 {offsets = [0, 0], sizes = [1, 4], strides = [1, 1]} : vector<1x8xf32> to vector<1x4xf32>
    %599 = vector.extract_strided_slice %597 {offsets = [0, 4], sizes = [1, 4], strides = [1, 1]} : vector<1x8xf32> to vector<1x4xf32>
    %cst_177 = arith.constant 1.000000e+00 : f32
    %600 = vector.broadcast %cst_177 : f32 to vector<1x4xf32>
    %601 = arith.cmpf ogt, %599, %600 : vector<1x4xf32>
    %cst_178 = arith.constant 1.000000e+00 : f32
    %602 = vector.broadcast %cst_178 : f32 to vector<1x4xf32>
    %603 = arith.minimumf %599, %602 : vector<1x4xf32>
    %604 = math.exp %603 : vector<1x4xf32>
    %cst_179 = arith.constant 1.000000e+00 : f32
    %605 = vector.broadcast %cst_179 : f32 to vector<1x4xf32>
    %606 = arith.addf %605, %604 : vector<1x4xf32>
    %607 = math.log %606 : vector<1x4xf32>
    %608 = arith.select %601, %599, %607 : vector<1x4xi1>, vector<1x4xf32>
    %609 = vector.extract_strided_slice %29 {offsets = [3, 8], sizes = [1, 4], strides = [1, 1]} : vector<8x128xf32> to vector<1x4xf32>
    %cst_180 = arith.constant 5.000000e-01 : f32
    %610 = vector.broadcast %cst_180 : f32 to vector<1x4xf32>
    %611 = arith.mulf %610, %608 : vector<1x4xf32>
    %612 = math.exp %611 : vector<1x4xf32>
    %613 = arith.mulf %609, %612 : vector<1x4xf32>
    %614 = arith.addf %598, %613 : vector<1x4xf32>
    %615 = vector.extract_strided_slice %16 {offsets = [0, 0], sizes = [1, 4], strides = [1, 1]} : vector<4x4xf32> to vector<1x4xf32>
    %616 = arith.mulf %615, %614 : vector<1x4xf32>
    %cst_181 = arith.constant dense<0.000000e+00> : vector<1xf32>
    %617 = vector.multi_reduction <add>, %616, %cst_181 [1] : vector<1x4xf32> to vector<1xf32>
    %618 = vector.shape_cast %617 : vector<1xf32> to vector<1x1xf32>
    %619 = vector.extract_strided_slice %17 {offsets = [0, 0], sizes = [1, 1], strides = [1, 1]} : vector<1x4xf32> to vector<1x1xf32>
    %620 = arith.addf %618, %619 : vector<1x1xf32>
    %621 = vector.extract_strided_slice %15 {offsets = [0, 0], sizes = [1, 4], strides = [1, 1]} : vector<4x4xf32> to vector<1x4xf32>
    %622 = math.tanh %620 : vector<1x1xf32>
    %623 = vector.broadcast %622 : vector<1x1xf32> to vector<1x4xf32>
    %624 = arith.mulf %621, %623 : vector<1x4xf32>
    %625 = arith.addf %614, %624 : vector<1x4xf32>
    %626 = vector.extract_strided_slice %16 {offsets = [1, 0], sizes = [1, 4], strides = [1, 1]} : vector<4x4xf32> to vector<1x4xf32>
    %627 = arith.mulf %626, %625 : vector<1x4xf32>
    %cst_182 = arith.constant dense<0.000000e+00> : vector<1xf32>
    %628 = vector.multi_reduction <add>, %627, %cst_182 [1] : vector<1x4xf32> to vector<1xf32>
    %629 = vector.shape_cast %628 : vector<1xf32> to vector<1x1xf32>
    %630 = vector.extract_strided_slice %17 {offsets = [0, 1], sizes = [1, 1], strides = [1, 1]} : vector<1x4xf32> to vector<1x1xf32>
    %631 = arith.addf %629, %630 : vector<1x1xf32>
    %632 = vector.extract_strided_slice %15 {offsets = [1, 0], sizes = [1, 4], strides = [1, 1]} : vector<4x4xf32> to vector<1x4xf32>
    %633 = math.tanh %631 : vector<1x1xf32>
    %634 = vector.broadcast %633 : vector<1x1xf32> to vector<1x4xf32>
    %635 = arith.mulf %632, %634 : vector<1x4xf32>
    %636 = arith.addf %625, %635 : vector<1x4xf32>
    %637 = vector.extract_strided_slice %16 {offsets = [2, 0], sizes = [1, 4], strides = [1, 1]} : vector<4x4xf32> to vector<1x4xf32>
    %638 = arith.mulf %637, %636 : vector<1x4xf32>
    %cst_183 = arith.constant dense<0.000000e+00> : vector<1xf32>
    %639 = vector.multi_reduction <add>, %638, %cst_183 [1] : vector<1x4xf32> to vector<1xf32>
    %640 = vector.shape_cast %639 : vector<1xf32> to vector<1x1xf32>
    %641 = vector.extract_strided_slice %17 {offsets = [0, 2], sizes = [1, 1], strides = [1, 1]} : vector<1x4xf32> to vector<1x1xf32>
    %642 = arith.addf %640, %641 : vector<1x1xf32>
    %643 = vector.extract_strided_slice %15 {offsets = [2, 0], sizes = [1, 4], strides = [1, 1]} : vector<4x4xf32> to vector<1x4xf32>
    %644 = math.tanh %642 : vector<1x1xf32>
    %645 = vector.broadcast %644 : vector<1x1xf32> to vector<1x4xf32>
    %646 = arith.mulf %643, %645 : vector<1x4xf32>
    %647 = arith.addf %636, %646 : vector<1x4xf32>
    %648 = vector.extract_strided_slice %16 {offsets = [3, 0], sizes = [1, 4], strides = [1, 1]} : vector<4x4xf32> to vector<1x4xf32>
    %649 = arith.mulf %648, %647 : vector<1x4xf32>
    %cst_184 = arith.constant dense<0.000000e+00> : vector<1xf32>
    %650 = vector.multi_reduction <add>, %649, %cst_184 [1] : vector<1x4xf32> to vector<1xf32>
    %651 = vector.shape_cast %650 : vector<1xf32> to vector<1x1xf32>
    %652 = vector.extract_strided_slice %17 {offsets = [0, 3], sizes = [1, 1], strides = [1, 1]} : vector<1x4xf32> to vector<1x1xf32>
    %653 = arith.addf %651, %652 : vector<1x1xf32>
    %654 = vector.extract_strided_slice %15 {offsets = [3, 0], sizes = [1, 4], strides = [1, 1]} : vector<4x4xf32> to vector<1x4xf32>
    %655 = math.tanh %653 : vector<1x1xf32>
    %656 = vector.broadcast %655 : vector<1x1xf32> to vector<1x4xf32>
    %657 = arith.mulf %654, %656 : vector<1x4xf32>
    %658 = arith.addf %647, %657 : vector<1x4xf32>
    %cst_185 = arith.constant dense<0.000000e+00> : vector<1x4xf32>
    %659 = tpu.matmul %658, %18, %cst_185 {dimension_numbers = #tpu.dot_dimension_numbers<[1], [0], [0], [1], [0, 0, 1, 1], [], []>} : vector<1x4xf32>, vector<4x4xf32>, vector<1x4xf32> -> vector<1x4xf32>
    %660 = vector.extract_strided_slice %29 {offsets = [3, 20], sizes = [1, 1], strides = [1, 1]} : vector<8x128xf32> to vector<1x1xf32>
    %661 = vector.broadcast %660 : vector<1x1xf32> to vector<1x4xf32>
    %662 = arith.addf %659, %661 : vector<1x4xf32>
    %cst_186 = arith.constant dense<0.000000e+00> : vector<1x4xf32>
    %663 = tpu.matmul %662, %19, %cst_186 {dimension_numbers = #tpu.dot_dimension_numbers<[1], [0], [0], [1], [0, 0, 1, 1], [], []>} : vector<1x4xf32>, vector<4x4xf32>, vector<1x4xf32> -> vector<1x4xf32>
    %664 = vector.extract_strided_slice %29 {offsets = [3, 21], sizes = [1, 1], strides = [1, 1]} : vector<8x128xf32> to vector<1x1xf32>
    %665 = vector.broadcast %664 : vector<1x1xf32> to vector<1x4xf32>
    %666 = arith.addf %663, %665 : vector<1x4xf32>
    %cst_187 = arith.constant dense<0.000000e+00> : vector<1x96xf32>
    %667 = tpu.matmul %666, %4, %cst_187 {dimension_numbers = #tpu.dot_dimension_numbers<[1], [0], [0], [1], [0, 0, 1, 1], [], []>} : vector<1x4xf32>, vector<4x96xf32>, vector<1x96xf32> -> vector<1x96xf32>
    %668 = arith.addf %667, %6 : vector<1x96xf32>
    %cst_188 = arith.constant dense<0.000000e+00> : vector<1x96xf32>
    %669 = tpu.matmul %525, %5, %cst_188 {dimension_numbers = #tpu.dot_dimension_numbers<[1], [0], [0], [1], [0, 0, 1, 1], [], []>} : vector<1x32xf32>, vector<32x96xf32>, vector<1x96xf32> -> vector<1x96xf32>
    %670 = arith.addf %669, %7 : vector<1x96xf32>
    %671 = vector.extract_strided_slice %668 {offsets = [0, 0], sizes = [1, 32], strides = [1, 1]} : vector<1x96xf32> to vector<1x32xf32>
    %672 = vector.extract_strided_slice %670 {offsets = [0, 0], sizes = [1, 32], strides = [1, 1]} : vector<1x96xf32> to vector<1x32xf32>
    %673 = arith.addf %671, %672 : vector<1x32xf32>
    %cst_189 = arith.constant 0.000000e+00 : f32
    %674 = vector.broadcast %cst_189 : f32 to vector<1x32xf32>
    %675 = arith.subf %674, %673 : vector<1x32xf32>
    %676 = math.exp %675 : vector<1x32xf32>
    %cst_190 = arith.constant 1.000000e+00 : f32
    %677 = vector.broadcast %cst_190 : f32 to vector<1x32xf32>
    %678 = arith.addf %677, %676 : vector<1x32xf32>
    %679 = tpu.reciprocal %678 {approx = true} : vector<1x32xf32> -> vector<1x32xf32>
    %680 = vector.extract_strided_slice %668 {offsets = [0, 32], sizes = [1, 32], strides = [1, 1]} : vector<1x96xf32> to vector<1x32xf32>
    %681 = vector.extract_strided_slice %670 {offsets = [0, 32], sizes = [1, 32], strides = [1, 1]} : vector<1x96xf32> to vector<1x32xf32>
    %682 = arith.addf %680, %681 : vector<1x32xf32>
    %cst_191 = arith.constant 0.000000e+00 : f32
    %683 = vector.broadcast %cst_191 : f32 to vector<1x32xf32>
    %684 = arith.subf %683, %682 : vector<1x32xf32>
    %685 = math.exp %684 : vector<1x32xf32>
    %cst_192 = arith.constant 1.000000e+00 : f32
    %686 = vector.broadcast %cst_192 : f32 to vector<1x32xf32>
    %687 = arith.addf %686, %685 : vector<1x32xf32>
    %688 = tpu.reciprocal %687 {approx = true} : vector<1x32xf32> -> vector<1x32xf32>
    %689 = vector.extract_strided_slice %668 {offsets = [0, 64], sizes = [1, 32], strides = [1, 1]} : vector<1x96xf32> to vector<1x32xf32>
    %690 = vector.extract_strided_slice %670 {offsets = [0, 64], sizes = [1, 32], strides = [1, 1]} : vector<1x96xf32> to vector<1x32xf32>
    %691 = arith.mulf %679, %690 : vector<1x32xf32>
    %692 = arith.addf %689, %691 : vector<1x32xf32>
    %693 = math.tanh %692 : vector<1x32xf32>
    %cst_193 = arith.constant 1.000000e+00 : f32
    %694 = vector.broadcast %cst_193 : f32 to vector<1x32xf32>
    %695 = arith.subf %694, %688 : vector<1x32xf32>
    %696 = arith.mulf %695, %693 : vector<1x32xf32>
    %697 = arith.mulf %688, %525 : vector<1x32xf32>
    %698 = arith.addf %696, %697 : vector<1x32xf32>
    %cst_194 = arith.constant dense<0.000000e+00> : vector<1x32xf32>
    %699 = tpu.matmul %698, %20, %cst_194 {dimension_numbers = #tpu.dot_dimension_numbers<[1], [0], [0], [1], [0, 0, 1, 1], [], []>} : vector<1x32xf32>, vector<32x32xf32>, vector<1x32xf32> -> vector<1x32xf32>
    %700 = arith.addf %699, %21 : vector<1x32xf32>
    %cst_195 = arith.constant 0.000000e+00 : f32
    %701 = vector.broadcast %cst_195 : f32 to vector<1x32xf32>
    %702 = arith.maximumf %700, %701 : vector<1x32xf32>
    %cst_196 = arith.constant dense<0.000000e+00> : vector<1x32xf32>
    %703 = tpu.matmul %702, %22, %cst_196 {dimension_numbers = #tpu.dot_dimension_numbers<[1], [0], [0], [1], [0, 0, 1, 1], [], []>} : vector<1x32xf32>, vector<32x32xf32>, vector<1x32xf32> -> vector<1x32xf32>
    %704 = arith.addf %703, %23 : vector<1x32xf32>
    %cst_197 = arith.constant 0.000000e+00 : f32
    %705 = vector.broadcast %cst_197 : f32 to vector<1x32xf32>
    %706 = arith.maximumf %704, %705 : vector<1x32xf32>
    %cst_198 = arith.constant dense<0.000000e+00> : vector<1x16xf32>
    %707 = tpu.matmul %706, %24, %cst_198 {dimension_numbers = #tpu.dot_dimension_numbers<[1], [0], [0], [1], [0, 0, 1, 1], [], []>} : vector<1x32xf32>, vector<32x16xf32>, vector<1x16xf32> -> vector<1x16xf32>
    %708 = arith.addf %707, %25 : vector<1x16xf32>
    %709 = vector.extract_strided_slice %708 {offsets = [0, 0], sizes = [1, 8], strides = [1, 1]} : vector<1x16xf32> to vector<1x8xf32>
    %710 = vector.extract_strided_slice %708 {offsets = [0, 8], sizes = [1, 8], strides = [1, 1]} : vector<1x16xf32> to vector<1x8xf32>
    %cst_199 = arith.constant 1.000000e+00 : f32
    %711 = vector.broadcast %cst_199 : f32 to vector<1x8xf32>
    %712 = arith.cmpf ogt, %710, %711 : vector<1x8xf32>
    %cst_200 = arith.constant 1.000000e+00 : f32
    %713 = vector.broadcast %cst_200 : f32 to vector<1x8xf32>
    %714 = arith.minimumf %710, %713 : vector<1x8xf32>
    %715 = math.exp %714 : vector<1x8xf32>
    %cst_201 = arith.constant 1.000000e+00 : f32
    %716 = vector.broadcast %cst_201 : f32 to vector<1x8xf32>
    %717 = arith.addf %716, %715 : vector<1x8xf32>
    %718 = math.log %717 : vector<1x8xf32>
    %719 = arith.select %712, %710, %718 : vector<1x8xi1>, vector<1x8xf32>
    %720 = vector.extract_strided_slice %29 {offsets = [3, 12], sizes = [1, 8], strides = [1, 1]} : vector<8x128xf32> to vector<1x8xf32>
    %cst_202 = arith.constant 5.000000e-01 : f32
    %721 = vector.broadcast %cst_202 : f32 to vector<1x8xf32>
    %722 = arith.mulf %721, %719 : vector<1x8xf32>
    %723 = math.exp %722 : vector<1x8xf32>
    %724 = arith.mulf %720, %723 : vector<1x8xf32>
    %725 = arith.addf %709, %724 : vector<1x8xf32>
    %c3 = arith.constant 3 : index
    %c0_203 = arith.constant 0 : index
    %726 = vector.load %arg2[%c3, %c0_203] : memref<8x128xf32, #tpu.memory_space<vmem>>, vector<1x8xf32>
    tpu.vector_store %arg2[%c3, %c0_203], %725 {strides = array<i32>} : memref<8x128xf32, #tpu.memory_space<vmem>>, vector<1x8xf32>,
    %c3_204 = arith.constant 3 : index
    %c8_205 = arith.constant 8 : index
    %727 = vector.load %arg2[%c3_204, %c8_205] : memref<8x128xf32, #tpu.memory_space<vmem>>, vector<1x4xf32>
    tpu.vector_store %arg2[%c3_204, %c8_205], %658 {strides = array<i32>} : memref<8x128xf32, #tpu.memory_space<vmem>>, vector<1x4xf32>,
    %c3_206 = arith.constant 3 : index
    %c12_207 = arith.constant 12 : index
    %728 = vector.load %arg2[%c3_206, %c12_207] : memref<8x128xf32, #tpu.memory_space<vmem>>, vector<1x4xf32>
    tpu.vector_store %arg2[%c3_206, %c12_207], %598 {strides = array<i32>} : memref<8x128xf32, #tpu.memory_space<vmem>>, vector<1x4xf32>,
    %c3_208 = arith.constant 3 : index
    %c16_209 = arith.constant 16 : index
    %729 = vector.load %arg2[%c3_208, %c16_209] : memref<8x128xf32, #tpu.memory_space<vmem>>, vector<1x4xf32>
    tpu.vector_store %arg2[%c3_208, %c16_209], %608 {strides = array<i32>} : memref<8x128xf32, #tpu.memory_space<vmem>>, vector<1x4xf32>,
    %730 = vector.extract_strided_slice %33 {offsets = [4, 0], sizes = [1, 96], strides = [1, 1]} : vector<8x96xf32> to vector<1x96xf32>
    %cst_210 = arith.constant dense<0.000000e+00> : vector<1x96xf32>
    %731 = tpu.matmul %587, %1, %cst_210 {dimension_numbers = #tpu.dot_dimension_numbers<[1], [0], [0], [1], [0, 0, 1, 1], [], []>} : vector<1x32xf32>, vector<32x96xf32>, vector<1x96xf32> -> vector<1x96xf32>
    %732 = arith.addf %731, %3 : vector<1x96xf32>
    %733 = vector.extract_strided_slice %730 {offsets = [0, 0], sizes = [1, 32], strides = [1, 1]} : vector<1x96xf32> to vector<1x32xf32>
    %734 = vector.extract_strided_slice %732 {offsets = [0, 0], sizes = [1, 32], strides = [1, 1]} : vector<1x96xf32> to vector<1x32xf32>
    %735 = arith.addf %733, %734 : vector<1x32xf32>
    %cst_211 = arith.constant 0.000000e+00 : f32
    %736 = vector.broadcast %cst_211 : f32 to vector<1x32xf32>
    %737 = arith.subf %736, %735 : vector<1x32xf32>
    %738 = math.exp %737 : vector<1x32xf32>
    %cst_212 = arith.constant 1.000000e+00 : f32
    %739 = vector.broadcast %cst_212 : f32 to vector<1x32xf32>
    %740 = arith.addf %739, %738 : vector<1x32xf32>
    %741 = tpu.reciprocal %740 {approx = true} : vector<1x32xf32> -> vector<1x32xf32>
    %742 = vector.extract_strided_slice %730 {offsets = [0, 32], sizes = [1, 32], strides = [1, 1]} : vector<1x96xf32> to vector<1x32xf32>
    %743 = vector.extract_strided_slice %732 {offsets = [0, 32], sizes = [1, 32], strides = [1, 1]} : vector<1x96xf32> to vector<1x32xf32>
    %744 = arith.addf %742, %743 : vector<1x32xf32>
    %cst_213 = arith.constant 0.000000e+00 : f32
    %745 = vector.broadcast %cst_213 : f32 to vector<1x32xf32>
    %746 = arith.subf %745, %744 : vector<1x32xf32>
    %747 = math.exp %746 : vector<1x32xf32>
    %cst_214 = arith.constant 1.000000e+00 : f32
    %748 = vector.broadcast %cst_214 : f32 to vector<1x32xf32>
    %749 = arith.addf %748, %747 : vector<1x32xf32>
    %750 = tpu.reciprocal %749 {approx = true} : vector<1x32xf32> -> vector<1x32xf32>
    %751 = vector.extract_strided_slice %730 {offsets = [0, 64], sizes = [1, 32], strides = [1, 1]} : vector<1x96xf32> to vector<1x32xf32>
    %752 = vector.extract_strided_slice %732 {offsets = [0, 64], sizes = [1, 32], strides = [1, 1]} : vector<1x96xf32> to vector<1x32xf32>
    %753 = arith.mulf %741, %752 : vector<1x32xf32>
    %754 = arith.addf %751, %753 : vector<1x32xf32>
    %755 = math.tanh %754 : vector<1x32xf32>
    %cst_215 = arith.constant 1.000000e+00 : f32
    %756 = vector.broadcast %cst_215 : f32 to vector<1x32xf32>
    %757 = arith.subf %756, %750 : vector<1x32xf32>
    %758 = arith.mulf %757, %755 : vector<1x32xf32>
    %759 = arith.mulf %750, %587 : vector<1x32xf32>
    %760 = arith.addf %758, %759 : vector<1x32xf32>
    %cst_216 = arith.constant dense<0.000000e+00> : vector<1x32xf32>
    %761 = tpu.matmul %760, %8, %cst_216 {dimension_numbers = #tpu.dot_dimension_numbers<[1], [0], [0], [1], [0, 0, 1, 1], [], []>} : vector<1x32xf32>, vector<32x32xf32>, vector<1x32xf32> -> vector<1x32xf32>
    %762 = arith.addf %761, %35 : vector<1x32xf32>
    %cst_217 = arith.constant 0.000000e+00 : f32
    %763 = vector.broadcast %cst_217 : f32 to vector<1x32xf32>
    %764 = arith.maximumf %762, %763 : vector<1x32xf32>
    %cst_218 = arith.constant dense<0.000000e+00> : vector<1x32xf32>
    %765 = tpu.matmul %764, %11, %cst_218 {dimension_numbers = #tpu.dot_dimension_numbers<[1], [0], [0], [1], [0, 0, 1, 1], [], []>} : vector<1x32xf32>, vector<32x32xf32>, vector<1x32xf32> -> vector<1x32xf32>
    %766 = arith.addf %765, %12 : vector<1x32xf32>
    %cst_219 = arith.constant 0.000000e+00 : f32
    %767 = vector.broadcast %cst_219 : f32 to vector<1x32xf32>
    %768 = arith.maximumf %766, %767 : vector<1x32xf32>
    %cst_220 = arith.constant dense<0.000000e+00> : vector<1x8xf32>
    %769 = tpu.matmul %768, %13, %cst_220 {dimension_numbers = #tpu.dot_dimension_numbers<[1], [0], [0], [1], [0, 0, 1, 1], [], []>} : vector<1x32xf32>, vector<32x8xf32>, vector<1x8xf32> -> vector<1x8xf32>
    %770 = arith.addf %769, %14 : vector<1x8xf32>
    %771 = vector.extract_strided_slice %770 {offsets = [0, 0], sizes = [1, 4], strides = [1, 1]} : vector<1x8xf32> to vector<1x4xf32>
    %772 = vector.extract_strided_slice %770 {offsets = [0, 4], sizes = [1, 4], strides = [1, 1]} : vector<1x8xf32> to vector<1x4xf32>
    %cst_221 = arith.constant 1.000000e+00 : f32
    %773 = vector.broadcast %cst_221 : f32 to vector<1x4xf32>
    %774 = arith.cmpf ogt, %772, %773 : vector<1x4xf32>
    %cst_222 = arith.constant 1.000000e+00 : f32
    %775 = vector.broadcast %cst_222 : f32 to vector<1x4xf32>
    %776 = arith.minimumf %772, %775 : vector<1x4xf32>
    %777 = math.exp %776 : vector<1x4xf32>
    %cst_223 = arith.constant 1.000000e+00 : f32
    %778 = vector.broadcast %cst_223 : f32 to vector<1x4xf32>
    %779 = arith.addf %778, %777 : vector<1x4xf32>
    %780 = math.log %779 : vector<1x4xf32>
    %781 = arith.select %774, %772, %780 : vector<1x4xi1>, vector<1x4xf32>
    %782 = vector.extract_strided_slice %29 {offsets = [4, 8], sizes = [1, 4], strides = [1, 1]} : vector<8x128xf32> to vector<1x4xf32>
    %cst_224 = arith.constant 5.000000e-01 : f32
    %783 = vector.broadcast %cst_224 : f32 to vector<1x4xf32>
    %784 = arith.mulf %783, %781 : vector<1x4xf32>
    %785 = math.exp %784 : vector<1x4xf32>
    %786 = arith.mulf %782, %785 : vector<1x4xf32>
    %787 = arith.addf %771, %786 : vector<1x4xf32>
    %788 = vector.extract_strided_slice %16 {offsets = [0, 0], sizes = [1, 4], strides = [1, 1]} : vector<4x4xf32> to vector<1x4xf32>
    %789 = arith.mulf %788, %787 : vector<1x4xf32>
    %cst_225 = arith.constant dense<0.000000e+00> : vector<1xf32>
    %790 = vector.multi_reduction <add>, %789, %cst_225 [1] : vector<1x4xf32> to vector<1xf32>
    %791 = vector.shape_cast %790 : vector<1xf32> to vector<1x1xf32>
    %792 = vector.extract_strided_slice %17 {offsets = [0, 0], sizes = [1, 1], strides = [1, 1]} : vector<1x4xf32> to vector<1x1xf32>
    %793 = arith.addf %791, %792 : vector<1x1xf32>
    %794 = vector.extract_strided_slice %15 {offsets = [0, 0], sizes = [1, 4], strides = [1, 1]} : vector<4x4xf32> to vector<1x4xf32>
    %795 = math.tanh %793 : vector<1x1xf32>
    %796 = vector.broadcast %795 : vector<1x1xf32> to vector<1x4xf32>
    %797 = arith.mulf %794, %796 : vector<1x4xf32>
    %798 = arith.addf %787, %797 : vector<1x4xf32>
    %799 = vector.extract_strided_slice %16 {offsets = [1, 0], sizes = [1, 4], strides = [1, 1]} : vector<4x4xf32> to vector<1x4xf32>
    %800 = arith.mulf %799, %798 : vector<1x4xf32>
    %cst_226 = arith.constant dense<0.000000e+00> : vector<1xf32>
    %801 = vector.multi_reduction <add>, %800, %cst_226 [1] : vector<1x4xf32> to vector<1xf32>
    %802 = vector.shape_cast %801 : vector<1xf32> to vector<1x1xf32>
    %803 = vector.extract_strided_slice %17 {offsets = [0, 1], sizes = [1, 1], strides = [1, 1]} : vector<1x4xf32> to vector<1x1xf32>
    %804 = arith.addf %802, %803 : vector<1x1xf32>
    %805 = vector.extract_strided_slice %15 {offsets = [1, 0], sizes = [1, 4], strides = [1, 1]} : vector<4x4xf32> to vector<1x4xf32>
    %806 = math.tanh %804 : vector<1x1xf32>
    %807 = vector.broadcast %806 : vector<1x1xf32> to vector<1x4xf32>
    %808 = arith.mulf %805, %807 : vector<1x4xf32>
    %809 = arith.addf %798, %808 : vector<1x4xf32>
    %810 = vector.extract_strided_slice %16 {offsets = [2, 0], sizes = [1, 4], strides = [1, 1]} : vector<4x4xf32> to vector<1x4xf32>
    %811 = arith.mulf %810, %809 : vector<1x4xf32>
    %cst_227 = arith.constant dense<0.000000e+00> : vector<1xf32>
    %812 = vector.multi_reduction <add>, %811, %cst_227 [1] : vector<1x4xf32> to vector<1xf32>
    %813 = vector.shape_cast %812 : vector<1xf32> to vector<1x1xf32>
    %814 = vector.extract_strided_slice %17 {offsets = [0, 2], sizes = [1, 1], strides = [1, 1]} : vector<1x4xf32> to vector<1x1xf32>
    %815 = arith.addf %813, %814 : vector<1x1xf32>
    %816 = vector.extract_strided_slice %15 {offsets = [2, 0], sizes = [1, 4], strides = [1, 1]} : vector<4x4xf32> to vector<1x4xf32>
    %817 = math.tanh %815 : vector<1x1xf32>
    %818 = vector.broadcast %817 : vector<1x1xf32> to vector<1x4xf32>
    %819 = arith.mulf %816, %818 : vector<1x4xf32>
    %820 = arith.addf %809, %819 : vector<1x4xf32>
    %821 = vector.extract_strided_slice %16 {offsets = [3, 0], sizes = [1, 4], strides = [1, 1]} : vector<4x4xf32> to vector<1x4xf32>
    %822 = arith.mulf %821, %820 : vector<1x4xf32>
    %cst_228 = arith.constant dense<0.000000e+00> : vector<1xf32>
    %823 = vector.multi_reduction <add>, %822, %cst_228 [1] : vector<1x4xf32> to vector<1xf32>
    %824 = vector.shape_cast %823 : vector<1xf32> to vector<1x1xf32>
    %825 = vector.extract_strided_slice %17 {offsets = [0, 3], sizes = [1, 1], strides = [1, 1]} : vector<1x4xf32> to vector<1x1xf32>
    %826 = arith.addf %824, %825 : vector<1x1xf32>
    %827 = vector.extract_strided_slice %15 {offsets = [3, 0], sizes = [1, 4], strides = [1, 1]} : vector<4x4xf32> to vector<1x4xf32>
    %828 = math.tanh %826 : vector<1x1xf32>
    %829 = vector.broadcast %828 : vector<1x1xf32> to vector<1x4xf32>
    %830 = arith.mulf %827, %829 : vector<1x4xf32>
    %831 = arith.addf %820, %830 : vector<1x4xf32>
    %cst_229 = arith.constant dense<0.000000e+00> : vector<1x4xf32>
    %832 = tpu.matmul %831, %18, %cst_229 {dimension_numbers = #tpu.dot_dimension_numbers<[1], [0], [0], [1], [0, 0, 1, 1], [], []>} : vector<1x4xf32>, vector<4x4xf32>, vector<1x4xf32> -> vector<1x4xf32>
    %833 = vector.extract_strided_slice %29 {offsets = [4, 20], sizes = [1, 1], strides = [1, 1]} : vector<8x128xf32> to vector<1x1xf32>
    %834 = vector.broadcast %833 : vector<1x1xf32> to vector<1x4xf32>
    %835 = arith.addf %832, %834 : vector<1x4xf32>
    %cst_230 = arith.constant dense<0.000000e+00> : vector<1x4xf32>
    %836 = tpu.matmul %835, %19, %cst_230 {dimension_numbers = #tpu.dot_dimension_numbers<[1], [0], [0], [1], [0, 0, 1, 1], [], []>} : vector<1x4xf32>, vector<4x4xf32>, vector<1x4xf32> -> vector<1x4xf32>
    %837 = vector.extract_strided_slice %29 {offsets = [4, 21], sizes = [1, 1], strides = [1, 1]} : vector<8x128xf32> to vector<1x1xf32>
    %838 = vector.broadcast %837 : vector<1x1xf32> to vector<1x4xf32>
    %839 = arith.addf %836, %838 : vector<1x4xf32>
    %cst_231 = arith.constant dense<0.000000e+00> : vector<1x96xf32>
    %840 = tpu.matmul %839, %4, %cst_231 {dimension_numbers = #tpu.dot_dimension_numbers<[1], [0], [0], [1], [0, 0, 1, 1], [], []>} : vector<1x4xf32>, vector<4x96xf32>, vector<1x96xf32> -> vector<1x96xf32>
    %841 = arith.addf %840, %6 : vector<1x96xf32>
    %cst_232 = arith.constant dense<0.000000e+00> : vector<1x96xf32>
    %842 = tpu.matmul %698, %5, %cst_232 {dimension_numbers = #tpu.dot_dimension_numbers<[1], [0], [0], [1], [0, 0, 1, 1], [], []>} : vector<1x32xf32>, vector<32x96xf32>, vector<1x96xf32> -> vector<1x96xf32>
    %843 = arith.addf %842, %7 : vector<1x96xf32>
    %844 = vector.extract_strided_slice %841 {offsets = [0, 0], sizes = [1, 32], strides = [1, 1]} : vector<1x96xf32> to vector<1x32xf32>
    %845 = vector.extract_strided_slice %843 {offsets = [0, 0], sizes = [1, 32], strides = [1, 1]} : vector<1x96xf32> to vector<1x32xf32>
    %846 = arith.addf %844, %845 : vector<1x32xf32>
    %cst_233 = arith.constant 0.000000e+00 : f32
    %847 = vector.broadcast %cst_233 : f32 to vector<1x32xf32>
    %848 = arith.subf %847, %846 : vector<1x32xf32>
    %849 = math.exp %848 : vector<1x32xf32>
    %cst_234 = arith.constant 1.000000e+00 : f32
    %850 = vector.broadcast %cst_234 : f32 to vector<1x32xf32>
    %851 = arith.addf %850, %849 : vector<1x32xf32>
    %852 = tpu.reciprocal %851 {approx = true} : vector<1x32xf32> -> vector<1x32xf32>
    %853 = vector.extract_strided_slice %841 {offsets = [0, 32], sizes = [1, 32], strides = [1, 1]} : vector<1x96xf32> to vector<1x32xf32>
    %854 = vector.extract_strided_slice %843 {offsets = [0, 32], sizes = [1, 32], strides = [1, 1]} : vector<1x96xf32> to vector<1x32xf32>
    %855 = arith.addf %853, %854 : vector<1x32xf32>
    %cst_235 = arith.constant 0.000000e+00 : f32
    %856 = vector.broadcast %cst_235 : f32 to vector<1x32xf32>
    %857 = arith.subf %856, %855 : vector<1x32xf32>
    %858 = math.exp %857 : vector<1x32xf32>
    %cst_236 = arith.constant 1.000000e+00 : f32
    %859 = vector.broadcast %cst_236 : f32 to vector<1x32xf32>
    %860 = arith.addf %859, %858 : vector<1x32xf32>
    %861 = tpu.reciprocal %860 {approx = true} : vector<1x32xf32> -> vector<1x32xf32>
    %862 = vector.extract_strided_slice %841 {offsets = [0, 64], sizes = [1, 32], strides = [1, 1]} : vector<1x96xf32> to vector<1x32xf32>
    %863 = vector.extract_strided_slice %843 {offsets = [0, 64], sizes = [1, 32], strides = [1, 1]} : vector<1x96xf32> to vector<1x32xf32>
    %864 = arith.mulf %852, %863 : vector<1x32xf32>
    %865 = arith.addf %862, %864 : vector<1x32xf32>
    %866 = math.tanh %865 : vector<1x32xf32>
    %cst_237 = arith.constant 1.000000e+00 : f32
    %867 = vector.broadcast %cst_237 : f32 to vector<1x32xf32>
    %868 = arith.subf %867, %861 : vector<1x32xf32>
    %869 = arith.mulf %868, %866 : vector<1x32xf32>
    %870 = arith.mulf %861, %698 : vector<1x32xf32>
    %871 = arith.addf %869, %870 : vector<1x32xf32>
    %cst_238 = arith.constant dense<0.000000e+00> : vector<1x32xf32>
    %872 = tpu.matmul %871, %20, %cst_238 {dimension_numbers = #tpu.dot_dimension_numbers<[1], [0], [0], [1], [0, 0, 1, 1], [], []>} : vector<1x32xf32>, vector<32x32xf32>, vector<1x32xf32> -> vector<1x32xf32>
    %873 = arith.addf %872, %21 : vector<1x32xf32>
    %cst_239 = arith.constant 0.000000e+00 : f32
    %874 = vector.broadcast %cst_239 : f32 to vector<1x32xf32>
    %875 = arith.maximumf %873, %874 : vector<1x32xf32>
    %cst_240 = arith.constant dense<0.000000e+00> : vector<1x32xf32>
    %876 = tpu.matmul %875, %22, %cst_240 {dimension_numbers = #tpu.dot_dimension_numbers<[1], [0], [0], [1], [0, 0, 1, 1], [], []>} : vector<1x32xf32>, vector<32x32xf32>, vector<1x32xf32> -> vector<1x32xf32>
    %877 = arith.addf %876, %23 : vector<1x32xf32>
    %cst_241 = arith.constant 0.000000e+00 : f32
    %878 = vector.broadcast %cst_241 : f32 to vector<1x32xf32>
    %879 = arith.maximumf %877, %878 : vector<1x32xf32>
    %cst_242 = arith.constant dense<0.000000e+00> : vector<1x16xf32>
    %880 = tpu.matmul %879, %24, %cst_242 {dimension_numbers = #tpu.dot_dimension_numbers<[1], [0], [0], [1], [0, 0, 1, 1], [], []>} : vector<1x32xf32>, vector<32x16xf32>, vector<1x16xf32> -> vector<1x16xf32>
    %881 = arith.addf %880, %25 : vector<1x16xf32>
    %882 = vector.extract_strided_slice %881 {offsets = [0, 0], sizes = [1, 8], strides = [1, 1]} : vector<1x16xf32> to vector<1x8xf32>
    %883 = vector.extract_strided_slice %881 {offsets = [0, 8], sizes = [1, 8], strides = [1, 1]} : vector<1x16xf32> to vector<1x8xf32>
    %cst_243 = arith.constant 1.000000e+00 : f32
    %884 = vector.broadcast %cst_243 : f32 to vector<1x8xf32>
    %885 = arith.cmpf ogt, %883, %884 : vector<1x8xf32>
    %cst_244 = arith.constant 1.000000e+00 : f32
    %886 = vector.broadcast %cst_244 : f32 to vector<1x8xf32>
    %887 = arith.minimumf %883, %886 : vector<1x8xf32>
    %888 = math.exp %887 : vector<1x8xf32>
    %cst_245 = arith.constant 1.000000e+00 : f32
    %889 = vector.broadcast %cst_245 : f32 to vector<1x8xf32>
    %890 = arith.addf %889, %888 : vector<1x8xf32>
    %891 = math.log %890 : vector<1x8xf32>
    %892 = arith.select %885, %883, %891 : vector<1x8xi1>, vector<1x8xf32>
    %893 = vector.extract_strided_slice %29 {offsets = [4, 12], sizes = [1, 8], strides = [1, 1]} : vector<8x128xf32> to vector<1x8xf32>
    %cst_246 = arith.constant 5.000000e-01 : f32
    %894 = vector.broadcast %cst_246 : f32 to vector<1x8xf32>
    %895 = arith.mulf %894, %892 : vector<1x8xf32>
    %896 = math.exp %895 : vector<1x8xf32>
    %897 = arith.mulf %893, %896 : vector<1x8xf32>
    %898 = arith.addf %882, %897 : vector<1x8xf32>
    %c4 = arith.constant 4 : index
    %c0_247 = arith.constant 0 : index
    %899 = vector.load %arg2[%c4, %c0_247] : memref<8x128xf32, #tpu.memory_space<vmem>>, vector<1x8xf32>
    tpu.vector_store %arg2[%c4, %c0_247], %898 {strides = array<i32>} : memref<8x128xf32, #tpu.memory_space<vmem>>, vector<1x8xf32>,
    %c4_248 = arith.constant 4 : index
    %c8_249 = arith.constant 8 : index
    %900 = vector.load %arg2[%c4_248, %c8_249] : memref<8x128xf32, #tpu.memory_space<vmem>>, vector<1x4xf32>
    tpu.vector_store %arg2[%c4_248, %c8_249], %831 {strides = array<i32>} : memref<8x128xf32, #tpu.memory_space<vmem>>, vector<1x4xf32>,
    %c4_250 = arith.constant 4 : index
    %c12_251 = arith.constant 12 : index
    %901 = vector.load %arg2[%c4_250, %c12_251] : memref<8x128xf32, #tpu.memory_space<vmem>>, vector<1x4xf32>
    tpu.vector_store %arg2[%c4_250, %c12_251], %771 {strides = array<i32>} : memref<8x128xf32, #tpu.memory_space<vmem>>, vector<1x4xf32>,
    %c4_252 = arith.constant 4 : index
    %c16_253 = arith.constant 16 : index
    %902 = vector.load %arg2[%c4_252, %c16_253] : memref<8x128xf32, #tpu.memory_space<vmem>>, vector<1x4xf32>
    tpu.vector_store %arg2[%c4_252, %c16_253], %781 {strides = array<i32>} : memref<8x128xf32, #tpu.memory_space<vmem>>, vector<1x4xf32>,
    %903 = vector.extract_strided_slice %33 {offsets = [5, 0], sizes = [1, 96], strides = [1, 1]} : vector<8x96xf32> to vector<1x96xf32>
    %cst_254 = arith.constant dense<0.000000e+00> : vector<1x96xf32>
    %904 = tpu.matmul %760, %1, %cst_254 {dimension_numbers = #tpu.dot_dimension_numbers<[1], [0], [0], [1], [0, 0, 1, 1], [], []>} : vector<1x32xf32>, vector<32x96xf32>, vector<1x96xf32> -> vector<1x96xf32>
    %905 = arith.addf %904, %3 : vector<1x96xf32>
    %906 = vector.extract_strided_slice %903 {offsets = [0, 0], sizes = [1, 32], strides = [1, 1]} : vector<1x96xf32> to vector<1x32xf32>
    %907 = vector.extract_strided_slice %905 {offsets = [0, 0], sizes = [1, 32], strides = [1, 1]} : vector<1x96xf32> to vector<1x32xf32>
    %908 = arith.addf %906, %907 : vector<1x32xf32>
    %cst_255 = arith.constant 0.000000e+00 : f32
    %909 = vector.broadcast %cst_255 : f32 to vector<1x32xf32>
    %910 = arith.subf %909, %908 : vector<1x32xf32>
    %911 = math.exp %910 : vector<1x32xf32>
    %cst_256 = arith.constant 1.000000e+00 : f32
    %912 = vector.broadcast %cst_256 : f32 to vector<1x32xf32>
    %913 = arith.addf %912, %911 : vector<1x32xf32>
    %914 = tpu.reciprocal %913 {approx = true} : vector<1x32xf32> -> vector<1x32xf32>
    %915 = vector.extract_strided_slice %903 {offsets = [0, 32], sizes = [1, 32], strides = [1, 1]} : vector<1x96xf32> to vector<1x32xf32>
    %916 = vector.extract_strided_slice %905 {offsets = [0, 32], sizes = [1, 32], strides = [1, 1]} : vector<1x96xf32> to vector<1x32xf32>
    %917 = arith.addf %915, %916 : vector<1x32xf32>
    %cst_257 = arith.constant 0.000000e+00 : f32
    %918 = vector.broadcast %cst_257 : f32 to vector<1x32xf32>
    %919 = arith.subf %918, %917 : vector<1x32xf32>
    %920 = math.exp %919 : vector<1x32xf32>
    %cst_258 = arith.constant 1.000000e+00 : f32
    %921 = vector.broadcast %cst_258 : f32 to vector<1x32xf32>
    %922 = arith.addf %921, %920 : vector<1x32xf32>
    %923 = tpu.reciprocal %922 {approx = true} : vector<1x32xf32> -> vector<1x32xf32>
    %924 = vector.extract_strided_slice %903 {offsets = [0, 64], sizes = [1, 32], strides = [1, 1]} : vector<1x96xf32> to vector<1x32xf32>
    %925 = vector.extract_strided_slice %905 {offsets = [0, 64], sizes = [1, 32], strides = [1, 1]} : vector<1x96xf32> to vector<1x32xf32>
    %926 = arith.mulf %914, %925 : vector<1x32xf32>
    %927 = arith.addf %924, %926 : vector<1x32xf32>
    %928 = math.tanh %927 : vector<1x32xf32>
    %cst_259 = arith.constant 1.000000e+00 : f32
    %929 = vector.broadcast %cst_259 : f32 to vector<1x32xf32>
    %930 = arith.subf %929, %923 : vector<1x32xf32>
    %931 = arith.mulf %930, %928 : vector<1x32xf32>
    %932 = arith.mulf %923, %760 : vector<1x32xf32>
    %933 = arith.addf %931, %932 : vector<1x32xf32>
    %cst_260 = arith.constant dense<0.000000e+00> : vector<1x32xf32>
    %934 = tpu.matmul %933, %8, %cst_260 {dimension_numbers = #tpu.dot_dimension_numbers<[1], [0], [0], [1], [0, 0, 1, 1], [], []>} : vector<1x32xf32>, vector<32x32xf32>, vector<1x32xf32> -> vector<1x32xf32>
    %935 = arith.addf %934, %35 : vector<1x32xf32>
    %cst_261 = arith.constant 0.000000e+00 : f32
    %936 = vector.broadcast %cst_261 : f32 to vector<1x32xf32>
    %937 = arith.maximumf %935, %936 : vector<1x32xf32>
    %cst_262 = arith.constant dense<0.000000e+00> : vector<1x32xf32>
    %938 = tpu.matmul %937, %11, %cst_262 {dimension_numbers = #tpu.dot_dimension_numbers<[1], [0], [0], [1], [0, 0, 1, 1], [], []>} : vector<1x32xf32>, vector<32x32xf32>, vector<1x32xf32> -> vector<1x32xf32>
    %939 = arith.addf %938, %12 : vector<1x32xf32>
    %cst_263 = arith.constant 0.000000e+00 : f32
    %940 = vector.broadcast %cst_263 : f32 to vector<1x32xf32>
    %941 = arith.maximumf %939, %940 : vector<1x32xf32>
    %cst_264 = arith.constant dense<0.000000e+00> : vector<1x8xf32>
    %942 = tpu.matmul %941, %13, %cst_264 {dimension_numbers = #tpu.dot_dimension_numbers<[1], [0], [0], [1], [0, 0, 1, 1], [], []>} : vector<1x32xf32>, vector<32x8xf32>, vector<1x8xf32> -> vector<1x8xf32>
    %943 = arith.addf %942, %14 : vector<1x8xf32>
    %944 = vector.extract_strided_slice %943 {offsets = [0, 0], sizes = [1, 4], strides = [1, 1]} : vector<1x8xf32> to vector<1x4xf32>
    %945 = vector.extract_strided_slice %943 {offsets = [0, 4], sizes = [1, 4], strides = [1, 1]} : vector<1x8xf32> to vector<1x4xf32>
    %cst_265 = arith.constant 1.000000e+00 : f32
    %946 = vector.broadcast %cst_265 : f32 to vector<1x4xf32>
    %947 = arith.cmpf ogt, %945, %946 : vector<1x4xf32>
    %cst_266 = arith.constant 1.000000e+00 : f32
    %948 = vector.broadcast %cst_266 : f32 to vector<1x4xf32>
    %949 = arith.minimumf %945, %948 : vector<1x4xf32>
    %950 = math.exp %949 : vector<1x4xf32>
    %cst_267 = arith.constant 1.000000e+00 : f32
    %951 = vector.broadcast %cst_267 : f32 to vector<1x4xf32>
    %952 = arith.addf %951, %950 : vector<1x4xf32>
    %953 = math.log %952 : vector<1x4xf32>
    %954 = arith.select %947, %945, %953 : vector<1x4xi1>, vector<1x4xf32>
    %955 = vector.extract_strided_slice %29 {offsets = [5, 8], sizes = [1, 4], strides = [1, 1]} : vector<8x128xf32> to vector<1x4xf32>
    %cst_268 = arith.constant 5.000000e-01 : f32
    %956 = vector.broadcast %cst_268 : f32 to vector<1x4xf32>
    %957 = arith.mulf %956, %954 : vector<1x4xf32>
    %958 = math.exp %957 : vector<1x4xf32>
    %959 = arith.mulf %955, %958 : vector<1x4xf32>
    %960 = arith.addf %944, %959 : vector<1x4xf32>
    %961 = vector.extract_strided_slice %16 {offsets = [0, 0], sizes = [1, 4], strides = [1, 1]} : vector<4x4xf32> to vector<1x4xf32>
    %962 = arith.mulf %961, %960 : vector<1x4xf32>
    %cst_269 = arith.constant dense<0.000000e+00> : vector<1xf32>
    %963 = vector.multi_reduction <add>, %962, %cst_269 [1] : vector<1x4xf32> to vector<1xf32>
    %964 = vector.shape_cast %963 : vector<1xf32> to vector<1x1xf32>
    %965 = vector.extract_strided_slice %17 {offsets = [0, 0], sizes = [1, 1], strides = [1, 1]} : vector<1x4xf32> to vector<1x1xf32>
    %966 = arith.addf %964, %965 : vector<1x1xf32>
    %967 = vector.extract_strided_slice %15 {offsets = [0, 0], sizes = [1, 4], strides = [1, 1]} : vector<4x4xf32> to vector<1x4xf32>
    %968 = math.tanh %966 : vector<1x1xf32>
    %969 = vector.broadcast %968 : vector<1x1xf32> to vector<1x4xf32>
    %970 = arith.mulf %967, %969 : vector<1x4xf32>
    %971 = arith.addf %960, %970 : vector<1x4xf32>
    %972 = vector.extract_strided_slice %16 {offsets = [1, 0], sizes = [1, 4], strides = [1, 1]} : vector<4x4xf32> to vector<1x4xf32>
    %973 = arith.mulf %972, %971 : vector<1x4xf32>
    %cst_270 = arith.constant dense<0.000000e+00> : vector<1xf32>
    %974 = vector.multi_reduction <add>, %973, %cst_270 [1] : vector<1x4xf32> to vector<1xf32>
    %975 = vector.shape_cast %974 : vector<1xf32> to vector<1x1xf32>
    %976 = vector.extract_strided_slice %17 {offsets = [0, 1], sizes = [1, 1], strides = [1, 1]} : vector<1x4xf32> to vector<1x1xf32>
    %977 = arith.addf %975, %976 : vector<1x1xf32>
    %978 = vector.extract_strided_slice %15 {offsets = [1, 0], sizes = [1, 4], strides = [1, 1]} : vector<4x4xf32> to vector<1x4xf32>
    %979 = math.tanh %977 : vector<1x1xf32>
    %980 = vector.broadcast %979 : vector<1x1xf32> to vector<1x4xf32>
    %981 = arith.mulf %978, %980 : vector<1x4xf32>
    %982 = arith.addf %971, %981 : vector<1x4xf32>
    %983 = vector.extract_strided_slice %16 {offsets = [2, 0], sizes = [1, 4], strides = [1, 1]} : vector<4x4xf32> to vector<1x4xf32>
    %984 = arith.mulf %983, %982 : vector<1x4xf32>
    %cst_271 = arith.constant dense<0.000000e+00> : vector<1xf32>
    %985 = vector.multi_reduction <add>, %984, %cst_271 [1] : vector<1x4xf32> to vector<1xf32>
    %986 = vector.shape_cast %985 : vector<1xf32> to vector<1x1xf32>
    %987 = vector.extract_strided_slice %17 {offsets = [0, 2], sizes = [1, 1], strides = [1, 1]} : vector<1x4xf32> to vector<1x1xf32>
    %988 = arith.addf %986, %987 : vector<1x1xf32>
    %989 = vector.extract_strided_slice %15 {offsets = [2, 0], sizes = [1, 4], strides = [1, 1]} : vector<4x4xf32> to vector<1x4xf32>
    %990 = math.tanh %988 : vector<1x1xf32>
    %991 = vector.broadcast %990 : vector<1x1xf32> to vector<1x4xf32>
    %992 = arith.mulf %989, %991 : vector<1x4xf32>
    %993 = arith.addf %982, %992 : vector<1x4xf32>
    %994 = vector.extract_strided_slice %16 {offsets = [3, 0], sizes = [1, 4], strides = [1, 1]} : vector<4x4xf32> to vector<1x4xf32>
    %995 = arith.mulf %994, %993 : vector<1x4xf32>
    %cst_272 = arith.constant dense<0.000000e+00> : vector<1xf32>
    %996 = vector.multi_reduction <add>, %995, %cst_272 [1] : vector<1x4xf32> to vector<1xf32>
    %997 = vector.shape_cast %996 : vector<1xf32> to vector<1x1xf32>
    %998 = vector.extract_strided_slice %17 {offsets = [0, 3], sizes = [1, 1], strides = [1, 1]} : vector<1x4xf32> to vector<1x1xf32>
    %999 = arith.addf %997, %998 : vector<1x1xf32>
    %1000 = vector.extract_strided_slice %15 {offsets = [3, 0], sizes = [1, 4], strides = [1, 1]} : vector<4x4xf32> to vector<1x4xf32>
    %1001 = math.tanh %999 : vector<1x1xf32>
    %1002 = vector.broadcast %1001 : vector<1x1xf32> to vector<1x4xf32>
    %1003 = arith.mulf %1000, %1002 : vector<1x4xf32>
    %1004 = arith.addf %993, %1003 : vector<1x4xf32>
    %cst_273 = arith.constant dense<0.000000e+00> : vector<1x4xf32>
    %1005 = tpu.matmul %1004, %18, %cst_273 {dimension_numbers = #tpu.dot_dimension_numbers<[1], [0], [0], [1], [0, 0, 1, 1], [], []>} : vector<1x4xf32>, vector<4x4xf32>, vector<1x4xf32> -> vector<1x4xf32>
    %1006 = vector.extract_strided_slice %29 {offsets = [5, 20], sizes = [1, 1], strides = [1, 1]} : vector<8x128xf32> to vector<1x1xf32>
    %1007 = vector.broadcast %1006 : vector<1x1xf32> to vector<1x4xf32>
    %1008 = arith.addf %1005, %1007 : vector<1x4xf32>
    %cst_274 = arith.constant dense<0.000000e+00> : vector<1x4xf32>
    %1009 = tpu.matmul %1008, %19, %cst_274 {dimension_numbers = #tpu.dot_dimension_numbers<[1], [0], [0], [1], [0, 0, 1, 1], [], []>} : vector<1x4xf32>, vector<4x4xf32>, vector<1x4xf32> -> vector<1x4xf32>
    %1010 = vector.extract_strided_slice %29 {offsets = [5, 21], sizes = [1, 1], strides = [1, 1]} : vector<8x128xf32> to vector<1x1xf32>
    %1011 = vector.broadcast %1010 : vector<1x1xf32> to vector<1x4xf32>
    %1012 = arith.addf %1009, %1011 : vector<1x4xf32>
    %cst_275 = arith.constant dense<0.000000e+00> : vector<1x96xf32>
    %1013 = tpu.matmul %1012, %4, %cst_275 {dimension_numbers = #tpu.dot_dimension_numbers<[1], [0], [0], [1], [0, 0, 1, 1], [], []>} : vector<1x4xf32>, vector<4x96xf32>, vector<1x96xf32> -> vector<1x96xf32>
    %1014 = arith.addf %1013, %6 : vector<1x96xf32>
    %cst_276 = arith.constant dense<0.000000e+00> : vector<1x96xf32>
    %1015 = tpu.matmul %871, %5, %cst_276 {dimension_numbers = #tpu.dot_dimension_numbers<[1], [0], [0], [1], [0, 0, 1, 1], [], []>} : vector<1x32xf32>, vector<32x96xf32>, vector<1x96xf32> -> vector<1x96xf32>
    %1016 = arith.addf %1015, %7 : vector<1x96xf32>
    %1017 = vector.extract_strided_slice %1014 {offsets = [0, 0], sizes = [1, 32], strides = [1, 1]} : vector<1x96xf32> to vector<1x32xf32>
    %1018 = vector.extract_strided_slice %1016 {offsets = [0, 0], sizes = [1, 32], strides = [1, 1]} : vector<1x96xf32> to vector<1x32xf32>
    %1019 = arith.addf %1017, %1018 : vector<1x32xf32>
    %cst_277 = arith.constant 0.000000e+00 : f32
    %1020 = vector.broadcast %cst_277 : f32 to vector<1x32xf32>
    %1021 = arith.subf %1020, %1019 : vector<1x32xf32>
    %1022 = math.exp %1021 : vector<1x32xf32>
    %cst_278 = arith.constant 1.000000e+00 : f32
    %1023 = vector.broadcast %cst_278 : f32 to vector<1x32xf32>
    %1024 = arith.addf %1023, %1022 : vector<1x32xf32>
    %1025 = tpu.reciprocal %1024 {approx = true} : vector<1x32xf32> -> vector<1x32xf32>
    %1026 = vector.extract_strided_slice %1014 {offsets = [0, 32], sizes = [1, 32], strides = [1, 1]} : vector<1x96xf32> to vector<1x32xf32>
    %1027 = vector.extract_strided_slice %1016 {offsets = [0, 32], sizes = [1, 32], strides = [1, 1]} : vector<1x96xf32> to vector<1x32xf32>
    %1028 = arith.addf %1026, %1027 : vector<1x32xf32>
    %cst_279 = arith.constant 0.000000e+00 : f32
    %1029 = vector.broadcast %cst_279 : f32 to vector<1x32xf32>
    %1030 = arith.subf %1029, %1028 : vector<1x32xf32>
    %1031 = math.exp %1030 : vector<1x32xf32>
    %cst_280 = arith.constant 1.000000e+00 : f32
    %1032 = vector.broadcast %cst_280 : f32 to vector<1x32xf32>
    %1033 = arith.addf %1032, %1031 : vector<1x32xf32>
    %1034 = tpu.reciprocal %1033 {approx = true} : vector<1x32xf32> -> vector<1x32xf32>
    %1035 = vector.extract_strided_slice %1014 {offsets = [0, 64], sizes = [1, 32], strides = [1, 1]} : vector<1x96xf32> to vector<1x32xf32>
    %1036 = vector.extract_strided_slice %1016 {offsets = [0, 64], sizes = [1, 32], strides = [1, 1]} : vector<1x96xf32> to vector<1x32xf32>
    %1037 = arith.mulf %1025, %1036 : vector<1x32xf32>
    %1038 = arith.addf %1035, %1037 : vector<1x32xf32>
    %1039 = math.tanh %1038 : vector<1x32xf32>
    %cst_281 = arith.constant 1.000000e+00 : f32
    %1040 = vector.broadcast %cst_281 : f32 to vector<1x32xf32>
    %1041 = arith.subf %1040, %1034 : vector<1x32xf32>
    %1042 = arith.mulf %1041, %1039 : vector<1x32xf32>
    %1043 = arith.mulf %1034, %871 : vector<1x32xf32>
    %1044 = arith.addf %1042, %1043 : vector<1x32xf32>
    %cst_282 = arith.constant dense<0.000000e+00> : vector<1x32xf32>
    %1045 = tpu.matmul %1044, %20, %cst_282 {dimension_numbers = #tpu.dot_dimension_numbers<[1], [0], [0], [1], [0, 0, 1, 1], [], []>} : vector<1x32xf32>, vector<32x32xf32>, vector<1x32xf32> -> vector<1x32xf32>
    %1046 = arith.addf %1045, %21 : vector<1x32xf32>
    %cst_283 = arith.constant 0.000000e+00 : f32
    %1047 = vector.broadcast %cst_283 : f32 to vector<1x32xf32>
    %1048 = arith.maximumf %1046, %1047 : vector<1x32xf32>
    %cst_284 = arith.constant dense<0.000000e+00> : vector<1x32xf32>
    %1049 = tpu.matmul %1048, %22, %cst_284 {dimension_numbers = #tpu.dot_dimension_numbers<[1], [0], [0], [1], [0, 0, 1, 1], [], []>} : vector<1x32xf32>, vector<32x32xf32>, vector<1x32xf32> -> vector<1x32xf32>
    %1050 = arith.addf %1049, %23 : vector<1x32xf32>
    %cst_285 = arith.constant 0.000000e+00 : f32
    %1051 = vector.broadcast %cst_285 : f32 to vector<1x32xf32>
    %1052 = arith.maximumf %1050, %1051 : vector<1x32xf32>
    %cst_286 = arith.constant dense<0.000000e+00> : vector<1x16xf32>
    %1053 = tpu.matmul %1052, %24, %cst_286 {dimension_numbers = #tpu.dot_dimension_numbers<[1], [0], [0], [1], [0, 0, 1, 1], [], []>} : vector<1x32xf32>, vector<32x16xf32>, vector<1x16xf32> -> vector<1x16xf32>
    %1054 = arith.addf %1053, %25 : vector<1x16xf32>
    %1055 = vector.extract_strided_slice %1054 {offsets = [0, 0], sizes = [1, 8], strides = [1, 1]} : vector<1x16xf32> to vector<1x8xf32>
    %1056 = vector.extract_strided_slice %1054 {offsets = [0, 8], sizes = [1, 8], strides = [1, 1]} : vector<1x16xf32> to vector<1x8xf32>
    %cst_287 = arith.constant 1.000000e+00 : f32
    %1057 = vector.broadcast %cst_287 : f32 to vector<1x8xf32>
    %1058 = arith.cmpf ogt, %1056, %1057 : vector<1x8xf32>
    %cst_288 = arith.constant 1.000000e+00 : f32
    %1059 = vector.broadcast %cst_288 : f32 to vector<1x8xf32>
    %1060 = arith.minimumf %1056, %1059 : vector<1x8xf32>
    %1061 = math.exp %1060 : vector<1x8xf32>
    %cst_289 = arith.constant 1.000000e+00 : f32
    %1062 = vector.broadcast %cst_289 : f32 to vector<1x8xf32>
    %1063 = arith.addf %1062, %1061 : vector<1x8xf32>
    %1064 = math.log %1063 : vector<1x8xf32>
    %1065 = arith.select %1058, %1056, %1064 : vector<1x8xi1>, vector<1x8xf32>
    %1066 = vector.extract_strided_slice %29 {offsets = [5, 12], sizes = [1, 8], strides = [1, 1]} : vector<8x128xf32> to vector<1x8xf32>
    %cst_290 = arith.constant 5.000000e-01 : f32
    %1067 = vector.broadcast %cst_290 : f32 to vector<1x8xf32>
    %1068 = arith.mulf %1067, %1065 : vector<1x8xf32>
    %1069 = math.exp %1068 : vector<1x8xf32>
    %1070 = arith.mulf %1066, %1069 : vector<1x8xf32>
    %1071 = arith.addf %1055, %1070 : vector<1x8xf32>
    %c5 = arith.constant 5 : index
    %c0_291 = arith.constant 0 : index
    %1072 = vector.load %arg2[%c5, %c0_291] : memref<8x128xf32, #tpu.memory_space<vmem>>, vector<1x8xf32>
    tpu.vector_store %arg2[%c5, %c0_291], %1071 {strides = array<i32>} : memref<8x128xf32, #tpu.memory_space<vmem>>, vector<1x8xf32>,
    %c5_292 = arith.constant 5 : index
    %c8_293 = arith.constant 8 : index
    %1073 = vector.load %arg2[%c5_292, %c8_293] : memref<8x128xf32, #tpu.memory_space<vmem>>, vector<1x4xf32>
    tpu.vector_store %arg2[%c5_292, %c8_293], %1004 {strides = array<i32>} : memref<8x128xf32, #tpu.memory_space<vmem>>, vector<1x4xf32>,
    %c5_294 = arith.constant 5 : index
    %c12_295 = arith.constant 12 : index
    %1074 = vector.load %arg2[%c5_294, %c12_295] : memref<8x128xf32, #tpu.memory_space<vmem>>, vector<1x4xf32>
    tpu.vector_store %arg2[%c5_294, %c12_295], %944 {strides = array<i32>} : memref<8x128xf32, #tpu.memory_space<vmem>>, vector<1x4xf32>,
    %c5_296 = arith.constant 5 : index
    %c16_297 = arith.constant 16 : index
    %1075 = vector.load %arg2[%c5_296, %c16_297] : memref<8x128xf32, #tpu.memory_space<vmem>>, vector<1x4xf32>
    tpu.vector_store %arg2[%c5_296, %c16_297], %954 {strides = array<i32>} : memref<8x128xf32, #tpu.memory_space<vmem>>, vector<1x4xf32>,
    %1076 = vector.extract_strided_slice %33 {offsets = [6, 0], sizes = [1, 96], strides = [1, 1]} : vector<8x96xf32> to vector<1x96xf32>
    %cst_298 = arith.constant dense<0.000000e+00> : vector<1x96xf32>
    %1077 = tpu.matmul %933, %1, %cst_298 {dimension_numbers = #tpu.dot_dimension_numbers<[1], [0], [0], [1], [0, 0, 1, 1], [], []>} : vector<1x32xf32>, vector<32x96xf32>, vector<1x96xf32> -> vector<1x96xf32>
    %1078 = arith.addf %1077, %3 : vector<1x96xf32>
    %1079 = vector.extract_strided_slice %1076 {offsets = [0, 0], sizes = [1, 32], strides = [1, 1]} : vector<1x96xf32> to vector<1x32xf32>
    %1080 = vector.extract_strided_slice %1078 {offsets = [0, 0], sizes = [1, 32], strides = [1, 1]} : vector<1x96xf32> to vector<1x32xf32>
    %1081 = arith.addf %1079, %1080 : vector<1x32xf32>
    %cst_299 = arith.constant 0.000000e+00 : f32
    %1082 = vector.broadcast %cst_299 : f32 to vector<1x32xf32>
    %1083 = arith.subf %1082, %1081 : vector<1x32xf32>
    %1084 = math.exp %1083 : vector<1x32xf32>
    %cst_300 = arith.constant 1.000000e+00 : f32
    %1085 = vector.broadcast %cst_300 : f32 to vector<1x32xf32>
    %1086 = arith.addf %1085, %1084 : vector<1x32xf32>
    %1087 = tpu.reciprocal %1086 {approx = true} : vector<1x32xf32> -> vector<1x32xf32>
    %1088 = vector.extract_strided_slice %1076 {offsets = [0, 32], sizes = [1, 32], strides = [1, 1]} : vector<1x96xf32> to vector<1x32xf32>
    %1089 = vector.extract_strided_slice %1078 {offsets = [0, 32], sizes = [1, 32], strides = [1, 1]} : vector<1x96xf32> to vector<1x32xf32>
    %1090 = arith.addf %1088, %1089 : vector<1x32xf32>
    %cst_301 = arith.constant 0.000000e+00 : f32
    %1091 = vector.broadcast %cst_301 : f32 to vector<1x32xf32>
    %1092 = arith.subf %1091, %1090 : vector<1x32xf32>
    %1093 = math.exp %1092 : vector<1x32xf32>
    %cst_302 = arith.constant 1.000000e+00 : f32
    %1094 = vector.broadcast %cst_302 : f32 to vector<1x32xf32>
    %1095 = arith.addf %1094, %1093 : vector<1x32xf32>
    %1096 = tpu.reciprocal %1095 {approx = true} : vector<1x32xf32> -> vector<1x32xf32>
    %1097 = vector.extract_strided_slice %1076 {offsets = [0, 64], sizes = [1, 32], strides = [1, 1]} : vector<1x96xf32> to vector<1x32xf32>
    %1098 = vector.extract_strided_slice %1078 {offsets = [0, 64], sizes = [1, 32], strides = [1, 1]} : vector<1x96xf32> to vector<1x32xf32>
    %1099 = arith.mulf %1087, %1098 : vector<1x32xf32>
    %1100 = arith.addf %1097, %1099 : vector<1x32xf32>
    %1101 = math.tanh %1100 : vector<1x32xf32>
    %cst_303 = arith.constant 1.000000e+00 : f32
    %1102 = vector.broadcast %cst_303 : f32 to vector<1x32xf32>
    %1103 = arith.subf %1102, %1096 : vector<1x32xf32>
    %1104 = arith.mulf %1103, %1101 : vector<1x32xf32>
    %1105 = arith.mulf %1096, %933 : vector<1x32xf32>
    %1106 = arith.addf %1104, %1105 : vector<1x32xf32>
    %cst_304 = arith.constant dense<0.000000e+00> : vector<1x32xf32>
    %1107 = tpu.matmul %1106, %8, %cst_304 {dimension_numbers = #tpu.dot_dimension_numbers<[1], [0], [0], [1], [0, 0, 1, 1], [], []>} : vector<1x32xf32>, vector<32x32xf32>, vector<1x32xf32> -> vector<1x32xf32>
    %1108 = arith.addf %1107, %35 : vector<1x32xf32>
    %cst_305 = arith.constant 0.000000e+00 : f32
    %1109 = vector.broadcast %cst_305 : f32 to vector<1x32xf32>
    %1110 = arith.maximumf %1108, %1109 : vector<1x32xf32>
    %cst_306 = arith.constant dense<0.000000e+00> : vector<1x32xf32>
    %1111 = tpu.matmul %1110, %11, %cst_306 {dimension_numbers = #tpu.dot_dimension_numbers<[1], [0], [0], [1], [0, 0, 1, 1], [], []>} : vector<1x32xf32>, vector<32x32xf32>, vector<1x32xf32> -> vector<1x32xf32>
    %1112 = arith.addf %1111, %12 : vector<1x32xf32>
    %cst_307 = arith.constant 0.000000e+00 : f32
    %1113 = vector.broadcast %cst_307 : f32 to vector<1x32xf32>
    %1114 = arith.maximumf %1112, %1113 : vector<1x32xf32>
    %cst_308 = arith.constant dense<0.000000e+00> : vector<1x8xf32>
    %1115 = tpu.matmul %1114, %13, %cst_308 {dimension_numbers = #tpu.dot_dimension_numbers<[1], [0], [0], [1], [0, 0, 1, 1], [], []>} : vector<1x32xf32>, vector<32x8xf32>, vector<1x8xf32> -> vector<1x8xf32>
    %1116 = arith.addf %1115, %14 : vector<1x8xf32>
    %1117 = vector.extract_strided_slice %1116 {offsets = [0, 0], sizes = [1, 4], strides = [1, 1]} : vector<1x8xf32> to vector<1x4xf32>
    %1118 = vector.extract_strided_slice %1116 {offsets = [0, 4], sizes = [1, 4], strides = [1, 1]} : vector<1x8xf32> to vector<1x4xf32>
    %cst_309 = arith.constant 1.000000e+00 : f32
    %1119 = vector.broadcast %cst_309 : f32 to vector<1x4xf32>
    %1120 = arith.cmpf ogt, %1118, %1119 : vector<1x4xf32>
    %cst_310 = arith.constant 1.000000e+00 : f32
    %1121 = vector.broadcast %cst_310 : f32 to vector<1x4xf32>
    %1122 = arith.minimumf %1118, %1121 : vector<1x4xf32>
    %1123 = math.exp %1122 : vector<1x4xf32>
    %cst_311 = arith.constant 1.000000e+00 : f32
    %1124 = vector.broadcast %cst_311 : f32 to vector<1x4xf32>
    %1125 = arith.addf %1124, %1123 : vector<1x4xf32>
    %1126 = math.log %1125 : vector<1x4xf32>
    %1127 = arith.select %1120, %1118, %1126 : vector<1x4xi1>, vector<1x4xf32>
    %1128 = vector.extract_strided_slice %29 {offsets = [6, 8], sizes = [1, 4], strides = [1, 1]} : vector<8x128xf32> to vector<1x4xf32>
    %cst_312 = arith.constant 5.000000e-01 : f32
    %1129 = vector.broadcast %cst_312 : f32 to vector<1x4xf32>
    %1130 = arith.mulf %1129, %1127 : vector<1x4xf32>
    %1131 = math.exp %1130 : vector<1x4xf32>
    %1132 = arith.mulf %1128, %1131 : vector<1x4xf32>
    %1133 = arith.addf %1117, %1132 : vector<1x4xf32>
    %1134 = vector.extract_strided_slice %16 {offsets = [0, 0], sizes = [1, 4], strides = [1, 1]} : vector<4x4xf32> to vector<1x4xf32>
    %1135 = arith.mulf %1134, %1133 : vector<1x4xf32>
    %cst_313 = arith.constant dense<0.000000e+00> : vector<1xf32>
    %1136 = vector.multi_reduction <add>, %1135, %cst_313 [1] : vector<1x4xf32> to vector<1xf32>
    %1137 = vector.shape_cast %1136 : vector<1xf32> to vector<1x1xf32>
    %1138 = vector.extract_strided_slice %17 {offsets = [0, 0], sizes = [1, 1], strides = [1, 1]} : vector<1x4xf32> to vector<1x1xf32>
    %1139 = arith.addf %1137, %1138 : vector<1x1xf32>
    %1140 = vector.extract_strided_slice %15 {offsets = [0, 0], sizes = [1, 4], strides = [1, 1]} : vector<4x4xf32> to vector<1x4xf32>
    %1141 = math.tanh %1139 : vector<1x1xf32>
    %1142 = vector.broadcast %1141 : vector<1x1xf32> to vector<1x4xf32>
    %1143 = arith.mulf %1140, %1142 : vector<1x4xf32>
    %1144 = arith.addf %1133, %1143 : vector<1x4xf32>
    %1145 = vector.extract_strided_slice %16 {offsets = [1, 0], sizes = [1, 4], strides = [1, 1]} : vector<4x4xf32> to vector<1x4xf32>
    %1146 = arith.mulf %1145, %1144 : vector<1x4xf32>
    %cst_314 = arith.constant dense<0.000000e+00> : vector<1xf32>
    %1147 = vector.multi_reduction <add>, %1146, %cst_314 [1] : vector<1x4xf32> to vector<1xf32>
    %1148 = vector.shape_cast %1147 : vector<1xf32> to vector<1x1xf32>
    %1149 = vector.extract_strided_slice %17 {offsets = [0, 1], sizes = [1, 1], strides = [1, 1]} : vector<1x4xf32> to vector<1x1xf32>
    %1150 = arith.addf %1148, %1149 : vector<1x1xf32>
    %1151 = vector.extract_strided_slice %15 {offsets = [1, 0], sizes = [1, 4], strides = [1, 1]} : vector<4x4xf32> to vector<1x4xf32>
    %1152 = math.tanh %1150 : vector<1x1xf32>
    %1153 = vector.broadcast %1152 : vector<1x1xf32> to vector<1x4xf32>
    %1154 = arith.mulf %1151, %1153 : vector<1x4xf32>
    %1155 = arith.addf %1144, %1154 : vector<1x4xf32>
    %1156 = vector.extract_strided_slice %16 {offsets = [2, 0], sizes = [1, 4], strides = [1, 1]} : vector<4x4xf32> to vector<1x4xf32>
    %1157 = arith.mulf %1156, %1155 : vector<1x4xf32>
    %cst_315 = arith.constant dense<0.000000e+00> : vector<1xf32>
    %1158 = vector.multi_reduction <add>, %1157, %cst_315 [1] : vector<1x4xf32> to vector<1xf32>
    %1159 = vector.shape_cast %1158 : vector<1xf32> to vector<1x1xf32>
    %1160 = vector.extract_strided_slice %17 {offsets = [0, 2], sizes = [1, 1], strides = [1, 1]} : vector<1x4xf32> to vector<1x1xf32>
    %1161 = arith.addf %1159, %1160 : vector<1x1xf32>
    %1162 = vector.extract_strided_slice %15 {offsets = [2, 0], sizes = [1, 4], strides = [1, 1]} : vector<4x4xf32> to vector<1x4xf32>
    %1163 = math.tanh %1161 : vector<1x1xf32>
    %1164 = vector.broadcast %1163 : vector<1x1xf32> to vector<1x4xf32>
    %1165 = arith.mulf %1162, %1164 : vector<1x4xf32>
    %1166 = arith.addf %1155, %1165 : vector<1x4xf32>
    %1167 = vector.extract_strided_slice %16 {offsets = [3, 0], sizes = [1, 4], strides = [1, 1]} : vector<4x4xf32> to vector<1x4xf32>
    %1168 = arith.mulf %1167, %1166 : vector<1x4xf32>
    %cst_316 = arith.constant dense<0.000000e+00> : vector<1xf32>
    %1169 = vector.multi_reduction <add>, %1168, %cst_316 [1] : vector<1x4xf32> to vector<1xf32>
    %1170 = vector.shape_cast %1169 : vector<1xf32> to vector<1x1xf32>
    %1171 = vector.extract_strided_slice %17 {offsets = [0, 3], sizes = [1, 1], strides = [1, 1]} : vector<1x4xf32> to vector<1x1xf32>
    %1172 = arith.addf %1170, %1171 : vector<1x1xf32>
    %1173 = vector.extract_strided_slice %15 {offsets = [3, 0], sizes = [1, 4], strides = [1, 1]} : vector<4x4xf32> to vector<1x4xf32>
    %1174 = math.tanh %1172 : vector<1x1xf32>
    %1175 = vector.broadcast %1174 : vector<1x1xf32> to vector<1x4xf32>
    %1176 = arith.mulf %1173, %1175 : vector<1x4xf32>
    %1177 = arith.addf %1166, %1176 : vector<1x4xf32>
    %cst_317 = arith.constant dense<0.000000e+00> : vector<1x4xf32>
    %1178 = tpu.matmul %1177, %18, %cst_317 {dimension_numbers = #tpu.dot_dimension_numbers<[1], [0], [0], [1], [0, 0, 1, 1], [], []>} : vector<1x4xf32>, vector<4x4xf32>, vector<1x4xf32> -> vector<1x4xf32>
    %1179 = vector.extract_strided_slice %29 {offsets = [6, 20], sizes = [1, 1], strides = [1, 1]} : vector<8x128xf32> to vector<1x1xf32>
    %1180 = vector.broadcast %1179 : vector<1x1xf32> to vector<1x4xf32>
    %1181 = arith.addf %1178, %1180 : vector<1x4xf32>
    %cst_318 = arith.constant dense<0.000000e+00> : vector<1x4xf32>
    %1182 = tpu.matmul %1181, %19, %cst_318 {dimension_numbers = #tpu.dot_dimension_numbers<[1], [0], [0], [1], [0, 0, 1, 1], [], []>} : vector<1x4xf32>, vector<4x4xf32>, vector<1x4xf32> -> vector<1x4xf32>
    %1183 = vector.extract_strided_slice %29 {offsets = [6, 21], sizes = [1, 1], strides = [1, 1]} : vector<8x128xf32> to vector<1x1xf32>
    %1184 = vector.broadcast %1183 : vector<1x1xf32> to vector<1x4xf32>
    %1185 = arith.addf %1182, %1184 : vector<1x4xf32>
    %cst_319 = arith.constant dense<0.000000e+00> : vector<1x96xf32>
    %1186 = tpu.matmul %1185, %4, %cst_319 {dimension_numbers = #tpu.dot_dimension_numbers<[1], [0], [0], [1], [0, 0, 1, 1], [], []>} : vector<1x4xf32>, vector<4x96xf32>, vector<1x96xf32> -> vector<1x96xf32>
    %1187 = arith.addf %1186, %6 : vector<1x96xf32>
    %cst_320 = arith.constant dense<0.000000e+00> : vector<1x96xf32>
    %1188 = tpu.matmul %1044, %5, %cst_320 {dimension_numbers = #tpu.dot_dimension_numbers<[1], [0], [0], [1], [0, 0, 1, 1], [], []>} : vector<1x32xf32>, vector<32x96xf32>, vector<1x96xf32> -> vector<1x96xf32>
    %1189 = arith.addf %1188, %7 : vector<1x96xf32>
    %1190 = vector.extract_strided_slice %1187 {offsets = [0, 0], sizes = [1, 32], strides = [1, 1]} : vector<1x96xf32> to vector<1x32xf32>
    %1191 = vector.extract_strided_slice %1189 {offsets = [0, 0], sizes = [1, 32], strides = [1, 1]} : vector<1x96xf32> to vector<1x32xf32>
    %1192 = arith.addf %1190, %1191 : vector<1x32xf32>
    %cst_321 = arith.constant 0.000000e+00 : f32
    %1193 = vector.broadcast %cst_321 : f32 to vector<1x32xf32>
    %1194 = arith.subf %1193, %1192 : vector<1x32xf32>
    %1195 = math.exp %1194 : vector<1x32xf32>
    %cst_322 = arith.constant 1.000000e+00 : f32
    %1196 = vector.broadcast %cst_322 : f32 to vector<1x32xf32>
    %1197 = arith.addf %1196, %1195 : vector<1x32xf32>
    %1198 = tpu.reciprocal %1197 {approx = true} : vector<1x32xf32> -> vector<1x32xf32>
    %1199 = vector.extract_strided_slice %1187 {offsets = [0, 32], sizes = [1, 32], strides = [1, 1]} : vector<1x96xf32> to vector<1x32xf32>
    %1200 = vector.extract_strided_slice %1189 {offsets = [0, 32], sizes = [1, 32], strides = [1, 1]} : vector<1x96xf32> to vector<1x32xf32>
    %1201 = arith.addf %1199, %1200 : vector<1x32xf32>
    %cst_323 = arith.constant 0.000000e+00 : f32
    %1202 = vector.broadcast %cst_323 : f32 to vector<1x32xf32>
    %1203 = arith.subf %1202, %1201 : vector<1x32xf32>
    %1204 = math.exp %1203 : vector<1x32xf32>
    %cst_324 = arith.constant 1.000000e+00 : f32
    %1205 = vector.broadcast %cst_324 : f32 to vector<1x32xf32>
    %1206 = arith.addf %1205, %1204 : vector<1x32xf32>
    %1207 = tpu.reciprocal %1206 {approx = true} : vector<1x32xf32> -> vector<1x32xf32>
    %1208 = vector.extract_strided_slice %1187 {offsets = [0, 64], sizes = [1, 32], strides = [1, 1]} : vector<1x96xf32> to vector<1x32xf32>
    %1209 = vector.extract_strided_slice %1189 {offsets = [0, 64], sizes = [1, 32], strides = [1, 1]} : vector<1x96xf32> to vector<1x32xf32>
    %1210 = arith.mulf %1198, %1209 : vector<1x32xf32>
    %1211 = arith.addf %1208, %1210 : vector<1x32xf32>
    %1212 = math.tanh %1211 : vector<1x32xf32>
    %cst_325 = arith.constant 1.000000e+00 : f32
    %1213 = vector.broadcast %cst_325 : f32 to vector<1x32xf32>
    %1214 = arith.subf %1213, %1207 : vector<1x32xf32>
    %1215 = arith.mulf %1214, %1212 : vector<1x32xf32>
    %1216 = arith.mulf %1207, %1044 : vector<1x32xf32>
    %1217 = arith.addf %1215, %1216 : vector<1x32xf32>
    %cst_326 = arith.constant dense<0.000000e+00> : vector<1x32xf32>
    %1218 = tpu.matmul %1217, %20, %cst_326 {dimension_numbers = #tpu.dot_dimension_numbers<[1], [0], [0], [1], [0, 0, 1, 1], [], []>} : vector<1x32xf32>, vector<32x32xf32>, vector<1x32xf32> -> vector<1x32xf32>
    %1219 = arith.addf %1218, %21 : vector<1x32xf32>
    %cst_327 = arith.constant 0.000000e+00 : f32
    %1220 = vector.broadcast %cst_327 : f32 to vector<1x32xf32>
    %1221 = arith.maximumf %1219, %1220 : vector<1x32xf32>
    %cst_328 = arith.constant dense<0.000000e+00> : vector<1x32xf32>
    %1222 = tpu.matmul %1221, %22, %cst_328 {dimension_numbers = #tpu.dot_dimension_numbers<[1], [0], [0], [1], [0, 0, 1, 1], [], []>} : vector<1x32xf32>, vector<32x32xf32>, vector<1x32xf32> -> vector<1x32xf32>
    %1223 = arith.addf %1222, %23 : vector<1x32xf32>
    %cst_329 = arith.constant 0.000000e+00 : f32
    %1224 = vector.broadcast %cst_329 : f32 to vector<1x32xf32>
    %1225 = arith.maximumf %1223, %1224 : vector<1x32xf32>
    %cst_330 = arith.constant dense<0.000000e+00> : vector<1x16xf32>
    %1226 = tpu.matmul %1225, %24, %cst_330 {dimension_numbers = #tpu.dot_dimension_numbers<[1], [0], [0], [1], [0, 0, 1, 1], [], []>} : vector<1x32xf32>, vector<32x16xf32>, vector<1x16xf32> -> vector<1x16xf32>
    %1227 = arith.addf %1226, %25 : vector<1x16xf32>
    %1228 = vector.extract_strided_slice %1227 {offsets = [0, 0], sizes = [1, 8], strides = [1, 1]} : vector<1x16xf32> to vector<1x8xf32>
    %1229 = vector.extract_strided_slice %1227 {offsets = [0, 8], sizes = [1, 8], strides = [1, 1]} : vector<1x16xf32> to vector<1x8xf32>
    %cst_331 = arith.constant 1.000000e+00 : f32
    %1230 = vector.broadcast %cst_331 : f32 to vector<1x8xf32>
    %1231 = arith.cmpf ogt, %1229, %1230 : vector<1x8xf32>
    %cst_332 = arith.constant 1.000000e+00 : f32
    %1232 = vector.broadcast %cst_332 : f32 to vector<1x8xf32>
    %1233 = arith.minimumf %1229, %1232 : vector<1x8xf32>
    %1234 = math.exp %1233 : vector<1x8xf32>
    %cst_333 = arith.constant 1.000000e+00 : f32
    %1235 = vector.broadcast %cst_333 : f32 to vector<1x8xf32>
    %1236 = arith.addf %1235, %1234 : vector<1x8xf32>
    %1237 = math.log %1236 : vector<1x8xf32>
    %1238 = arith.select %1231, %1229, %1237 : vector<1x8xi1>, vector<1x8xf32>
    %1239 = vector.extract_strided_slice %29 {offsets = [6, 12], sizes = [1, 8], strides = [1, 1]} : vector<8x128xf32> to vector<1x8xf32>
    %cst_334 = arith.constant 5.000000e-01 : f32
    %1240 = vector.broadcast %cst_334 : f32 to vector<1x8xf32>
    %1241 = arith.mulf %1240, %1238 : vector<1x8xf32>
    %1242 = math.exp %1241 : vector<1x8xf32>
    %1243 = arith.mulf %1239, %1242 : vector<1x8xf32>
    %1244 = arith.addf %1228, %1243 : vector<1x8xf32>
    %c6 = arith.constant 6 : index
    %c0_335 = arith.constant 0 : index
    %1245 = vector.load %arg2[%c6, %c0_335] : memref<8x128xf32, #tpu.memory_space<vmem>>, vector<1x8xf32>
    tpu.vector_store %arg2[%c6, %c0_335], %1244 {strides = array<i32>} : memref<8x128xf32, #tpu.memory_space<vmem>>, vector<1x8xf32>,
    %c6_336 = arith.constant 6 : index
    %c8_337 = arith.constant 8 : index
    %1246 = vector.load %arg2[%c6_336, %c8_337] : memref<8x128xf32, #tpu.memory_space<vmem>>, vector<1x4xf32>
    tpu.vector_store %arg2[%c6_336, %c8_337], %1177 {strides = array<i32>} : memref<8x128xf32, #tpu.memory_space<vmem>>, vector<1x4xf32>,
    %c6_338 = arith.constant 6 : index
    %c12_339 = arith.constant 12 : index
    %1247 = vector.load %arg2[%c6_338, %c12_339] : memref<8x128xf32, #tpu.memory_space<vmem>>, vector<1x4xf32>
    tpu.vector_store %arg2[%c6_338, %c12_339], %1117 {strides = array<i32>} : memref<8x128xf32, #tpu.memory_space<vmem>>, vector<1x4xf32>,
    %c6_340 = arith.constant 6 : index
    %c16_341 = arith.constant 16 : index
    %1248 = vector.load %arg2[%c6_340, %c16_341] : memref<8x128xf32, #tpu.memory_space<vmem>>, vector<1x4xf32>
    tpu.vector_store %arg2[%c6_340, %c16_341], %1127 {strides = array<i32>} : memref<8x128xf32, #tpu.memory_space<vmem>>, vector<1x4xf32>,
    %1249 = vector.extract_strided_slice %33 {offsets = [7, 0], sizes = [1, 96], strides = [1, 1]} : vector<8x96xf32> to vector<1x96xf32>
    %cst_342 = arith.constant dense<0.000000e+00> : vector<1x96xf32>
    %1250 = tpu.matmul %1106, %1, %cst_342 {dimension_numbers = #tpu.dot_dimension_numbers<[1], [0], [0], [1], [0, 0, 1, 1], [], []>} : vector<1x32xf32>, vector<32x96xf32>, vector<1x96xf32> -> vector<1x96xf32>
    %1251 = arith.addf %1250, %3 : vector<1x96xf32>
    %1252 = vector.extract_strided_slice %1249 {offsets = [0, 0], sizes = [1, 32], strides = [1, 1]} : vector<1x96xf32> to vector<1x32xf32>
    %1253 = vector.extract_strided_slice %1251 {offsets = [0, 0], sizes = [1, 32], strides = [1, 1]} : vector<1x96xf32> to vector<1x32xf32>
    %1254 = arith.addf %1252, %1253 : vector<1x32xf32>
    %cst_343 = arith.constant 0.000000e+00 : f32
    %1255 = vector.broadcast %cst_343 : f32 to vector<1x32xf32>
    %1256 = arith.subf %1255, %1254 : vector<1x32xf32>
    %1257 = math.exp %1256 : vector<1x32xf32>
    %cst_344 = arith.constant 1.000000e+00 : f32
    %1258 = vector.broadcast %cst_344 : f32 to vector<1x32xf32>
    %1259 = arith.addf %1258, %1257 : vector<1x32xf32>
    %1260 = tpu.reciprocal %1259 {approx = true} : vector<1x32xf32> -> vector<1x32xf32>
    %1261 = vector.extract_strided_slice %1249 {offsets = [0, 32], sizes = [1, 32], strides = [1, 1]} : vector<1x96xf32> to vector<1x32xf32>
    %1262 = vector.extract_strided_slice %1251 {offsets = [0, 32], sizes = [1, 32], strides = [1, 1]} : vector<1x96xf32> to vector<1x32xf32>
    %1263 = arith.addf %1261, %1262 : vector<1x32xf32>
    %cst_345 = arith.constant 0.000000e+00 : f32
    %1264 = vector.broadcast %cst_345 : f32 to vector<1x32xf32>
    %1265 = arith.subf %1264, %1263 : vector<1x32xf32>
    %1266 = math.exp %1265 : vector<1x32xf32>
    %cst_346 = arith.constant 1.000000e+00 : f32
    %1267 = vector.broadcast %cst_346 : f32 to vector<1x32xf32>
    %1268 = arith.addf %1267, %1266 : vector<1x32xf32>
    %1269 = tpu.reciprocal %1268 {approx = true} : vector<1x32xf32> -> vector<1x32xf32>
    %1270 = vector.extract_strided_slice %1249 {offsets = [0, 64], sizes = [1, 32], strides = [1, 1]} : vector<1x96xf32> to vector<1x32xf32>
    %1271 = vector.extract_strided_slice %1251 {offsets = [0, 64], sizes = [1, 32], strides = [1, 1]} : vector<1x96xf32> to vector<1x32xf32>
    %1272 = arith.mulf %1260, %1271 : vector<1x32xf32>
    %1273 = arith.addf %1270, %1272 : vector<1x32xf32>
    %1274 = math.tanh %1273 : vector<1x32xf32>
    %cst_347 = arith.constant 1.000000e+00 : f32
    %1275 = vector.broadcast %cst_347 : f32 to vector<1x32xf32>
    %1276 = arith.subf %1275, %1269 : vector<1x32xf32>
    %1277 = arith.mulf %1276, %1274 : vector<1x32xf32>
    %1278 = arith.mulf %1269, %1106 : vector<1x32xf32>
    %1279 = arith.addf %1277, %1278 : vector<1x32xf32>
    %cst_348 = arith.constant dense<0.000000e+00> : vector<1x32xf32>
    %1280 = tpu.matmul %1279, %8, %cst_348 {dimension_numbers = #tpu.dot_dimension_numbers<[1], [0], [0], [1], [0, 0, 1, 1], [], []>} : vector<1x32xf32>, vector<32x32xf32>, vector<1x32xf32> -> vector<1x32xf32>
    %1281 = arith.addf %1280, %35 : vector<1x32xf32>
    %cst_349 = arith.constant 0.000000e+00 : f32
    %1282 = vector.broadcast %cst_349 : f32 to vector<1x32xf32>
    %1283 = arith.maximumf %1281, %1282 : vector<1x32xf32>
    %cst_350 = arith.constant dense<0.000000e+00> : vector<1x32xf32>
    %1284 = tpu.matmul %1283, %11, %cst_350 {dimension_numbers = #tpu.dot_dimension_numbers<[1], [0], [0], [1], [0, 0, 1, 1], [], []>} : vector<1x32xf32>, vector<32x32xf32>, vector<1x32xf32> -> vector<1x32xf32>
    %1285 = arith.addf %1284, %12 : vector<1x32xf32>
    %cst_351 = arith.constant 0.000000e+00 : f32
    %1286 = vector.broadcast %cst_351 : f32 to vector<1x32xf32>
    %1287 = arith.maximumf %1285, %1286 : vector<1x32xf32>
    %cst_352 = arith.constant dense<0.000000e+00> : vector<1x8xf32>
    %1288 = tpu.matmul %1287, %13, %cst_352 {dimension_numbers = #tpu.dot_dimension_numbers<[1], [0], [0], [1], [0, 0, 1, 1], [], []>} : vector<1x32xf32>, vector<32x8xf32>, vector<1x8xf32> -> vector<1x8xf32>
    %1289 = arith.addf %1288, %14 : vector<1x8xf32>
    %1290 = vector.extract_strided_slice %1289 {offsets = [0, 0], sizes = [1, 4], strides = [1, 1]} : vector<1x8xf32> to vector<1x4xf32>
    %1291 = vector.extract_strided_slice %1289 {offsets = [0, 4], sizes = [1, 4], strides = [1, 1]} : vector<1x8xf32> to vector<1x4xf32>
    %cst_353 = arith.constant 1.000000e+00 : f32
    %1292 = vector.broadcast %cst_353 : f32 to vector<1x4xf32>
    %1293 = arith.cmpf ogt, %1291, %1292 : vector<1x4xf32>
    %cst_354 = arith.constant 1.000000e+00 : f32
    %1294 = vector.broadcast %cst_354 : f32 to vector<1x4xf32>
    %1295 = arith.minimumf %1291, %1294 : vector<1x4xf32>
    %1296 = math.exp %1295 : vector<1x4xf32>
    %cst_355 = arith.constant 1.000000e+00 : f32
    %1297 = vector.broadcast %cst_355 : f32 to vector<1x4xf32>
    %1298 = arith.addf %1297, %1296 : vector<1x4xf32>
    %1299 = math.log %1298 : vector<1x4xf32>
    %1300 = arith.select %1293, %1291, %1299 : vector<1x4xi1>, vector<1x4xf32>
    %1301 = vector.extract_strided_slice %29 {offsets = [7, 8], sizes = [1, 4], strides = [1, 1]} : vector<8x128xf32> to vector<1x4xf32>
    %cst_356 = arith.constant 5.000000e-01 : f32
    %1302 = vector.broadcast %cst_356 : f32 to vector<1x4xf32>
    %1303 = arith.mulf %1302, %1300 : vector<1x4xf32>
    %1304 = math.exp %1303 : vector<1x4xf32>
    %1305 = arith.mulf %1301, %1304 : vector<1x4xf32>
    %1306 = arith.addf %1290, %1305 : vector<1x4xf32>
    %1307 = vector.extract_strided_slice %16 {offsets = [0, 0], sizes = [1, 4], strides = [1, 1]} : vector<4x4xf32> to vector<1x4xf32>
    %1308 = arith.mulf %1307, %1306 : vector<1x4xf32>
    %cst_357 = arith.constant dense<0.000000e+00> : vector<1xf32>
    %1309 = vector.multi_reduction <add>, %1308, %cst_357 [1] : vector<1x4xf32> to vector<1xf32>
    %1310 = vector.shape_cast %1309 : vector<1xf32> to vector<1x1xf32>
    %1311 = vector.extract_strided_slice %17 {offsets = [0, 0], sizes = [1, 1], strides = [1, 1]} : vector<1x4xf32> to vector<1x1xf32>
    %1312 = arith.addf %1310, %1311 : vector<1x1xf32>
    %1313 = vector.extract_strided_slice %15 {offsets = [0, 0], sizes = [1, 4], strides = [1, 1]} : vector<4x4xf32> to vector<1x4xf32>
    %1314 = math.tanh %1312 : vector<1x1xf32>
    %1315 = vector.broadcast %1314 : vector<1x1xf32> to vector<1x4xf32>
    %1316 = arith.mulf %1313, %1315 : vector<1x4xf32>
    %1317 = arith.addf %1306, %1316 : vector<1x4xf32>
    %1318 = vector.extract_strided_slice %16 {offsets = [1, 0], sizes = [1, 4], strides = [1, 1]} : vector<4x4xf32> to vector<1x4xf32>
    %1319 = arith.mulf %1318, %1317 : vector<1x4xf32>
    %cst_358 = arith.constant dense<0.000000e+00> : vector<1xf32>
    %1320 = vector.multi_reduction <add>, %1319, %cst_358 [1] : vector<1x4xf32> to vector<1xf32>
    %1321 = vector.shape_cast %1320 : vector<1xf32> to vector<1x1xf32>
    %1322 = vector.extract_strided_slice %17 {offsets = [0, 1], sizes = [1, 1], strides = [1, 1]} : vector<1x4xf32> to vector<1x1xf32>
    %1323 = arith.addf %1321, %1322 : vector<1x1xf32>
    %1324 = vector.extract_strided_slice %15 {offsets = [1, 0], sizes = [1, 4], strides = [1, 1]} : vector<4x4xf32> to vector<1x4xf32>
    %1325 = math.tanh %1323 : vector<1x1xf32>
    %1326 = vector.broadcast %1325 : vector<1x1xf32> to vector<1x4xf32>
    %1327 = arith.mulf %1324, %1326 : vector<1x4xf32>
    %1328 = arith.addf %1317, %1327 : vector<1x4xf32>
    %1329 = vector.extract_strided_slice %16 {offsets = [2, 0], sizes = [1, 4], strides = [1, 1]} : vector<4x4xf32> to vector<1x4xf32>
    %1330 = arith.mulf %1329, %1328 : vector<1x4xf32>
    %cst_359 = arith.constant dense<0.000000e+00> : vector<1xf32>
    %1331 = vector.multi_reduction <add>, %1330, %cst_359 [1] : vector<1x4xf32> to vector<1xf32>
    %1332 = vector.shape_cast %1331 : vector<1xf32> to vector<1x1xf32>
    %1333 = vector.extract_strided_slice %17 {offsets = [0, 2], sizes = [1, 1], strides = [1, 1]} : vector<1x4xf32> to vector<1x1xf32>
    %1334 = arith.addf %1332, %1333 : vector<1x1xf32>
    %1335 = vector.extract_strided_slice %15 {offsets = [2, 0], sizes = [1, 4], strides = [1, 1]} : vector<4x4xf32> to vector<1x4xf32>
    %1336 = math.tanh %1334 : vector<1x1xf32>
    %1337 = vector.broadcast %1336 : vector<1x1xf32> to vector<1x4xf32>
    %1338 = arith.mulf %1335, %1337 : vector<1x4xf32>
    %1339 = arith.addf %1328, %1338 : vector<1x4xf32>
    %1340 = vector.extract_strided_slice %16 {offsets = [3, 0], sizes = [1, 4], strides = [1, 1]} : vector<4x4xf32> to vector<1x4xf32>
    %1341 = arith.mulf %1340, %1339 : vector<1x4xf32>
    %cst_360 = arith.constant dense<0.000000e+00> : vector<1xf32>
    %1342 = vector.multi_reduction <add>, %1341, %cst_360 [1] : vector<1x4xf32> to vector<1xf32>
    %1343 = vector.shape_cast %1342 : vector<1xf32> to vector<1x1xf32>
    %1344 = vector.extract_strided_slice %17 {offsets = [0, 3], sizes = [1, 1], strides = [1, 1]} : vector<1x4xf32> to vector<1x1xf32>
    %1345 = arith.addf %1343, %1344 : vector<1x1xf32>
    %1346 = vector.extract_strided_slice %15 {offsets = [3, 0], sizes = [1, 4], strides = [1, 1]} : vector<4x4xf32> to vector<1x4xf32>
    %1347 = math.tanh %1345 : vector<1x1xf32>
    %1348 = vector.broadcast %1347 : vector<1x1xf32> to vector<1x4xf32>
    %1349 = arith.mulf %1346, %1348 : vector<1x4xf32>
    %1350 = arith.addf %1339, %1349 : vector<1x4xf32>
    %cst_361 = arith.constant dense<0.000000e+00> : vector<1x4xf32>
    %1351 = tpu.matmul %1350, %18, %cst_361 {dimension_numbers = #tpu.dot_dimension_numbers<[1], [0], [0], [1], [0, 0, 1, 1], [], []>} : vector<1x4xf32>, vector<4x4xf32>, vector<1x4xf32> -> vector<1x4xf32>
    %1352 = vector.extract_strided_slice %29 {offsets = [7, 20], sizes = [1, 1], strides = [1, 1]} : vector<8x128xf32> to vector<1x1xf32>
    %1353 = vector.broadcast %1352 : vector<1x1xf32> to vector<1x4xf32>
    %1354 = arith.addf %1351, %1353 : vector<1x4xf32>
    %cst_362 = arith.constant dense<0.000000e+00> : vector<1x4xf32>
    %1355 = tpu.matmul %1354, %19, %cst_362 {dimension_numbers = #tpu.dot_dimension_numbers<[1], [0], [0], [1], [0, 0, 1, 1], [], []>} : vector<1x4xf32>, vector<4x4xf32>, vector<1x4xf32> -> vector<1x4xf32>
    %1356 = vector.extract_strided_slice %29 {offsets = [7, 21], sizes = [1, 1], strides = [1, 1]} : vector<8x128xf32> to vector<1x1xf32>
    %1357 = vector.broadcast %1356 : vector<1x1xf32> to vector<1x4xf32>
    %1358 = arith.addf %1355, %1357 : vector<1x4xf32>
    %cst_363 = arith.constant dense<0.000000e+00> : vector<1x96xf32>
    %1359 = tpu.matmul %1358, %4, %cst_363 {dimension_numbers = #tpu.dot_dimension_numbers<[1], [0], [0], [1], [0, 0, 1, 1], [], []>} : vector<1x4xf32>, vector<4x96xf32>, vector<1x96xf32> -> vector<1x96xf32>
    %1360 = arith.addf %1359, %6 : vector<1x96xf32>
    %cst_364 = arith.constant dense<0.000000e+00> : vector<1x96xf32>
    %1361 = tpu.matmul %1217, %5, %cst_364 {dimension_numbers = #tpu.dot_dimension_numbers<[1], [0], [0], [1], [0, 0, 1, 1], [], []>} : vector<1x32xf32>, vector<32x96xf32>, vector<1x96xf32> -> vector<1x96xf32>
    %1362 = arith.addf %1361, %7 : vector<1x96xf32>
    %1363 = vector.extract_strided_slice %1360 {offsets = [0, 0], sizes = [1, 32], strides = [1, 1]} : vector<1x96xf32> to vector<1x32xf32>
    %1364 = vector.extract_strided_slice %1362 {offsets = [0, 0], sizes = [1, 32], strides = [1, 1]} : vector<1x96xf32> to vector<1x32xf32>
    %1365 = arith.addf %1363, %1364 : vector<1x32xf32>
    %cst_365 = arith.constant 0.000000e+00 : f32
    %1366 = vector.broadcast %cst_365 : f32 to vector<1x32xf32>
    %1367 = arith.subf %1366, %1365 : vector<1x32xf32>
    %1368 = math.exp %1367 : vector<1x32xf32>
    %cst_366 = arith.constant 1.000000e+00 : f32
    %1369 = vector.broadcast %cst_366 : f32 to vector<1x32xf32>
    %1370 = arith.addf %1369, %1368 : vector<1x32xf32>
    %1371 = tpu.reciprocal %1370 {approx = true} : vector<1x32xf32> -> vector<1x32xf32>
    %1372 = vector.extract_strided_slice %1360 {offsets = [0, 32], sizes = [1, 32], strides = [1, 1]} : vector<1x96xf32> to vector<1x32xf32>
    %1373 = vector.extract_strided_slice %1362 {offsets = [0, 32], sizes = [1, 32], strides = [1, 1]} : vector<1x96xf32> to vector<1x32xf32>
    %1374 = arith.addf %1372, %1373 : vector<1x32xf32>
    %cst_367 = arith.constant 0.000000e+00 : f32
    %1375 = vector.broadcast %cst_367 : f32 to vector<1x32xf32>
    %1376 = arith.subf %1375, %1374 : vector<1x32xf32>
    %1377 = math.exp %1376 : vector<1x32xf32>
    %cst_368 = arith.constant 1.000000e+00 : f32
    %1378 = vector.broadcast %cst_368 : f32 to vector<1x32xf32>
    %1379 = arith.addf %1378, %1377 : vector<1x32xf32>
    %1380 = tpu.reciprocal %1379 {approx = true} : vector<1x32xf32> -> vector<1x32xf32>
    %1381 = vector.extract_strided_slice %1360 {offsets = [0, 64], sizes = [1, 32], strides = [1, 1]} : vector<1x96xf32> to vector<1x32xf32>
    %1382 = vector.extract_strided_slice %1362 {offsets = [0, 64], sizes = [1, 32], strides = [1, 1]} : vector<1x96xf32> to vector<1x32xf32>
    %1383 = arith.mulf %1371, %1382 : vector<1x32xf32>
    %1384 = arith.addf %1381, %1383 : vector<1x32xf32>
    %1385 = math.tanh %1384 : vector<1x32xf32>
    %cst_369 = arith.constant 1.000000e+00 : f32
    %1386 = vector.broadcast %cst_369 : f32 to vector<1x32xf32>
    %1387 = arith.subf %1386, %1380 : vector<1x32xf32>
    %1388 = arith.mulf %1387, %1385 : vector<1x32xf32>
    %1389 = arith.mulf %1380, %1217 : vector<1x32xf32>
    %1390 = arith.addf %1388, %1389 : vector<1x32xf32>
    %cst_370 = arith.constant dense<0.000000e+00> : vector<1x32xf32>
    %1391 = tpu.matmul %1390, %20, %cst_370 {dimension_numbers = #tpu.dot_dimension_numbers<[1], [0], [0], [1], [0, 0, 1, 1], [], []>} : vector<1x32xf32>, vector<32x32xf32>, vector<1x32xf32> -> vector<1x32xf32>
    %1392 = arith.addf %1391, %21 : vector<1x32xf32>
    %cst_371 = arith.constant 0.000000e+00 : f32
    %1393 = vector.broadcast %cst_371 : f32 to vector<1x32xf32>
    %1394 = arith.maximumf %1392, %1393 : vector<1x32xf32>
    %cst_372 = arith.constant dense<0.000000e+00> : vector<1x32xf32>
    %1395 = tpu.matmul %1394, %22, %cst_372 {dimension_numbers = #tpu.dot_dimension_numbers<[1], [0], [0], [1], [0, 0, 1, 1], [], []>} : vector<1x32xf32>, vector<32x32xf32>, vector<1x32xf32> -> vector<1x32xf32>
    %1396 = arith.addf %1395, %23 : vector<1x32xf32>
    %cst_373 = arith.constant 0.000000e+00 : f32
    %1397 = vector.broadcast %cst_373 : f32 to vector<1x32xf32>
    %1398 = arith.maximumf %1396, %1397 : vector<1x32xf32>
    %cst_374 = arith.constant dense<0.000000e+00> : vector<1x16xf32>
    %1399 = tpu.matmul %1398, %24, %cst_374 {dimension_numbers = #tpu.dot_dimension_numbers<[1], [0], [0], [1], [0, 0, 1, 1], [], []>} : vector<1x32xf32>, vector<32x16xf32>, vector<1x16xf32> -> vector<1x16xf32>
    %1400 = arith.addf %1399, %25 : vector<1x16xf32>
    %1401 = vector.extract_strided_slice %1400 {offsets = [0, 0], sizes = [1, 8], strides = [1, 1]} : vector<1x16xf32> to vector<1x8xf32>
    %1402 = vector.extract_strided_slice %1400 {offsets = [0, 8], sizes = [1, 8], strides = [1, 1]} : vector<1x16xf32> to vector<1x8xf32>
    %cst_375 = arith.constant 1.000000e+00 : f32
    %1403 = vector.broadcast %cst_375 : f32 to vector<1x8xf32>
    %1404 = arith.cmpf ogt, %1402, %1403 : vector<1x8xf32>
    %cst_376 = arith.constant 1.000000e+00 : f32
    %1405 = vector.broadcast %cst_376 : f32 to vector<1x8xf32>
    %1406 = arith.minimumf %1402, %1405 : vector<1x8xf32>
    %1407 = math.exp %1406 : vector<1x8xf32>
    %cst_377 = arith.constant 1.000000e+00 : f32
    %1408 = vector.broadcast %cst_377 : f32 to vector<1x8xf32>
    %1409 = arith.addf %1408, %1407 : vector<1x8xf32>
    %1410 = math.log %1409 : vector<1x8xf32>
    %1411 = arith.select %1404, %1402, %1410 : vector<1x8xi1>, vector<1x8xf32>
    %1412 = vector.extract_strided_slice %29 {offsets = [7, 12], sizes = [1, 8], strides = [1, 1]} : vector<8x128xf32> to vector<1x8xf32>
    %cst_378 = arith.constant 5.000000e-01 : f32
    %1413 = vector.broadcast %cst_378 : f32 to vector<1x8xf32>
    %1414 = arith.mulf %1413, %1411 : vector<1x8xf32>
    %1415 = math.exp %1414 : vector<1x8xf32>
    %1416 = arith.mulf %1412, %1415 : vector<1x8xf32>
    %1417 = arith.addf %1401, %1416 : vector<1x8xf32>
    %c7 = arith.constant 7 : index
    %c0_379 = arith.constant 0 : index
    %1418 = vector.load %arg2[%c7, %c0_379] : memref<8x128xf32, #tpu.memory_space<vmem>>, vector<1x8xf32>
    tpu.vector_store %arg2[%c7, %c0_379], %1417 {strides = array<i32>} : memref<8x128xf32, #tpu.memory_space<vmem>>, vector<1x8xf32>,
    %c7_380 = arith.constant 7 : index
    %c8_381 = arith.constant 8 : index
    %1419 = vector.load %arg2[%c7_380, %c8_381] : memref<8x128xf32, #tpu.memory_space<vmem>>, vector<1x4xf32>
    tpu.vector_store %arg2[%c7_380, %c8_381], %1350 {strides = array<i32>} : memref<8x128xf32, #tpu.memory_space<vmem>>, vector<1x4xf32>,
    %c7_382 = arith.constant 7 : index
    %c12_383 = arith.constant 12 : index
    %1420 = vector.load %arg2[%c7_382, %c12_383] : memref<8x128xf32, #tpu.memory_space<vmem>>, vector<1x4xf32>
    tpu.vector_store %arg2[%c7_382, %c12_383], %1290 {strides = array<i32>} : memref<8x128xf32, #tpu.memory_space<vmem>>, vector<1x4xf32>,
    %c7_384 = arith.constant 7 : index
    %c16_385 = arith.constant 16 : index
    %1421 = vector.load %arg2[%c7_384, %c16_385] : memref<8x128xf32, #tpu.memory_space<vmem>>, vector<1x4xf32>
    tpu.vector_store %arg2[%c7_384, %c16_385], %1300 {strides = array<i32>} : memref<8x128xf32, #tpu.memory_space<vmem>>, vector<1x4xf32>,
    return
  }
}

</mosaic_0001>

<bundles_post_ra>
// kernel: tpu_custom_call.1
= control target key start
LH: loop header
LB: loop body
LE: loop exit
PB: predicated region body
PF: predicated region fallthrough
CT: control target
= control target key end

     0   :  { %7 = vsyncpa [#allocation3], 0  ;;  %s5705_s0 = inlined_call_operand.hbm [shape: f32[424,128], index: 0, kind: input, shape index: {}]   ;;  %s5706_s1 = inlined_call_operand.hbm [shape: f32[8,128], index: 1, kind: input, shape index: {}]   ;;  %s5707_s2 = inlined_call_operand.hbm [shape: f32[8,128], index: 2, kind: output, shape index: {}]  }
   0x1   :  { %8 = vsyncpa [#allocation6], 0 }
   0x2   :  { %9 = vsyncpa [#allocation4], 0  ;;  %s14_s11 = sshll.u32 %s5705_s0, 4  ;;  %s4325_s12 = smov [#allocation2]   ;;  %s15_s11 = int_to_ptr.hbm [resolvable:$true] %s14_s11 }
   0x3   :  { %s16_s13 = sshll.u32 %s4325_s12, 4  ;;  %s28_s16 = sshll.u32 %s5706_s1, 4  ;;  %s17_s13 = int_to_ptr.vmem [resolvable:$true] %s16_s13  ;;  %s29_s16 = int_to_ptr.hbm [resolvable:$true] %s28_s16 }
   0x4   :  { %s4326_s17 = smov 128   ;;  %s4327_s18 = smov 8  }
   0x5   :  { %22 = dma.hbm_to_vmem [thread:$0]  %s15_s11, 6784, %s17_s13, [#allocation3], %s4326_s17, %s4326_s17, %s4327_s18  }
   0x6   :  { %s4328_s19 = smov [#allocation5]  }
   0x7   :  { %s30_s20 = sshll.u32 %s4328_s19, 4  ;;  %s31_s20 = int_to_ptr.vmem [resolvable:$true] %s30_s20 }
   0x8   :  { %33 = dma.hbm_to_vmem [thread:$0]  %s29_s16, 128, %s31_s20, [#allocation6]  }
   0x9   :  { %4319 = dma.done.wait [#allocation3], 6784  }
   0xa   :  { %4320 = vsyncadd [#allocation3], 4294960512 }
   0xb   :  { %4321 = dma.done.wait [#allocation6], 128  }
   0xc   :  { %4322 = vsyncadd [#allocation6], 4294967168  ;;  %v4366_v0 = vld [vmem:[#allocation2 + $0x20] sm:$0xff]  ;;  %v4368_v1 = vld [vmem:[#allocation2 + $0x18] sm:$0xff]  ;;  %vm97_vm0 = vcmask 64512   ;;  %vm145_vm1 = vcmask 261120  }
   0xd   :  { %161 = vmatpush.msra.mxu2 %v4366_v0  ;;  %v42_v2 = vld [vmem:[#allocation2] sm:$0xff]  ;;  %v4371_v3 = vld [vmem:[#allocation2 + $0x10] sm:$0xff]  ;;  %v4373_v4 = vld [vmem:[#allocation5] sm:$0xff]  ;;  %s4329_s0 = smov 64   ;;  %s4330_s1 = smov 96   ;;  %vm292_vm3 = vcmask 24576  }
   0xe   :  { %116 = vmatpush.msra.mxu0 %v42_v2  ;;  %v4378_v5 = vld [vmem:[#allocation2 + $0x8] sm:$0xff]  ;;  %v92_v6 = vld [vmem:[#allocation2 + $0x190] sm:$0x1]  ;;  %s4331_s21 = smov 32   ;;  %v4396_v25 = vld [vmem:[#allocation2 + $0x80] sm:$0xff]  ;;  %s4332_s22 = smov 4  }
   0xf   :  { %162 = vmatpush.msra.mxu2 %v4368_v1  ;;  %3763 = vmatmul.msk.f32.vlgmr.msra.gmra.mxu0 %vm97_vm0, %v4373_v4  ;;  %v4383_v7 = vld [vmem:[#allocation2 + $0x30] sm:$0x1]  ;;  %v3901_v10 = vld [vmem:[#allocation2 + $0x28] ss:$0 sm:$0xff]  ;;  %v4399_v26 = vld [vmem:[#allocation2 + $0x78] sm:$0xff]  ;;  %s4333_s23 = smov 120  }
  0x10   :  { %v4394_v24 = vld [vmem:[#allocation2 + $0x88] sm:$0xff]  ;;  %v4402_v27 = vld [vmem:[#allocation2 + $0x70] sm:$0xff]  ;;  %v94_v35 = vld [vmem:[#allocation2 + $0x1a0] sm:$0x1]  ;;  %s4335_s24 = smov 126   ;;  %s4336_s25 = smov 125  }
  0x11   :  { %163 = vmatpush.msra.mxu2 %v4371_v3  ;;  %214 = vmatpush.msra.mxu3 %v4394_v24  ;;  %v60_v34 = vld [vmem:[#allocation2 + $0x90] sm:$0xff]  ;;  %v4410_v36 = vld [vmem:[#allocation2 + $0xb8] sm:$0xff]  ;;  %v4418_v39 = vld [vmem:[#allocation2 + $0xa8] sm:$0xff]  ;;  %s4339_s26 = smov 127   ;;  %vm309_vm4 = vcmask 25601   ;;  %vm334_vm5 = vcmask 26626  }
  0x12   :  { %139 = vmatpush.msra.mxu1 %v60_v34  ;;  %238 = vmatpush.msrb.mxu0 %v4410_v36  ;;  %v4415_v38 = vld [vmem:[#allocation2 + $0xb0] sm:$0xff]  ;;  %v4421_v40 = vld [vmem:[#allocation2 + $0xa0] sm:$0xff]  ;;  %v4426_v42 = vld [vmem:[#allocation2 + $0xd8] sm:$0xff]  ;;  %v4337_v34 = vmov 21   ;;  %vm358_vm6 = vcmask 27651   ;;  %vm386_vm7 = vcmask 1043456  }
  0x13   :  { %164 = vmatpush.msra.mxu2 %v4378_v5  ;;  %215 = vmatpush.msra.mxu3 %v4396_v25  ;;  %v4424_v41 = vld [vmem:[#allocation2 + $0xe0] sm:$0xff]  ;;  %v61_v43 = vld [vmem:[#allocation2 + $0x98] sm:$0x1]  ;;  %v4434_v49 = vld [vmem:[#allocation2 + $0xd0] sm:$0xff]  ;;  %vm382_vm8 = vcmask 31744   ;;  %s4340_s27 = smov 12  }
  0x14   :  { %3765 = vmatmul.msk.f32.vlgmr.msra.gmra.mxu2 %vm145_vm1, %v92_v6  ;;  %3764 = vmatmul.msk.f32.vlgmr.msra.gmra.mxu1 %vm97_vm0, %v94_v35  ;;  %v4437_v50 = vld [vmem:[#allocation2 + $0xc8] sm:$0xff]  ;;  %v4440_v51 = vld [vmem:[#allocation2 + $0x58] sm:$0xff]  ;;  %v4442_v52 = vld [vmem:[#allocation2 + $0x50] sm:$0xff]  ;;  %s4341_s28 = smov 116   ;;  %s4343_s29 = smov [#allocation7]  }
  0x15   :  { %216 = vmatpush.msra.mxu3 %v4399_v26  ;;  %239 = vmatpush.msrb.mxu0 %v4415_v38  ;;  %v4445_v53 = vld [vmem:[#allocation2 + $0x48] sm:$0xff]  ;;  %v4448_v54 = vld [vmem:[#allocation2 + $0x40] sm:$0xff]  ;;  %v4458_v59 = vld [vmem:[#allocation2 + $0x198] sm:$0x1]  ;;  %s3750_s30 = sshll.u32 %s4343_s29, 4  ;;  %s3752_s5 = sshll.u32 %s5707_s2, 4  ;;  %s3751_s30 = int_to_ptr.vmem [resolvable:$true] %s3750_s30  ;;  %s3753_s5 = int_to_ptr.hbm [resolvable:$true] %s3752_s5 }
  0x16   :  { %262 = vmatpush.msrb.mxu1 %v4424_v41  ;;  %v4452_v55 = vld [vmem:[#allocation2 + $0xc0] sm:$0x1]  ;;  %v4465_v60 = vld [vmem:[#allocation2 + $0xe8] sm:$0x1] }
  0x17   :  { %217 = vmatpush.msra.mxu3 %v4402_v27  ;;  %240 = vmatpush.msrb.mxu0 %v4418_v39 }
  0x18   :  { %263 = vmatpush.msrb.mxu1 %v4426_v42 }
  0x19   :  { %241 = vmatpush.msrb.mxu0 %v4421_v40 }
  0x1a   :  { %264 = vmatpush.msrb.mxu1 %v4434_v49 }
  0x1c   :  { %265 = vmatpush.msrb.mxu1 %v4437_v50 }
  0x1e   :  { %481 = vmatpush.msra.mxu1 %v4440_v51 }
  0x20   :  { %482 = vmatpush.msra.mxu1 %v4442_v52 }
  0x22   :  { %483 = vmatpush.msra.mxu1 %v4445_v53 }
  0x24   :  { %484 = vmatpush.msra.mxu1 %v4448_v54 }
  0x8c   :  { %v118_v11 = vpop.f32.mrf.mxu0 }
  0x8d   :  { %v4387_v12 = vadd.f32 %v3901_v10, %v118_v11 }
  0x91   :  { %v141_v44 = vpop.f32.mrf.mxu1 }
  0x92   :  { %v4430_v45 = vadd.f32 %v141_v44, %v61_v43  ;;  %v4338_v43 = vmov 0  }
  0x93   :  { %3896 = vset.pattern.permute.xlu2 %v4338_v43  ;;  %3897 = vset.pattern.permute.xlu0 %v4338_v43 }
  0x97   :  { %v166_v8 = vpop.f32.mrf.mxu2 }
  0x98   :  { %v167_v9 = vadd.f32 %v166_v8, %v4383_v7 }
  0x9a   :  { %176 = vrot.lane.b32.xlu0 %v167_v9, %s4329_s0  ;;  %v169_v13 = vadd.f32 %v167_v9, %v4387_v12 }
  0x9c   :  { %v170_v14 = vsub.f32 0.0, %v169_v13 }
  0x9e   :  { %v171_v15 = vmul.f32 1.442695, %v170_v14 }
  0xa0   :  { %3902 = vpow2.f32 %v171_v15 }
  0xa6   :  { %v3903_v16 = vpop.eup %3902 }
  0xa7   :  { %v173_v17 = vadd.f32 1.0, %v3903_v16 }
  0xa9   :  { %3904 = vrcp.f32 %v173_v17 }
  0xaf   :  { %v3905_v18 = vpop.eup %3904 }
  0xb0   :  { %v186_v29 = vsub.f32 1.0, %v3905_v18 }
 0x10c   :  { %v177_v19 = vpop.permute.xlu0 %176 }
 0x10d   :  { %v179_v20 = vmul.f32 %v3905_v18, %v177_v19  ;;  %v4479_v19 = vld [vmem:[#allocation2 + $0xf8] sm:$0xf] }
 0x10f   :  { %181 = vrot.lane.b32.xlu0 %v179_v20, %s4329_s0 }
 0x181   :  { %v182_v21 = vpop.permute.xlu0 %181 }
 0x182   :  { %v184_v22 = vadd.f32 %v182_v21, %v4387_v12 }
 0x184   :  { %3906 = vtanh.f32 %v184_v22 }
 0x18a   :  { %v3907_v23 = vpop.eup %3906 }
 0x18b   :  { %188 = vrot.lane.b32.xlu1 %v3907_v23, %s4330_s1  ;;  %v4334_v23 = vmov 20  }
 0x18c   :  { %3898 = vset.pattern.permute.xlu1 %v4334_v23 }
 0x193   :  { %192 = vrot.lane.b32.xlu1 %v92_v6, %s4331_s21 }
 0x1fd   :  { %v189_v28 = vpop.permute.xlu1 %188 }
 0x1fe   :  { %v191_v31 = vmul.f32 %v189_v28, %v186_v29  ;;  %v4484_v28 = vld [vmem:[#allocation2 + $0x100] sm:$0x1] }
 0x1ff   :  { %5731 = vst [vmem:[#allocation13_spill] sm:$0xff] %v4484_v28  ;;  %v338_v29 = vrot.slane %v4484_v28, 6 }
 0x205   :  { %v193_v30 = vpop.permute.xlu1 %192 }
 0x206   :  { %v195_v32 = vmul.f32 %v3905_v18, %v193_v30  ;;  %v362_v30 = vrot.slane %v4484_v28, 5 }
 0x208   :  { %v4406_v33 = vadd.f32 %v195_v32, %v191_v31 }
 0x20a   :  { %198 = vrot.lane.b32.xlu2 %v4406_v33, %s4330_s1 }
 0x264   :  { %v199_v37 = vpop.permute.xlu2 %198 }
 0x265   :  { %3766 = vmatmul.msk.f32.vlgmr.msra.gmra.mxu3 %vm145_vm1, %v199_v37 }
 0x2e8   :  { %v219_v46 = vpop.f32.mrf.mxu3 }
 0x2e9   :  { %v220_v47 = vadd.f32 %v219_v46, %v4430_v45 }
 0x2eb   :  { %v222_v48 = vmax.f32 %v220_v47, 0.0 }
 0x2ed   :  { %3767 = vmatmul.msk.f32.vlgmr.msrb.gmra.mxu0 %vm145_vm1, %v222_v48  ;;  %v314_v48 = vrot.slane %v4484_v28, 7 }
 0x36a   :  { %v243_v56 = vpop.f32.mrf.mxu0 }
 0x36b   :  { %v244_v57 = vadd.f32 %v243_v56, %v4452_v55  ;;  %v4494_v56 = vld [vmem:[#allocation2 + $0xf0] sm:$0xf] }
 0x36d   :  { %v246_v58 = vmax.f32 %v244_v57, 0.0 }
 0x36f   :  { %3768 = vmatmul.msk.f32.vlgmr.msrb.gmra.mxu1 %vm145_vm1, %v246_v58 }
 0x370   :  { %642 = vmatpush.msrb.mxu1 %v4366_v0 }
 0x372   :  { %643 = vmatpush.msrb.mxu1 %v4368_v1 }
 0x374   :  { %644 = vmatpush.msrb.mxu1 %v4371_v3 }
 0x376   :  { %645 = vmatpush.msrb.mxu1 %v4378_v5 }
 0x377   :  { %3775 = vmatmul.msk.f32.vlgmr.msra.gmra.mxu1 %vm145_vm1, %v4458_v59 }
 0x37f   :  { %3779 = vmatmul.msk.f32.vlgmr.msrb.gmra.mxu1 %vm145_vm1, %v199_v37 }
 0x3ec   :  { %v267_v61 = vpop.f32.mrf.mxu1 }
 0x3ed   :  { %v4468_v62 = vadd.f32 %v267_v61, %v4465_v60 }
 0x3ef   :  { %5729 = vst [vmem:[#allocation11_spill] sm:$0xff] %v4468_v62  ;;  %v271_v63 = vmin.f32 %v4468_v62, 1.0  ;;  %vm270_vm2 = vcmp.gt.f32.partialorder %v4468_v62, 1.0 }
 0x3f1   :  { %v272_v2 = vmul.f32 1.442695, %v271_v63 }
 0x3f3   :  { %3908 = vpow2.f32 %v272_v2 }
 0x3f4   :  { %v486_v31 = vpop.f32.mrf.mxu1 }
 0x3f9   :  { %v3909_v6 = vpop.eup %3908 }
 0x3fa   :  { %v274_v8 = vadd.f32 1.0, %v3909_v6 }
 0x3fc   :  { %3910 = vlog2.f32 %v274_v8  ;;  %v647_v32 = vpop.f32.mrf.mxu1 }
 0x3fd   :  { %v648_v35 = vadd.f32 %v647_v32, %v4383_v7 }
 0x3ff   :  { %v651_v37 = vrot.slane %v648_v35, 7 }
 0x402   :  { %v3911_v9 = vpop.eup %3910 }
 0x403   :  { %v276_v10 = vmul.f32 0.6931472, %v3911_v9 }
 0x405   :  { %v4473_v11 = vsel %vm270_vm2, %v4468_v62, %v276_v10 }
 0x406   :  { %5730 = vst [vmem:[#allocation12_spill] sm:$0xff] %v4473_v11  ;;  %v278_v13 = vmul.f32 0.5, %v4473_v11 }
 0x408   :  { %v279_v14 = vmul.f32 1.442695, %v278_v13 }
 0x40a   :  { %3912 = vpow2.f32 %v279_v14 }
 0x410   :  { %v3913_v15 = vpop.eup %3912 }
 0x411   :  { %282 = vrot.lane.b32.xlu2 %v3913_v15, %s4332_s22 }
 0x46b   :  { %v283_v16 = vpop.permute.xlu2 %282 }
 0x46c   :  { %v285_v17 = vmul.f32 %v283_v16, %v4373_v4 }
 0x46e   :  { %287 = vrot.lane.b32.xlu0 %v285_v17, %s4333_s23 }
 0x4e0   :  { %v288_v18 = vpop.permute.xlu0 %287 }
 0x4e1   :  { %v290_v20 = vadd.f32 %v288_v18, %v4468_v62 }
 0x4e3   :  { %v291_v21 = vmul.f32 %v290_v20, %v4479_v19 }
 0x4e5   :  { %v293_v22 = vsel %vm292_vm3, %v291_v21, 0.0 }
 0x4e6   :  { %294 = vadd.xlane.f32.xlu1 %v293_v22 }
 0x4ff   :  { %339 = vrot.lane.b32.xlu1 %v338_v29, %s4335_s24  ;;  %v653_v29 = vadd.f32 %v651_v37, %v4387_v12 }
 0x507   :  { %363 = vrot.lane.b32.xlu1 %v362_v30, %s4336_s25  ;;  %v654_v30 = vsub.f32 0.0, %v653_v29 }
 0x509   :  { %v655_v32 = vmul.f32 1.442695, %v654_v30 }
 0x50f   :  { %379 = vperm.xlu1 %3898, %v4373_v4  }
 0x517   :  { %3899 = vset.pattern.permute.xlu1 %v4337_v34 }
 0x518   :  { %411 = vperm.xlu1 %3899, %v4373_v4  }
 0x520   :  { %659 = vrot.lane.b32.xlu1 %v651_v37, %s4329_s0 }
 0x521   :  { %3900 = vset.pattern.permute.xlu1 %v4338_v43 }
 0x559   :  { %v295_v44 = vpop.xlane.xlu1 %294 }
 0x55a   :  { %v296_v46 = vadd.f32 %v295_v44, %v4484_v28 }
 0x55c   :  { %3914 = vtanh.f32 %v296_v46 }
 0x562   :  { %v3915_v47 = vpop.eup %3914 }
 0x563   :  { %300 = vperm.xlu2 %3896, %v3915_v47   ;;  %v4513_v47 = vld [vmem:[#allocation2 + $0x68] sm:$0x1] }
 0x56b   :  { %315 = vrot.lane.b32.xlu2 %v314_v48, %s4339_s26 }
 0x571   :  { %v4505_v22 = vpop.permute.xlu1 %339 }
 0x572   :  { %5732 = vst [vmem:[#allocation14_spill] sm:$0xff] %v4505_v22 }
 0x579   :  { %v4507_v23 = vpop.permute.xlu1 %363 }
 0x581   :  { %v4510_v35 = vpop.permute.xlu1 %379 }
 0x58a   :  { %v4515_v48 = vpop.permute.xlu1 %411 }
 0x592   :  { %v660_v37 = vpop.permute.xlu1 %659 }
 0x5bd   :  { %v301_v57 = vpop.permute.xlu2 %300 }
 0x5be   :  { %v303_v58 = vmul.f32 %v301_v57, %v4494_v56 }
 0x5c0   :  { %v304_v61 = vadd.f32 %v303_v58, %v290_v20  ;;  %v487_v58 = vadd.f32 %v486_v31, %v4513_v47 }
 0x5c2   :  { %v306_v63 = vrot.slane %v304_v61, 7 }
 0x5c4   :  { %v308_v2 = vmul.f32 %v306_v63, %v4479_v19 }
 0x5c5   :  { %v4499_v8 = vpop.permute.xlu2 %315 }
 0x5c6   :  { %v310_v6 = vsel %vm309_vm4, %v308_v2, 0.0 }
 0x5c7   :  { %311 = vadd.xlane.f32.xlu0 %v310_v6 }
 0x63a   :  { %v312_v9 = vpop.xlane.xlu0 %311 }
 0x63b   :  { %v318_v10 = vadd.f32 %v4499_v8, %v312_v9 }
 0x63d   :  { %3916 = vtanh.f32 %v318_v10 }
 0x643   :  { %v3917_v13 = vpop.eup %3916 }
 0x644   :  { %322 = vperm.xlu2 %3896, %v3917_v13  }
 0x69e   :  { %v323_v14 = vpop.permute.xlu2 %322 }
 0x69f   :  { %v325_v15 = vmul.f32 %v323_v14, %v4494_v56 }
 0x6a1   :  { %v327_v16 = vrot.slane %v325_v15, 1 }
 0x6a3   :  { %v329_v17 = vadd.f32 %v327_v16, %v304_v61 }
 0x6a5   :  { %v331_v18 = vrot.slane %v329_v17, 6 }
 0x6a7   :  { %v333_v20 = vmul.f32 %v331_v18, %v4479_v19 }
 0x6a9   :  { %v335_v21 = vsel %vm334_vm5, %v333_v20, 0.0 }
 0x6aa   :  { %336 = vadd.xlane.f32.xlu2 %v335_v21  ;;  %v4525_v21 = vld [vmem:[#allocation2 + $0x108] sm:$0xf] }
 0x6ab   :  { %3769 = vmatpush.msk.msrb.mxu2 %vm386_vm7, %v4525_v21  ;;  %3783 = vmatpush.msk.msra.mxu1 %vm386_vm7, %v4525_v21 }
 0x71d   :  { %v337_v34 = vpop.xlane.xlu2 %336 }
 0x71e   :  { %v342_v43 = vadd.f32 %v4505_v22, %v337_v34 }
 0x720   :  { %3918 = vtanh.f32 %v342_v43 }
 0x721   :  { %3920 = vpow2.f32 %v655_v32  ;;  %v4532_v32 = vld [vmem:[#allocation2 + $0x110] sm:$0xf] }
 0x722   :  { %3771 = vmatpush.msk.msrb.mxu3 %vm386_vm7, %v4532_v32 }
 0x726   :  { %v3919_v44 = vpop.eup %3918 }
 0x727   :  { %v3921_v46 = vpop.eup %3920  ;;  %346 = vperm.xlu0 %3897, %v3919_v44  }
 0x728   :  { %v657_v57 = vadd.f32 1.0, %v3921_v46 }
 0x72a   :  { %3922 = vrcp.f32 %v657_v57  ;;  %v4541_v57 = vld [vmem:[#allocation2 + $0x38] sm:$0xf] }
 0x72b   :  { %3773 = vmatpush.msk.msra.mxu0 %vm386_vm7, %v4541_v57 }
 0x72f   :  { %496 = vrot.lane.b32.xlu0 %v487_v58, %s4329_s0 }
 0x730   :  { %v3923_v61 = vpop.eup %3922 }
 0x731   :  { %v662_v63 = vmul.f32 %v3923_v61, %v660_v37 }
 0x737   :  { %664 = vrot.lane.b32.xlu0 %v662_v63, %s4329_s0 }
 0x799   :  { %v347_v2 = vpop.permute.xlu0 %346 }
 0x79a   :  { %v349_v6 = vmul.f32 %v347_v2, %v4494_v56 }
 0x79c   :  { %v351_v9 = vrot.slane %v349_v6, 2 }
 0x79e   :  { %v353_v10 = vadd.f32 %v351_v9, %v329_v17  ;;  %v4549_v9 = vld [vmem:[#allocation2 + $0x60] sm:$0x1] }
 0x7a0   :  { %v355_v13 = vrot.slane %v353_v10, 5 }
 0x7a1   :  { %v497_v14 = vpop.permute.xlu0 %496 }
 0x7a2   :  { %v357_v15 = vmul.f32 %v355_v13, %v4479_v19 }
 0x7a4   :  { %v359_v31 = vsel %vm358_vm6, %v357_v15, 0.0 }
 0x7a5   :  { %360 = vadd.xlane.f32.xlu2 %v359_v31 }
 0x7a9   :  { %v665_v16 = vpop.permute.xlu0 %664 }
 0x7aa   :  { %v667_v18 = vadd.f32 %v665_v16, %v4387_v12 }
 0x7ac   :  { %3924 = vtanh.f32 %v667_v18 }
 0x7b2   :  { %v3925_v20 = vpop.eup %3924 }
 0x7b3   :  { %671 = vrot.lane.b32.xlu0 %v3925_v20, %s4330_s1 }
 0x818   :  { %v361_v17 = vpop.xlane.xlu2 %360 }
 0x819   :  { %v366_v29 = vadd.f32 %v4507_v23, %v361_v17 }
 0x81b   :  { %3926 = vtanh.f32 %v366_v29 }
 0x821   :  { %v3927_v30 = vpop.eup %3926 }
 0x822   :  { %370 = vperm.xlu2 %3896, %v3927_v30  }
 0x825   :  { %v672_v30 = vpop.permute.xlu0 %671 }
 0x87c   :  { %v371_v34 = vpop.permute.xlu2 %370 }
 0x87d   :  { %v373_v43 = vmul.f32 %v371_v34, %v4494_v56  ;;  %v669_v34 = vsub.f32 1.0, %v3923_v61 }
 0x87f   :  { %v375_v44 = vrot.slane %v373_v43, 3  ;;  %v675_v43 = vrot.slane %v4406_v33, 7  ;;  %v4563_v33 = vld [vmem:[#allocation2 + $0x128] sm:$0xff] }
 0x881   :  { %v4537_v46 = vadd.f32 %v375_v44, %v353_v10  ;;  %v674_v44 = vmul.f32 %v672_v30, %v669_v34  ;;  %v4587_v30 = vld [vmem:[#allocation2 + $0x150] sm:$0xff] }
 0x883   :  { %5733 = vst [vmem:[#allocation15_spill] sm:$0xff] %v4537_v46  ;;  %3770 = vmatmul.msk.f32.vlgmr.msrb.gmra.mxu2 %vm382_vm8, %v4537_v46 }
 0x906   :  { %v407_v37 = vpop.f32.mrf.mxu2 }
 0x907   :  { %v408_v63 = vadd.f32 %v407_v37, %v4510_v35  ;;  %v677_v37 = vmul.f32 %v3923_v61, %v675_v43  ;;  %v4571_v61 = vld [vmem:[#allocation2 + $0x118] sm:$0xff]  ;;  %v4597_v43 = vld [vmem:[#allocation2 + $0x148] sm:$0xff] }
 0x909   :  { %3772 = vmatmul.msk.f32.vlgmr.msrb.gmra.mxu3 %vm382_vm8, %v408_v63 }
 0x98c   :  { %v437_v2 = vpop.f32.mrf.mxu3 }
 0x98d   :  { %v438_v6 = vadd.f32 %v437_v2, %v4515_v48 }
 0x98f   :  { %3774 = vmatmul.msk.f32.vlgmr.msra.gmra.mxu0 %vm382_vm8, %v438_v6 }
 0xa0c   :  { %v463_v10 = vpop.f32.mrf.mxu0 }
 0xa0d   :  { %v464_v13 = vadd.f32 %v463_v10, %v4549_v9  ;;  %v4561_v10 = vld [vmem:[#allocation2 + $0x130] sm:$0xff] }
 0xa0e   :  { %534 = vmatpush.msra.mxu2 %v4561_v10  ;;  %981 = vmatpush.msrb.mxu1 %v4561_v10 }
 0xa0f   :  { %v489_v15 = vadd.f32 %v487_v58, %v464_v13  ;;  %v4556_v58 = vadd.f32 %v677_v37, %v674_v44  ;;  %v4601_v44 = vld [vmem:[#allocation2 + $0x140] sm:$0xff] }
 0xa10   :  { %535 = vmatpush.msra.mxu2 %v4563_v33  ;;  %982 = vmatpush.msrb.mxu1 %v4563_v33  ;;  %v4609_v37 = vld [vmem:[#allocation2 + $0x180] sm:$0xff] }
 0xa11   :  { %v490_v31 = vsub.f32 0.0, %v489_v15  ;;  %v680_v63 = vrot.slane %v4556_v58, 1  ;;  %582 = vmatpush.msrb.mxu0 %v4609_v37 }
 0xa13   :  { %v491_v16 = vmul.f32 1.442695, %v490_v31 }
 0xa15   :  { %3928 = vpow2.f32 %v491_v16 }
 0xa1b   :  { %v3929_v18 = vpop.eup %3928 }
 0xa1c   :  { %v493_v20 = vadd.f32 1.0, %v3929_v18 }
 0xa1e   :  { %3930 = vrcp.f32 %v493_v20 }
 0xa24   :  { %v3931_v17 = vpop.eup %3930 }
 0xa25   :  { %v499_v29 = vmul.f32 %v3931_v17, %v497_v14  ;;  %v506_v15 = vsub.f32 1.0, %v3931_v17 }
 0xa27   :  { %501 = vrot.lane.b32.xlu2 %v499_v29, %s4329_s0  ;;  %v4585_v29 = vld [vmem:[#allocation2 + $0x158] sm:$0xff] }
 0xa28   :  { %558 = vmatpush.msra.mxu3 %v4585_v29 }
 0xa2a   :  { %559 = vmatpush.msra.mxu3 %v4587_v30 }
 0xa2c   :  { %560 = vmatpush.msra.mxu3 %v4597_v43 }
 0xa2e   :  { %561 = vmatpush.msra.mxu3 %v4601_v44 }
 0xa2f   :  { %512 = vrot.lane.b32.xlu2 %v4458_v59, %s4331_s21  ;;  %v4567_v59 = vld [vmem:[#allocation2 + $0x120] sm:$0xff] }
 0xa30   :  { %536 = vmatpush.msra.mxu2 %v4567_v59  ;;  %983 = vmatpush.msrb.mxu1 %v4567_v59 }
 0xa31   :  { %721 = vmatpush.msrb.mxu3 %v4410_v36 }
 0xa32   :  { %537 = vmatpush.msra.mxu2 %v4571_v61  ;;  %984 = vmatpush.msrb.mxu1 %v4571_v61 }
 0xa33   :  { %722 = vmatpush.msrb.mxu3 %v4415_v38 }
 0xa34   :  { %697 = vmatpush.msrb.mxu2 %v4394_v24 }
 0xa35   :  { %723 = vmatpush.msrb.mxu3 %v4418_v39 }
 0xa36   :  { %698 = vmatpush.msrb.mxu2 %v4396_v25 }
 0xa37   :  { %681 = vrot.lane.b32.xlu2 %v680_v63, %s4330_s1  ;;  %724 = vmatpush.msrb.mxu3 %v4421_v40  ;;  %v4611_v63 = vld [vmem:[#allocation2 + $0x178] sm:$0xff] }
 0xa38   :  { %699 = vmatpush.msrb.mxu2 %v4399_v26  ;;  %583 = vmatpush.msrb.mxu0 %v4611_v63 }
 0xa3a   :  { %700 = vmatpush.msrb.mxu2 %v4402_v27 }
 0xa81   :  { %v502_v2 = vpop.permute.xlu2 %501 }
 0xa82   :  { %v504_v6 = vadd.f32 %v502_v2, %v464_v13  ;;  %v4615_v2 = vld [vmem:[#allocation2 + $0x138] sm:$0x1] }
 0xa84   :  { %3932 = vtanh.f32 %v504_v6 }
 0xa89   :  { %v513_v13 = vpop.permute.xlu2 %512 }
 0xa8a   :  { %v3933_v14 = vpop.eup %3932  ;;  %v515_v16 = vmul.f32 %v3931_v17, %v513_v13 }
 0xa8b   :  { %508 = vrot.lane.b32.xlu1 %v3933_v14, %s4330_s1 }
 0xa91   :  { %v682_v17 = vpop.permute.xlu2 %681 }
 0xafd   :  { %v509_v31 = vpop.permute.xlu1 %508 }
 0xafe   :  { %v511_v18 = vmul.f32 %v509_v31, %v506_v15 }
 0xb00   :  { %v4581_v20 = vadd.f32 %v515_v16, %v511_v18  ;;  %v4625_v18 = vld [vmem:[#allocation2 + $0x170] sm:$0xff] }
 0xb01   :  { %584 = vmatpush.msrb.mxu0 %v4625_v18 }
 0xb02   :  { %518 = vrot.lane.b32.xlu1 %v4581_v20, %s4330_s1 }
 0xb74   :  { %v519_v34 = vpop.permute.xlu1 %518 }
 0xb75   :  { %3776 = vmatmul.msk.f32.vlgmr.msra.gmra.mxu2 %vm145_vm1, %v519_v34 }
 0xb76   :  { %3785 = vmatpush.msk.msra.mxu2 %vm386_vm7, %v4532_v32 }
 0xb7d   :  { %3780 = vmatmul.msk.f32.vlgmr.msrb.gmra.mxu2 %vm145_vm1, %v682_v17 }
 0xb7e   :  { %1005 = vmatpush.msrb.mxu2 %v4585_v29 }
 0xb80   :  { %1006 = vmatpush.msrb.mxu2 %v4587_v30 }
 0xb82   :  { %1007 = vmatpush.msrb.mxu2 %v4597_v43 }
 0xb84   :  { %1008 = vmatpush.msrb.mxu2 %v4601_v44 }
 0xbf8   :  { %v539_v6 = vpop.f32.mrf.mxu2 }
 0xbf9   :  { %v540_v14 = vadd.f32 %v539_v6, %v4615_v2  ;;  %v4629_v6 = vld [vmem:[#allocation2 + $0x168] sm:$0xff] }
 0xbfa   :  { %585 = vmatpush.msrb.mxu0 %v4629_v6 }
 0xbfb   :  { %v542_v13 = vmax.f32 %v540_v14, 0.0  ;;  %v4637_v14 = vld [vmem:[#allocation2 + $0x160] sm:$0x1] }
 0xbfc   :  { %745 = vmatpush.msra.mxu0 %v4424_v41 }
 0xbfd   :  { %3777 = vmatmul.msk.f32.vlgmr.msra.gmra.mxu3 %vm145_vm1, %v542_v13 }
 0xbfe   :  { %3787 = vmatpush.msk.msra.mxu3 %vm386_vm7, %v4541_v57  ;;  %746 = vmatpush.msra.mxu0 %v4426_v42 }
 0xc00   :  { %v702_v15 = vpop.f32.mrf.mxu2  ;;  %747 = vmatpush.msra.mxu0 %v4434_v49 }
 0xc01   :  { %v703_v31 = vadd.f32 %v702_v15, %v4430_v45 }
 0xc02   :  { %748 = vmatpush.msra.mxu0 %v4437_v50 }
 0xc03   :  { %v705_v16 = vmax.f32 %v703_v31, 0.0 }
 0xc05   :  { %3781 = vmatmul.msk.f32.vlgmr.msrb.gmra.mxu3 %vm145_vm1, %v705_v16 }
 0xc06   :  { %1029 = vmatpush.msrb.mxu3 %v4609_v37 }
 0xc08   :  { %1030 = vmatpush.msrb.mxu3 %v4611_v63 }
 0xc0a   :  { %1031 = vmatpush.msrb.mxu3 %v4625_v18 }
 0xc0c   :  { %1032 = vmatpush.msrb.mxu3 %v4629_v6 }
 0xc80   :  { %v563_v13 = vpop.f32.mrf.mxu3 }
 0xc81   :  { %v564_v15 = vadd.f32 %v563_v13, %v4637_v14 }
 0xc83   :  { %v566_v31 = vmax.f32 %v564_v15, 0.0 }
 0xc85   :  { %3778 = vmatmul.msk.f32.vlgmr.msrb.gmra.mxu0 %vm145_vm1, %v566_v31 }
 0xc86   :  { %931 = vmatpush.msrb.mxu0 %v4440_v51 }
 0xc88   :  { %v726_v16 = vpop.f32.mrf.mxu3  ;;  %932 = vmatpush.msrb.mxu0 %v4442_v52 }
 0xc89   :  { %v727_v46 = vadd.f32 %v726_v16, %v4452_v55 }
 0xc8a   :  { %933 = vmatpush.msrb.mxu0 %v4445_v53 }
 0xc8b   :  { %v729_v11 = vmax.f32 %v727_v46, 0.0 }
 0xc8c   :  { %934 = vmatpush.msrb.mxu0 %v4448_v54 }
 0xc8d   :  { %3782 = vmatmul.msk.f32.vlgmr.msra.gmra.mxu0 %vm145_vm1, %v729_v11 }
 0xc8e   :  { %1087 = vmatpush.msra.mxu0 %v4366_v0 }
 0xc90   :  { %1088 = vmatpush.msra.mxu0 %v4368_v1 }
 0xc92   :  { %1089 = vmatpush.msra.mxu0 %v4371_v3 }
 0xc94   :  { %1090 = vmatpush.msra.mxu0 %v4378_v5 }
 0xc95   :  { %3789 = vmatmul.msk.f32.vlgmr.msrb.gmra.mxu0 %vm145_vm1, %v519_v34 }
 0xc96   :  { %3797 = vmatpush.msk.msrb.mxu0 %vm386_vm7, %v4525_v21 }
 0xc9d   :  { %3793 = vmatmul.msk.f32.vlgmr.msra.gmra.mxu0 %vm145_vm1, %v682_v17 }
 0xc9e   :  { %1426 = vmatpush.msra.mxu0 %v4561_v10 }
 0xca0   :  { %1427 = vmatpush.msra.mxu0 %v4563_v33 }
 0xca2   :  { %1428 = vmatpush.msra.mxu0 %v4567_v59 }
 0xca4   :  { %1429 = vmatpush.msra.mxu0 %v4571_v61 }
 0xd02   :  { %v4659_v0 = vpop.f32.mrf.mxu0 }
 0xd03   :  { %5734 = vst [vmem:[#allocation16_spill] sm:$0xff] %v4659_v0 }
 0xd0a   :  { %v750_v1 = vpop.f32.mrf.mxu0 }
 0xd0b   :  { %v4662_v3 = vadd.f32 %v750_v1, %v4465_v60 }
 0xd0d   :  { %5735 = vst [vmem:[#allocation17_spill] sm:$0xff] %v4662_v3  ;;  %v754_v5 = vmin.f32 %v4662_v3, 1.0  ;;  %vm753_vm9 = vcmp.gt.f32.partialorder %v4662_v3, 1.0 }
 0xd0f   :  { %v755_v11 = vmul.f32 1.442695, %v754_v5 }
 0xd11   :  { %3934 = vpow2.f32 %v755_v11 }
 0xd17   :  { %v3935_v46 = vpop.eup %3934 }
 0xd18   :  { %v757_v34 = vadd.f32 1.0, %v3935_v46 }
 0xd1a   :  { %3936 = vlog2.f32 %v757_v34 }
 0xd20   :  { %v3937_v17 = vpop.eup %3936 }
 0xd21   :  { %v759_v13 = vmul.f32 0.6931472, %v3937_v17 }
 0xd23   :  { %v4667_v15 = vsel %vm753_vm9, %v4662_v3, %v759_v13  ;;  %vm622_vm9 = vcmask 122976  }
 0xd24   :  { %5736 = vst [vmem:[#allocation18_spill] sm:$0xff] %v4667_v15  ;;  %v761_v31 = vmul.f32 0.5, %v4667_v15 }
 0xd26   :  { %v762_v16 = vmul.f32 1.442695, %v761_v31 }
 0xd28   :  { %3938 = vpow2.f32 %v762_v16 }
 0xd2e   :  { %v3939_v1 = vpop.eup %3938 }
 0xd2f   :  { %v765_v62 = vrot.slane %v3939_v1, 7 }
 0xd31   :  { %766 = vrot.lane.b32.xlu0 %v765_v62, %s4332_s22 }
 0xda3   :  { %v767_v5 = vpop.permute.xlu0 %766 }
 0xda4   :  { %v769_v11 = vmul.f32 %v767_v5, %v4373_v4 }
 0xda6   :  { %v771_v46 = vrot.slane %v769_v11, 1 }
 0xda8   :  { %772 = vrot.lane.b32.xlu1 %v771_v46, %s4333_s23 }
 0xe1a   :  { %v773_v34 = vpop.permute.xlu1 %772 }
 0xe1b   :  { %v775_v17 = vadd.f32 %v773_v34, %v4662_v3 }
 0xe1d   :  { %v776_v13 = vmul.f32 %v775_v17, %v4479_v19 }
 0xe1f   :  { %v777_v0 = vsel %vm292_vm3, %v776_v13, 0.0 }
 0xe20   :  { %778 = vadd.xlane.f32.xlu2 %v777_v0 }
 0xe93   :  { %v779_v31 = vpop.xlane.xlu2 %778 }
 0xe94   :  { %v780_v16 = vadd.f32 %v779_v31, %v4484_v28 }
 0xe96   :  { %3940 = vtanh.f32 %v780_v16 }
 0xe9c   :  { %v3941_v1 = vpop.eup %3940 }
 0xe9d   :  { %784 = vperm.xlu0 %3897, %v3941_v1  }
 0xf0f   :  { %v785_v62 = vpop.permute.xlu0 %784 }
 0xf10   :  { %v787_v4 = vmul.f32 %v785_v62, %v4494_v56 }
 0xf12   :  { %v788_v5 = vadd.f32 %v787_v4, %v775_v17  ;;  %v936_v4 = vpop.f32.mrf.mxu0 }
 0xf14   :  { %v790_v11 = vrot.slane %v788_v5, 7 }
 0xf16   :  { %v792_v46 = vmul.f32 %v790_v11, %v4479_v19  ;;  %v937_v11 = vadd.f32 %v936_v4, %v4513_v47 }
 0xf18   :  { %v793_v34 = vsel %vm309_vm4, %v792_v46, 0.0 }
 0xf19   :  { %794 = vadd.xlane.f32.xlu1 %v793_v34 }
 0xf8c   :  { %v795_v15 = vpop.xlane.xlu1 %794 }
 0xf8d   :  { %v796_v13 = vadd.f32 %v795_v15, %v4499_v8 }
 0xf8f   :  { %3942 = vtanh.f32 %v796_v13  ;;  %v1092_v13 = vpop.f32.mrf.mxu0 }
 0xf95   :  { %v3943_v0 = vpop.eup %3942 }
 0xf96   :  { %800 = vperm.xlu0 %3897, %v3943_v0  }
0x1008   :  { %v801_v31 = vpop.permute.xlu0 %800 }
0x1009   :  { %v803_v16 = vmul.f32 %v801_v31, %v4494_v56 }
0x100b   :  { %v805_v1 = vrot.slane %v803_v16, 1 }
0x100d   :  { %v807_v3 = vadd.f32 %v805_v1, %v788_v5  ;;  %v1093_v5 = vadd.f32 %v1092_v13, %v4383_v7 }
0x100f   :  { %v809_v28 = vrot.slane %v807_v3, 6  ;;  %v1096_v0 = vrot.slane %v1093_v5, 6 }
0x1011   :  { %v811_v17 = vmul.f32 %v809_v28, %v4479_v19 }
0x1013   :  { %v812_v62 = vsel %vm334_vm5, %v811_v17, 0.0 }
0x1014   :  { %813 = vadd.xlane.f32.xlu0 %v812_v62 }
0x1028   :  { %946 = vrot.lane.b32.xlu0 %v937_v11, %s4329_s0 }
0x1087   :  { %v814_v15 = vpop.xlane.xlu0 %813 }
0x1088   :  { %v815_v46 = vadd.f32 %v814_v15, %v4505_v22  ;;  %v1098_v15 = vadd.f32 %v1096_v0, %v4387_v12 }
0x108a   :  { %3944 = vtanh.f32 %v815_v46  ;;  %v1099_v46 = vsub.f32 0.0, %v1098_v15 }
0x1090   :  { %v3945_v34 = vpop.eup %3944 }
0x1091   :  { %819 = vperm.xlu2 %3896, %v3945_v34   ;;  %v1100_v34 = vmul.f32 1.442695, %v1099_v46 }
0x1093   :  { %3946 = vpow2.f32 %v1100_v34 }
0x1099   :  { %1104 = vrot.lane.b32.xlu2 %v1096_v0, %s4329_s0  ;;  %v3947_v5 = vpop.eup %3946 }
0x109a   :  { %v1102_v22 = vadd.f32 1.0, %v3947_v5  ;;  %v947_v5 = vpop.permute.xlu0 %946 }
0x10eb   :  { %v820_v28 = vpop.permute.xlu2 %819 }
0x10ec   :  { %v822_v31 = vmul.f32 %v820_v28, %v4494_v56 }
0x10ee   :  { %v824_v16 = vrot.slane %v822_v31, 2 }
0x10f0   :  { %v826_v1 = vadd.f32 %v824_v16, %v807_v3 }
0x10f2   :  { %v828_v17 = vrot.slane %v826_v1, 5 }
0x10f3   :  { %v1105_v3 = vpop.permute.xlu2 %1104 }
0x10f4   :  { %v830_v62 = vmul.f32 %v828_v17, %v4479_v19 }
0x10f6   :  { %v831_v4 = vsel %vm358_vm6, %v830_v62, 0.0 }
0x10f7   :  { %832 = vadd.xlane.f32.xlu1 %v831_v4 }
0x116a   :  { %v833_v7 = vpop.xlane.xlu1 %832 }
0x116b   :  { %v834_v13 = vadd.f32 %v833_v7, %v4507_v23 }
0x116d   :  { %3948 = vtanh.f32 %v834_v13 }
0x116e   :  { %3950 = vrcp.f32 %v1102_v22  ;;  %v846_v22 = vrot.slane %v4510_v35, 1 }
0x1173   :  { %v3949_v28 = vpop.eup %3948 }
0x1174   :  { %838 = vperm.xlu1 %3900, %v3949_v28   ;;  %v3951_v31 = vpop.eup %3950 }
0x1175   :  { %v1107_v16 = vmul.f32 %v3951_v31, %v1105_v3  ;;  %v1114_v28 = vsub.f32 1.0, %v3951_v31  ;;  %v1120_v3 = vrot.slane %v4556_v58, 7 }
0x117c   :  { %1109 = vrot.lane.b32.xlu1 %v1107_v16, %s4329_s0 }
0x11e6   :  { %v839_v17 = vpop.permute.xlu1 %838 }
0x11e7   :  { %v841_v0 = vmul.f32 %v839_v17, %v4494_v56 }
0x11e9   :  { %v843_v62 = vrot.slane %v841_v0, 3 }
0x11eb   :  { %v4696_v4 = vadd.f32 %v843_v62, %v826_v1  ;;  %v1122_v62 = vmul.f32 %v3951_v31, %v1120_v3 }
0x11ed   :  { %5737 = vst [vmem:[#allocation19_spill] sm:$0xff] %v4696_v4  ;;  %3784 = vmatmul.msk.f32.vlgmr.msra.gmra.mxu1 %vm382_vm8, %v4696_v4 }
0x11ee   :  { %1142 = vmatpush.msra.mxu1 %v4394_v24  ;;  %v871_v24 = vrot.slane %v4515_v48, 1  ;;  %v1110_v7 = vpop.permute.xlu1 %1109 }
0x11f0   :  { %1143 = vmatpush.msra.mxu1 %v4396_v25 }
0x11f2   :  { %1144 = vmatpush.msra.mxu1 %v4399_v26 }
0x11f4   :  { %1145 = vmatpush.msra.mxu1 %v4402_v27 }
0x126a   :  { %v868_v15 = vpop.f32.mrf.mxu1 }
0x126b   :  { %v869_v46 = vadd.f32 %v868_v15, %v846_v22 }
0x126d   :  { %3786 = vmatmul.msk.f32.vlgmr.msra.gmra.mxu2 %vm382_vm8, %v869_v46 }
0x126e   :  { %1166 = vmatpush.msra.mxu2 %v4410_v36 }
0x1270   :  { %1167 = vmatpush.msra.mxu2 %v4415_v38 }
0x1272   :  { %1168 = vmatpush.msra.mxu2 %v4418_v39 }
0x1274   :  { %1169 = vmatpush.msra.mxu2 %v4421_v40 }
0x12f0   :  { %v893_v25 = vpop.f32.mrf.mxu2 }
0x12f1   :  { %v894_v26 = vadd.f32 %v893_v25, %v871_v24 }
0x12f3   :  { %3788 = vmatmul.msk.f32.vlgmr.msra.gmra.mxu3 %vm382_vm8, %v894_v26 }
0x12f4   :  { %1190 = vmatpush.msra.mxu3 %v4424_v41  ;;  %v1112_v41 = vadd.f32 %v1110_v7, %v4387_v12 }
0x12f6   :  { %1191 = vmatpush.msra.mxu3 %v4426_v42 }
0x12f8   :  { %1192 = vmatpush.msra.mxu3 %v4434_v49 }
0x12fa   :  { %1193 = vmatpush.msra.mxu3 %v4437_v50 }
0x1376   :  { %v916_v27 = vpop.f32.mrf.mxu3 }
0x1377   :  { %v917_v36 = vadd.f32 %v916_v27, %v4549_v9 }
0x1379   :  { %v939_v38 = vadd.f32 %v937_v11, %v917_v36 }
0x137b   :  { %v940_v39 = vsub.f32 0.0, %v939_v38 }
0x137d   :  { %v941_v40 = vmul.f32 1.442695, %v940_v39 }
0x137f   :  { %3952 = vpow2.f32 %v941_v40 }
0x1385   :  { %v3953_v1 = vpop.eup %3952 }
0x1386   :  { %v943_v34 = vadd.f32 1.0, %v3953_v1 }
0x1388   :  { %3954 = vrcp.f32 %v943_v34 }
0x1389   :  { %3956 = vtanh.f32 %v1112_v41 }
0x138e   :  { %v3955_v13 = vpop.eup %3954 }
0x138f   :  { %v949_v42 = vmul.f32 %v3955_v13, %v947_v5  ;;  %v3957_v49 = vpop.eup %3956  ;;  %v956_v46 = vsub.f32 1.0, %v3955_v13  ;;  %v962_v25 = vmul.f32 %v3955_v13, %v4581_v20 }
0x1391   :  { %951 = vrot.lane.b32.xlu2 %v949_v42, %s4329_s0 }
0x1399   :  { %1116 = vrot.lane.b32.xlu2 %v3957_v49, %s4330_s1  ;;  %v4757_v49 = vld [vmem:[#allocation2 + $0x20] sm:$0xff] }
0x13eb   :  { %v952_v50 = vpop.permute.xlu2 %951 }
0x13ec   :  { %v954_v11 = vadd.f32 %v952_v50, %v917_v36  ;;  %v4760_v50 = vld [vmem:[#allocation2 + $0x18] sm:$0xff] }
0x13ee   :  { %3958 = vtanh.f32 %v954_v11 }
0x13f3   :  { %v1117_v16 = vpop.permute.xlu2 %1116 }
0x13f4   :  { %v3959_v17 = vpop.eup %3958  ;;  %v1119_v0 = vmul.f32 %v1117_v16, %v1114_v28 }
0x13f5   :  { %958 = vrot.lane.b32.xlu0 %v3959_v17, %s4330_s1 }
0x13f6   :  { %v4722_v22 = vadd.f32 %v1122_v62, %v1119_v0 }
0x13f8   :  { %v1125_v15 = vrot.slane %v4722_v22, 2 }
0x13fd   :  { %1126 = vrot.lane.b32.xlu0 %v1125_v15, %s4330_s1 }
0x1467   :  { %v959_v24 = vpop.permute.xlu0 %958 }
0x1468   :  { %v961_v26 = vmul.f32 %v959_v24, %v956_v46 }
0x146a   :  { %v4727_v27 = vadd.f32 %v962_v25, %v961_v26  ;;  %v4789_v25 = vld [vmem:[#allocation5] sm:$0xff] }
0x146c   :  { %965 = vrot.lane.b32.xlu1 %v4727_v27, %s4330_s1 }
0x146f   :  { %v1127_v31 = vpop.permute.xlu0 %1126 }
0x14de   :  { %v966_v58 = vpop.permute.xlu1 %965 }
0x14df   :  { %3790 = vmatmul.msk.f32.vlgmr.msrb.gmra.mxu1 %vm145_vm1, %v966_v58 }
0x14e0   :  { %3799 = vmatpush.msk.msrb.mxu1 %vm386_vm7, %v4532_v32 }
0x14e7   :  { %3794 = vmatmul.msk.f32.vlgmr.msra.gmra.mxu1 %vm145_vm1, %v1127_v31 }
0x14e8   :  { %1450 = vmatpush.msra.mxu1 %v4585_v29 }
0x14ea   :  { %1451 = vmatpush.msra.mxu1 %v4587_v30 }
0x14ec   :  { %1452 = vmatpush.msra.mxu1 %v4597_v43 }
0x14ee   :  { %1453 = vmatpush.msra.mxu1 %v4601_v44 }
0x155c   :  { %v986_v20 = vpop.f32.mrf.mxu1 }
0x155d   :  { %v987_v36 = vadd.f32 %v986_v20, %v4615_v2 }
0x155f   :  { %v989_v38 = vmax.f32 %v987_v36, 0.0 }
0x1561   :  { %3791 = vmatmul.msk.f32.vlgmr.msrb.gmra.mxu2 %vm145_vm1, %v989_v38 }
0x1562   :  { %3801 = vmatpush.msk.msrb.mxu2 %vm386_vm7, %v4541_v57 }
0x1564   :  { %v1147_v39 = vpop.f32.mrf.mxu1 }
0x1565   :  { %v1148_v40 = vadd.f32 %v1147_v39, %v4430_v45 }
0x1567   :  { %v1150_v1 = vmax.f32 %v1148_v40, 0.0  ;;  %v5741_v40 = vld [vmem:[#allocation13_spill] sm:$0xff] }
0x1569   :  { %3795 = vmatmul.msk.f32.vlgmr.msra.gmra.mxu2 %vm145_vm1, %v1150_v1 }
0x156a   :  { %1474 = vmatpush.msra.mxu2 %v4609_v37 }
0x156c   :  { %1475 = vmatpush.msra.mxu2 %v4611_v63 }
0x156e   :  { %1476 = vmatpush.msra.mxu2 %v4625_v18 }
0x1570   :  { %1477 = vmatpush.msra.mxu2 %v4629_v6 }
0x15e4   :  { %v1010_v34 = vpop.f32.mrf.mxu2 }
0x15e5   :  { %v1011_v7 = vadd.f32 %v1010_v34, %v4637_v14 }
0x15e7   :  { %v1013_v13 = vmax.f32 %v1011_v7, 0.0 }
0x15e9   :  { %3792 = vmatmul.msk.f32.vlgmr.msrb.gmra.mxu3 %vm145_vm1, %v1013_v13 }
0x15ea   :  { %1376 = vmatpush.msrb.mxu3 %v4440_v51  ;;  %v4763_v51 = vld [vmem:[#allocation2 + $0x10] sm:$0xff] }
0x15ec   :  { %v1171_v5 = vpop.f32.mrf.mxu2  ;;  %1377 = vmatpush.msrb.mxu3 %v4442_v52  ;;  %v4766_v52 = vld [vmem:[#allocation2 + $0x8] sm:$0xff] }
0x15ed   :  { %v1172_v41 = vadd.f32 %v1171_v5, %v4452_v55 }
0x15ee   :  { %1378 = vmatpush.msrb.mxu3 %v4445_v53 }
0x15ef   :  { %v1174_v42 = vmax.f32 %v1172_v41, 0.0 }
0x15f0   :  { %1379 = vmatpush.msrb.mxu3 %v4448_v54 }
0x15f1   :  { %3796 = vmatmul.msk.f32.vlgmr.msra.gmra.mxu3 %vm145_vm1, %v1174_v42 }
0x15f2   :  { %1532 = vmatpush.msra.mxu3 %v4757_v49 }
0x15f4   :  { %1533 = vmatpush.msra.mxu3 %v4760_v50 }
0x15f6   :  { %1534 = vmatpush.msra.mxu3 %v4763_v51 }
0x15f8   :  { %1535 = vmatpush.msra.mxu3 %v4766_v52 }
0x15f9   :  { %3803 = vmatmul.msk.f32.vlgmr.msrb.gmra.mxu3 %vm145_vm1, %v966_v58 }
0x15fa   :  { %3811 = vmatpush.msk.msrb.mxu3 %vm386_vm7, %v4525_v21 }
0x1601   :  { %3807 = vmatmul.msk.f32.vlgmr.msra.gmra.mxu3 %vm145_vm1, %v1127_v31 }
0x1602   :  { %1871 = vmatpush.msra.mxu3 %v4561_v10 }
0x1604   :  { %1872 = vmatpush.msra.mxu3 %v4563_v33 }
0x1606   :  { %1873 = vmatpush.msra.mxu3 %v4567_v59 }
0x1608   :  { %1874 = vmatpush.msra.mxu3 %v4571_v61 }
0x166c   :  { %v4777_v53 = vpop.f32.mrf.mxu3 }
0x166d   :  { %5738 = vst [vmem:[#allocation20_spill] sm:$0xff] %v4777_v53 }
0x1674   :  { %v1195_v54 = vpop.f32.mrf.mxu3 }
0x1675   :  { %v4780_v55 = vadd.f32 %v1195_v54, %v4465_v60 }
0x1677   :  { %5739 = vst [vmem:[#allocation21_spill] sm:$0xff] %v4780_v55  ;;  %v1199_v11 = vmin.f32 %v4780_v55, 1.0  ;;  %vm1198_vm10 = vcmp.gt.f32.partialorder %v4780_v55, 1.0 }
0x1679   :  { %v1200_v28 = vmul.f32 1.442695, %v1199_v11 }
0x167b   :  { %3960 = vpow2.f32 %v1200_v28 }
0x1681   :  { %v3961_v21 = vpop.eup %3960 }
0x1682   :  { %v1202_v3 = vadd.f32 1.0, %v3961_v21 }
0x1684   :  { %3962 = vlog2.f32 %v1202_v3 }
0x168a   :  { %v3963_v16 = vpop.eup %3962 }
0x168b   :  { %v1204_v17 = vmul.f32 0.6931472, %v3963_v16 }
0x168d   :  { %v4785_v0 = vsel %vm1198_vm10, %v4780_v55, %v1204_v17  ;;  %vm628_vm10 = vcmask 155776  }
0x168e   :  { %5740 = vst [vmem:[#allocation22_spill] sm:$0xff] %v4785_v0  ;;  %v1206_v62 = vmul.f32 0.5, %v4785_v0 }
0x1690   :  { %v1207_v15 = vmul.f32 1.442695, %v1206_v62 }
0x1692   :  { %3964 = vpow2.f32 %v1207_v15 }
0x1698   :  { %v3965_v60 = vpop.eup %3964 }
0x1699   :  { %v1210_v46 = vrot.slane %v3965_v60, 6 }
0x169b   :  { %1211 = vrot.lane.b32.xlu2 %v1210_v46, %s4332_s22 }
0x16f5   :  { %v1212_v24 = vpop.permute.xlu2 %1211 }
0x16f6   :  { %v1214_v26 = vmul.f32 %v4789_v25, %v1212_v24  ;;  %v1381_v24 = vpop.f32.mrf.mxu3 }
0x16f8   :  { %v1216_v58 = vrot.slane %v1214_v26, 2  ;;  %v4805_v26 = vadd.f32 %v1381_v24, %v4513_v47 }
0x16fa   :  { %1217 = vrot.lane.b32.xlu1 %v1216_v58, %s4333_s23 }
0x176c   :  { %v1218_v31 = vpop.permute.xlu1 %1217 }
0x176d   :  { %v1220_v20 = vadd.f32 %v1218_v31, %v4780_v55  ;;  %v5742_v31 = vld [vmem:[#allocation14_spill] sm:$0xff] }
0x176f   :  { %v1221_v36 = vmul.f32 %v1220_v20, %v4479_v19 }
0x1771   :  { %v1222_v38 = vsel %vm292_vm3, %v1221_v36, 0.0 }
0x1772   :  { %1223 = vadd.xlane.f32.xlu0 %v1222_v38  ;;  %v1537_v38 = vpop.f32.mrf.mxu3 }
0x17e5   :  { %v1224_v39 = vpop.xlane.xlu0 %1223 }
0x17e6   :  { %v1225_v1 = vadd.f32 %v1224_v39, %v5741_v40  ;;  %v4810_v39 = vld [vmem:[#allocation2 + $0x30] sm:$0x1] }
0x17e7   :  { %v1538_v40 = vadd.f32 %v4810_v39, %v1537_v38  ;;  %v4846_v38 = vld [vmem:[#allocation2 + $0xa0] sm:$0xff] }
0x17e8   :  { %3966 = vtanh.f32 %v1225_v1 }
0x17e9   :  { %v1541_v1 = vrot.slane %v1538_v40, 5  ;;  %v1316_v40 = vrot.slane %v4515_v48, 2 }
0x17ee   :  { %v3967_v34 = vpop.eup %3966 }
0x17ef   :  { %1229 = vperm.xlu2 %3896, %v3967_v34  }
0x1849   :  { %v1230_v7 = vpop.permute.xlu2 %1229 }
0x184a   :  { %v1232_v13 = vmul.f32 %v1230_v7, %v4494_v56 }
0x184c   :  { %v1233_v5 = vadd.f32 %v1232_v13, %v1220_v20 }
0x184e   :  { %v1235_v41 = vrot.slane %v1233_v5, 7 }
0x1850   :  { %v1237_v42 = vmul.f32 %v1235_v41, %v4479_v19 }
0x1852   :  { %v1238_v54 = vsel %vm309_vm4, %v1237_v42, 0.0 }
0x1853   :  { %1239 = vadd.xlane.f32.xlu1 %v1238_v54 }
0x18c6   :  { %v1240_v11 = vpop.xlane.xlu1 %1239 }
0x18c7   :  { %v1241_v28 = vadd.f32 %v1240_v11, %v4499_v8 }
0x18c9   :  { %3968 = vtanh.f32 %v1241_v28 }
0x18cf   :  { %v3969_v21 = vpop.eup %3968 }
0x18d0   :  { %1245 = vperm.xlu2 %3896, %v3969_v21  }
0x192a   :  { %v1246_v3 = vpop.permute.xlu2 %1245 }
0x192b   :  { %v1248_v16 = vmul.f32 %v1246_v3, %v4494_v56 }
0x192d   :  { %v1250_v17 = vrot.slane %v1248_v16, 1 }
0x192f   :  { %v1252_v62 = vadd.f32 %v1250_v17, %v1233_v5 }
0x1931   :  { %v1254_v15 = vrot.slane %v1252_v62, 6 }
0x1933   :  { %v1256_v60 = vmul.f32 %v1254_v15, %v4479_v19  ;;  %v4829_v15 = vld [vmem:[#allocation2 + $0x78] sm:$0xff] }
0x1935   :  { %v1257_v46 = vsel %vm334_vm5, %v1256_v60, 0.0  ;;  %v4832_v60 = vld [vmem:[#allocation2 + $0x70] sm:$0xff] }
0x1936   :  { %1258 = vadd.xlane.f32.xlu2 %v1257_v46 }
0x194e   :  { %1391 = vrot.lane.b32.xlu2 %v4805_v26, %s4329_s0 }
0x19a9   :  { %v1259_v58 = vpop.xlane.xlu2 %1258 }
0x19aa   :  { %v1260_v20 = vadd.f32 %v1259_v58, %v5742_v31  ;;  %v4837_v58 = vld [vmem:[#allocation2 + $0xb8] sm:$0xff] }
0x19ac   :  { %3970 = vtanh.f32 %v1260_v20  ;;  %v4840_v20 = vld [vmem:[#allocation2 + $0xb0] sm:$0xff] }
0x19b1   :  { %v1392_v55 = vpop.permute.xlu2 %1391 }
0x19b2   :  { %v3971_v36 = vpop.eup %3970 }
0x19b3   :  { %1264 = vperm.xlu0 %3897, %v3971_v36   ;;  %v4843_v36 = vld [vmem:[#allocation2 + $0xa8] sm:$0xff] }
0x19bb   :  { %1549 = vrot.lane.b32.xlu0 %v1541_v1, %s4329_s0 }
0x1a25   :  { %v1265_v34 = vpop.permute.xlu0 %1264 }
0x1a26   :  { %v1267_v47 = vmul.f32 %v1265_v34, %v4494_v56 }
0x1a28   :  { %v1269_v7 = vrot.slane %v1267_v47, 2 }
0x1a2a   :  { %v1271_v13 = vadd.f32 %v1269_v7, %v1252_v62  ;;  %v4823_v62 = vld [vmem:[#allocation2 + $0x88] sm:$0xff]  ;;  %v4851_v7 = vld [vmem:[#allocation2 + $0xe0] sm:$0xff] }
0x1a2c   :  { %v1273_v5 = vrot.slane %v1271_v13, 5 }
0x1a2e   :  { %v1275_v41 = vmul.f32 %v1273_v5, %v4479_v19  ;;  %v4826_v19 = vld [vmem:[#allocation2 + $0x80] sm:$0xff]  ;;  %v4857_v5 = vld [vmem:[#allocation2 + $0xd0] sm:$0xff] }
0x1a30   :  { %v1276_v42 = vsel %vm358_vm6, %v1275_v41, 0.0  ;;  %v4860_v41 = vld [vmem:[#allocation2 + $0xc8] sm:$0xff] }
0x1a31   :  { %1277 = vadd.xlane.f32.xlu1 %v1276_v42 }
0x1aa4   :  { %v1278_v54 = vpop.xlane.xlu1 %1277 }
0x1aa5   :  { %v1279_v11 = vadd.f32 %v1278_v54, %v4507_v23  ;;  %v1543_v54 = vadd.f32 %v1541_v1, %v4387_v12 }
0x1aa7   :  { %3972 = vtanh.f32 %v1279_v11 }
0x1aad   :  { %v3973_v28 = vpop.eup %3972 }
0x1aae   :  { %1283 = vperm.xlu1 %3900, %v3973_v28  }
0x1b20   :  { %v1284_v21 = vpop.permute.xlu1 %1283 }
0x1b21   :  { %v1286_v3 = vmul.f32 %v1284_v21, %v4494_v56  ;;  %v1291_v56 = vrot.slane %v4510_v35, 2  ;;  %v1544_v21 = vsub.f32 0.0, %v1543_v54 }
0x1b23   :  { %v1288_v16 = vrot.slane %v1286_v3, 3 }
0x1b25   :  { %v4819_v17 = vadd.f32 %v1288_v16, %v1271_v13  ;;  %v4854_v13 = vld [vmem:[#allocation2 + $0xd8] sm:$0xff] }
0x1b27   :  { %5743 = vst [vmem:[#allocation13_spill] sm:$0xff] %v4819_v17  ;;  %3798 = vmatmul.msk.f32.vlgmr.msrb.gmra.mxu0 %vm382_vm8, %v4819_v17 }
0x1b28   :  { %1587 = vmatpush.msrb.mxu0 %v4823_v62 }
0x1b2a   :  { %1588 = vmatpush.msrb.mxu0 %v4826_v19 }
0x1b2c   :  { %1589 = vmatpush.msrb.mxu0 %v4829_v15 }
0x1b2e   :  { %1590 = vmatpush.msrb.mxu0 %v4832_v60 }
0x1ba4   :  { %v1313_v46 = vpop.f32.mrf.mxu0 }
0x1ba5   :  { %v1314_v24 = vadd.f32 %v1313_v46, %v1291_v56  ;;  %v1545_v56 = vmul.f32 1.442695, %v1544_v21 }
0x1ba7   :  { %3800 = vmatmul.msk.f32.vlgmr.msrb.gmra.mxu1 %vm382_vm8, %v1314_v24 }
0x1ba8   :  { %1611 = vmatpush.msrb.mxu1 %v4837_v58 }
0x1baa   :  { %1612 = vmatpush.msrb.mxu1 %v4840_v20 }
0x1bac   :  { %1613 = vmatpush.msrb.mxu1 %v4843_v36 }
0x1bae   :  { %1614 = vmatpush.msrb.mxu1 %v4846_v38 }
0x1c24   :  { %v1338_v34 = vpop.f32.mrf.mxu1 }
0x1c25   :  { %v1339_v47 = vadd.f32 %v1338_v34, %v1316_v40 }
0x1c27   :  { %3802 = vmatmul.msk.f32.vlgmr.msrb.gmra.mxu2 %vm382_vm8, %v1339_v47 }
0x1c28   :  { %1635 = vmatpush.msrb.mxu2 %v4851_v7 }
0x1c2a   :  { %1636 = vmatpush.msrb.mxu2 %v4854_v13 }
0x1c2c   :  { %1637 = vmatpush.msrb.mxu2 %v4857_v5 }
0x1c2e   :  { %1638 = vmatpush.msrb.mxu2 %v4860_v41 }
0x1caa   :  { %v1361_v42 = vpop.f32.mrf.mxu2 }
0x1cab   :  { %v1362_v11 = vadd.f32 %v1361_v42, %v4549_v9  ;;  %v1550_v9 = vpop.permute.xlu0 %1549 }
0x1cad   :  { %v1384_v28 = vadd.f32 %v4805_v26, %v1362_v11 }
0x1caf   :  { %v1385_v3 = vsub.f32 0.0, %v1384_v28 }
0x1cb1   :  { %v1386_v16 = vmul.f32 1.442695, %v1385_v3 }
0x1cb3   :  { %3974 = vpow2.f32 %v1386_v16 }
0x1cb4   :  { %3976 = vpow2.f32 %v1545_v56 }
0x1cb9   :  { %v3975_v46 = vpop.eup %3974 }
0x1cba   :  { %v1388_v24 = vadd.f32 1.0, %v3975_v46  ;;  %v3977_v40 = vpop.eup %3976 }
0x1cbb   :  { %v1547_v34 = vadd.f32 1.0, %v3977_v40 }
0x1cbc   :  { %3978 = vrcp.f32 %v1388_v24 }
0x1cbd   :  { %3980 = vrcp.f32 %v1547_v34 }
0x1cc2   :  { %v3979_v47 = vpop.eup %3978 }
0x1cc3   :  { %v1394_v17 = vmul.f32 %v3979_v47, %v1392_v55  ;;  %v3981_v1 = vpop.eup %3980  ;;  %v1565_v55 = vrot.slane %v4722_v22, 7  ;;  %v1401_v34 = vsub.f32 1.0, %v3979_v47 }
0x1cc4   :  { %v1552_v26 = vmul.f32 %v3981_v1, %v1550_v9 }
0x1cc5   :  { %1396 = vrot.lane.b32.xlu0 %v1394_v17, %s4329_s0  ;;  %v1559_v17 = vsub.f32 1.0, %v3981_v1  ;;  %v1567_v46 = vmul.f32 %v3981_v1, %v1565_v55 }
0x1ccd   :  { %1554 = vrot.lane.b32.xlu0 %v1552_v26, %s4329_s0  ;;  %v1407_v26 = vmul.f32 %v3979_v47, %v4727_v27 }
0x1d37   :  { %v1397_v42 = vpop.permute.xlu0 %1396 }
0x1d38   :  { %v1399_v54 = vadd.f32 %v1397_v42, %v1362_v11 }
0x1d3a   :  { %3982 = vtanh.f32 %v1399_v54 }
0x1d3f   :  { %v1555_v28 = vpop.permute.xlu0 %1554 }
0x1d40   :  { %v3983_v21 = vpop.eup %3982  ;;  %v1557_v3 = vadd.f32 %v1555_v28, %v4387_v12 }
0x1d41   :  { %1403 = vrot.lane.b32.xlu1 %v3983_v21, %s4330_s1 }
0x1d42   :  { %3984 = vtanh.f32 %v1557_v3 }
0x1d48   :  { %v3985_v16 = vpop.eup %3984 }
0x1d49   :  { %1561 = vrot.lane.b32.xlu2 %v3985_v16, %s4330_s1  ;;  %v4922_v16 = vld [vmem:[#allocation2 + $0x108] sm:$0xf] }
0x1da3   :  { %v1562_v56 = vpop.permute.xlu2 %1561 }
0x1da4   :  { %v1564_v24 = vmul.f32 %v1562_v56, %v1559_v17  ;;  %v4933_v56 = vld [vmem:[#allocation2 + $0xe8] sm:$0x1] }
0x1da6   :  { %v4872_v40 = vadd.f32 %v1567_v46, %v1564_v24 }
0x1da8   :  { %v1570_v11 = vrot.slane %v4872_v40, 3 }
0x1daa   :  { %1571 = vrot.lane.b32.xlu1 %v1570_v11, %s4330_s1 }
0x1db3   :  { %v1404_v9 = vpop.permute.xlu1 %1403 }
0x1db4   :  { %v1406_v42 = vmul.f32 %v1404_v9, %v1401_v34 }
0x1db6   :  { %v4877_v54 = vadd.f32 %v1407_v26, %v1406_v42 }
0x1db8   :  { %1410 = vrot.lane.b32.xlu0 %v4877_v54, %s4330_s1 }
0x1e1c   :  { %v1572_v1 = vpop.permute.xlu1 %1571 }
0x1e2a   :  { %v1411_v22 = vpop.permute.xlu0 %1410 }
0x1e2b   :  { %3804 = vmatmul.msk.f32.vlgmr.msra.gmra.mxu0 %vm145_vm1, %v1411_v22 }
0x1e2c   :  { %3813 = vmatpush.msk.msra.mxu0 %vm386_vm7, %v4532_v32 }
0x1e33   :  { %3808 = vmatmul.msk.f32.vlgmr.msrb.gmra.mxu0 %vm145_vm1, %v1572_v1 }
0x1e34   :  { %1895 = vmatpush.msrb.mxu0 %v4585_v29 }
0x1e36   :  { %1896 = vmatpush.msrb.mxu0 %v4587_v30 }
0x1e38   :  { %1897 = vmatpush.msrb.mxu0 %v4597_v43 }
0x1e3a   :  { %1898 = vmatpush.msrb.mxu0 %v4601_v44 }
0x1ea8   :  { %v1431_v27 = vpop.f32.mrf.mxu0 }
0x1ea9   :  { %v1432_v47 = vadd.f32 %v1431_v27, %v4615_v2  ;;  %v4904_v2 = vld [vmem:[#allocation2 + $0x50] sm:$0xff] }
0x1eab   :  { %v1434_v28 = vmax.f32 %v1432_v47, 0.0 }
0x1ead   :  { %3805 = vmatmul.msk.f32.vlgmr.msra.gmra.mxu1 %vm145_vm1, %v1434_v28 }
0x1eae   :  { %3815 = vmatpush.msk.msra.mxu1 %vm386_vm7, %v4541_v57  ;;  %v4901_v57 = vld [vmem:[#allocation2 + $0x58] sm:$0xff] }
0x1eb0   :  { %v1592_v32 = vpop.f32.mrf.mxu0 }
0x1eb1   :  { %v1593_v21 = vadd.f32 %v1592_v32, %v4430_v45 }
0x1eb3   :  { %v1595_v3 = vmax.f32 %v1593_v21, 0.0  ;;  %v4948_v21 = vld [vmem:[#allocation2 + $0xf8] sm:$0xf] }
0x1eb5   :  { %3809 = vmatmul.msk.f32.vlgmr.msrb.gmra.mxu1 %vm145_vm1, %v1595_v3 }
0x1eb6   :  { %1919 = vmatpush.msrb.mxu1 %v4609_v37  ;;  %v4907_v37 = vld [vmem:[#allocation2 + $0xc0] sm:$0x1] }
0x1eb8   :  { %1920 = vmatpush.msrb.mxu1 %v4611_v63 }
0x1eba   :  { %1921 = vmatpush.msrb.mxu1 %v4625_v18  ;;  %v4910_v18 = vld [vmem:[#allocation2 + $0x48] sm:$0xff] }
0x1ebc   :  { %1922 = vmatpush.msrb.mxu1 %v4629_v6 }
0x1f2a   :  { %v1455_v29 = vpop.f32.mrf.mxu1 }
0x1f2b   :  { %v1456_v30 = vadd.f32 %v1455_v29, %v4637_v14  ;;  %v4913_v14 = vld [vmem:[#allocation2 + $0x40] sm:$0xff] }
0x1f2d   :  { %v1458_v43 = vmax.f32 %v1456_v30, 0.0 }
0x1f2f   :  { %3806 = vmatmul.msk.f32.vlgmr.msra.gmra.mxu2 %vm145_vm1, %v1458_v43  ;;  %v4952_v43 = vld [vmem:[#allocation2 + $0x100] sm:$0x1] }
0x1f30   :  { %1821 = vmatpush.msra.mxu2 %v4901_v57  ;;  %5747 = vst [vmem:[#allocation26_spill] sm:$0xff] %v4952_v43 }
0x1f32   :  { %v1616_v44 = vpop.f32.mrf.mxu1  ;;  %1822 = vmatpush.msra.mxu2 %v4904_v2 }
0x1f33   :  { %v1617_v63 = vadd.f32 %v4907_v37, %v1616_v44 }
0x1f34   :  { %1823 = vmatpush.msra.mxu2 %v4910_v18 }
0x1f35   :  { %v1619_v6 = vmax.f32 %v1617_v63, 0.0 }
0x1f36   :  { %1824 = vmatpush.msra.mxu2 %v4913_v14 }
0x1f37   :  { %3810 = vmatmul.msk.f32.vlgmr.msrb.gmra.mxu2 %vm145_vm1, %v1619_v6 }
0x1f38   :  { %1977 = vmatpush.msrb.mxu2 %v4757_v49 }
0x1f3a   :  { %1978 = vmatpush.msrb.mxu2 %v4760_v50 }
0x1f3c   :  { %1979 = vmatpush.msrb.mxu2 %v4763_v51 }
0x1f3e   :  { %1980 = vmatpush.msrb.mxu2 %v4766_v52 }
0x1f3f   :  { %3817 = vmatmul.msk.f32.vlgmr.msra.gmra.mxu2 %vm145_vm1, %v1411_v22 }
0x1f40   :  { %3825 = vmatpush.msk.msra.mxu2 %vm386_vm7, %v4922_v16 }
0x1f47   :  { %3821 = vmatmul.msk.f32.vlgmr.msrb.gmra.mxu2 %vm145_vm1, %v1572_v1 }
0x1f48   :  { %2316 = vmatpush.msrb.mxu2 %v4561_v10 }
0x1f4a   :  { %2317 = vmatpush.msrb.mxu2 %v4563_v33 }
0x1f4c   :  { %2318 = vmatpush.msrb.mxu2 %v4567_v59 }
0x1f4e   :  { %2319 = vmatpush.msrb.mxu2 %v4571_v61 }
0x1fb2   :  { %v4931_v55 = vpop.f32.mrf.mxu2 }
0x1fb3   :  { %5744 = vst [vmem:[#allocation23_spill] sm:$0xff] %v4931_v55 }
0x1fba   :  { %v1640_v17 = vpop.f32.mrf.mxu2 }
0x1fbb   :  { %v4936_v46 = vadd.f32 %v4933_v56, %v1640_v17  ;;  %v4955_v17 = vld [vmem:[#allocation2 + $0xf0] sm:$0xf] }
0x1fbd   :  { %5745 = vst [vmem:[#allocation24_spill] sm:$0xff] %v4936_v46  ;;  %v1644_v24 = vmin.f32 %v4936_v46, 1.0  ;;  %vm1643_vm11 = vcmp.gt.f32.partialorder %v4936_v46, 1.0 }
0x1fbf   :  { %v1645_v11 = vmul.f32 1.442695, %v1644_v24 }
0x1fc1   :  { %3986 = vpow2.f32 %v1645_v11 }
0x1fc7   :  { %v3987_v34 = vpop.eup %3986 }
0x1fc8   :  { %v1647_v10 = vadd.f32 1.0, %v3987_v34 }
0x1fca   :  { %3988 = vlog2.f32 %v1647_v10 }
0x1fd0   :  { %v3989_v33 = vpop.eup %3988 }
0x1fd1   :  { %v1649_v9 = vmul.f32 0.6931472, %v3989_v33 }
0x1fd3   :  { %v4941_v59 = vsel %vm1643_vm11, %v4936_v46, %v1649_v9 }
0x1fd4   :  { %5746 = vst [vmem:[#allocation25_spill] sm:$0xff] %v4941_v59  ;;  %v1651_v61 = vmul.f32 0.5, %v4941_v59 }
0x1fd6   :  { %v1652_v26 = vmul.f32 1.442695, %v1651_v61 }
0x1fd8   :  { %3990 = vpow2.f32 %v1652_v26 }
0x1fde   :  { %v3991_v42 = vpop.eup %3990 }
0x1fdf   :  { %v1655_v22 = vrot.slane %v3991_v42, 5 }
0x1fe1   :  { %1656 = vrot.lane.b32.xlu2 %v1655_v22, %s4332_s22 }
0x203b   :  { %v1657_v1 = vpop.permute.xlu2 %1656 }
0x203c   :  { %v1659_v27 = vmul.f32 %v4789_v25, %v1657_v1 }
0x203e   :  { %v1661_v47 = vrot.slane %v1659_v27, 3 }
0x2040   :  { %1662 = vrot.lane.b32.xlu0 %v1661_v47, %s4333_s23 }
0x20b2   :  { %v1663_v28 = vpop.permute.xlu0 %1662 }
0x20b3   :  { %v1665_v32 = vadd.f32 %v1663_v28, %v4936_v46 }
0x20b5   :  { %v1666_v3 = vmul.f32 %v4948_v21, %v1665_v32 }
0x20b7   :  { %v1667_v29 = vsel %vm292_vm3, %v1666_v3, 0.0  ;;  %v1826_v3 = vpop.f32.mrf.mxu2 }
0x20b8   :  { %1668 = vadd.xlane.f32.xlu1 %v1667_v29  ;;  %v4964_v29 = vld [vmem:[#allocation2 + $0x68] sm:$0x1] }
0x212b   :  { %v1669_v30 = vpop.xlane.xlu1 %1668 }
0x212c   :  { %v1670_v44 = vadd.f32 %v4952_v43, %v1669_v30  ;;  %v4967_v30 = vadd.f32 %v4964_v29, %v1826_v3 }
0x212e   :  { %3992 = vtanh.f32 %v1670_v44 }
0x2134   :  { %v3993_v63 = vpop.eup %3992 }
0x2135   :  { %1674 = vperm.xlu2 %3896, %v3993_v63  }
0x218f   :  { %v1675_v6 = vpop.permute.xlu2 %1674 }
0x2190   :  { %v1677_v24 = vmul.f32 %v4955_v17, %v1675_v6 }
0x2192   :  { %v1678_v11 = vadd.f32 %v1677_v24, %v1665_v32  ;;  %v1982_v24 = vpop.f32.mrf.mxu2 }
0x2194   :  { %v1680_v34 = vrot.slane %v1678_v11, 7 }
0x2196   :  { %v1682_v10 = vmul.f32 %v4948_v21, %v1680_v34 }
0x2198   :  { %v1683_v33 = vsel %vm309_vm4, %v1682_v10, 0.0 }
0x2199   :  { %1684 = vadd.xlane.f32.xlu0 %v1683_v33 }
0x220c   :  { %v1685_v9 = vpop.xlane.xlu0 %1684 }
0x220d   :  { %v1686_v61 = vadd.f32 %v1685_v9, %v4499_v8 }
0x220f   :  { %3994 = vtanh.f32 %v1686_v61 }
0x2215   :  { %v3995_v26 = vpop.eup %3994 }
0x2216   :  { %1690 = vperm.xlu2 %3896, %v3995_v26  }
0x2270   :  { %v1691_v42 = vpop.permute.xlu2 %1690 }
0x2271   :  { %v1693_v22 = vmul.f32 %v4955_v17, %v1691_v42 }
0x2273   :  { %v1695_v1 = vrot.slane %v1693_v22, 1 }
0x2275   :  { %v1697_v27 = vadd.f32 %v1695_v1, %v1678_v11  ;;  %v1983_v11 = vadd.f32 %v4810_v39, %v1982_v24 }
0x2277   :  { %v1699_v47 = vrot.slane %v1697_v27, 6  ;;  %v1986_v34 = vrot.slane %v1983_v11, 4 }
0x2279   :  { %v1701_v28 = vmul.f32 %v4948_v21, %v1699_v47  ;;  %v1988_v10 = vadd.f32 %v1986_v34, %v4387_v12 }
0x227b   :  { %v1702_v32 = vsel %vm334_vm5, %v1701_v28, 0.0  ;;  %v1989_v33 = vsub.f32 0.0, %v1988_v10 }
0x227c   :  { %1703 = vadd.xlane.f32.xlu2 %v1702_v32 }
0x227d   :  { %v1990_v9 = vmul.f32 1.442695, %v1989_v33 }
0x2294   :  { %1836 = vrot.lane.b32.xlu2 %v4967_v30, %s4329_s0 }
0x22ef   :  { %v1704_v44 = vpop.xlane.xlu2 %1703 }
0x22f0   :  { %v1705_v63 = vadd.f32 %v1704_v44, %v5742_v31 }
0x22f2   :  { %3996 = vtanh.f32 %v1705_v63 }
0x22f3   :  { %3998 = vpow2.f32 %v1990_v9 }
0x22f8   :  { %v3997_v6 = vpop.eup %3996 }
0x22f9   :  { %1709 = vperm.xlu1 %3900, %v3997_v6   ;;  %v3999_v61 = vpop.eup %3998 }
0x22fa   :  { %v1992_v26 = vadd.f32 1.0, %v3999_v61 }
0x22fc   :  { %4000 = vrcp.f32 %v1992_v26 }
0x2301   :  { %1994 = vrot.lane.b32.xlu1 %v1986_v34, %s4329_s0 }
0x2302   :  { %v4976_v32 = vpop.eup %4000 }
0x236b   :  { %v1710_v42 = vpop.permute.xlu1 %1709 }
0x236c   :  { %v1712_v22 = vmul.f32 %v4955_v17, %v1710_v42 }
0x236e   :  { %v1714_v1 = vrot.slane %v1712_v22, 2  ;;  %v1736_v22 = vrot.slane %v4510_v35, 3 }
0x2370   :  { %v1716_v47 = vadd.f32 %v1714_v1, %v1697_v27 }
0x2372   :  { %v1718_v28 = vrot.slane %v1716_v47, 5 }
0x2373   :  { %v1995_v3 = vpop.permute.xlu1 %1994 }
0x2374   :  { %v1997_v44 = vmul.f32 %v4976_v32, %v1995_v3  ;;  %v1720_v63 = vmul.f32 %v4948_v21, %v1718_v28 }
0x2376   :  { %1999 = vrot.lane.b32.xlu1 %v1997_v44, %s4329_s0  ;;  %v1721_v6 = vsel %vm358_vm6, %v1720_v63, 0.0 }
0x2377   :  { %1722 = vadd.xlane.f32.xlu0 %v1721_v6  ;;  %v5006_v6 = vld [vmem:[#allocation2 + $0x60] sm:$0x1] }
0x23e8   :  { %v2000_v24 = vpop.permute.xlu1 %1999 }
0x23e9   :  { %v2002_v11 = vadd.f32 %v2000_v24, %v4387_v12 }
0x23ea   :  { %v1723_v34 = vpop.xlane.xlu0 %1722 }
0x23eb   :  { %4002 = vtanh.f32 %v2002_v11  ;;  %v1724_v27 = vadd.f32 %v1723_v34, %v4507_v23 }
0x23ed   :  { %4004 = vtanh.f32 %v1724_v27 }
0x23f1   :  { %v4003_v10 = vpop.eup %4002 }
0x23f2   :  { %2006 = vrot.lane.b32.xlu1 %v4003_v10, %s4330_s1 }
0x23f3   :  { %v4005_v33 = vpop.eup %4004 }
0x23f4   :  { %1728 = vperm.xlu0 %3897, %v4005_v33  }
0x2466   :  { %v1729_v9 = vpop.permute.xlu0 %1728 }
0x2467   :  { %v1731_v61 = vmul.f32 %v4955_v17, %v1729_v9 }
0x2469   :  { %v1733_v26 = vrot.slane %v1731_v61, 3  ;;  %v1837_v61 = vpop.permute.xlu2 %1836 }
0x246b   :  { %v4986_v42 = vadd.f32 %v1733_v26, %v1716_v47  ;;  %v1761_v47 = vrot.slane %v4515_v48, 3 }
0x246d   :  { %5748 = vst [vmem:[#allocation27_spill] sm:$0xff] %v4986_v42  ;;  %3812 = vmatmul.msk.f32.vlgmr.msrb.gmra.mxu3 %vm382_vm8, %v4986_v42 }
0x246e   :  { %2032 = vmatpush.msrb.mxu3 %v4823_v62 }
0x2470   :  { %2033 = vmatpush.msrb.mxu3 %v4826_v19 }
0x2472   :  { %2034 = vmatpush.msrb.mxu3 %v4829_v15 }
0x2474   :  { %2035 = vmatpush.msrb.mxu3 %v4832_v60 }
0x24f0   :  { %v1758_v1 = vpop.f32.mrf.mxu3 }
0x24f1   :  { %v1759_v28 = vadd.f32 %v1758_v1, %v1736_v22 }
0x24f3   :  { %3814 = vmatmul.msk.f32.vlgmr.msra.gmra.mxu0 %vm382_vm8, %v1759_v28  ;;  %v2007_v28 = vpop.permute.xlu1 %2006 }
0x24f4   :  { %2056 = vmatpush.msra.mxu0 %v4837_v58 }
0x24f6   :  { %2057 = vmatpush.msra.mxu0 %v4840_v20 }
0x24f8   :  { %2058 = vmatpush.msra.mxu0 %v4843_v36 }
0x24fa   :  { %2059 = vmatpush.msra.mxu0 %v4846_v38 }
0x2570   :  { %v1783_v3 = vpop.f32.mrf.mxu0 }
0x2571   :  { %v1784_v44 = vadd.f32 %v1783_v3, %v1761_v47  ;;  %v2004_v47 = vsub.f32 1.0, %v4976_v32  ;;  %v2010_v3 = vrot.slane %v4872_v40, 7 }
0x2573   :  { %3816 = vmatmul.msk.f32.vlgmr.msra.gmra.mxu1 %vm382_vm8, %v1784_v44 }
0x2574   :  { %2080 = vmatpush.msra.mxu1 %v4851_v7 }
0x2576   :  { %2081 = vmatpush.msra.mxu1 %v4854_v13 }
0x2578   :  { %2082 = vmatpush.msra.mxu1 %v4857_v5 }
0x257a   :  { %2083 = vmatpush.msra.mxu1 %v4860_v41 }
0x25f0   :  { %v1806_v63 = vpop.f32.mrf.mxu1 }
0x25f1   :  { %v1807_v24 = vadd.f32 %v5006_v6, %v1806_v63  ;;  %v2012_v63 = vmul.f32 %v4976_v32, %v2010_v3  ;;  %v5025_v32 = vld [vmem:[#allocation2 + $0x110] sm:$0xf] }
0x25f3   :  { %v1829_v11 = vadd.f32 %v4967_v30, %v1807_v24  ;;  %v2009_v30 = vmul.f32 %v2007_v28, %v2004_v47  ;;  %v5042_v47 = vld [vmem:[#allocation2 + $0x138] sm:$0x1] }
0x25f5   :  { %v1830_v34 = vsub.f32 0.0, %v1829_v11  ;;  %v5015_v11 = vadd.f32 %v2012_v63, %v2009_v30 }
0x25f7   :  { %v1831_v27 = vmul.f32 1.442695, %v1830_v34  ;;  %v2015_v34 = vrot.slane %v5015_v11, 4 }
0x25f9   :  { %4006 = vpow2.f32 %v1831_v27 }
0x25ff   :  { %v4007_v10 = vpop.eup %4006 }
0x2600   :  { %v1833_v33 = vadd.f32 1.0, %v4007_v10 }
0x2602   :  { %4008 = vrcp.f32 %v1833_v33 }
0x2608   :  { %v4009_v9 = vpop.eup %4008 }
0x2609   :  { %v1839_v26 = vmul.f32 %v4009_v9, %v1837_v61  ;;  %v1846_v27 = vsub.f32 1.0, %v4009_v9  ;;  %v1852_v10 = vmul.f32 %v4009_v9, %v4877_v54  ;;  %v5033_v54 = vld [vmem:[#allocation2 + $0x150] sm:$0xff]  ;;  %v5036_v9 = vld [vmem:[#allocation2 + $0x148] sm:$0xff] }
0x260b   :  { %1841 = vrot.lane.b32.xlu0 %v1839_v26, %s4329_s0 }
0x267d   :  { %v1842_v22 = vpop.permute.xlu0 %1841 }
0x267e   :  { %v1844_v1 = vadd.f32 %v1842_v22, %v1807_v24  ;;  %v5030_v22 = vld [vmem:[#allocation2 + $0x158] sm:$0xff] }
0x2680   :  { %4010 = vtanh.f32 %v1844_v1  ;;  %v5039_v1 = vld [vmem:[#allocation2 + $0x140] sm:$0xff] }
0x2686   :  { %v4011_v44 = vpop.eup %4010 }
0x2687   :  { %1848 = vrot.lane.b32.xlu0 %v4011_v44, %s4330_s1  ;;  %v5046_v44 = vld [vmem:[#allocation2 + $0x38] sm:$0xf] }
0x268f   :  { %2016 = vrot.lane.b32.xlu0 %v2015_v34, %s4330_s1 }
0x26f9   :  { %v1849_v24 = vpop.permute.xlu0 %1848 }
0x26fa   :  { %v1851_v33 = vmul.f32 %v1849_v24, %v1846_v27  ;;  %v5052_v24 = vld [vmem:[#allocation2 + $0x180] sm:$0xff] }
0x26fc   :  { %v5020_v61 = vadd.f32 %v1852_v10, %v1851_v33  ;;  %v5055_v10 = vld [vmem:[#allocation2 + $0x178] sm:$0xff]  ;;  %v5058_v33 = vld [vmem:[#allocation2 + $0x170] sm:$0xff] }
0x26fe   :  { %1855 = vrot.lane.b32.xlu2 %v5020_v61, %s4330_s1 }
0x2701   :  { %v2017_v26 = vpop.permute.xlu0 %2016 }
0x2758   :  { %v1856_v40 = vpop.permute.xlu2 %1855 }
0x2759   :  { %3818 = vmatmul.msk.f32.vlgmr.msra.gmra.mxu3 %vm145_vm1, %v1856_v40 }
0x275a   :  { %3827 = vmatpush.msk.msra.mxu3 %vm386_vm7, %v5025_v32 }
0x2761   :  { %3822 = vmatmul.msk.f32.vlgmr.msrb.gmra.mxu3 %vm145_vm1, %v2017_v26 }
0x2762   :  { %2340 = vmatpush.msrb.mxu3 %v5030_v22 }
0x2764   :  { %2341 = vmatpush.msrb.mxu3 %v5033_v54 }
0x2766   :  { %2342 = vmatpush.msrb.mxu3 %v5036_v9 }
0x2768   :  { %2343 = vmatpush.msrb.mxu3 %v5039_v1 }
0x27dc   :  { %v1876_v28 = vpop.f32.mrf.mxu3 }
0x27dd   :  { %v1877_v3 = vadd.f32 %v5042_v47, %v1876_v28  ;;  %v5061_v28 = vld [vmem:[#allocation2 + $0x168] sm:$0xff] }
0x27df   :  { %v1879_v30 = vmax.f32 %v1877_v3, 0.0 }
0x27e1   :  { %3819 = vmatmul.msk.f32.vlgmr.msrb.gmra.mxu0 %vm145_vm1, %v1879_v30  ;;  %v5064_v30 = vld [vmem:[#allocation2 + $0x160] sm:$0x1] }
0x27e2   :  { %3829 = vmatpush.msk.msrb.mxu0 %vm386_vm7, %v5046_v44 }
0x27e4   :  { %v2037_v63 = vpop.f32.mrf.mxu3 }
0x27e5   :  { %v2038_v34 = vadd.f32 %v2037_v63, %v4430_v45 }
0x27e7   :  { %v2040_v27 = vmax.f32 %v2038_v34, 0.0 }
0x27e9   :  { %3823 = vmatmul.msk.f32.vlgmr.msra.gmra.mxu0 %vm145_vm1, %v2040_v27 }
0x27ea   :  { %2364 = vmatpush.msra.mxu0 %v5052_v24 }
0x27ec   :  { %2365 = vmatpush.msra.mxu0 %v5055_v10 }
0x27ee   :  { %2366 = vmatpush.msra.mxu0 %v5058_v33 }
0x27f0   :  { %2367 = vmatpush.msra.mxu0 %v5061_v28 }
0x285e   :  { %v1900_v3 = vpop.f32.mrf.mxu0 }
0x285f   :  { %v1901_v63 = vadd.f32 %v5064_v30, %v1900_v3 }
0x2861   :  { %v1903_v34 = vmax.f32 %v1901_v63, 0.0 }
0x2863   :  { %3820 = vmatmul.msk.f32.vlgmr.msrb.gmra.mxu1 %vm145_vm1, %v1903_v34 }
0x2864   :  { %2266 = vmatpush.msrb.mxu1 %v4901_v57 }
0x2866   :  { %v2061_v27 = vpop.f32.mrf.mxu0  ;;  %2267 = vmatpush.msrb.mxu1 %v4904_v2 }
0x2867   :  { %v2062_v42 = vadd.f32 %v4907_v37, %v2061_v27 }
0x2868   :  { %2268 = vmatpush.msrb.mxu1 %v4910_v18 }
0x2869   :  { %v2064_v59 = vmax.f32 %v2062_v42, 0.0  ;;  %v5082_v42 = vld [vmem:[#allocation2 + $0x130] sm:$0xff] }
0x286a   :  { %2269 = vmatpush.msrb.mxu1 %v4913_v14 }
0x286b   :  { %3824 = vmatmul.msk.f32.vlgmr.msra.gmra.mxu1 %vm145_vm1, %v2064_v59  ;;  %v5085_v59 = vld [vmem:[#allocation2 + $0x128] sm:$0xff] }
0x286c   :  { %2422 = vmatpush.msra.mxu1 %v4757_v49  ;;  %v5088_v49 = vld [vmem:[#allocation2 + $0x120] sm:$0xff] }
0x286e   :  { %2423 = vmatpush.msra.mxu1 %v4760_v50  ;;  %v5091_v50 = vld [vmem:[#allocation2 + $0x118] sm:$0xff] }
0x2870   :  { %2424 = vmatpush.msra.mxu1 %v4763_v51 }
0x2872   :  { %2425 = vmatpush.msra.mxu1 %v4766_v52 }
0x2873   :  { %3831 = vmatmul.msk.f32.vlgmr.msrb.gmra.mxu1 %vm145_vm1, %v1856_v40 }
0x2874   :  { %3839 = vmatpush.msk.msrb.mxu1 %vm386_vm7, %v4922_v16 }
0x287b   :  { %3835 = vmatmul.msk.f32.vlgmr.msra.gmra.mxu1 %vm145_vm1, %v2017_v26 }
0x287c   :  { %2761 = vmatpush.msra.mxu1 %v5082_v42 }
0x287e   :  { %2762 = vmatpush.msra.mxu1 %v5085_v59 }
0x2880   :  { %2763 = vmatpush.msra.mxu1 %v5088_v49 }
0x2882   :  { %2764 = vmatpush.msra.mxu1 %v5091_v50 }
0x28e0   :  { %v5094_v51 = vpop.f32.mrf.mxu1 }
0x28e1   :  { %5749 = vst [vmem:[#allocation28_spill] sm:$0xff] %v5094_v51 }
0x28e8   :  { %v2085_v52 = vpop.f32.mrf.mxu1 }
0x28e9   :  { %v5097_v40 = vadd.f32 %v4933_v56, %v2085_v52 }
0x28eb   :  { %5750 = vst [vmem:[#allocation29_spill] sm:$0xff] %v5097_v40  ;;  %v2089_v26 = vmin.f32 %v5097_v40, 1.0  ;;  %vm2088_vm12 = vcmp.gt.f32.partialorder %v5097_v40, 1.0 }
0x28ed   :  { %v2090_v3 = vmul.f32 1.442695, %v2089_v26 }
0x28ef   :  { %4012 = vpow2.f32 %v2090_v3 }
0x28f5   :  { %v4013_v63 = vpop.eup %4012 }
0x28f6   :  { %v2092_v34 = vadd.f32 1.0, %v4013_v63 }
0x28f8   :  { %4014 = vlog2.f32 %v2092_v34 }
0x28fe   :  { %v4015_v27 = vpop.eup %4014 }
0x28ff   :  { %v2094_v46 = vmul.f32 0.6931472, %v4015_v27 }
0x2901   :  { %v5102_v0 = vsel %vm2088_vm12, %v5097_v40, %v2094_v46 }
0x2902   :  { %5751 = vst [vmem:[#allocation30_spill] sm:$0xff] %v5102_v0  ;;  %v2096_v51 = vmul.f32 0.5, %v5102_v0 }
0x2904   :  { %v2097_v53 = vmul.f32 1.442695, %v2096_v51 }
0x2906   :  { %4016 = vpow2.f32 %v2097_v53 }
0x290c   :  { %v4017_v52 = vpop.eup %4016 }
0x290d   :  { %v2100_v4 = vrot.slane %v4017_v52, 4 }
0x290f   :  { %2101 = vrot.lane.b32.xlu1 %v2100_v4, %s4332_s22 }
0x2981   :  { %v2102_v26 = vpop.permute.xlu1 %2101 }
0x2982   :  { %v2104_v3 = vmul.f32 %v4789_v25, %v2102_v26 }
0x2984   :  { %v2106_v63 = vrot.slane %v2104_v3, 4 }
0x2986   :  { %2107 = vrot.lane.b32.xlu2 %v2106_v63, %s4333_s23 }
0x29e0   :  { %v2108_v34 = vpop.permute.xlu2 %2107 }
0x29e1   :  { %v2110_v27 = vadd.f32 %v2108_v34, %v5097_v40 }
0x29e3   :  { %v2111_v46 = vmul.f32 %v4948_v21, %v2110_v27 }
0x29e5   :  { %v2112_v55 = vsel %vm292_vm3, %v2111_v46, 0.0 }
0x29e6   :  { %2113 = vadd.xlane.f32.xlu0 %v2112_v55 }
0x2a59   :  { %v2114_v51 = vpop.xlane.xlu0 %2113 }
0x2a5a   :  { %v2115_v53 = vadd.f32 %v4952_v43, %v2114_v51 }
0x2a5c   :  { %4018 = vtanh.f32 %v2115_v53 }
0x2a62   :  { %v4019_v52 = vpop.eup %4018 }
0x2a63   :  { %2119 = vperm.xlu1 %3900, %v4019_v52  }
0x2ad5   :  { %v2120_v4 = vpop.permute.xlu1 %2119 }
0x2ad6   :  { %v2122_v25 = vmul.f32 %v4955_v17, %v2120_v4 }
0x2ad8   :  { %v2123_v26 = vadd.f32 %v2122_v25, %v2110_v27  ;;  %v2271_v25 = vpop.f32.mrf.mxu1 }
0x2ada   :  { %v2125_v3 = vrot.slane %v2123_v26, 7 }
0x2adc   :  { %v2127_v63 = vmul.f32 %v4948_v21, %v2125_v3  ;;  %v5120_v3 = vadd.f32 %v4964_v29, %v2271_v25 }
0x2ade   :  { %v2128_v34 = vsel %vm309_vm4, %v2127_v63, 0.0 }
0x2adf   :  { %2129 = vadd.xlane.f32.xlu2 %v2128_v34 }
0x2b52   :  { %v2130_v0 = vpop.xlane.xlu2 %2129 }
0x2b53   :  { %v2131_v46 = vadd.f32 %v2130_v0, %v4499_v8 }
0x2b55   :  { %4020 = vtanh.f32 %v2131_v46  ;;  %v2427_v46 = vpop.f32.mrf.mxu1 }
0x2b5b   :  { %v4021_v55 = vpop.eup %4020 }
0x2b5c   :  { %2135 = vperm.xlu1 %3900, %v4021_v55  }
0x2bce   :  { %v2136_v51 = vpop.permute.xlu1 %2135 }
0x2bcf   :  { %v2138_v53 = vmul.f32 %v4955_v17, %v2136_v51 }
0x2bd1   :  { %v2140_v52 = vrot.slane %v2138_v53, 1 }
0x2bd3   :  { %v2142_v40 = vadd.f32 %v2140_v52, %v2123_v26  ;;  %v2428_v26 = vadd.f32 %v4810_v39, %v2427_v46 }
0x2bd5   :  { %v2144_v43 = vrot.slane %v2142_v40, 6 }
0x2bd7   :  { %v2146_v27 = vmul.f32 %v4948_v21, %v2144_v43  ;;  %v2431_v43 = vrot.slane %v2428_v26, 3 }
0x2bd9   :  { %v2147_v4 = vsel %vm334_vm5, %v2146_v27, 0.0  ;;  %v2433_v55 = vadd.f32 %v2431_v43, %v4387_v12 }
0x2bda   :  { %2148 = vadd.xlane.f32.xlu1 %v2147_v4 }
0x2bdb   :  { %v2434_v51 = vsub.f32 0.0, %v2433_v55 }
0x2bdd   :  { %v2435_v53 = vmul.f32 1.442695, %v2434_v51 }
0x2bf3   :  { %2281 = vrot.lane.b32.xlu1 %v5120_v3, %s4329_s0 }
0x2c4d   :  { %v2149_v0 = vpop.xlane.xlu1 %2148 }
0x2c4e   :  { %v2150_v63 = vadd.f32 %v2149_v0, %v5742_v31 }
0x2c50   :  { %4022 = vtanh.f32 %v2150_v63 }
0x2c51   :  { %4024 = vpow2.f32 %v2435_v53 }
0x2c56   :  { %v4023_v34 = vpop.eup %4022 }
0x2c57   :  { %2154 = vperm.xlu2 %3896, %v4023_v34   ;;  %v4025_v52 = vpop.eup %4024 }
0x2c58   :  { %v2437_v27 = vadd.f32 1.0, %v4025_v52 }
0x2c5a   :  { %4026 = vrcp.f32 %v2437_v27 }
0x2c5f   :  { %2439 = vrot.lane.b32.xlu2 %v2431_v43, %s4329_s0 }
0x2c60   :  { %v5129_v34 = vpop.eup %4026 }
0x2cb1   :  { %v2155_v4 = vpop.permute.xlu2 %2154 }
0x2cb2   :  { %v2157_v25 = vmul.f32 %v4955_v17, %v2155_v4 }
0x2cb4   :  { %v2159_v0 = vrot.slane %v2157_v25, 2 }
0x2cb6   :  { %v2161_v63 = vadd.f32 %v2159_v0, %v2142_v40 }
0x2cb8   :  { %v2163_v31 = vrot.slane %v2161_v63, 5 }
0x2cb9   :  { %v2440_v39 = vpop.permute.xlu2 %2439 }
0x2cba   :  { %v2442_v46 = vmul.f32 %v5129_v34, %v2440_v39  ;;  %v2165_v26 = vmul.f32 %v4948_v21, %v2163_v31  ;;  %v2181_v39 = vrot.slane %v4510_v35, 4 }
0x2cbc   :  { %2444 = vrot.lane.b32.xlu2 %v2442_v46, %s4329_s0  ;;  %v2166_v43 = vsel %vm358_vm6, %v2165_v26, 0.0 }
0x2cbd   :  { %2167 = vadd.xlane.f32.xlu0 %v2166_v43 }
0x2d16   :  { %v2445_v55 = vpop.permute.xlu2 %2444 }
0x2d17   :  { %v2447_v51 = vadd.f32 %v2445_v55, %v4387_v12 }
0x2d19   :  { %4028 = vtanh.f32 %v2447_v51  ;;  %v2282_v51 = vpop.permute.xlu1 %2281 }
0x2d1f   :  { %v4029_v53 = vpop.eup %4028 }
0x2d20   :  { %2451 = vrot.lane.b32.xlu2 %v4029_v53, %s4330_s1  ;;  %v2449_v53 = vsub.f32 1.0, %v5129_v34 }
0x2d30   :  { %v2168_v40 = vpop.xlane.xlu0 %2167 }
0x2d31   :  { %v2169_v52 = vadd.f32 %v2168_v40, %v4507_v23  ;;  %v2455_v40 = vrot.slane %v5015_v11, 7 }
0x2d33   :  { %4030 = vtanh.f32 %v2169_v52 }
0x2d39   :  { %v4031_v27 = vpop.eup %4030 }
0x2d3a   :  { %2173 = vperm.xlu0 %3897, %v4031_v27   ;;  %v2457_v27 = vmul.f32 %v5129_v34, %v2455_v40 }
0x2dac   :  { %v2174_v4 = vpop.permute.xlu0 %2173 }
0x2dad   :  { %v2176_v31 = vmul.f32 %v4955_v17, %v2174_v4 }
0x2daf   :  { %v2178_v25 = vrot.slane %v2176_v31, 3 }
0x2db1   :  { %v5139_v0 = vadd.f32 %v2178_v25, %v2161_v63 }
0x2db3   :  { %3826 = vmatmul.msk.f32.vlgmr.msra.gmra.mxu2 %vm382_vm8, %v5139_v0 }
0x2db4   :  { %2477 = vmatpush.msra.mxu2 %v4823_v62  ;;  %v2206_v62 = vrot.slane %v4515_v48, 4 }
0x2db6   :  { %2478 = vmatpush.msra.mxu2 %v4826_v19 }
0x2db8   :  { %2479 = vmatpush.msra.mxu2 %v4829_v15 }
0x2dba   :  { %2480 = vmatpush.msra.mxu2 %v4832_v60 }
0x2e36   :  { %v2203_v46 = vpop.f32.mrf.mxu2 }
0x2e37   :  { %v2204_v26 = vadd.f32 %v2203_v46, %v2181_v39 }
0x2e39   :  { %3828 = vmatmul.msk.f32.vlgmr.msra.gmra.mxu3 %vm382_vm8, %v2204_v26 }
0x2e3a   :  { %2501 = vmatpush.msra.mxu3 %v4837_v58 }
0x2e3c   :  { %2502 = vmatpush.msra.mxu3 %v4840_v20 }
0x2e3e   :  { %2503 = vmatpush.msra.mxu3 %v4843_v36 }
0x2e40   :  { %2504 = vmatpush.msra.mxu3 %v4846_v38 }
0x2ebc   :  { %v2228_v19 = vpop.f32.mrf.mxu3 }
0x2ebd   :  { %v2229_v15 = vadd.f32 %v2228_v19, %v2206_v62 }
0x2ebf   :  { %3830 = vmatmul.msk.f32.vlgmr.msrb.gmra.mxu0 %vm382_vm8, %v2229_v15 }
0x2ec0   :  { %2525 = vmatpush.msrb.mxu0 %v4851_v7 }
0x2ec2   :  { %2526 = vmatpush.msrb.mxu0 %v4854_v13 }
0x2ec4   :  { %2527 = vmatpush.msrb.mxu0 %v4857_v5 }
0x2ec6   :  { %2528 = vmatpush.msrb.mxu0 %v4860_v41  ;;  %v2452_v41 = vpop.permute.xlu2 %2451 }
0x2f3c   :  { %v2251_v60 = vpop.f32.mrf.mxu0 }
0x2f3d   :  { %v2252_v58 = vadd.f32 %v5006_v6, %v2251_v60 }
0x2f3f   :  { %v2274_v20 = vadd.f32 %v5120_v3, %v2252_v58  ;;  %v2454_v3 = vmul.f32 %v2452_v41, %v2449_v53 }
0x2f41   :  { %v2275_v36 = vsub.f32 0.0, %v2274_v20  ;;  %v5166_v4 = vadd.f32 %v2457_v27, %v2454_v3 }
0x2f43   :  { %v2276_v38 = vmul.f32 1.442695, %v2275_v36  ;;  %v2460_v31 = vrot.slane %v5166_v4, 5 }
0x2f45   :  { %4032 = vpow2.f32 %v2276_v38 }
0x2f4b   :  { %v4033_v63 = vpop.eup %4032 }
0x2f4c   :  { %v2278_v43 = vadd.f32 1.0, %v4033_v63 }
0x2f4e   :  { %4034 = vrcp.f32 %v2278_v43 }
0x2f54   :  { %v4035_v55 = vpop.eup %4034 }
0x2f55   :  { %v2284_v7 = vmul.f32 %v4035_v55, %v2282_v51  ;;  %v2291_v25 = vsub.f32 1.0, %v4035_v55  ;;  %v2297_v46 = vmul.f32 %v4035_v55, %v5020_v61 }
0x2f57   :  { %2286 = vrot.lane.b32.xlu0 %v2284_v7, %s4329_s0  ;;  %v5201_v7 = vld [vmem:[#allocation2 + $0x20] sm:$0xff] }
0x2fc9   :  { %v2287_v13 = vpop.permute.xlu0 %2286 }
0x2fca   :  { %v2289_v5 = vadd.f32 %v2287_v13, %v2252_v58  ;;  %v5204_v13 = vld [vmem:[#allocation2 + $0x18] sm:$0xff] }
0x2fcc   :  { %4036 = vtanh.f32 %v2289_v5 }
0x2fd2   :  { %v4037_v52 = vpop.eup %4036 }
0x2fd3   :  { %2293 = vrot.lane.b32.xlu0 %v4037_v52, %s4330_s1 }
0x2fdb   :  { %2461 = vrot.lane.b32.xlu0 %v2460_v31, %s4330_s1 }
0x3045   :  { %v2294_v39 = vpop.permute.xlu0 %2293 }
0x3046   :  { %v2296_v26 = vmul.f32 %v2294_v39, %v2291_v25 }
0x3048   :  { %v5171_v62 = vadd.f32 %v2297_v46, %v2296_v26  ;;  %v5233_v46 = vld [vmem:[#allocation5] sm:$0xff] }
0x304a   :  { %2300 = vrot.lane.b32.xlu1 %v5171_v62, %s4330_s1 }
0x304d   :  { %v2462_v34 = vpop.permute.xlu0 %2461 }
0x30bc   :  { %v2301_v11 = vpop.permute.xlu1 %2300 }
0x30bd   :  { %3832 = vmatmul.msk.f32.vlgmr.msrb.gmra.mxu2 %vm145_vm1, %v2301_v11 }
0x30be   :  { %3841 = vmatpush.msk.msrb.mxu2 %vm386_vm7, %v5025_v32 }
0x30c5   :  { %3836 = vmatmul.msk.f32.vlgmr.msra.gmra.mxu2 %vm145_vm1, %v2462_v34 }
0x30c6   :  { %2785 = vmatpush.msra.mxu2 %v5030_v22 }
0x30c8   :  { %2786 = vmatpush.msra.mxu2 %v5033_v54 }
0x30ca   :  { %2787 = vmatpush.msra.mxu2 %v5036_v9 }
0x30cc   :  { %2788 = vmatpush.msra.mxu2 %v5039_v1 }
0x3140   :  { %v2321_v61 = vpop.f32.mrf.mxu2 }
0x3141   :  { %v2322_v19 = vadd.f32 %v5042_v47, %v2321_v61 }
0x3143   :  { %v2324_v15 = vmax.f32 %v2322_v19, 0.0 }
0x3145   :  { %3833 = vmatmul.msk.f32.vlgmr.msrb.gmra.mxu3 %vm145_vm1, %v2324_v15 }
0x3146   :  { %3843 = vmatpush.msk.msrb.mxu3 %vm386_vm7, %v5046_v44 }
0x3148   :  { %v2482_v60 = vpop.f32.mrf.mxu2 }
0x3149   :  { %v2483_v58 = vadd.f32 %v2482_v60, %v4430_v45 }
0x314b   :  { %v2485_v20 = vmax.f32 %v2483_v58, 0.0  ;;  %v5753_v58 = vld [vmem:[#allocation26_spill] sm:$0xff] }
0x314d   :  { %3837 = vmatmul.msk.f32.vlgmr.msra.gmra.mxu3 %vm145_vm1, %v2485_v20 }
0x314e   :  { %2809 = vmatpush.msra.mxu3 %v5052_v24 }
0x3150   :  { %2810 = vmatpush.msra.mxu3 %v5055_v10 }
0x3152   :  { %2811 = vmatpush.msra.mxu3 %v5058_v33 }
0x3154   :  { %2812 = vmatpush.msra.mxu3 %v5061_v28 }
0x31c8   :  { %v2345_v36 = vpop.f32.mrf.mxu3 }
0x31c9   :  { %v2346_v38 = vadd.f32 %v5064_v30, %v2345_v36 }
0x31cb   :  { %v2348_v63 = vmax.f32 %v2346_v38, 0.0 }
0x31cd   :  { %3834 = vmatmul.msk.f32.vlgmr.msra.gmra.mxu0 %vm145_vm1, %v2348_v63 }
0x31ce   :  { %2711 = vmatpush.msra.mxu0 %v4901_v57  ;;  %v5207_v57 = vld [vmem:[#allocation2 + $0x10] sm:$0xff] }
0x31d0   :  { %v2506_v43 = vpop.f32.mrf.mxu3  ;;  %2712 = vmatpush.msra.mxu0 %v4904_v2  ;;  %v5210_v2 = vld [vmem:[#allocation2 + $0x8] sm:$0xff] }
0x31d1   :  { %v2507_v55 = vadd.f32 %v4907_v37, %v2506_v43 }
0x31d2   :  { %2713 = vmatpush.msra.mxu0 %v4910_v18 }
0x31d3   :  { %v2509_v51 = vmax.f32 %v2507_v55, 0.0 }
0x31d4   :  { %2714 = vmatpush.msra.mxu0 %v4913_v14 }
0x31d5   :  { %3838 = vmatmul.msk.f32.vlgmr.msrb.gmra.mxu0 %vm145_vm1, %v2509_v51 }
0x31d6   :  { %2867 = vmatpush.msrb.mxu0 %v5201_v7 }
0x31d8   :  { %2868 = vmatpush.msrb.mxu0 %v5204_v13 }
0x31da   :  { %2869 = vmatpush.msrb.mxu0 %v5207_v57 }
0x31dc   :  { %2870 = vmatpush.msrb.mxu0 %v5210_v2 }
0x31dd   :  { %3845 = vmatmul.msk.f32.vlgmr.msra.gmra.mxu0 %vm145_vm1, %v2301_v11 }
0x31de   :  { %3853 = vmatpush.msk.msra.mxu0 %vm386_vm7, %v4922_v16 }
0x31e5   :  { %3849 = vmatmul.msk.f32.vlgmr.msrb.gmra.mxu0 %vm145_vm1, %v2462_v34 }
0x31e6   :  { %3206 = vmatpush.msrb.mxu0 %v5082_v42 }
0x31e8   :  { %3207 = vmatpush.msrb.mxu0 %v5085_v59 }
0x31ea   :  { %3208 = vmatpush.msrb.mxu0 %v5088_v49 }
0x31ec   :  { %3209 = vmatpush.msrb.mxu0 %v5091_v50 }
0x324a   :  { %v5221_v37 = vpop.f32.mrf.mxu0 }
0x3252   :  { %v2530_v18 = vpop.f32.mrf.mxu0 }
0x3253   :  { %v5224_v14 = vadd.f32 %v4933_v56, %v2530_v18 }
0x3255   :  { %5752 = vst [vmem:[#allocation31_spill] sm:$0xff] %v5224_v14  ;;  %v2534_v5 = vmin.f32 %v5224_v14, 1.0  ;;  %vm2533_vm13 = vcmp.gt.f32.partialorder %v5224_v14, 1.0 }
0x3257   :  { %v2535_v41 = vmul.f32 1.442695, %v2534_v5 }
0x3259   :  { %4038 = vpow2.f32 %v2535_v41 }
0x325f   :  { %v4039_v16 = vpop.eup %4038 }
0x3260   :  { %v2537_v53 = vadd.f32 1.0, %v4039_v16 }
0x3262   :  { %4040 = vlog2.f32 %v2537_v53 }
0x3268   :  { %v4041_v40 = vpop.eup %4040 }
0x3269   :  { %v2539_v3 = vmul.f32 0.6931472, %v4041_v40 }
0x326b   :  { %v5229_v52 = vsel %vm2533_vm13, %v5224_v14, %v2539_v3 }
0x326c   :  { %v2541_v27 = vmul.f32 0.5, %v5229_v52 }
0x326e   :  { %v2542_v31 = vmul.f32 1.442695, %v2541_v27 }
0x3270   :  { %4042 = vpow2.f32 %v2542_v31 }
0x3276   :  { %v4043_v56 = vpop.eup %4042 }
0x3277   :  { %v2545_v25 = vrot.slane %v4043_v56, 3 }
0x3279   :  { %2546 = vrot.lane.b32.xlu2 %v2545_v25, %s4332_s22 }
0x32d3   :  { %v2547_v39 = vpop.permute.xlu2 %2546 }
0x32d4   :  { %v2549_v26 = vmul.f32 %v5233_v46, %v2547_v39  ;;  %v2716_v39 = vpop.f32.mrf.mxu0 }
0x32d6   :  { %v2551_v11 = vrot.slane %v2549_v26, 5  ;;  %v5249_v26 = vadd.f32 %v4964_v29, %v2716_v39 }
0x32d8   :  { %2552 = vrot.lane.b32.xlu1 %v2551_v11, %s4333_s23 }
0x334a   :  { %v2553_v34 = vpop.permute.xlu1 %2552 }
0x334b   :  { %v2555_v61 = vadd.f32 %v2553_v34, %v5224_v14  ;;  %v5754_v34 = vld [vmem:[#allocation14_spill] sm:$0xff] }
0x334d   :  { %v2556_v19 = vmul.f32 %v4948_v21, %v2555_v61 }
0x334f   :  { %v2557_v15 = vsel %vm292_vm3, %v2556_v19, 0.0 }
0x3350   :  { %2558 = vadd.xlane.f32.xlu0 %v2557_v15  ;;  %v2872_v15 = vpop.f32.mrf.mxu0 }
0x33c3   :  { %v2559_v60 = vpop.xlane.xlu0 %2558 }
0x33c4   :  { %v2560_v20 = vadd.f32 %v5753_v58, %v2559_v60  ;;  %v5254_v60 = vld [vmem:[#allocation2 + $0x30] sm:$0x1] }
0x33c5   :  { %v2873_v58 = vadd.f32 %v5254_v60, %v2872_v15  ;;  %v5290_v15 = vld [vmem:[#allocation2 + $0xa0] sm:$0xff] }
0x33c6   :  { %4044 = vtanh.f32 %v2560_v20 }
0x33c7   :  { %v2876_v20 = vrot.slane %v2873_v58, 2  ;;  %v2651_v58 = vrot.slane %v4515_v48, 5 }
0x33cc   :  { %v4045_v36 = vpop.eup %4044 }
0x33cd   :  { %2564 = vperm.xlu2 %3896, %v4045_v36  }
0x3427   :  { %v2565_v38 = vpop.permute.xlu2 %2564 }
0x3428   :  { %v2567_v63 = vmul.f32 %v4955_v17, %v2565_v38 }
0x342a   :  { %v2568_v43 = vadd.f32 %v2567_v63, %v2555_v61 }
0x342c   :  { %v2570_v55 = vrot.slane %v2568_v43, 7 }
0x342e   :  { %v2572_v51 = vmul.f32 %v4948_v21, %v2570_v55 }
0x3430   :  { %v2573_v18 = vsel %vm309_vm4, %v2572_v51, 0.0 }
0x3431   :  { %2574 = vadd.xlane.f32.xlu1 %v2573_v18 }
0x34a4   :  { %v2575_v5 = vpop.xlane.xlu1 %2574 }
0x34a5   :  { %v2576_v41 = vadd.f32 %v2575_v5, %v4499_v8 }
0x34a7   :  { %4046 = vtanh.f32 %v2576_v41 }
0x34ad   :  { %v4047_v16 = vpop.eup %4046 }
0x34ae   :  { %2580 = vperm.xlu2 %3896, %v4047_v16  }
0x3508   :  { %v2581_v53 = vpop.permute.xlu2 %2580 }
0x3509   :  { %v2583_v40 = vmul.f32 %v4955_v17, %v2581_v53 }
0x350b   :  { %v2585_v3 = vrot.slane %v2583_v40, 1 }
0x350d   :  { %v2587_v27 = vadd.f32 %v2585_v3, %v2568_v43 }
0x350f   :  { %v2589_v31 = vrot.slane %v2587_v27, 6 }
0x3511   :  { %v2591_v56 = vmul.f32 %v4948_v21, %v2589_v31  ;;  %v5273_v31 = vld [vmem:[#allocation2 + $0x78] sm:$0xff] }
0x3513   :  { %v2592_v25 = vsel %vm334_vm5, %v2591_v56, 0.0  ;;  %v5276_v56 = vld [vmem:[#allocation2 + $0x70] sm:$0xff] }
0x3514   :  { %2593 = vadd.xlane.f32.xlu2 %v2592_v25 }
0x352c   :  { %2726 = vrot.lane.b32.xlu2 %v5249_v26, %s4329_s0 }
0x3587   :  { %v2594_v11 = vpop.xlane.xlu2 %2593 }
0x3588   :  { %v2595_v61 = vadd.f32 %v2594_v11, %v5754_v34  ;;  %v5281_v11 = vld [vmem:[#allocation2 + $0xb8] sm:$0xff] }
0x358a   :  { %4048 = vtanh.f32 %v2595_v61  ;;  %v5284_v61 = vld [vmem:[#allocation2 + $0xb0] sm:$0xff] }
0x358f   :  { %v2727_v14 = vpop.permute.xlu2 %2726 }
0x3590   :  { %v4049_v19 = vpop.eup %4048 }
0x3591   :  { %2599 = vperm.xlu0 %3897, %v4049_v19   ;;  %v5287_v19 = vld [vmem:[#allocation2 + $0xa8] sm:$0xff] }
0x3599   :  { %2884 = vrot.lane.b32.xlu0 %v2876_v20, %s4329_s0 }
0x3603   :  { %v2600_v36 = vpop.permute.xlu0 %2599 }
0x3604   :  { %v2602_v29 = vmul.f32 %v4955_v17, %v2600_v36 }
0x3606   :  { %v2604_v38 = vrot.slane %v2602_v29, 2 }
0x3608   :  { %v2606_v63 = vadd.f32 %v2604_v38, %v2587_v27  ;;  %v5267_v27 = vld [vmem:[#allocation2 + $0x88] sm:$0xff]  ;;  %v5295_v38 = vld [vmem:[#allocation2 + $0xe0] sm:$0xff] }
0x360a   :  { %v2608_v43 = vrot.slane %v2606_v63, 5 }
0x360c   :  { %v2610_v55 = vmul.f32 %v4948_v21, %v2608_v43  ;;  %v5270_v21 = vld [vmem:[#allocation2 + $0x80] sm:$0xff]  ;;  %v5301_v43 = vld [vmem:[#allocation2 + $0xd0] sm:$0xff] }
0x360e   :  { %v2611_v51 = vsel %vm358_vm6, %v2610_v55, 0.0  ;;  %v5304_v55 = vld [vmem:[#allocation2 + $0xc8] sm:$0xff] }
0x360f   :  { %2612 = vadd.xlane.f32.xlu1 %v2611_v51 }
0x3682   :  { %v2613_v18 = vpop.xlane.xlu1 %2612 }
0x3683   :  { %v2614_v5 = vadd.f32 %v2613_v18, %v4507_v23  ;;  %v2878_v18 = vadd.f32 %v2876_v20, %v4387_v12 }
0x3685   :  { %4050 = vtanh.f32 %v2614_v5 }
0x368b   :  { %v4051_v41 = vpop.eup %4050 }
0x368c   :  { %2618 = vperm.xlu1 %3900, %v4051_v41  }
0x36fe   :  { %v2619_v16 = vpop.permute.xlu1 %2618 }
0x36ff   :  { %v2621_v53 = vmul.f32 %v4955_v17, %v2619_v16  ;;  %v2626_v17 = vrot.slane %v4510_v35, 5  ;;  %v2879_v16 = vsub.f32 0.0, %v2878_v18 }
0x3701   :  { %v2623_v40 = vrot.slane %v2621_v53, 3 }
0x3703   :  { %v5263_v3 = vadd.f32 %v2623_v40, %v2606_v63  ;;  %v5298_v63 = vld [vmem:[#allocation2 + $0xd8] sm:$0xff] }
0x3705   :  { %5755 = vst [vmem:[#allocation26_spill] sm:$0xff] %v5263_v3  ;;  %3840 = vmatmul.msk.f32.vlgmr.msrb.gmra.mxu1 %vm382_vm8, %v5263_v3 }
0x3706   :  { %2922 = vmatpush.msrb.mxu1 %v5267_v27 }
0x3708   :  { %2923 = vmatpush.msrb.mxu1 %v5270_v21 }
0x370a   :  { %2924 = vmatpush.msrb.mxu1 %v5273_v31 }
0x370c   :  { %2925 = vmatpush.msrb.mxu1 %v5276_v56 }
0x3782   :  { %v2648_v25 = vpop.f32.mrf.mxu1 }
0x3783   :  { %v2649_v39 = vadd.f32 %v2648_v25, %v2626_v17  ;;  %v2880_v17 = vmul.f32 1.442695, %v2879_v16 }
0x3785   :  { %3842 = vmatmul.msk.f32.vlgmr.msrb.gmra.mxu2 %vm382_vm8, %v2649_v39 }
0x3786   :  { %2946 = vmatpush.msrb.mxu2 %v5281_v11 }
0x3788   :  { %2947 = vmatpush.msrb.mxu2 %v5284_v61 }
0x378a   :  { %2948 = vmatpush.msrb.mxu2 %v5287_v19 }
0x378c   :  { %2949 = vmatpush.msrb.mxu2 %v5290_v15 }
0x3808   :  { %v2673_v36 = vpop.f32.mrf.mxu2 }
0x3809   :  { %v2674_v29 = vadd.f32 %v2673_v36, %v2651_v58 }
0x380b   :  { %3844 = vmatmul.msk.f32.vlgmr.msrb.gmra.mxu3 %vm382_vm8, %v2674_v29 }
0x380c   :  { %2970 = vmatpush.msrb.mxu3 %v5295_v38 }
0x380e   :  { %2971 = vmatpush.msrb.mxu3 %v5298_v63 }
0x3810   :  { %2972 = vmatpush.msrb.mxu3 %v5301_v43 }
0x3812   :  { %2973 = vmatpush.msrb.mxu3 %v5304_v55 }
0x388e   :  { %v2696_v51 = vpop.f32.mrf.mxu3 }
0x388f   :  { %v2697_v5 = vadd.f32 %v5006_v6, %v2696_v51  ;;  %v2885_v6 = vpop.permute.xlu0 %2884 }
0x3891   :  { %v2719_v41 = vadd.f32 %v5249_v26, %v2697_v5 }
0x3893   :  { %v2720_v53 = vsub.f32 0.0, %v2719_v41 }
0x3895   :  { %v2721_v40 = vmul.f32 1.442695, %v2720_v53 }
0x3897   :  { %4052 = vpow2.f32 %v2721_v40 }
0x3898   :  { %4054 = vpow2.f32 %v2880_v17 }
0x389d   :  { %v4053_v25 = vpop.eup %4052 }
0x389e   :  { %v2723_v39 = vadd.f32 1.0, %v4053_v25  ;;  %v4055_v58 = vpop.eup %4054 }
0x389f   :  { %v2882_v36 = vadd.f32 1.0, %v4055_v58 }
0x38a0   :  { %4056 = vrcp.f32 %v2723_v39 }
0x38a1   :  { %4058 = vrcp.f32 %v2882_v36 }
0x38a6   :  { %v4057_v29 = vpop.eup %4056 }
0x38a7   :  { %v2729_v3 = vmul.f32 %v4057_v29, %v2727_v14  ;;  %v4059_v20 = vpop.eup %4058  ;;  %v2900_v14 = vrot.slane %v5166_v4, 7  ;;  %v2736_v36 = vsub.f32 1.0, %v4057_v29 }
0x38a8   :  { %v2887_v26 = vmul.f32 %v4059_v20, %v2885_v6 }
0x38a9   :  { %2731 = vrot.lane.b32.xlu0 %v2729_v3, %s4329_s0  ;;  %v2894_v3 = vsub.f32 1.0, %v4059_v20  ;;  %v2902_v25 = vmul.f32 %v4059_v20, %v2900_v14 }
0x38b1   :  { %2889 = vrot.lane.b32.xlu0 %v2887_v26, %s4329_s0  ;;  %v2742_v26 = vmul.f32 %v4057_v29, %v5171_v62 }
0x391b   :  { %v2732_v51 = vpop.permute.xlu0 %2731 }
0x391c   :  { %v2734_v18 = vadd.f32 %v2732_v51, %v2697_v5 }
0x391e   :  { %4060 = vtanh.f32 %v2734_v18 }
0x3923   :  { %v2890_v41 = vpop.permute.xlu0 %2889 }
0x3924   :  { %v4061_v16 = vpop.eup %4060  ;;  %v2892_v53 = vadd.f32 %v2890_v41, %v4387_v12 }
0x3925   :  { %2738 = vrot.lane.b32.xlu1 %v4061_v16, %s4330_s1 }
0x3926   :  { %4062 = vtanh.f32 %v2892_v53 }
0x392c   :  { %v4063_v40 = vpop.eup %4062 }
0x392d   :  { %2896 = vrot.lane.b32.xlu2 %v4063_v40, %s4330_s1  ;;  %v4227_v40 = vld [vmem:[#allocation2 + $0x108] sm:$0xf] }
0x3987   :  { %v2897_v17 = vpop.permute.xlu2 %2896 }
0x3988   :  { %v2899_v39 = vmul.f32 %v2897_v17, %v2894_v3 }
0x398a   :  { %v5316_v58 = vadd.f32 %v2902_v25, %v2899_v39 }
0x398c   :  { %v2905_v5 = vrot.slane %v5316_v58, 6 }
0x398e   :  { %2906 = vrot.lane.b32.xlu1 %v2905_v5, %s4330_s1 }
0x3997   :  { %v2739_v6 = vpop.permute.xlu1 %2738 }
0x3998   :  { %v2741_v51 = vmul.f32 %v2739_v6, %v2736_v36 }
0x399a   :  { %v5321_v18 = vadd.f32 %v2742_v26, %v2741_v51 }
0x399c   :  { %2745 = vrot.lane.b32.xlu0 %v5321_v18, %s4330_s1 }
0x3a00   :  { %v2907_v20 = vpop.permute.xlu1 %2906 }
0x3a0e   :  { %v2746_v4 = vpop.permute.xlu0 %2745 }
0x3a0f   :  { %3846 = vmatmul.msk.f32.vlgmr.msra.gmra.mxu1 %vm145_vm1, %v2746_v4 }
0x3a10   :  { %3855 = vmatpush.msk.msra.mxu1 %vm386_vm7, %v5025_v32 }
0x3a17   :  { %3850 = vmatmul.msk.f32.vlgmr.msrb.gmra.mxu1 %vm145_vm1, %v2907_v20 }
0x3a18   :  { %3230 = vmatpush.msrb.mxu1 %v5030_v22 }
0x3a1a   :  { %3231 = vmatpush.msrb.mxu1 %v5033_v54 }
0x3a1c   :  { %3232 = vmatpush.msrb.mxu1 %v5036_v9 }
0x3a1e   :  { %3233 = vmatpush.msrb.mxu1 %v5039_v1  ;;  %v5345_v1 = vld [vmem:[#allocation2 + $0x58] sm:$0xff] }
0x3a8c   :  { %v2766_v62 = vpop.f32.mrf.mxu1 }
0x3a8d   :  { %v2767_v29 = vadd.f32 %v5042_v47, %v2766_v62  ;;  %v5389_v62 = vld [vmem:[#allocation2 + $0xf8] sm:$0xf] }
0x3a8f   :  { %v2769_v41 = vmax.f32 %v2767_v29, 0.0 }
0x3a91   :  { %3847 = vmatmul.msk.f32.vlgmr.msra.gmra.mxu2 %vm145_vm1, %v2769_v41 }
0x3a92   :  { %3857 = vmatpush.msk.msra.mxu2 %vm386_vm7, %v5046_v44  ;;  %v5348_v44 = vld [vmem:[#allocation2 + $0x50] sm:$0xff] }
0x3a94   :  { %v2927_v32 = vpop.f32.mrf.mxu1 }
0x3a95   :  { %v2928_v16 = vadd.f32 %v2927_v32, %v4430_v45 }
0x3a97   :  { %v2930_v53 = vmax.f32 %v2928_v16, 0.0  ;;  %v5393_v16 = vld [vmem:[#allocation2 + $0x100] sm:$0x1] }
0x3a99   :  { %3851 = vmatmul.msk.f32.vlgmr.msrb.gmra.mxu2 %vm145_vm1, %v2930_v53 }
0x3a9a   :  { %3254 = vmatpush.msrb.mxu2 %v5052_v24  ;;  %v5351_v24 = vld [vmem:[#allocation2 + $0xc0] sm:$0x1] }
0x3a9c   :  { %3255 = vmatpush.msrb.mxu2 %v5055_v10 }
0x3a9e   :  { %3256 = vmatpush.msrb.mxu2 %v5058_v33  ;;  %v5354_v33 = vld [vmem:[#allocation2 + $0x48] sm:$0xff] }
0x3aa0   :  { %3257 = vmatpush.msrb.mxu2 %v5061_v28 }
0x3b14   :  { %v2790_v22 = vpop.f32.mrf.mxu2 }
0x3b15   :  { %v2791_v54 = vadd.f32 %v5064_v30, %v2790_v22  ;;  %v5357_v30 = vld [vmem:[#allocation2 + $0x40] sm:$0xff] }
0x3b17   :  { %v2793_v9 = vmax.f32 %v2791_v54, 0.0 }
0x3b19   :  { %3848 = vmatmul.msk.f32.vlgmr.msra.gmra.mxu3 %vm145_vm1, %v2793_v9  ;;  %v5396_v9 = vld [vmem:[#allocation2 + $0xf0] sm:$0xf] }
0x3b1a   :  { %3156 = vmatpush.msra.mxu3 %v5345_v1 }
0x3b1c   :  { %v2951_v47 = vpop.f32.mrf.mxu2  ;;  %3157 = vmatpush.msra.mxu3 %v5348_v44 }
0x3b1d   :  { %v2952_v10 = vadd.f32 %v5351_v24, %v2951_v47 }
0x3b1e   :  { %3158 = vmatpush.msra.mxu3 %v5354_v33 }
0x3b1f   :  { %v2954_v28 = vmax.f32 %v2952_v10, 0.0 }
0x3b20   :  { %3159 = vmatpush.msra.mxu3 %v5357_v30 }
0x3b21   :  { %3852 = vmatmul.msk.f32.vlgmr.msrb.gmra.mxu3 %vm145_vm1, %v2954_v28 }
0x3b22   :  { %3312 = vmatpush.msrb.mxu3 %v5201_v7 }
0x3b24   :  { %3313 = vmatpush.msrb.mxu3 %v5204_v13 }
0x3b26   :  { %3314 = vmatpush.msrb.mxu3 %v5207_v57  ;;  %v5374_v57 = vld [vmem:[#allocation2 + $0xe8] sm:$0x1] }
0x3b28   :  { %3315 = vmatpush.msrb.mxu3 %v5210_v2 }
0x3b29   :  { %3859 = vmatmul.msk.f32.vlgmr.msra.gmra.mxu3 %vm145_vm1, %v2746_v4 }
0x3b2a   :  { %3867 = vmatpush.msk.msra.mxu3 %vm386_vm7, %v4227_v40 }
0x3b31   :  { %3863 = vmatmul.msk.f32.vlgmr.msrb.gmra.mxu3 %vm145_vm1, %v2907_v20 }
0x3b32   :  { %3651 = vmatpush.msrb.mxu3 %v5082_v42 }
0x3b34   :  { %3652 = vmatpush.msrb.mxu3 %v5085_v59 }
0x3b36   :  { %3653 = vmatpush.msrb.mxu3 %v5088_v49 }
0x3b38   :  { %3654 = vmatpush.msrb.mxu3 %v5091_v50 }
0x3b9c   :  { %v5372_v7 = vpop.f32.mrf.mxu3 }
0x3ba4   :  { %v2975_v13 = vpop.f32.mrf.mxu3 }
0x3ba5   :  { %v5377_v2 = vadd.f32 %v5374_v57, %v2975_v13 }
0x3ba7   :  { %v2979_v14 = vmin.f32 %v5377_v2, 1.0  ;;  %vm2978_vm14 = vcmp.gt.f32.partialorder %v5377_v2, 1.0 }
0x3ba9   :  { %v2980_v3 = vmul.f32 1.442695, %v2979_v14 }
0x3bab   :  { %4064 = vpow2.f32 %v2980_v3 }
0x3bb1   :  { %v4065_v17 = vpop.eup %4064 }
0x3bb2   :  { %v2982_v42 = vadd.f32 1.0, %v4065_v17 }
0x3bb4   :  { %4066 = vlog2.f32 %v2982_v42 }
0x3bba   :  { %v4067_v59 = vpop.eup %4066 }
0x3bbb   :  { %v2984_v25 = vmul.f32 0.6931472, %v4067_v59 }
0x3bbd   :  { %v5382_v49 = vsel %vm2978_vm14, %v5377_v2, %v2984_v25 }
0x3bbe   :  { %v2986_v50 = vmul.f32 0.5, %v5382_v49 }
0x3bc0   :  { %v2987_v39 = vmul.f32 1.442695, %v2986_v50 }
0x3bc2   :  { %4068 = vpow2.f32 %v2987_v39 }
0x3bc8   :  { %v4069_v5 = vpop.eup %4068 }
0x3bc9   :  { %v2990_v36 = vrot.slane %v4069_v5, 2 }
0x3bcb   :  { %2991 = vrot.lane.b32.xlu2 %v2990_v36, %s4332_s22 }
0x3c25   :  { %v2992_v6 = vpop.permute.xlu2 %2991 }
0x3c26   :  { %v2994_v26 = vmul.f32 %v5233_v46, %v2992_v6  ;;  %v3161_v6 = vpop.f32.mrf.mxu3 }
0x3c28   :  { %v2996_v51 = vrot.slane %v2994_v26, 6  ;;  %v5405_v26 = vld [vmem:[#allocation2 + $0x68] sm:$0x1] }
0x3c2a   :  { %2997 = vrot.lane.b32.xlu0 %v2996_v51, %s4333_s23  ;;  %v5408_v51 = vadd.f32 %v5405_v26, %v3161_v6 }
0x3c9c   :  { %v2998_v4 = vpop.permute.xlu0 %2997 }
0x3c9d   :  { %v3000_v20 = vadd.f32 %v2998_v4, %v5377_v2 }
0x3c9f   :  { %v3001_v29 = vmul.f32 %v5389_v62, %v3000_v20 }
0x3ca1   :  { %v3002_v41 = vsel %vm292_vm3, %v3001_v29, 0.0 }
0x3ca2   :  { %3003 = vadd.xlane.f32.xlu1 %v3002_v41  ;;  %v3317_v41 = vpop.f32.mrf.mxu3 }
0x3d15   :  { %v3004_v32 = vpop.xlane.xlu1 %3003 }
0x3d16   :  { %v3005_v53 = vadd.f32 %v5393_v16, %v3004_v32  ;;  %v3318_v32 = vadd.f32 %v5254_v60, %v3317_v41 }
0x3d18   :  { %4070 = vtanh.f32 %v3005_v53  ;;  %v3321_v53 = vrot.slane %v3318_v32, 1 }
0x3d1e   :  { %v4071_v22 = vpop.eup %4070 }
0x3d1f   :  { %3009 = vperm.xlu2 %3896, %v4071_v22  }
0x3d79   :  { %v3010_v54 = vpop.permute.xlu2 %3009 }
0x3d7a   :  { %v3012_v47 = vmul.f32 %v5396_v9, %v3010_v54 }
0x3d7c   :  { %v3013_v10 = vadd.f32 %v3012_v47, %v3000_v20 }
0x3d7e   :  { %v3015_v28 = vrot.slane %v3013_v10, 7 }
0x3d80   :  { %v3017_v40 = vmul.f32 %v5389_v62, %v3015_v28 }
0x3d82   :  { %v3018_v13 = vsel %vm309_vm4, %v3017_v40, 0.0 }
0x3d83   :  { %3019 = vadd.xlane.f32.xlu0 %v3018_v13 }
0x3df6   :  { %v3020_v14 = vpop.xlane.xlu0 %3019 }
0x3df7   :  { %v3021_v3 = vadd.f32 %v3020_v14, %v4499_v8  ;;  %v3323_v14 = vadd.f32 %v3321_v53, %v4387_v12 }
0x3df9   :  { %4072 = vtanh.f32 %v3021_v3  ;;  %v3324_v3 = vsub.f32 0.0, %v3323_v14 }
0x3dff   :  { %v4073_v17 = vpop.eup %4072 }
0x3e00   :  { %3025 = vperm.xlu2 %3896, %v4073_v17   ;;  %v3325_v17 = vmul.f32 1.442695, %v3324_v3  ;;  %v3345_v3 = vrot.slane %v5316_v58, 7 }
0x3e5a   :  { %v3026_v42 = vpop.permute.xlu2 %3025 }
0x3e5b   :  { %v3028_v59 = vmul.f32 %v5396_v9, %v3026_v42 }
0x3e5d   :  { %v3030_v25 = vrot.slane %v3028_v59, 1 }
0x3e5f   :  { %v3032_v50 = vadd.f32 %v3030_v25, %v3013_v10 }
0x3e61   :  { %v3034_v39 = vrot.slane %v3032_v50, 6 }
0x3e63   :  { %v3036_v5 = vmul.f32 %v5389_v62, %v3034_v39 }
0x3e65   :  { %v3037_v36 = vsel %vm334_vm5, %v3036_v5, 0.0 }
0x3e66   :  { %3038 = vadd.xlane.f32.xlu2 %v3037_v36 }
0x3e7e   :  { %3171 = vrot.lane.b32.xlu2 %v5408_v51, %s4329_s0 }
0x3ed9   :  { %v3039_v4 = vpop.xlane.xlu2 %3038 }
0x3eda   :  { %v3040_v20 = vadd.f32 %v3039_v4, %v5754_v34 }
0x3edc   :  { %4074 = vtanh.f32 %v3040_v20 }
0x3edd   :  { %4076 = vpow2.f32 %v3325_v17 }
0x3ee2   :  { %v4075_v29 = vpop.eup %4074 }
0x3ee3   :  { %3044 = vperm.xlu1 %3900, %v4075_v29   ;;  %v4077_v59 = vpop.eup %4076 }
0x3ee4   :  { %v3327_v25 = vadd.f32 1.0, %v4077_v59 }
0x3eeb   :  { %3329 = vrot.lane.b32.xlu1 %v3321_v53, %s4329_s0 }
0x3f55   :  { %v3045_v22 = vpop.permute.xlu1 %3044 }
0x3f56   :  { %v3047_v54 = vmul.f32 %v5396_v9, %v3045_v22  ;;  %v3071_v22 = vrot.slane %v4510_v35, 6 }
0x3f58   :  { %v3049_v47 = vrot.slane %v3047_v54, 2 }
0x3f5a   :  { %v3051_v10 = vadd.f32 %v3049_v47, %v3032_v50 }
0x3f5c   :  { %v3053_v28 = vrot.slane %v3051_v10, 5 }
0x3f5d   :  { %v3330_v50 = vpop.permute.xlu1 %3329 }
0x3f5e   :  { %v3055_v40 = vmul.f32 %v5389_v62, %v3053_v28 }
0x3f60   :  { %v3056_v13 = vsel %vm358_vm6, %v3055_v40, 0.0  ;;  %v3172_v40 = vpop.permute.xlu2 %3171 }
0x3f61   :  { %3057 = vadd.xlane.f32.xlu0 %v3056_v13 }
0x3fd4   :  { %v3058_v60 = vpop.xlane.xlu0 %3057 }
0x3fd5   :  { %v3059_v42 = vadd.f32 %v3058_v60, %v4507_v23 }
0x3fd7   :  { %4078 = vtanh.f32 %v3059_v42 }
0x3fd8   :  { %4080 = vrcp.f32 %v3327_v25 }
0x3fdd   :  { %v4079_v39 = vpop.eup %4078 }
0x3fde   :  { %3063 = vperm.xlu0 %3897, %v4079_v39   ;;  %v4081_v5 = vpop.eup %4080 }
0x3fdf   :  { %v3332_v36 = vmul.f32 %v4081_v5, %v3330_v50  ;;  %v3339_v14 = vsub.f32 1.0, %v4081_v5  ;;  %v3347_v60 = vmul.f32 %v4081_v5, %v3345_v3  ;;  %v4234_v5 = vld [vmem:[#allocation2 + $0x110] sm:$0xf] }
0x3fe6   :  { %3334 = vrot.lane.b32.xlu0 %v3332_v36, %s4329_s0 }
0x4050   :  { %v3064_v6 = vpop.permute.xlu0 %3063 }
0x4051   :  { %v3066_v4 = vmul.f32 %v5396_v9, %v3064_v6 }
0x4053   :  { %v3068_v20 = vrot.slane %v3066_v4, 3 }
0x4055   :  { %v5422_v29 = vadd.f32 %v3068_v20, %v3051_v10  ;;  %v4235_v20 = vld [vmem:[#allocation2 + $0x158] sm:$0xff] }
0x4057   :  { %3854 = vmatmul.msk.f32.vlgmr.msra.gmra.mxu0 %vm382_vm8, %v5422_v29 }
0x4058   :  { %v3335_v41 = vpop.permute.xlu0 %3334  ;;  %3367 = vmatpush.msra.mxu0 %v5267_v27 }
0x4059   :  { %v3337_v32 = vadd.f32 %v3335_v41, %v4387_v12  ;;  %v3096_v12 = vrot.slane %v4515_v48, 6  ;;  %v4236_v41 = vld [vmem:[#allocation2 + $0x150] sm:$0xff] }
0x405a   :  { %3368 = vmatpush.msra.mxu0 %v5270_v21 }
0x405b   :  { %4082 = vtanh.f32 %v3337_v32  ;;  %v4238_v32 = vld [vmem:[#allocation2 + $0x140] sm:$0xff] }
0x405c   :  { %3369 = vmatpush.msra.mxu0 %v5273_v31 }
0x405e   :  { %3370 = vmatpush.msra.mxu0 %v5276_v56  ;;  %v5444_v56 = vld [vmem:[#allocation2 + $0x60] sm:$0x1] }
0x4061   :  { %v4083_v53 = vpop.eup %4082 }
0x4062   :  { %3341 = vrot.lane.b32.xlu0 %v4083_v53, %s4330_s1 }
0x40d4   :  { %v3093_v54 = vpop.f32.mrf.mxu0  ;;  %v3342_v13 = vpop.permute.xlu0 %3341 }
0x40d5   :  { %v3094_v47 = vadd.f32 %v3093_v54, %v3071_v22  ;;  %v3344_v17 = vmul.f32 %v3342_v13, %v3339_v14  ;;  %v5460_v22 = vld [vmem:[#allocation2 + $0x138] sm:$0x1] }
0x40d7   :  { %3856 = vmatmul.msk.f32.vlgmr.msra.gmra.mxu1 %vm382_vm8, %v3094_v47  ;;  %v3348_v42 = vadd.f32 %v3347_v60, %v3344_v17 }
0x40d8   :  { %3391 = vmatpush.msra.mxu1 %v5281_v11 }
0x40d9   :  { %v3350_v59 = vrot.slane %v3348_v42, 7 }
0x40da   :  { %3392 = vmatpush.msra.mxu1 %v5284_v61 }
0x40dc   :  { %3393 = vmatpush.msra.mxu1 %v5287_v19 }
0x40de   :  { %3394 = vmatpush.msra.mxu1 %v5290_v15 }
0x4154   :  { %v3118_v27 = vpop.f32.mrf.mxu1 }
0x4155   :  { %v3119_v21 = vadd.f32 %v3118_v27, %v3096_v12  ;;  %v4240_v12 = vld [vmem:[#allocation2 + $0x38] sm:$0xf] }
0x4157   :  { %3858 = vmatmul.msk.f32.vlgmr.msra.gmra.mxu2 %vm382_vm8, %v3119_v21 }
0x4158   :  { %3415 = vmatpush.msra.mxu2 %v5295_v38 }
0x415a   :  { %3416 = vmatpush.msra.mxu2 %v5298_v63 }
0x415c   :  { %3417 = vmatpush.msra.mxu2 %v5301_v43 }
0x415e   :  { %3418 = vmatpush.msra.mxu2 %v5304_v55 }
0x41da   :  { %v3141_v31 = vpop.f32.mrf.mxu2 }
0x41db   :  { %v3142_v11 = vadd.f32 %v5444_v56, %v3141_v31 }
0x41dd   :  { %v3164_v61 = vadd.f32 %v5408_v51, %v3142_v11 }
0x41df   :  { %v3165_v19 = vsub.f32 0.0, %v3164_v61  ;;  %v4242_v61 = vld [vmem:[#allocation2 + $0x178] sm:$0xff] }
0x41e1   :  { %v3166_v15 = vmul.f32 1.442695, %v3165_v19  ;;  %v4243_v19 = vld [vmem:[#allocation2 + $0x170] sm:$0xff] }
0x41e3   :  { %4084 = vpow2.f32 %v3166_v15  ;;  %v4244_v15 = vld [vmem:[#allocation2 + $0x168] sm:$0xff] }
0x41e9   :  { %v4085_v10 = vpop.eup %4084 }
0x41ea   :  { %v3168_v28 = vadd.f32 1.0, %v4085_v10 }
0x41ec   :  { %4086 = vrcp.f32 %v3168_v28  ;;  %v5467_v28 = vld [vmem:[#allocation2 + $0x160] sm:$0x1] }
0x41f2   :  { %v4087_v38 = vpop.eup %4086 }
0x41f3   :  { %v3174_v63 = vmul.f32 %v4087_v38, %v3172_v40  ;;  %v3181_v25 = vsub.f32 1.0, %v4087_v38  ;;  %v3187_v50 = vmul.f32 %v4087_v38, %v5321_v18  ;;  %v4237_v18 = vld [vmem:[#allocation2 + $0x148] sm:$0xff] }
0x41f5   :  { %3176 = vrot.lane.b32.xlu1 %v3174_v63, %s4329_s0 }
0x4267   :  { %v3177_v43 = vpop.permute.xlu1 %3176 }
0x4268   :  { %v3179_v55 = vadd.f32 %v3177_v43, %v3142_v11  ;;  %v4241_v11 = vld [vmem:[#allocation2 + $0x180] sm:$0xff] }
0x426a   :  { %4088 = vtanh.f32 %v3179_v55 }
0x4270   :  { %v4089_v51 = vpop.eup %4088 }
0x4271   :  { %3183 = vrot.lane.b32.xlu1 %v4089_v51, %s4330_s1 }
0x4279   :  { %3351 = vrot.lane.b32.xlu1 %v3350_v59, %s4330_s1 }
0x42e3   :  { %v3184_v39 = vpop.permute.xlu1 %3183 }
0x42e4   :  { %v3186_v36 = vmul.f32 %v3184_v39, %v3181_v25 }
0x42e6   :  { %v5453_v6 = vadd.f32 %v3187_v50, %v3186_v36 }
0x42e8   :  { %3190 = vrot.lane.b32.xlu2 %v5453_v6, %s4330_s1 }
0x42eb   :  { %v3352_v4 = vpop.permute.xlu1 %3351 }
0x4342   :  { %v3191_v58 = vpop.permute.xlu2 %3190 }
0x4343   :  { %3860 = vmatmul.msk.f32.vlgmr.msrb.gmra.mxu0 %vm145_vm1, %v3191_v58 }
0x4344   :  { %3869 = vmatpush.msk.msrb.mxu0 %vm386_vm7, %v4234_v5 }
0x434b   :  { %3864 = vmatmul.msk.f32.vlgmr.msra.gmra.mxu0 %vm145_vm1, %v3352_v4 }
0x434c   :  { %3675 = vmatpush.msra.mxu0 %v4235_v20 }
0x434e   :  { %3676 = vmatpush.msra.mxu0 %v4236_v41 }
0x4350   :  { %3677 = vmatpush.msra.mxu0 %v4237_v18 }
0x4352   :  { %3678 = vmatpush.msra.mxu0 %v4238_v32 }
0x43c0   :  { %v3211_v53 = vpop.f32.mrf.mxu0 }
0x43c1   :  { %v3212_v54 = vadd.f32 %v5460_v22, %v3211_v53 }
0x43c3   :  { %v3214_v47 = vmax.f32 %v3212_v54, 0.0 }
0x43c5   :  { %3861 = vmatmul.msk.f32.vlgmr.msrb.gmra.mxu1 %vm145_vm1, %v3214_v47 }
0x43c6   :  { %3871 = vmatpush.msk.msrb.mxu1 %vm386_vm7, %v4240_v12 }
0x43c8   :  { %v3372_v27 = vpop.f32.mrf.mxu0 }
0x43c9   :  { %v3373_v21 = vadd.f32 %v3372_v27, %v4430_v45 }
0x43cb   :  { %v3375_v31 = vmax.f32 %v3373_v21, 0.0 }
0x43cd   :  { %3865 = vmatmul.msk.f32.vlgmr.msra.gmra.mxu1 %vm145_vm1, %v3375_v31 }
0x43ce   :  { %3699 = vmatpush.msra.mxu1 %v4241_v11  ;;  %v5756_v11 = vld [vmem:[#allocation16_spill] sm:$0xff] }
0x43d0   :  { %3700 = vmatpush.msra.mxu1 %v4242_v61 }
0x43d2   :  { %3701 = vmatpush.msra.mxu1 %v4243_v19 }
0x43d4   :  { %3702 = vmatpush.msra.mxu1 %v4244_v15 }
0x4442   :  { %v3235_v10 = vpop.f32.mrf.mxu1 }
0x4443   :  { %v3236_v38 = vadd.f32 %v5467_v28, %v3235_v10 }
0x4445   :  { %v3238_v40 = vmax.f32 %v3236_v38, 0.0 }
0x4447   :  { %3862 = vmatmul.msk.f32.vlgmr.msrb.gmra.mxu2 %vm145_vm1, %v3238_v40 }
0x4448   :  { %3601 = vmatpush.msrb.mxu2 %v5345_v1 }
0x444a   :  { %v3396_v45 = vpop.f32.mrf.mxu1  ;;  %3602 = vmatpush.msrb.mxu2 %v5348_v44 }
0x444b   :  { %v3397_v63 = vadd.f32 %v5351_v24, %v3396_v45 }
0x444c   :  { %3603 = vmatpush.msrb.mxu2 %v5354_v33 }
0x444d   :  { %v3399_v43 = vmax.f32 %v3397_v63, 0.0 }
0x444e   :  { %3604 = vmatpush.msrb.mxu2 %v5357_v30 }
0x444f   :  { %3866 = vmatmul.msk.f32.vlgmr.msra.gmra.mxu2 %vm145_vm1, %v3399_v43 }
0x4457   :  { %3873 = vmatmul.msk.f32.vlgmr.msrb.gmra.mxu2 %vm145_vm1, %v3191_v58 }
0x44ca   :  { %v5478_v55 = vpop.f32.mrf.mxu2 }
0x44d2   :  { %v3420_v13 = vpop.f32.mrf.mxu2 }
0x44d3   :  { %v5481_v14 = vadd.f32 %v5374_v57, %v3420_v13 }
0x44d5   :  { %v3424_v1 = vmin.f32 %v5481_v14, 1.0  ;;  %vm3423_vm15 = vcmp.gt.f32.partialorder %v5481_v14, 1.0 }
0x44d7   :  { %v3425_v44 = vmul.f32 1.442695, %v3424_v1 }
0x44d9   :  { %4090 = vpow2.f32 %v3425_v44 }
0x44df   :  { %v4091_v24 = vpop.eup %4090 }
0x44e0   :  { %v3427_v3 = vadd.f32 1.0, %v4091_v24 }
0x44e2   :  { %4092 = vlog2.f32 %v3427_v3 }
0x44e8   :  { %v4093_v33 = vpop.eup %4092 }
0x44e9   :  { %v3429_v17 = vmul.f32 0.6931472, %v4093_v33 }
0x44eb   :  { %v5486_v30 = vsel %vm3423_vm15, %v5481_v14, %v3429_v17  ;;  %v3606_v17 = vpop.f32.mrf.mxu2 }
0x44ec   :  { %v3431_v51 = vmul.f32 0.5, %v5486_v30 }
0x44ee   :  { %v3432_v60 = vmul.f32 1.442695, %v3431_v51 }
0x44f0   :  { %4094 = vpow2.f32 %v3432_v60  ;;  %v3607_v60 = vadd.f32 %v5405_v26, %v3606_v17 }
0x44f6   :  { %v4095_v57 = vpop.eup %4094 }
0x44f7   :  { %v3435_v42 = vrot.slane %v4095_v57, 1 }
0x44f9   :  { %3436 = vrot.lane.b32.xlu0 %v3435_v42, %s4332_s22  ;;  %v5757_v42 = vld [vmem:[#allocation11_spill] sm:$0xff] }
0x456b   :  { %v3437_v59 = vpop.permute.xlu0 %3436 }
0x456c   :  { %v3439_v25 = vmul.f32 %v5233_v46, %v3437_v59 }
0x456e   :  { %v3441_v39 = vrot.slane %v3439_v25, 7 }
0x4570   :  { %3442 = vrot.lane.b32.xlu2 %v3441_v39, %s4333_s23 }
0x45ca   :  { %v3443_v50 = vpop.permute.xlu2 %3442 }
0x45cb   :  { %v3445_v36 = vadd.f32 %v3443_v50, %v5481_v14 }
0x45cd   :  { %v3446_v58 = vmul.f32 %v5389_v62, %v3445_v36 }
0x45cf   :  { %v3447_v5 = vsel %vm292_vm3, %v3446_v58, 0.0 }
0x45d0   :  { %3448 = vadd.xlane.f32.xlu1 %v3447_v5 }
0x4643   :  { %v3449_v4 = vpop.xlane.xlu1 %3448 }
0x4644   :  { %v3450_v20 = vadd.f32 %v5393_v16, %v3449_v4  ;;  %v5500_v16 = vld [vmem:[#allocation2 + $0x188] sm:$0x1] }
0x4645   :  { %v5504_v61 = vadd.f32 %v5756_v11, %v5500_v16 }
0x4646   :  { %4096 = vtanh.f32 %v3450_v20 }
0x4647   :  { %v591_v19 = vmin.f32 %v5504_v61, 1.0  ;;  %vm590_vm0 = vcmp.gt.f32.partialorder %v5504_v61, 1.0 }
0x4649   :  { %v592_v15 = vmul.f32 1.442695, %v591_v19 }
0x464c   :  { %v4097_v41 = vpop.eup %4096 }
0x464d   :  { %3454 = vperm.xlu0 %3897, %v4097_v41  }
0x46bf   :  { %v3455_v18 = vpop.permute.xlu0 %3454 }
0x46c0   :  { %v3457_v32 = vmul.f32 %v5396_v9, %v3455_v18 }
0x46c2   :  { %v3458_v53 = vadd.f32 %v3457_v32, %v3445_v36 }
0x46c4   :  { %v3460_v54 = vrot.slane %v3458_v53, 7 }
0x46c6   :  { %v3462_v47 = vmul.f32 %v5389_v62, %v3460_v54 }
0x46c8   :  { %v3463_v12 = vsel %vm309_vm4, %v3462_v47, 0.0 }
0x46c9   :  { %3464 = vadd.xlane.f32.xlu2 %v3463_v12 }
0x473c   :  { %v3465_v27 = vpop.xlane.xlu2 %3464 }
0x473d   :  { %v3466_v21 = vadd.f32 %v3465_v27, %v4499_v8 }
0x473f   :  { %4098 = vtanh.f32 %v3466_v21 }
0x4740   :  { %4100 = vpow2.f32 %v592_v15 }
0x4745   :  { %v4099_v31 = vpop.eup %4098 }
0x4746   :  { %3470 = vperm.xlu0 %3897, %v4099_v31   ;;  %v4101_v40 = vpop.eup %4100 }
0x4747   :  { %v594_v63 = vadd.f32 1.0, %v4101_v40 }
0x4749   :  { %4102 = vlog2.f32 %v594_v63 }
0x474f   :  { %v4103_v44 = vpop.eup %4102 }
0x4750   :  { %v596_v24 = vmul.f32 0.6931472, %v4103_v44 }
0x4752   :  { %v597_v3 = vsel %vm590_vm0, %v5504_v61, %v596_v24 }
0x4753   :  { %v598_v33 = vmul.f32 0.5, %v597_v3 }
0x4755   :  { %v599_v51 = vmul.f32 1.442695, %v598_v33 }
0x4757   :  { %4104 = vpow2.f32 %v599_v51 }
0x475d   :  { %v4105_v57 = vpop.eup %4104 }
0x47b8   :  { %v3471_v10 = vpop.permute.xlu0 %3470 }
0x47b9   :  { %v3473_v38 = vmul.f32 %v5396_v9, %v3471_v10 }
0x47bb   :  { %v3475_v45 = vrot.slane %v3473_v38, 1 }
0x47bd   :  { %v3477_v8 = vadd.f32 %v3475_v45, %v3458_v53 }
0x47bf   :  { %v3479_v43 = vrot.slane %v3477_v8, 6 }
0x47c1   :  { %v3481_v13 = vmul.f32 %v5389_v62, %v3479_v43 }
0x47c3   :  { %v3482_v1 = vsel %vm334_vm5, %v3481_v13, 0.0  ;;  %v5543_v13 = vadd.f32 %v5372_v7, %v5500_v16  ;;  %vm611_vm5 = vcmask 57344  }
0x47c4   :  { %3483 = vadd.xlane.f32.xlu0 %v3482_v1 }
0x47c5   :  { %v2818_v1 = vmin.f32 %v5543_v13, 1.0  ;;  %vm2817_vm3 = vcmp.gt.f32.partialorder %v5543_v13, 1.0 }
0x47c7   :  { %v2819_v44 = vmul.f32 1.442695, %v2818_v1 }
0x47d8   :  { %3616 = vrot.lane.b32.xlu0 %v3607_v60, %s4329_s0 }
0x47e0   :  { %602 = vrot.lane.b32.xlu0 %v4105_v57, %s4332_s22 }
0x47e8   :  { %619 = vrot.lane.b32.xlu0 %v5757_v42, %s4340_s27 }
0x4837   :  { %v3484_v59 = vpop.xlane.xlu0 %3483 }
0x4838   :  { %v3485_v25 = vadd.f32 %v3484_v59, %v5754_v34 }
0x483a   :  { %4106 = vtanh.f32 %v3485_v25 }
0x4840   :  { %v4107_v39 = vpop.eup %4106 }
0x4841   :  { %3489 = vperm.xlu1 %3900, %v4107_v39  }
0x484a   :  { %v3617_v45 = vpop.permute.xlu0 %3616 }
0x4852   :  { %v603_v59 = vpop.permute.xlu0 %602 }
0x4853   :  { %v605_v25 = vmul.f32 %v5233_v46, %v603_v59  ;;  %v5760_v46 = vld [vmem:[#allocation19_spill] sm:$0xff] }
0x48b3   :  { %v3490_v50 = vpop.permute.xlu1 %3489 }
0x48b4   :  { %v3492_v36 = vmul.f32 %v5396_v9, %v3490_v50 }
0x48b6   :  { %v3494_v26 = vrot.slane %v3492_v36, 2 }
0x48b8   :  { %v3496_v58 = vadd.f32 %v3494_v26, %v3477_v8 }
0x48ba   :  { %v3498_v5 = vrot.slane %v3496_v58, 5 }
0x48bc   :  { %v3500_v4 = vmul.f32 %v5389_v62, %v3498_v5  ;;  %v3516_v62 = vrot.slane %v4510_v35, 7 }
0x48be   :  { %v3501_v20 = vsel %vm358_vm6, %v3500_v4, 0.0 }
0x48bf   :  { %3502 = vadd.xlane.f32.xlu2 %v3501_v20 }
0x4932   :  { %v3503_v41 = vpop.xlane.xlu2 %3502 }
0x4933   :  { %v3504_v18 = vadd.f32 %v3503_v41, %v4507_v23  ;;  %v3541_v23 = vrot.slane %v4515_v48, 7  ;;  %v5758_v48 = vld [vmem:[#allocation23_spill] sm:$0xff] }
0x4934   :  { %v5538_v8 = vadd.f32 %v5758_v48, %v5500_v16 }
0x4935   :  { %4108 = vtanh.f32 %v3504_v18 }
0x4936   :  { %vm1482_vm2 = vcmp.gt.f32.partialorder %v5538_v8, 1.0 }
0x493b   :  { %v4109_v32 = vpop.eup %4108 }
0x493c   :  { %3508 = vperm.xlu2 %3896, %v4109_v32  }
0x4996   :  { %v3509_v34 = vpop.permute.xlu2 %3508 }
0x4997   :  { %v3511_v53 = vmul.f32 %v5396_v9, %v3509_v34 }
0x4999   :  { %v3513_v54 = vrot.slane %v3511_v53, 3 }
0x499b   :  { %v5523_v47 = vadd.f32 %v3513_v54, %v3496_v58  ;;  %v5759_v58 = vld [vmem:[#allocation12_spill] sm:$0xff] }
0x499c   :  { %v5761_v54 = vld [vmem:[#allocation20_spill] sm:$0xff] }
0x499d   :  { %3868 = vmatmul.msk.f32.vlgmr.msra.gmra.mxu3 %vm382_vm8, %v5523_v47 }
0x4a20   :  { %v3538_v12 = vpop.f32.mrf.mxu3 }
0x4a21   :  { %v3539_v27 = vadd.f32 %v3538_v12, %v3516_v62  ;;  %v5561_v62 = vadd.f32 %v5761_v54, %v5500_v16 }
0x4a23   :  { %3870 = vmatmul.msk.f32.vlgmr.msrb.gmra.mxu0 %vm382_vm8, %v3539_v27  ;;  %v1038_v12 = vmin.f32 %v5561_v62, 1.0  ;;  %vm1037_vm4 = vcmp.gt.f32.partialorder %v5561_v62, 1.0 }
0x4a25   :  { %v1039_v27 = vmul.f32 1.442695, %v1038_v12 }
0x4aa0   :  { %v3563_v21 = vpop.f32.mrf.mxu0 }
0x4aa1   :  { %v3564_v31 = vadd.f32 %v3563_v21, %v3541_v23  ;;  %v5762_v23 = vld [vmem:[#allocation28_spill] sm:$0xff] }
0x4aa2   :  { %v5566_v21 = vadd.f32 %v5762_v23, %v5500_v16 }
0x4aa3   :  { %3872 = vmatmul.msk.f32.vlgmr.msrb.gmra.mxu1 %vm382_vm8, %v3564_v31  ;;  %vm616_vm8 = vcmask 90176  }
0x4aa4   :  { %vm1927_vm6 = vcmp.gt.f32.partialorder %v5566_v21, 1.0 }
0x4b20   :  { %v3586_v11 = vpop.f32.mrf.mxu1 }
0x4b21   :  { %v3587_v9 = vadd.f32 %v5444_v56, %v3586_v11  ;;  %v1483_v56 = vmin.f32 %v5538_v8, 1.0  ;;  %v4342_v11 = vmov 0.0  }
0x4b22   :  { %144 = vst [vmem:[#allocation7] sm:$0xff] %v4342_v11 }
0x4b23   :  { %v3609_v19 = vadd.f32 %v3607_v60, %v3587_v9  ;;  %v1484_v43 = vmul.f32 1.442695, %v1483_v56 }
0x4b25   :  { %v3610_v15 = vsub.f32 0.0, %v3609_v19  ;;  %v1928_v19 = vmin.f32 %v5566_v21, 1.0 }
0x4b27   :  { %v3611_v10 = vmul.f32 1.442695, %v3610_v15  ;;  %v1929_v15 = vmul.f32 1.442695, %v1928_v19  ;;  %v5767_v19 = vld [vmem:[#allocation24_spill] sm:$0xff] }
0x4b29   :  { %4110 = vpow2.f32 %v3611_v10  ;;  %v5571_v10 = vadd.f32 %v5478_v55, %v5500_v16 }
0x4b2b   :  { %vm3262_vm7 = vcmp.gt.f32.partialorder %v5571_v10, 1.0 }
0x4b2f   :  { %v4111_v38 = vpop.eup %4110 }
0x4b30   :  { %v3613_v40 = vadd.f32 1.0, %v4111_v38  ;;  %v3263_v38 = vmin.f32 %v5571_v10, 1.0 }
0x4b32   :  { %4112 = vrcp.f32 %v3613_v40 }
0x4b33   :  { %4114 = vpow2.f32 %v1484_v43 }
0x4b34   :  { %4116 = vpow2.f32 %v2819_v44 }
0x4b38   :  { %v5532_v35 = vpop.eup %4112 }
0x4b39   :  { %v3619_v63 = vmul.f32 %v5532_v35, %v3617_v45  ;;  %v4115_v24 = vpop.eup %4114  ;;  %v3264_v45 = vmul.f32 1.442695, %v3263_v38  ;;  %v3626_v1 = vsub.f32 1.0, %v5532_v35  ;;  %v3632_v55 = vmul.f32 %v5532_v35, %v5453_v6  ;;  %v5763_v6 = vld [vmem:[#allocation15_spill] sm:$0xff] }
0x4b3a   :  { %v1486_v17 = vadd.f32 1.0, %v4115_v24  ;;  %v4117_v51 = vpop.eup %4116 }
0x4b3b   :  { %3621 = vrot.lane.b32.xlu1 %v3619_v63, %s4329_s0  ;;  %v2821_v57 = vadd.f32 1.0, %v4117_v51 }
0x4bad   :  { %v3622_v3 = vpop.permute.xlu1 %3621 }
0x4bae   :  { %v3624_v33 = vadd.f32 %v3622_v3, %v3587_v9 }
0x4bb0   :  { %4118 = vtanh.f32 %v3624_v33 }
0x4bb1   :  { %4120 = vlog2.f32 %v1486_v17 }
0x4bb2   :  { %4122 = vlog2.f32 %v2821_v57 }
0x4bb6   :  { %v4119_v60 = vpop.eup %4118 }
0x4bb7   :  { %3628 = vrot.lane.b32.xlu1 %v4119_v60, %s4330_s1  ;;  %v4121_v42 = vpop.eup %4120 }
0x4bb8   :  { %v1488_v7 = vmul.f32 0.6931472, %v4121_v42  ;;  %v4123_v50 = vpop.eup %4122 }
0x4bb9   :  { %v2823_v26 = vmul.f32 0.6931472, %v4123_v50 }
0x4bba   :  { %v1489_v39 = vsel %vm1482_vm2, %v5538_v8, %v1488_v7 }
0x4bbb   :  { %v1490_v36 = vmul.f32 0.5, %v1489_v39  ;;  %v2824_v4 = vsel %vm2817_vm3, %v5543_v13, %v2823_v26 }
0x4bbc   :  { %v2825_v20 = vmul.f32 0.5, %v2824_v4 }
0x4bbd   :  { %v1491_v5 = vmul.f32 1.442695, %v1490_v36 }
0x4bbe   :  { %v2826_v41 = vmul.f32 1.442695, %v2825_v20 }
0x4bbf   :  { %607 = vrot.lane.b32.xlu1 %v605_v25, %s4341_s28  ;;  %4124 = vpow2.f32 %v1491_v5 }
0x4bc0   :  { %4126 = vpow2.f32 %v2826_v41 }
0x4bc1   :  { %4128 = vpow2.f32 %v1039_v27 }
0x4bc5   :  { %v4125_v18 = vpop.eup %4124 }
0x4bc6   :  { %v1494_v32 = vrot.slane %v4125_v18, 6  ;;  %v4127_v34 = vpop.eup %4126 }
0x4bc7   :  { %625 = vrot.lane.b32.xlu1 %v5759_v58, %s4340_s27  ;;  %v2829_v53 = vrot.slane %v4127_v34, 3  ;;  %v4129_v31 = vpop.eup %4128  ;;  %v5593_v34 = vld [vmem:[#allocation5] sm:$0xff] }
0x4bc8   :  { %v1041_v9 = vadd.f32 1.0, %v4129_v31  ;;  %v5765_v31 = vld [vmem:[#allocation22_spill] sm:$0xff] }
0x4bca   :  { %4130 = vlog2.f32 %v1041_v9  ;;  %v5766_v9 = vld [vmem:[#allocation13_spill] sm:$0xff] }
0x4bcb   :  { %4132 = vpow2.f32 %v1929_v15 }
0x4bcc   :  { %4134 = vpow2.f32 %v3264_v45 }
0x4bcf   :  { %1061 = vrot.lane.b32.xlu1 %v5760_v46, %s4327_s18  ;;  %v5764_v46 = vld [vmem:[#allocation17_spill] sm:$0xff] }
0x4bd0   :  { %v4131_v40 = vpop.eup %4130 }
0x4bd1   :  { %v1043_v63 = vmul.f32 0.6931472, %v4131_v40  ;;  %v4133_v48 = vpop.eup %4132  ;;  %v5611_v40 = vadd.f32 %v5221_v37, %v5500_v16 }
0x4bd2   :  { %v1931_v43 = vadd.f32 1.0, %v4133_v48  ;;  %v4135_v33 = vpop.eup %4134 }
0x4bd3   :  { %v1044_v56 = vsel %vm1037_vm4, %v5561_v62, %v1043_v63  ;;  %v3266_v60 = vadd.f32 1.0, %v4135_v33  ;;  %v2373_v45 = vmin.f32 %v5611_v40, 1.0  ;;  %vm2372_vm11 = vcmp.gt.f32.partialorder %v5611_v40, 1.0 }
0x4bd4   :  { %v1045_v24 = vmul.f32 0.5, %v1044_v56  ;;  %4136 = vlog2.f32 %v1931_v43 }
0x4bd5   :  { %v2374_v63 = vmul.f32 1.442695, %v2373_v45 }
0x4bd6   :  { %v1046_v51 = vmul.f32 1.442695, %v1045_v24 }
0x4bd7   :  { %1495 = vrot.lane.b32.xlu1 %v1494_v32, %s4332_s22 }
0x4bd8   :  { %4138 = vpow2.f32 %v1046_v51 }
0x4bd9   :  { %4140 = vlog2.f32 %v3266_v60 }
0x4bda   :  { %v4137_v57 = vpop.eup %4136 }
0x4bdb   :  { %v1933_v7 = vmul.f32 0.6931472, %v4137_v57 }
0x4bdd   :  { %v1934_v25 = vsel %vm1927_vm6, %v5566_v21, %v1933_v7 }
0x4bde   :  { %v4139_v35 = vpop.eup %4138  ;;  %v1935_v36 = vmul.f32 0.5, %v1934_v25 }
0x4bdf   :  { %2830 = vrot.lane.b32.xlu1 %v2829_v53, %s4332_s22  ;;  %v4141_v39 = vpop.eup %4140  ;;  %v1049_v58 = vrot.slane %v4139_v35, 7  ;;  %v5770_v35 = vld [vmem:[#allocation25_spill] sm:$0xff] }
0x4be0   :  { %v3268_v26 = vmul.f32 0.6931472, %v4141_v39 }
0x4be2   :  { %v3269_v5 = vsel %vm3262_vm7, %v5571_v10, %v3268_v26 }
0x4be3   :  { %v3270_v20 = vmul.f32 0.5, %v3269_v5 }
0x4be5   :  { %v3271_v41 = vmul.f32 1.442695, %v3270_v20  ;;  %v5773_v20 = vld [vmem:[#allocation29_spill] sm:$0xff] }
0x4c29   :  { %v3629_v44 = vpop.permute.xlu1 %3628 }
0x4c2a   :  { %v3631_v3 = vmul.f32 %v3629_v44, %v3626_v1 }
0x4c2c   :  { %v3633_v17 = vadd.f32 %v3632_v55, %v3631_v3 }
0x4c2e   :  { %3635 = vrot.lane.b32.xlu2 %v3633_v17, %s4330_s1  ;;  %v5768_v17 = vld [vmem:[#allocation18_spill] sm:$0xff] }
0x4c31   :  { %v608_v42 = vpop.permute.xlu1 %607 }
0x4c32   :  { %v610_v59 = vadd.f32 %v608_v42, %v5504_v61  ;;  %v1936_v61 = vmul.f32 1.442695, %v1935_v36 }
0x4c34   :  { %612 = vst.msk [vmem:[#allocation7] sm:$0x1] %vm611_vm5, %v610_v59  ;;  %4142 = vpow2.f32 %v1936_v61  ;;  %v5772_v61 = vld [vmem:[#allocation26_spill] sm:$0xff] }
0x4c35   :  { %4144 = vpow2.f32 %v3271_v41 }
0x4c36   :  { %613 = vrot.lane.b32.xlu2 %v5763_v6, %s4327_s18  ;;  %4146 = vpow2.f32 %v2374_v63  ;;  %v5769_v6 = vld [vmem:[#allocation21_spill] sm:$0xff] }
0x4c39   :  { %v626_v50 = vpop.permute.xlu1 %625 }
0x4c3a   :  { %v4143_v18 = vpop.eup %4142 }
0x4c3b   :  { %v1939_v12 = vrot.slane %v4143_v18, 5  ;;  %v4145_v27 = vpop.eup %4144 }
0x4c3c   :  { %v3274_v23 = vrot.slane %v4145_v27, 2  ;;  %v4147_v48 = vpop.eup %4146 }
0x4c3d   :  { %v2376_v56 = vadd.f32 1.0, %v4147_v48 }
0x4c3e   :  { %1050 = vrot.lane.b32.xlu2 %v1049_v58, %s4332_s22 }
0x4c3f   :  { %4148 = vlog2.f32 %v2376_v56 }
0x4c41   :  { %v5589_v4 = vpop.permute.xlu1 %1061 }
0x4c45   :  { %v4149_v37 = vpop.eup %4148 }
0x4c46   :  { %1066 = vrot.lane.b32.xlu2 %v5764_v46, %s4340_s27 }
0x4c49   :  { %v1496_v32 = vpop.permute.xlu1 %1495 }
0x4c4a   :  { %v1498_v53 = vmul.f32 %v5593_v34, %v1496_v32 }
0x4c4c   :  { %v1500_v54 = vrot.slane %v1498_v53, 2 }
0x4c4e   :  { %1940 = vrot.lane.b32.xlu2 %v1939_v12, %s4332_s22  ;;  %1501 = vrot.lane.b32.xlu1 %v1500_v54, %s4341_s28 }
0x4c51   :  { %v2831_v11 = vpop.permute.xlu1 %2830 }
0x4c52   :  { %v2833_v15 = vmul.f32 %v5593_v34, %v2831_v11 }
0x4c54   :  { %v2835_v38 = vrot.slane %v2833_v15, 5 }
0x4c56   :  { %3275 = vrot.lane.b32.xlu2 %v3274_v23, %s4332_s22  ;;  %1516 = vrot.lane.b32.xlu1 %v5765_v31, %s4340_s27 }
0x4c5e   :  { %1506 = vrot.lane.b32.xlu2 %v5766_v9, %s4327_s18  ;;  %1956 = vrot.lane.b32.xlu1 %v5767_v19, %s4340_s27 }
0x4c66   :  { %2836 = vrot.lane.b32.xlu1 %v2835_v38, %s4341_s28 }
0x4c6e   :  { %2396 = vrot.lane.b32.xlu1 %v5139_v0, %s4327_s18 }
0x4c76   :  { %3731 = vrot.lane.b32.xlu1 %v5523_v47, %s4327_s18  ;;  %v620_v47 = vpop.permute.xlu0 %619 }
0x4c7e   :  { %3291 = vrot.lane.b32.xlu1 %v5377_v2, %s4340_s27  ;;  %v2378_v2 = vmul.f32 0.6931472, %v4149_v37 }
0x4c86   :  { %2851 = vrot.lane.b32.xlu1 %v5229_v52, %s4340_s27  ;;  %v2379_v52 = vsel %vm2372_vm11, %v5611_v40, %v2378_v2 }
0x4c87   :  { %v2380_v24 = vmul.f32 0.5, %v2379_v52 }
0x4c88   :  { %v3636_v0 = vpop.permute.xlu2 %3635 }
0x4c89   :  { %3874 = vmatmul.msk.f32.vlgmr.msrb.gmra.mxu3 %vm145_vm1, %v3636_v0  ;;  %v2381_v3 = vmul.f32 1.442695, %v2380_v24 }
0x4c8b   :  { %4150 = vpow2.f32 %v2381_v3 }
0x4c90   :  { %v614_v43 = vpop.permute.xlu2 %613 }
0x4c91   :  { %617 = vst.msk [vmem:[#allocation7] sm:$0x1] %vm616_vm8, %v614_v43  ;;  %v4151_v51 = vpop.eup %4150 }
0x4c92   :  { %623 = vst.msk [vmem:[#allocation7] sm:$0x1] %vm622_vm9, %v620_v47  ;;  %v2384_v59 = vrot.slane %v4151_v51, 4 }
0x4c93   :  { %629 = vst.msk [vmem:[#allocation7] sm:$0x1] %vm628_vm10, %v626_v50  ;;  %v5771_v50 = vld [vmem:[#allocation27_spill] sm:$0xff] }
0x4c98   :  { %v1051_v1 = vpop.permute.xlu2 %1050 }
0x4c99   :  { %v1053_v44 = vmul.f32 %v5593_v34, %v1051_v1  ;;  %v5774_v1 = vld [vmem:[#allocation31_spill] sm:$0xff] }
0x4c9b   :  { %v1055_v55 = vrot.slane %v1053_v44, 1  ;;  %v5775_v44 = vld [vmem:[#allocation30_spill] sm:$0xff] }
0x4c9d   :  { %1056 = vrot.lane.b32.xlu0 %v1055_v55, %s4341_s28 }
0x4ca0   :  { %v1067_v33 = vpop.permute.xlu2 %1066 }
0x4ca5   :  { %1071 = vrot.lane.b32.xlu0 %v5768_v17, %s4340_s27 }
0x4ca8   :  { %v1941_v60 = vpop.permute.xlu2 %1940 }
0x4ca9   :  { %v1943_v57 = vmul.f32 %v5593_v34, %v1941_v60 }
0x4cab   :  { %v1945_v42 = vrot.slane %v1943_v57, 3 }
0x4cad   :  { %2385 = vrot.lane.b32.xlu0 %v2384_v59, %s4332_s22  ;;  %1946 = vrot.lane.b32.xlu2 %v1945_v42, %s4341_s28 }
0x4cb0   :  { %v3276_v7 = vpop.permute.xlu2 %3275 }
0x4cb1   :  { %v3278_v25 = vmul.f32 %v5593_v34, %v3276_v7 }
0x4cb3   :  { %v3280_v39 = vrot.slane %v3278_v25, 6 }
0x4cb5   :  { %1511 = vrot.lane.b32.xlu0 %v5769_v6, %s4340_s27  ;;  %1961 = vrot.lane.b32.xlu2 %v5770_v35, %s4340_s27 }
0x4cb8   :  { %v1507_v58 = vpop.permute.xlu2 %1506 }
0x4cbd   :  { %1951 = vrot.lane.b32.xlu0 %v5771_v50, %s4327_s18  ;;  %3281 = vrot.lane.b32.xlu2 %v3280_v39, %s4341_s28 }
0x4cc0   :  { %v1502_v36 = vpop.permute.xlu1 %1501 }
0x4cc1   :  { %v1504_v26 = vadd.f32 %v1502_v36, %v5538_v8 }
0x4cc3   :  { %1505 = vst.msk [vmem:[#allocation7 + $0x2] sm:$0x1] %vm611_vm5, %v1504_v26 }
0x4cc4   :  { %1509 = vst.msk [vmem:[#allocation7 + $0x2] sm:$0x1] %vm616_vm8, %v1507_v58 }
0x4cc5   :  { %2841 = vrot.lane.b32.xlu2 %v5772_v61, %s4327_s18 }
0x4cc8   :  { %v1517_v5 = vpop.permute.xlu1 %1516 }
0x4ccd   :  { %2401 = vrot.lane.b32.xlu2 %v5773_v20, %s4340_s27 }
0x4cd0   :  { %v1957_v46 = vpop.permute.xlu1 %1956 }
0x4cd5   :  { %3736 = vrot.lane.b32.xlu2 %v5481_v14, %s4340_s27 }
0x4cd8   :  { %v2837_v41 = vpop.permute.xlu1 %2836 }
0x4cd9   :  { %v2839_v18 = vadd.f32 %v2837_v41, %v5543_v13 }
0x4cdb   :  { %2840 = vst.msk [vmem:[#allocation7 + $0x5] sm:$0x1] %vm611_vm5, %v2839_v18 }
0x4cdd   :  { %3296 = vrot.lane.b32.xlu2 %v5382_v49, %s4340_s27 }
0x4ce0   :  { %v2397_v24 = vpop.permute.xlu1 %2396 }
0x4ce8   :  { %v3732_v51 = vpop.permute.xlu1 %3731 }
0x4d07   :  { %v1947_v8 = vpop.permute.xlu2 %1946 }
0x4d08   :  { %v1949_v32 = vadd.f32 %v1947_v8, %v5566_v21 }
0x4d0a   :  { %1950 = vst.msk [vmem:[#allocation7 + $0x3] sm:$0x1] %vm611_vm5, %v1949_v32 }
0x4d0c   :  { %v3656_v53 = vpop.f32.mrf.mxu3 }
0x4d0d   :  { %v3657_v54 = vadd.f32 %v5460_v22, %v3656_v53 }
0x4d0f   :  { %v3659_v12 = vmax.f32 %v3657_v54, 0.0  ;;  %v1962_v27 = vpop.permute.xlu2 %1961  ;;  %v1057_v23 = vpop.permute.xlu0 %1056 }
0x4d10   :  { %v1059_v14 = vadd.f32 %v1057_v23, %v5561_v62 }
0x4d11   :  { %3875 = vmatmul.msk.f32.vlgmr.msra.gmra.mxu0 %vm145_vm1, %v3659_v12 }
0x4d12   :  { %1060 = vst.msk [vmem:[#allocation7 + $0x1] sm:$0x1] %vm611_vm5, %v1059_v14 }
0x4d13   :  { %1064 = vst.msk [vmem:[#allocation7 + $0x1] sm:$0x1] %vm616_vm8, %v5589_v4 }
0x4d14   :  { %1069 = vst.msk [vmem:[#allocation7 + $0x1] sm:$0x1] %vm622_vm9, %v1067_v33 }
0x4d17   :  { %v3282_v49 = vpop.permute.xlu2 %3281  ;;  %v1072_v13 = vpop.permute.xlu0 %1071 }
0x4d18   :  { %v3284_v21 = vadd.f32 %v3282_v49, %v5571_v10  ;;  %1074 = vst.msk [vmem:[#allocation7 + $0x1] sm:$0x1] %vm628_vm10, %v1072_v13 }
0x4d1a   :  { %3285 = vst.msk [vmem:[#allocation7 + $0x6] sm:$0x1] %vm611_vm5, %v3284_v21 }
0x4d1f   :  { %v2842_v22 = vpop.permute.xlu2 %2841  ;;  %v2386_v31 = vpop.permute.xlu0 %2385 }
0x4d20   :  { %2844 = vst.msk [vmem:[#allocation7 + $0x5] sm:$0x1] %vm616_vm8, %v2842_v22  ;;  %v2388_v52 = vmul.f32 %v5593_v34, %v2386_v31 }
0x4d27   :  { %v1512_v62 = vpop.permute.xlu0 %1511  ;;  %v2402_v55 = vpop.permute.xlu2 %2401 }
0x4d28   :  { %1514 = vst.msk [vmem:[#allocation7 + $0x2] sm:$0x1] %vm622_vm9, %v1512_v62 }
0x4d29   :  { %1519 = vst.msk [vmem:[#allocation7 + $0x2] sm:$0x1] %vm628_vm10, %v1517_v5 }
0x4d2f   :  { %v1952_v4 = vpop.permute.xlu0 %1951  ;;  %v3737_v60 = vpop.permute.xlu2 %3736 }
0x4d30   :  { %1954 = vst.msk [vmem:[#allocation7 + $0x3] sm:$0x1] %vm616_vm8, %v1952_v4 }
0x4d31   :  { %1959 = vst.msk [vmem:[#allocation7 + $0x3] sm:$0x1] %vm622_vm9, %v1957_v46 }
0x4d32   :  { %1964 = vst.msk [vmem:[#allocation7 + $0x3] sm:$0x1] %vm628_vm10, %v1962_v27 }
0x4d8e   :  { %v3680_v10 = vpop.f32.mrf.mxu0 }
0x4d8f   :  { %v3681_v11 = vadd.f32 %v5467_v28, %v3680_v10 }
0x4d91   :  { %v3683_v9 = vmax.f32 %v3681_v11, 0.0 }
0x4d93   :  { %3876 = vmatmul.msk.f32.vlgmr.msra.gmra.mxu1 %vm145_vm1, %v3683_v9 }
0x4e10   :  { %v3704_v19 = vpop.f32.mrf.mxu1 }
0x4e11   :  { %v3705_v15 = vadd.f32 %v3704_v19, %v5500_v16  ;;  %v2390_v16 = vrot.slane %v2388_v52, 4 }
0x4e13   :  { %v3708_v38 = vmin.f32 %v3705_v15, 1.0  ;;  %vm3707_vm12 = vcmp.gt.f32.partialorder %v3705_v15, 1.0 }
0x4e15   :  { %v3709_v45 = vmul.f32 1.442695, %v3708_v38 }
0x4e17   :  { %4152 = vpow2.f32 %v3709_v45 }
0x4e1d   :  { %v4153_v63 = vpop.eup %4152 }
0x4e1e   :  { %v3711_v48 = vadd.f32 1.0, %v4153_v63 }
0x4e20   :  { %4154 = vlog2.f32 %v3711_v48 }
0x4e26   :  { %v4155_v56 = vpop.eup %4154 }
0x4e27   :  { %v3713_v0 = vmul.f32 0.6931472, %v4155_v56 }
0x4e29   :  { %v3714_v37 = vsel %vm3707_vm12, %v3705_v15, %v3713_v0 }
0x4e2a   :  { %v3715_v43 = vmul.f32 0.5, %v3714_v37 }
0x4e2c   :  { %v3716_v47 = vmul.f32 1.442695, %v3715_v43 }
0x4e2e   :  { %4156 = vpow2.f32 %v3716_v47 }
0x4e34   :  { %v4157_v28 = vpop.eup %4156 }
0x4e35   :  { %v3719_v2 = vrot.slane %v4157_v28, 1 }
0x4e37   :  { %3720 = vrot.lane.b32.xlu0 %v3719_v2, %s4332_s22 }
0x4e3f   :  { %2391 = vrot.lane.b32.xlu0 %v2390_v16, %s4341_s28 }
0x4e47   :  { %3286 = vrot.lane.b32.xlu0 %v5422_v29, %s4327_s18  ;;  %v3292_v29 = vpop.permute.xlu1 %3291 }
0x4e4f   :  { %2846 = vrot.lane.b32.xlu0 %v5774_v1, %s4340_s27 }
0x4e57   :  { %2406 = vrot.lane.b32.xlu0 %v5775_v44, %s4340_s27 }
0x4ea9   :  { %v3721_v3 = vpop.permute.xlu0 %3720 }
0x4eaa   :  { %v3723_v33 = vmul.f32 %v5593_v34, %v3721_v3  ;;  %v3297_v34 = vpop.permute.xlu2 %3296 }
0x4eac   :  { %v3725_v17 = vrot.slane %v3723_v33, 7 }
0x4eae   :  { %3726 = vrot.lane.b32.xlu0 %v3725_v17, %s4341_s28 }
0x4eb1   :  { %v2392_v57 = vpop.permute.xlu0 %2391 }
0x4eb2   :  { %v2394_v42 = vadd.f32 %v2392_v57, %v5611_v40  ;;  %v2852_v40 = vpop.permute.xlu1 %2851 }
0x4eb4   :  { %2395 = vst.msk [vmem:[#allocation7 + $0x4] sm:$0x1] %vm611_vm5, %v2394_v42 }
0x4eb5   :  { %2399 = vst.msk [vmem:[#allocation7 + $0x4] sm:$0x1] %vm616_vm8, %v2397_v24 }
0x4eb6   :  { %3741 = vrot.lane.b32.xlu0 %v5486_v30, %s4340_s27  ;;  %2404 = vst.msk [vmem:[#allocation7 + $0x4] sm:$0x1] %vm622_vm9, %v2402_v55 }
0x4eb9   :  { %v3287_v59 = vpop.permute.xlu0 %3286 }
0x4eba   :  { %3289 = vst.msk [vmem:[#allocation7 + $0x6] sm:$0x1] %vm616_vm8, %v3287_v59 }
0x4ebb   :  { %3294 = vst.msk [vmem:[#allocation7 + $0x6] sm:$0x1] %vm622_vm9, %v3292_v29 }
0x4ebc   :  { %3299 = vst.msk [vmem:[#allocation7 + $0x6] sm:$0x1] %vm628_vm10, %v3297_v34 }
0x4ec1   :  { %v2847_v7 = vpop.permute.xlu0 %2846 }
0x4ec2   :  { %2849 = vst.msk [vmem:[#allocation7 + $0x5] sm:$0x1] %vm622_vm9, %v2847_v7 }
0x4ec3   :  { %2854 = vst.msk [vmem:[#allocation7 + $0x5] sm:$0x1] %vm628_vm10, %v2852_v40 }
0x4ec9   :  { %v2407_v6 = vpop.permute.xlu0 %2406 }
0x4eca   :  { %2409 = vst.msk [vmem:[#allocation7 + $0x4] sm:$0x1] %vm628_vm10, %v2407_v6 }
0x4f20   :  { %v3727_v30 = vpop.permute.xlu0 %3726 }
0x4f21   :  { %v3729_v35 = vadd.f32 %v3727_v30, %v3705_v15 }
0x4f23   :  { %3730 = vst.msk [vmem:[#allocation7 + $0x7] sm:$0x1] %vm611_vm5, %v3729_v35 }
0x4f24   :  { %3734 = vst.msk [vmem:[#allocation7 + $0x7] sm:$0x1] %vm616_vm8, %v3732_v51 }
0x4f25   :  { %3739 = vst.msk [vmem:[#allocation7 + $0x7] sm:$0x1] %vm622_vm9, %v3737_v60 }
0x4f28   :  { %v3742_v25 = vpop.permute.xlu0 %3741 }
0x4f29   :  { %3744 = vst.msk [vmem:[#allocation7 + $0x7] sm:$0x1] %vm628_vm10, %v3742_v25 }
0x4f2a   :  { %3755 = dma.vmem_to_hbm [thread:$0]  %s3751_s30, 128, %s3753_s5, [#allocation4]  }
0x4f2b   :  { %4323 = dma.done.wait [#allocation4], 128  }
0x4f2c   :  { %4324 = vsyncadd [#allocation4], 4294967168 }
0x4f2d   :  { %3760 = vsyncpa [#allocation3], 1 }
0x4f2e   :  { %3761 = vsyncpa [#allocation6], 1 }
0x4f2f   :  { %3762 = vsyncpa [#allocation4], 1 }

</bundles_post_ra>
